<compile_context>
chip_gen: v6e
topology: v6e:2x2x1
jax: 0.10.0
libtpu: 0.0.40
codegen_flags: <defaults>
</compile_context>

<pallas_src>
import functools

import jax
import jax.numpy as jnp
from jax import lax
from jax.experimental import pallas as pl
from jax.experimental.pallas import tpu as pltpu


# -----------------------------------------------------------------------------
# Fused kernel: conv3x3+BN+ReLU -> conv3x3+BN+add+ReLU for a batch block.
# -----------------------------------------------------------------------------
def _basic_block_kernel(x_ref, w1_ref, w2_ref, b1_ref, b2_ref, out_ref,
                        xpad_ref):
    """
    x_ref   : (Nb, H, W, Cp)      input tile, compute dtype, lane-dense Cp
    w1_ref  : (9, Cp, Cp)         per-tap weights, BN1 scale folded in
    w2_ref  : (9, Cp, Cp)         per-tap weights, BN2 scale folded in
    b1_ref  : (1, Cp)  b2_ref : (1, Cp)   folded BN biases (f32)
    out_ref : (Nb, H, W, Cp)
    xpad_ref: (Nb, H+2, W+2, Cp)  VMEM scratch, compute dtype (halo'd acts)
    """
    Nb, H, W, Cp = x_ref.shape
    M = Nb * H * W
    cdt = xpad_ref.dtype

    # Zero only the 1-pixel halo border; the interior is fully overwritten
    # below.  NOTE: the border must never be written by anything else (the
    # interior writes below keep 1:H+1 / 1:W+1) — this is what keeps the
    # implicit conv padding correct without a full-plane zero pass.
    xpad_ref[:, 0:1, :, :] = jnp.zeros((Nb, 1, W + 2, Cp), cdt)
    xpad_ref[:, H + 1:H + 2, :, :] = jnp.zeros((Nb, 1, W + 2, Cp), cdt)
    xpad_ref[:, 1:H + 1, 0:1, :] = jnp.zeros((Nb, H, 1, Cp), cdt)
    xpad_ref[:, 1:H + 1, W + 1:W + 2, :] = jnp.zeros((Nb, H, 1, Cp), cdt)

    def conv3x3(w_ref):
        # 3x3 conv as 9 accumulating MXU matmuls over shifted views of the
        # halo'd plane (single f32 accumulator, no materialized im2col slab).
        acc = jnp.zeros((M, Cp), jnp.float32)
        for dy in range(3):
            for dx in range(3):
                tap = xpad_ref[:, dy:dy + H, dx:dx + W, :].reshape(M, Cp)
                acc = acc + jnp.dot(tap, w_ref[dy * 3 + dx],
                                    preferred_element_type=jnp.float32)
        return acc

    xv = x_ref[...]                              # compute-dtype input block

    # ---- conv1 (BN1 scale folded into w1) + bias + ReLU ----------------------
    xpad_ref[:, 1:H + 1, 1:W + 1, :] = xv.astype(cdt)
    y1 = jnp.maximum(conv3x3(w1_ref) + b1_ref[...], 0.0)

    # Intermediate never leaves VMEM: reuse xpad (its border is still zero).
    xpad_ref[:, 1:H + 1, 1:W + 1, :] = y1.reshape(Nb, H, W, Cp).astype(cdt)

    # ---- conv2 (BN2 scale folded into w2) + bias + residual + ReLU (f32) -----
    y2 = conv3x3(w2_ref) + b2_ref[...]
    y2 = y2 + xv.reshape(M, Cp).astype(jnp.float32)
    y2 = jnp.maximum(y2, 0.0)
    out_ref[...] = y2.reshape(Nb, H, W, Cp).astype(out_ref.dtype)


# -----------------------------------------------------------------------------
# Wrapper helpers
# -----------------------------------------------------------------------------
def _round_up(x, m):
    return ((x + m - 1) // m) * m


def fold_bn(gamma, beta, mean, var, eps=1e-5):
    scale = gamma / jnp.sqrt(var + eps)
    bias = beta - mean * scale
    return scale, bias


def _prep_weight(w_hwio, scale, cp, compute_dtype):
    """(3,3,Cin,Cout) HWIO, BN scale folded per Cout -> (9, Cp, Cp) per-tap."""
    kh, kw, cin, cout = w_hwio.shape
    w = w_hwio.astype(jnp.float32) * scale.astype(jnp.float32)   # fold BN scale
    w = jnp.pad(w, ((0, 0), (0, 0), (0, cp - cin), (0, cp - cout)))
    return w.reshape(kh * kw, cp, cp).astype(compute_dtype)


def _pad_vec(v, cp):
    return jnp.pad(v.astype(jnp.float32), (0, cp - v.shape[0])).reshape(1, cp)


def _pick_batch_block(n, h, w, cp, cbytes):
    """Largest divisor of n (up to ceil(512/HW)) fitting a small VMEM budget."""
    target = max(1, -(-512 // (h * w)))          # ceil(512 / HW) rows target
    nb = 1
    for cand in range(1, n + 1):
        if n % cand:
            continue
        if cand > target:
            break
        if cand * (h + 2) * (w + 2) * cp * cbytes > (8 << 20):
            break
        nb = cand
    return nb


# -----------------------------------------------------------------------------
# Forward
# -----------------------------------------------------------------------------
@functools.partial(jax.jit, static_argnames=("compute_dtype",))
def basic_block_forward(x_nchw, params, *, compute_dtype=jnp.bfloat16):
    """BasicBlock forward (stride=1, downsample=None, act=ReLU), NCHW in/out."""
    N, C, H, W = x_nchw.shape
    out_dtype = x_nchw.dtype
    Cp = _round_up(C, 128)                       # lane-dense channel count
    cbytes = jnp.dtype(compute_dtype).itemsize
    obytes = jnp.dtype(out_dtype).itemsize
    Nb = _pick_batch_block(N, H, W, Cp, cbytes)

    # NCHW -> NHWC, channel pad to lane width, cast to compute dtype (halves
    # the HBM->VMEM input DMA on the bf16 path; residual upcast in-kernel).
    x = jnp.transpose(x_nchw, (0, 2, 3, 1))
    x = jnp.pad(x, ((0, 0), (0, 0), (0, 0), (0, Cp - C))).astype(compute_dtype)

    s1, b1 = fold_bn(*params["bn1"])
    s2, b2 = fold_bn(*params["bn2"])
    w1 = _prep_weight(params["w1"], s1, Cp, compute_dtype)
    w2 = _prep_weight(params["w2"], s2, Cp, compute_dtype)
    b1 = _pad_vec(b1, Cp)
    b2 = _pad_vec(b2, Cp)

    # Explicit scoped-VMEM budget: double-buffered blocks + scratch + f32
    # accumulator / epilogue headroom (+2x safety margin).
    footprint = (
        2 * Nb * H * W * Cp * cbytes             # x block   (double-buffered)
        + 2 * Nb * H * W * Cp * obytes           # out block (double-buffered)
        + 2 * 2 * 9 * Cp * Cp * cbytes           # w1, w2    (double-buffered)
        + Nb * (H + 2) * (W + 2) * Cp * cbytes   # halo scratch
        + 4 * Nb * H * W * Cp * 4                # f32 acc / epilogue values
    )
    vmem_limit = int(min(2 * footprint + (4 << 20), 100 << 20))

    out = pl.pallas_call(
        _basic_block_kernel,
        out_shape=jax.ShapeDtypeStruct((N, H, W, Cp), out_dtype),
        grid_spec=pltpu.PrefetchScalarGridSpec(
            num_scalar_prefetch=0,
            grid=(N // Nb,),
            in_specs=[
                pl.BlockSpec((Nb, H, W, Cp), lambda b: (b, 0, 0, 0)),
                pl.BlockSpec((9, Cp, Cp), lambda b: (0, 0, 0)),
                pl.BlockSpec((9, Cp, Cp), lambda b: (0, 0, 0)),
                pl.BlockSpec((1, Cp), lambda b: (0, 0)),
                pl.BlockSpec((1, Cp), lambda b: (0, 0)),
            ],
            out_specs=pl.BlockSpec((Nb, H, W, Cp), lambda b: (b, 0, 0, 0)),
            scratch_shapes=[
                pltpu.VMEM((Nb, H + 2, W + 2, Cp), compute_dtype),  # halo acts
            ],
        ),
        compiler_params=pltpu.CompilerParams(
            dimension_semantics=("parallel",),
            vmem_limit_bytes=vmem_limit),
    )(x, w1, w2, b1, b2)

    out = out[..., :C]                           # drop channel padding
    return jnp.transpose(out, (0, 3, 1, 2))      # NHWC -> NCHW


# -----------------------------------------------------------------------------
# Pure-JAX reference (f32) for correctness check
# -----------------------------------------------------------------------------
def _ref_conv(x_nhwc, w_hwio):
    return lax.conv_general_dilated(
        x_nhwc, w_hwio, window_strides=(1, 1), padding="SAME",
        dimension_numbers=("NHWC", "HWIO", "NHWC"))


def basic_block_ref(x_nchw, params):
    x = jnp.transpose(x_nchw, (0, 2, 3, 1))
    s1, b1 = fold_bn(*params["bn1"])
    s2, b2 = fold_bn(*params["bn2"])
    o = jnp.maximum(_ref_conv(x, params["w1"]) * s1 + b1, 0.0)
    o = _ref_conv(o, params["w2"]) * s2 + b2
    o = jnp.maximum(o + x, 0.0)
    return jnp.transpose(o, (0, 3, 1, 2))


# -----------------------------------------------------------------------------
if __name__ == "__main__":
    # Small shapes: batch=2, inplanes=planes=8, spatial 16x16 (stride=1).
    N, C, H, W = 2, 8, 16, 16
    key = jax.random.PRNGKey(0)
    kx, kw1, kw2 = jax.random.split(key, 3)

    x = jax.random.normal(kx, (N, C, H, W), jnp.float32)

    # conv weights directly in HWIO layout (PyTorch stores OIHW; same math).
    w1 = jax.random.normal(kw1, (3, 3, C, C), jnp.float32) * 0.1
    w2 = jax.random.normal(kw2, (3, 3, C, C), jnp.float32) * 0.1

    # Deterministic BN (eval-mode running stats): gamma, beta, mean, var.
    ar = jnp.arange(C, dtype=jnp.float32)
    bn1 = (1.0 + 0.01 * ar, 0.02 * ar, 0.03 * ar, 1.0 + 0.05 * ar)
    bn2 = (1.0 - 0.01 * ar, -0.02 * ar, 0.01 * ar, 1.0 + 0.02 * ar)

    params = {"w1": w1, "w2": w2, "bn1": bn1, "bn2": bn2}

    ref = jax.block_until_ready(basic_block_ref(x, params))

    # f32 compute path: tight check against the f32 reference.
    out_f32 = jax.block_until_ready(
        basic_block_forward(x, params, compute_dtype=jnp.float32))
    assert out_f32.shape == (N, C, H, W)
    assert jnp.max(jnp.abs(out_f32 - ref)) < 5e-4, "f32 path mismatch"

    # bf16 MXU path (bf16 I/O + f32 accumulation + f32 epilogue).
    out_bf16 = jax.block_until_ready(
        basic_block_forward(x, params, compute_dtype=jnp.bfloat16))
    assert out_bf16.shape == (N, C, H, W)
    assert jnp.max(jnp.abs(out_bf16 - ref)) < 1e-1, "bf16 path mismatch"

    print("KERNEL_OK")
</pallas_src>

<mosaic_0001>
module attributes {stable_mosaic.version = 11 : i64} {
  func.func @_basic_block_kernel(%arg0: i32, %arg1: memref<2x16x16x128xf32, #tpu.memory_space<vmem>>, %arg2: memref<9x128x128xf32, #tpu.memory_space<vmem>>, %arg3: memref<9x128x128xf32, #tpu.memory_space<vmem>>, %arg4: memref<1x128xf32, #tpu.memory_space<vmem>>, %arg5: memref<1x128xf32, #tpu.memory_space<vmem>>, %arg6: memref<2x16x16x128xf32, #tpu.memory_space<vmem>>, %arg7: memref<2x18x18x128xf32, #tpu.memory_space<vmem>>) attributes {dimension_semantics = [#tpu.dimension_semantics<parallel>], iteration_bounds = array<i64: 1>, scalar_prefetch = 0 : i64, scratch_operands = 1 : i64, tpu.core_type = #tpu.core_type<tc>, window_params = [{transform_indices = @transform_0, window_bounds = array<i64: 2, 16, 16, 128>}, {pipeline_mode = #tpu.pipeline_mode<synchronous>, transform_indices = @transform_1, window_bounds = array<i64: 9, 128, 128>}, {pipeline_mode = #tpu.pipeline_mode<synchronous>, transform_indices = @transform_2, window_bounds = array<i64: 9, 128, 128>}, {pipeline_mode = #tpu.pipeline_mode<synchronous>, transform_indices = @transform_3, window_bounds = array<i64: 1, 128>}, {pipeline_mode = #tpu.pipeline_mode<synchronous>, transform_indices = @transform_4, window_bounds = array<i64: 1, 128>}, {transform_indices = @transform_5, window_bounds = array<i64: 2, 16, 16, 128>}]} {
    %cst = arith.constant 0.000000e+00 : f32
    %0 = vector.broadcast %cst : f32 to vector<2x1x18x128xf32>
    %c0 = arith.constant 0 : index
    %c0_0 = arith.constant 0 : index
    %c0_1 = arith.constant 0 : index
    %c0_2 = arith.constant 0 : index
    %1 = vector.load %arg7[%c0, %c0_0, %c0_1, %c0_2] : memref<2x18x18x128xf32, #tpu.memory_space<vmem>>, vector<2x1x18x128xf32>
    tpu.vector_store %arg7[%c0, %c0_0, %c0_1, %c0_2], %0 {strides = array<i32>} : memref<2x18x18x128xf32, #tpu.memory_space<vmem>>, vector<2x1x18x128xf32>,
    %cst_3 = arith.constant 0.000000e+00 : f32
    %2 = vector.broadcast %cst_3 : f32 to vector<2x1x18x128xf32>
    %c0_4 = arith.constant 0 : index
    %c17 = arith.constant 17 : index
    %c0_5 = arith.constant 0 : index
    %c0_6 = arith.constant 0 : index
    %3 = vector.load %arg7[%c0_4, %c17, %c0_5, %c0_6] : memref<2x18x18x128xf32, #tpu.memory_space<vmem>>, vector<2x1x18x128xf32>
    tpu.vector_store %arg7[%c0_4, %c17, %c0_5, %c0_6], %2 {strides = array<i32>} : memref<2x18x18x128xf32, #tpu.memory_space<vmem>>, vector<2x1x18x128xf32>,
    %cst_7 = arith.constant 0.000000e+00 : f32
    %4 = vector.broadcast %cst_7 : f32 to vector<2x16x1x128xf32>
    %c0_8 = arith.constant 0 : index
    %c1 = arith.constant 1 : index
    %c0_9 = arith.constant 0 : index
    %c0_10 = arith.constant 0 : index
    %5 = vector.load %arg7[%c0_8, %c1, %c0_9, %c0_10] : memref<2x18x18x128xf32, #tpu.memory_space<vmem>>, vector<2x16x1x128xf32>
    tpu.vector_store %arg7[%c0_8, %c1, %c0_9, %c0_10], %4 {strides = array<i32>} : memref<2x18x18x128xf32, #tpu.memory_space<vmem>>, vector<2x16x1x128xf32>,
    %cst_11 = arith.constant 0.000000e+00 : f32
    %6 = vector.broadcast %cst_11 : f32 to vector<2x16x1x128xf32>
    %c0_12 = arith.constant 0 : index
    %c1_13 = arith.constant 1 : index
    %c17_14 = arith.constant 17 : index
    %c0_15 = arith.constant 0 : index
    %7 = vector.load %arg7[%c0_12, %c1_13, %c17_14, %c0_15] : memref<2x18x18x128xf32, #tpu.memory_space<vmem>>, vector<2x16x1x128xf32>
    tpu.vector_store %arg7[%c0_12, %c1_13, %c17_14, %c0_15], %6 {strides = array<i32>} : memref<2x18x18x128xf32, #tpu.memory_space<vmem>>, vector<2x16x1x128xf32>,
    %c0_16 = arith.constant 0 : index
    %c0_17 = arith.constant 0 : index
    %c0_18 = arith.constant 0 : index
    %c0_19 = arith.constant 0 : index
    %8 = vector.load %arg1[%c0_16, %c0_17, %c0_18, %c0_19] : memref<2x16x16x128xf32, #tpu.memory_space<vmem>>, vector<2x16x16x128xf32>
    %c0_20 = arith.constant 0 : index
    %c1_21 = arith.constant 1 : index
    %c1_22 = arith.constant 1 : index
    %c0_23 = arith.constant 0 : index
    %9 = vector.load %arg7[%c0_20, %c1_21, %c1_22, %c0_23] : memref<2x18x18x128xf32, #tpu.memory_space<vmem>>, vector<2x16x16x128xf32>
    tpu.vector_store %arg7[%c0_20, %c1_21, %c1_22, %c0_23], %8 {strides = array<i32>} : memref<2x18x18x128xf32, #tpu.memory_space<vmem>>, vector<2x16x16x128xf32>,
    %cst_24 = arith.constant 0.000000e+00 : f32
    %10 = vector.broadcast %cst_24 : f32 to vector<512x128xf32>
    %c0_25 = arith.constant 0 : index
    %c0_26 = arith.constant 0 : index
    %c0_27 = arith.constant 0 : index
    %c0_28 = arith.constant 0 : index
    %11 = vector.load %arg7[%c0_25, %c0_26, %c0_27, %c0_28] : memref<2x18x18x128xf32, #tpu.memory_space<vmem>>, vector<2x16x16x128xf32>
    %12 = vector.shape_cast %11 : vector<2x16x16x128xf32> to vector<512x128xf32>
    %c0_29 = arith.constant 0 : index
    %c0_30 = arith.constant 0 : index
    %c0_31 = arith.constant 0 : index
    %13 = vector.load %arg2[%c0_29, %c0_30, %c0_31] : memref<9x128x128xf32, #tpu.memory_space<vmem>>, vector<1x128x128xf32>
    %14 = vector.shape_cast %13 : vector<1x128x128xf32> to vector<128x128xf32>
    %cst_32 = arith.constant dense<0.000000e+00> : vector<512x128xf32>
    %15 = tpu.matmul %12, %14, %cst_32 {dimension_numbers = #tpu.dot_dimension_numbers<[1], [0], [0], [1], [0, 0, 1, 1], [], []>} : vector<512x128xf32>, vector<128x128xf32>, vector<512x128xf32> -> vector<512x128xf32>
    %16 = arith.addf %10, %15 : vector<512x128xf32>
    %c0_33 = arith.constant 0 : index
    %c0_34 = arith.constant 0 : index
    %c1_35 = arith.constant 1 : index
    %c0_36 = arith.constant 0 : index
    %17 = vector.load %arg7[%c0_33, %c0_34, %c1_35, %c0_36] : memref<2x18x18x128xf32, #tpu.memory_space<vmem>>, vector<2x16x16x128xf32>
    %18 = vector.shape_cast %17 : vector<2x16x16x128xf32> to vector<512x128xf32>
    %c1_37 = arith.constant 1 : index
    %c0_38 = arith.constant 0 : index
    %c0_39 = arith.constant 0 : index
    %19 = vector.load %arg2[%c1_37, %c0_38, %c0_39] : memref<9x128x128xf32, #tpu.memory_space<vmem>>, vector<1x128x128xf32>
    %20 = vector.shape_cast %19 : vector<1x128x128xf32> to vector<128x128xf32>
    %cst_40 = arith.constant dense<0.000000e+00> : vector<512x128xf32>
    %21 = tpu.matmul %18, %20, %cst_40 {dimension_numbers = #tpu.dot_dimension_numbers<[1], [0], [0], [1], [0, 0, 1, 1], [], []>} : vector<512x128xf32>, vector<128x128xf32>, vector<512x128xf32> -> vector<512x128xf32>
    %22 = arith.addf %16, %21 : vector<512x128xf32>
    %c0_41 = arith.constant 0 : index
    %c0_42 = arith.constant 0 : index
    %c2 = arith.constant 2 : index
    %c0_43 = arith.constant 0 : index
    %23 = vector.load %arg7[%c0_41, %c0_42, %c2, %c0_43] : memref<2x18x18x128xf32, #tpu.memory_space<vmem>>, vector<2x16x16x128xf32>
    %24 = vector.shape_cast %23 : vector<2x16x16x128xf32> to vector<512x128xf32>
    %c2_44 = arith.constant 2 : index
    %c0_45 = arith.constant 0 : index
    %c0_46 = arith.constant 0 : index
    %25 = vector.load %arg2[%c2_44, %c0_45, %c0_46] : memref<9x128x128xf32, #tpu.memory_space<vmem>>, vector<1x128x128xf32>
    %26 = vector.shape_cast %25 : vector<1x128x128xf32> to vector<128x128xf32>
    %cst_47 = arith.constant dense<0.000000e+00> : vector<512x128xf32>
    %27 = tpu.matmul %24, %26, %cst_47 {dimension_numbers = #tpu.dot_dimension_numbers<[1], [0], [0], [1], [0, 0, 1, 1], [], []>} : vector<512x128xf32>, vector<128x128xf32>, vector<512x128xf32> -> vector<512x128xf32>
    %28 = arith.addf %22, %27 : vector<512x128xf32>
    %c0_48 = arith.constant 0 : index
    %c1_49 = arith.constant 1 : index
    %c0_50 = arith.constant 0 : index
    %c0_51 = arith.constant 0 : index
    %29 = vector.load %arg7[%c0_48, %c1_49, %c0_50, %c0_51] : memref<2x18x18x128xf32, #tpu.memory_space<vmem>>, vector<2x16x16x128xf32>
    %30 = vector.shape_cast %29 : vector<2x16x16x128xf32> to vector<512x128xf32>
    %c3 = arith.constant 3 : index
    %c0_52 = arith.constant 0 : index
    %c0_53 = arith.constant 0 : index
    %31 = vector.load %arg2[%c3, %c0_52, %c0_53] : memref<9x128x128xf32, #tpu.memory_space<vmem>>, vector<1x128x128xf32>
    %32 = vector.shape_cast %31 : vector<1x128x128xf32> to vector<128x128xf32>
    %cst_54 = arith.constant dense<0.000000e+00> : vector<512x128xf32>
    %33 = tpu.matmul %30, %32, %cst_54 {dimension_numbers = #tpu.dot_dimension_numbers<[1], [0], [0], [1], [0, 0, 1, 1], [], []>} : vector<512x128xf32>, vector<128x128xf32>, vector<512x128xf32> -> vector<512x128xf32>
    %34 = arith.addf %28, %33 : vector<512x128xf32>
    %c0_55 = arith.constant 0 : index
    %c1_56 = arith.constant 1 : index
    %c1_57 = arith.constant 1 : index
    %c0_58 = arith.constant 0 : index
    %35 = vector.load %arg7[%c0_55, %c1_56, %c1_57, %c0_58] : memref<2x18x18x128xf32, #tpu.memory_space<vmem>>, vector<2x16x16x128xf32>
    %36 = vector.shape_cast %35 : vector<2x16x16x128xf32> to vector<512x128xf32>
    %c4 = arith.constant 4 : index
    %c0_59 = arith.constant 0 : index
    %c0_60 = arith.constant 0 : index
    %37 = vector.load %arg2[%c4, %c0_59, %c0_60] : memref<9x128x128xf32, #tpu.memory_space<vmem>>, vector<1x128x128xf32>
    %38 = vector.shape_cast %37 : vector<1x128x128xf32> to vector<128x128xf32>
    %cst_61 = arith.constant dense<0.000000e+00> : vector<512x128xf32>
    %39 = tpu.matmul %36, %38, %cst_61 {dimension_numbers = #tpu.dot_dimension_numbers<[1], [0], [0], [1], [0, 0, 1, 1], [], []>} : vector<512x128xf32>, vector<128x128xf32>, vector<512x128xf32> -> vector<512x128xf32>
    %40 = arith.addf %34, %39 : vector<512x128xf32>
    %c0_62 = arith.constant 0 : index
    %c1_63 = arith.constant 1 : index
    %c2_64 = arith.constant 2 : index
    %c0_65 = arith.constant 0 : index
    %41 = vector.load %arg7[%c0_62, %c1_63, %c2_64, %c0_65] : memref<2x18x18x128xf32, #tpu.memory_space<vmem>>, vector<2x16x16x128xf32>
    %42 = vector.shape_cast %41 : vector<2x16x16x128xf32> to vector<512x128xf32>
    %c5 = arith.constant 5 : index
    %c0_66 = arith.constant 0 : index
    %c0_67 = arith.constant 0 : index
    %43 = vector.load %arg2[%c5, %c0_66, %c0_67] : memref<9x128x128xf32, #tpu.memory_space<vmem>>, vector<1x128x128xf32>
    %44 = vector.shape_cast %43 : vector<1x128x128xf32> to vector<128x128xf32>
    %cst_68 = arith.constant dense<0.000000e+00> : vector<512x128xf32>
    %45 = tpu.matmul %42, %44, %cst_68 {dimension_numbers = #tpu.dot_dimension_numbers<[1], [0], [0], [1], [0, 0, 1, 1], [], []>} : vector<512x128xf32>, vector<128x128xf32>, vector<512x128xf32> -> vector<512x128xf32>
    %46 = arith.addf %40, %45 : vector<512x128xf32>
    %c0_69 = arith.constant 0 : index
    %c2_70 = arith.constant 2 : index
    %c0_71 = arith.constant 0 : index
    %c0_72 = arith.constant 0 : index
    %47 = vector.load %arg7[%c0_69, %c2_70, %c0_71, %c0_72] : memref<2x18x18x128xf32, #tpu.memory_space<vmem>>, vector<2x16x16x128xf32>
    %48 = vector.shape_cast %47 : vector<2x16x16x128xf32> to vector<512x128xf32>
    %c6 = arith.constant 6 : index
    %c0_73 = arith.constant 0 : index
    %c0_74 = arith.constant 0 : index
    %49 = vector.load %arg2[%c6, %c0_73, %c0_74] : memref<9x128x128xf32, #tpu.memory_space<vmem>>, vector<1x128x128xf32>
    %50 = vector.shape_cast %49 : vector<1x128x128xf32> to vector<128x128xf32>
    %cst_75 = arith.constant dense<0.000000e+00> : vector<512x128xf32>
    %51 = tpu.matmul %48, %50, %cst_75 {dimension_numbers = #tpu.dot_dimension_numbers<[1], [0], [0], [1], [0, 0, 1, 1], [], []>} : vector<512x128xf32>, vector<128x128xf32>, vector<512x128xf32> -> vector<512x128xf32>
    %52 = arith.addf %46, %51 : vector<512x128xf32>
    %c0_76 = arith.constant 0 : index
    %c2_77 = arith.constant 2 : index
    %c1_78 = arith.constant 1 : index
    %c0_79 = arith.constant 0 : index
    %53 = vector.load %arg7[%c0_76, %c2_77, %c1_78, %c0_79] : memref<2x18x18x128xf32, #tpu.memory_space<vmem>>, vector<2x16x16x128xf32>
    %54 = vector.shape_cast %53 : vector<2x16x16x128xf32> to vector<512x128xf32>
    %c7 = arith.constant 7 : index
    %c0_80 = arith.constant 0 : index
    %c0_81 = arith.constant 0 : index
    %55 = vector.load %arg2[%c7, %c0_80, %c0_81] : memref<9x128x128xf32, #tpu.memory_space<vmem>>, vector<1x128x128xf32>
    %56 = vector.shape_cast %55 : vector<1x128x128xf32> to vector<128x128xf32>
    %cst_82 = arith.constant dense<0.000000e+00> : vector<512x128xf32>
    %57 = tpu.matmul %54, %56, %cst_82 {dimension_numbers = #tpu.dot_dimension_numbers<[1], [0], [0], [1], [0, 0, 1, 1], [], []>} : vector<512x128xf32>, vector<128x128xf32>, vector<512x128xf32> -> vector<512x128xf32>
    %58 = arith.addf %52, %57 : vector<512x128xf32>
    %c0_83 = arith.constant 0 : index
    %c2_84 = arith.constant 2 : index
    %c2_85 = arith.constant 2 : index
    %c0_86 = arith.constant 0 : index
    %59 = vector.load %arg7[%c0_83, %c2_84, %c2_85, %c0_86] : memref<2x18x18x128xf32, #tpu.memory_space<vmem>>, vector<2x16x16x128xf32>
    %60 = vector.shape_cast %59 : vector<2x16x16x128xf32> to vector<512x128xf32>
    %c8 = arith.constant 8 : index
    %c0_87 = arith.constant 0 : index
    %c0_88 = arith.constant 0 : index
    %61 = vector.load %arg2[%c8, %c0_87, %c0_88] : memref<9x128x128xf32, #tpu.memory_space<vmem>>, vector<1x128x128xf32>
    %62 = vector.shape_cast %61 : vector<1x128x128xf32> to vector<128x128xf32>
    %cst_89 = arith.constant dense<0.000000e+00> : vector<512x128xf32>
    %63 = tpu.matmul %60, %62, %cst_89 {dimension_numbers = #tpu.dot_dimension_numbers<[1], [0], [0], [1], [0, 0, 1, 1], [], []>} : vector<512x128xf32>, vector<128x128xf32>, vector<512x128xf32> -> vector<512x128xf32>
    %64 = arith.addf %58, %63 : vector<512x128xf32>
    %c0_90 = arith.constant 0 : index
    %c0_91 = arith.constant 0 : index
    %65 = vector.load %arg4[%c0_90, %c0_91] : memref<1x128xf32, #tpu.memory_space<vmem>>, vector<1x128xf32>
    %66 = vector.broadcast %65 : vector<1x128xf32> to vector<512x128xf32>
    %67 = arith.addf %64, %66 : vector<512x128xf32>
    %cst_92 = arith.constant 0.000000e+00 : f32
    %68 = vector.broadcast %cst_92 : f32 to vector<512x128xf32>
    %69 = arith.maximumf %67, %68 : vector<512x128xf32>
    %70 = vector.shape_cast %69 : vector<512x128xf32> to vector<2x16x16x128xf32>
    %c0_93 = arith.constant 0 : index
    %c1_94 = arith.constant 1 : index
    %c1_95 = arith.constant 1 : index
    %c0_96 = arith.constant 0 : index
    %71 = vector.load %arg7[%c0_93, %c1_94, %c1_95, %c0_96] : memref<2x18x18x128xf32, #tpu.memory_space<vmem>>, vector<2x16x16x128xf32>
    tpu.vector_store %arg7[%c0_93, %c1_94, %c1_95, %c0_96], %70 {strides = array<i32>} : memref<2x18x18x128xf32, #tpu.memory_space<vmem>>, vector<2x16x16x128xf32>,
    %cst_97 = arith.constant 0.000000e+00 : f32
    %72 = vector.broadcast %cst_97 : f32 to vector<512x128xf32>
    %c0_98 = arith.constant 0 : index
    %c0_99 = arith.constant 0 : index
    %c0_100 = arith.constant 0 : index
    %c0_101 = arith.constant 0 : index
    %73 = vector.load %arg7[%c0_98, %c0_99, %c0_100, %c0_101] : memref<2x18x18x128xf32, #tpu.memory_space<vmem>>, vector<2x16x16x128xf32>
    %74 = vector.shape_cast %73 : vector<2x16x16x128xf32> to vector<512x128xf32>
    %c0_102 = arith.constant 0 : index
    %c0_103 = arith.constant 0 : index
    %c0_104 = arith.constant 0 : index
    %75 = vector.load %arg3[%c0_102, %c0_103, %c0_104] : memref<9x128x128xf32, #tpu.memory_space<vmem>>, vector<1x128x128xf32>
    %76 = vector.shape_cast %75 : vector<1x128x128xf32> to vector<128x128xf32>
    %cst_105 = arith.constant dense<0.000000e+00> : vector<512x128xf32>
    %77 = tpu.matmul %74, %76, %cst_105 {dimension_numbers = #tpu.dot_dimension_numbers<[1], [0], [0], [1], [0, 0, 1, 1], [], []>} : vector<512x128xf32>, vector<128x128xf32>, vector<512x128xf32> -> vector<512x128xf32>
    %78 = arith.addf %72, %77 : vector<512x128xf32>
    %c0_106 = arith.constant 0 : index
    %c0_107 = arith.constant 0 : index
    %c1_108 = arith.constant 1 : index
    %c0_109 = arith.constant 0 : index
    %79 = vector.load %arg7[%c0_106, %c0_107, %c1_108, %c0_109] : memref<2x18x18x128xf32, #tpu.memory_space<vmem>>, vector<2x16x16x128xf32>
    %80 = vector.shape_cast %79 : vector<2x16x16x128xf32> to vector<512x128xf32>
    %c1_110 = arith.constant 1 : index
    %c0_111 = arith.constant 0 : index
    %c0_112 = arith.constant 0 : index
    %81 = vector.load %arg3[%c1_110, %c0_111, %c0_112] : memref<9x128x128xf32, #tpu.memory_space<vmem>>, vector<1x128x128xf32>
    %82 = vector.shape_cast %81 : vector<1x128x128xf32> to vector<128x128xf32>
    %cst_113 = arith.constant dense<0.000000e+00> : vector<512x128xf32>
    %83 = tpu.matmul %80, %82, %cst_113 {dimension_numbers = #tpu.dot_dimension_numbers<[1], [0], [0], [1], [0, 0, 1, 1], [], []>} : vector<512x128xf32>, vector<128x128xf32>, vector<512x128xf32> -> vector<512x128xf32>
    %84 = arith.addf %78, %83 : vector<512x128xf32>
    %c0_114 = arith.constant 0 : index
    %c0_115 = arith.constant 0 : index
    %c2_116 = arith.constant 2 : index
    %c0_117 = arith.constant 0 : index
    %85 = vector.load %arg7[%c0_114, %c0_115, %c2_116, %c0_117] : memref<2x18x18x128xf32, #tpu.memory_space<vmem>>, vector<2x16x16x128xf32>
    %86 = vector.shape_cast %85 : vector<2x16x16x128xf32> to vector<512x128xf32>
    %c2_118 = arith.constant 2 : index
    %c0_119 = arith.constant 0 : index
    %c0_120 = arith.constant 0 : index
    %87 = vector.load %arg3[%c2_118, %c0_119, %c0_120] : memref<9x128x128xf32, #tpu.memory_space<vmem>>, vector<1x128x128xf32>
    %88 = vector.shape_cast %87 : vector<1x128x128xf32> to vector<128x128xf32>
    %cst_121 = arith.constant dense<0.000000e+00> : vector<512x128xf32>
    %89 = tpu.matmul %86, %88, %cst_121 {dimension_numbers = #tpu.dot_dimension_numbers<[1], [0], [0], [1], [0, 0, 1, 1], [], []>} : vector<512x128xf32>, vector<128x128xf32>, vector<512x128xf32> -> vector<512x128xf32>
    %90 = arith.addf %84, %89 : vector<512x128xf32>
    %c0_122 = arith.constant 0 : index
    %c1_123 = arith.constant 1 : index
    %c0_124 = arith.constant 0 : index
    %c0_125 = arith.constant 0 : index
    %91 = vector.load %arg7[%c0_122, %c1_123, %c0_124, %c0_125] : memref<2x18x18x128xf32, #tpu.memory_space<vmem>>, vector<2x16x16x128xf32>
    %92 = vector.shape_cast %91 : vector<2x16x16x128xf32> to vector<512x128xf32>
    %c3_126 = arith.constant 3 : index
    %c0_127 = arith.constant 0 : index
    %c0_128 = arith.constant 0 : index
    %93 = vector.load %arg3[%c3_126, %c0_127, %c0_128] : memref<9x128x128xf32, #tpu.memory_space<vmem>>, vector<1x128x128xf32>
    %94 = vector.shape_cast %93 : vector<1x128x128xf32> to vector<128x128xf32>
    %cst_129 = arith.constant dense<0.000000e+00> : vector<512x128xf32>
    %95 = tpu.matmul %92, %94, %cst_129 {dimension_numbers = #tpu.dot_dimension_numbers<[1], [0], [0], [1], [0, 0, 1, 1], [], []>} : vector<512x128xf32>, vector<128x128xf32>, vector<512x128xf32> -> vector<512x128xf32>
    %96 = arith.addf %90, %95 : vector<512x128xf32>
    %c0_130 = arith.constant 0 : index
    %c1_131 = arith.constant 1 : index
    %c1_132 = arith.constant 1 : index
    %c0_133 = arith.constant 0 : index
    %97 = vector.load %arg7[%c0_130, %c1_131, %c1_132, %c0_133] : memref<2x18x18x128xf32, #tpu.memory_space<vmem>>, vector<2x16x16x128xf32>
    %98 = vector.shape_cast %97 : vector<2x16x16x128xf32> to vector<512x128xf32>
    %c4_134 = arith.constant 4 : index
    %c0_135 = arith.constant 0 : index
    %c0_136 = arith.constant 0 : index
    %99 = vector.load %arg3[%c4_134, %c0_135, %c0_136] : memref<9x128x128xf32, #tpu.memory_space<vmem>>, vector<1x128x128xf32>
    %100 = vector.shape_cast %99 : vector<1x128x128xf32> to vector<128x128xf32>
    %cst_137 = arith.constant dense<0.000000e+00> : vector<512x128xf32>
    %101 = tpu.matmul %98, %100, %cst_137 {dimension_numbers = #tpu.dot_dimension_numbers<[1], [0], [0], [1], [0, 0, 1, 1], [], []>} : vector<512x128xf32>, vector<128x128xf32>, vector<512x128xf32> -> vector<512x128xf32>
    %102 = arith.addf %96, %101 : vector<512x128xf32>
    %c0_138 = arith.constant 0 : index
    %c1_139 = arith.constant 1 : index
    %c2_140 = arith.constant 2 : index
    %c0_141 = arith.constant 0 : index
    %103 = vector.load %arg7[%c0_138, %c1_139, %c2_140, %c0_141] : memref<2x18x18x128xf32, #tpu.memory_space<vmem>>, vector<2x16x16x128xf32>
    %104 = vector.shape_cast %103 : vector<2x16x16x128xf32> to vector<512x128xf32>
    %c5_142 = arith.constant 5 : index
    %c0_143 = arith.constant 0 : index
    %c0_144 = arith.constant 0 : index
    %105 = vector.load %arg3[%c5_142, %c0_143, %c0_144] : memref<9x128x128xf32, #tpu.memory_space<vmem>>, vector<1x128x128xf32>
    %106 = vector.shape_cast %105 : vector<1x128x128xf32> to vector<128x128xf32>
    %cst_145 = arith.constant dense<0.000000e+00> : vector<512x128xf32>
    %107 = tpu.matmul %104, %106, %cst_145 {dimension_numbers = #tpu.dot_dimension_numbers<[1], [0], [0], [1], [0, 0, 1, 1], [], []>} : vector<512x128xf32>, vector<128x128xf32>, vector<512x128xf32> -> vector<512x128xf32>
    %108 = arith.addf %102, %107 : vector<512x128xf32>
    %c0_146 = arith.constant 0 : index
    %c2_147 = arith.constant 2 : index
    %c0_148 = arith.constant 0 : index
    %c0_149 = arith.constant 0 : index
    %109 = vector.load %arg7[%c0_146, %c2_147, %c0_148, %c0_149] : memref<2x18x18x128xf32, #tpu.memory_space<vmem>>, vector<2x16x16x128xf32>
    %110 = vector.shape_cast %109 : vector<2x16x16x128xf32> to vector<512x128xf32>
    %c6_150 = arith.constant 6 : index
    %c0_151 = arith.constant 0 : index
    %c0_152 = arith.constant 0 : index
    %111 = vector.load %arg3[%c6_150, %c0_151, %c0_152] : memref<9x128x128xf32, #tpu.memory_space<vmem>>, vector<1x128x128xf32>
    %112 = vector.shape_cast %111 : vector<1x128x128xf32> to vector<128x128xf32>
    %cst_153 = arith.constant dense<0.000000e+00> : vector<512x128xf32>
    %113 = tpu.matmul %110, %112, %cst_153 {dimension_numbers = #tpu.dot_dimension_numbers<[1], [0], [0], [1], [0, 0, 1, 1], [], []>} : vector<512x128xf32>, vector<128x128xf32>, vector<512x128xf32> -> vector<512x128xf32>
    %114 = arith.addf %108, %113 : vector<512x128xf32>
    %c0_154 = arith.constant 0 : index
    %c2_155 = arith.constant 2 : index
    %c1_156 = arith.constant 1 : index
    %c0_157 = arith.constant 0 : index
    %115 = vector.load %arg7[%c0_154, %c2_155, %c1_156, %c0_157] : memref<2x18x18x128xf32, #tpu.memory_space<vmem>>, vector<2x16x16x128xf32>
    %116 = vector.shape_cast %115 : vector<2x16x16x128xf32> to vector<512x128xf32>
    %c7_158 = arith.constant 7 : index
    %c0_159 = arith.constant 0 : index
    %c0_160 = arith.constant 0 : index
    %117 = vector.load %arg3[%c7_158, %c0_159, %c0_160] : memref<9x128x128xf32, #tpu.memory_space<vmem>>, vector<1x128x128xf32>
    %118 = vector.shape_cast %117 : vector<1x128x128xf32> to vector<128x128xf32>
    %cst_161 = arith.constant dense<0.000000e+00> : vector<512x128xf32>
    %119 = tpu.matmul %116, %118, %cst_161 {dimension_numbers = #tpu.dot_dimension_numbers<[1], [0], [0], [1], [0, 0, 1, 1], [], []>} : vector<512x128xf32>, vector<128x128xf32>, vector<512x128xf32> -> vector<512x128xf32>
    %120 = arith.addf %114, %119 : vector<512x128xf32>
    %c0_162 = arith.constant 0 : index
    %c2_163 = arith.constant 2 : index
    %c2_164 = arith.constant 2 : index
    %c0_165 = arith.constant 0 : index
    %121 = vector.load %arg7[%c0_162, %c2_163, %c2_164, %c0_165] : memref<2x18x18x128xf32, #tpu.memory_space<vmem>>, vector<2x16x16x128xf32>
    %122 = vector.shape_cast %121 : vector<2x16x16x128xf32> to vector<512x128xf32>
    %c8_166 = arith.constant 8 : index
    %c0_167 = arith.constant 0 : index
    %c0_168 = arith.constant 0 : index
    %123 = vector.load %arg3[%c8_166, %c0_167, %c0_168] : memref<9x128x128xf32, #tpu.memory_space<vmem>>, vector<1x128x128xf32>
    %124 = vector.shape_cast %123 : vector<1x128x128xf32> to vector<128x128xf32>
    %cst_169 = arith.constant dense<0.000000e+00> : vector<512x128xf32>
    %125 = tpu.matmul %122, %124, %cst_169 {dimension_numbers = #tpu.dot_dimension_numbers<[1], [0], [0], [1], [0, 0, 1, 1], [], []>} : vector<512x128xf32>, vector<128x128xf32>, vector<512x128xf32> -> vector<512x128xf32>
    %126 = arith.addf %120, %125 : vector<512x128xf32>
    %c0_170 = arith.constant 0 : index
    %c0_171 = arith.constant 0 : index
    %127 = vector.load %arg5[%c0_170, %c0_171] : memref<1x128xf32, #tpu.memory_space<vmem>>, vector<1x128xf32>
    %128 = vector.broadcast %127 : vector<1x128xf32> to vector<512x128xf32>
    %129 = arith.addf %126, %128 : vector<512x128xf32>
    %130 = vector.shape_cast %8 : vector<2x16x16x128xf32> to vector<512x128xf32>
    %131 = arith.addf %129, %130 : vector<512x128xf32>
    %cst_172 = arith.constant 0.000000e+00 : f32
    %132 = vector.broadcast %cst_172 : f32 to vector<512x128xf32>
    %133 = arith.maximumf %131, %132 : vector<512x128xf32>
    %134 = vector.shape_cast %133 : vector<512x128xf32> to vector<2x16x16x128xf32>
    %c0_173 = arith.constant 0 : index
    %c0_174 = arith.constant 0 : index
    %c0_175 = arith.constant 0 : index
    %c0_176 = arith.constant 0 : index
    %135 = vector.load %arg6[%c0_173, %c0_174, %c0_175, %c0_176] : memref<2x16x16x128xf32, #tpu.memory_space<vmem>>, vector<2x16x16x128xf32>
    tpu.vector_store %arg6[%c0_173, %c0_174, %c0_175, %c0_176], %134 {strides = array<i32>} : memref<2x16x16x128xf32, #tpu.memory_space<vmem>>, vector<2x16x16x128xf32>,
    return
  }
  func.func @transform_0(%arg0: i32) -> (i32, i32, i32, i32) {
    %c0_i32 = arith.constant 0 : i32
    %c0_i32_0 = arith.constant 0 : i32
    %c0_i32_1 = arith.constant 0 : i32
    %c0_i32_2 = arith.constant 0 : i32
    return %arg0, %c0_i32, %c0_i32_0, %c0_i32_1 : i32, i32, i32, i32
  }
  func.func @transform_1(%arg0: i32) -> (i32, i32, i32) {
    %c0_i32 = arith.constant 0 : i32
    %c0_i32_0 = arith.constant 0 : i32
    %c0_i32_1 = arith.constant 0 : i32
    %c0_i32_2 = arith.constant 0 : i32
    return %c0_i32, %c0_i32_0, %c0_i32_1 : i32, i32, i32
  }
  func.func @transform_2(%arg0: i32) -> (i32, i32, i32) {
    %c0_i32 = arith.constant 0 : i32
    %c0_i32_0 = arith.constant 0 : i32
    %c0_i32_1 = arith.constant 0 : i32
    %c0_i32_2 = arith.constant 0 : i32
    return %c0_i32, %c0_i32_0, %c0_i32_1 : i32, i32, i32
  }
  func.func @transform_3(%arg0: i32) -> (i32, i32) {
    %c0_i32 = arith.constant 0 : i32
    %c0_i32_0 = arith.constant 0 : i32
    %c0_i32_1 = arith.constant 0 : i32
    return %c0_i32, %c0_i32_0 : i32, i32
  }
  func.func @transform_4(%arg0: i32) -> (i32, i32) {
    %c0_i32 = arith.constant 0 : i32
    %c0_i32_0 = arith.constant 0 : i32
    %c0_i32_1 = arith.constant 0 : i32
    return %c0_i32, %c0_i32_0 : i32, i32
  }
  func.func @transform_5(%arg0: i32) -> (i32, i32, i32, i32) {
    %c0_i32 = arith.constant 0 : i32
    %c0_i32_0 = arith.constant 0 : i32
    %c0_i32_1 = arith.constant 0 : i32
    %c0_i32_2 = arith.constant 0 : i32
    return %arg0, %c0_i32, %c0_i32_0, %c0_i32_1 : i32, i32, i32, i32
  }
}

</mosaic_0001>

<bundles_post_ra>
// kernel: basic_block_forward.1
= control target key start
LH: loop header
LB: loop body
LE: loop exit
PB: predicated region body
PF: predicated region fallthrough
CT: control target
= control target key end

     0   :  { %v18378_v3 = vmov 0.0   ;;  %s18372_s1 = inlined_call_operand.vmem [shape: f32[9,128,128], index: 1, kind: input, shape index: {}]   ;;  %s18373_s0 = inlined_call_operand.vmem [shape: f32[2,16,16,128], index: 0, kind: input, shape index: {}]   ;;  %s18374_s2 = inlined_call_operand.vmem [shape: f32[9,128,128], index: 2, kind: input, shape index: {}]   ;;  %s18375_s3 = inlined_call_operand.vmem [shape: f32[1,128], index: 3, kind: input, shape index: {}]   ;;  %s18376_s4 = inlined_call_operand.vmem [shape: f32[1,128], index: 4, kind: input, shape index: {}]   ;;  %s18377_s5 = inlined_call_operand.vmem [shape: f32[2,16,16,128], index: 5, kind: output, shape index: {}]  }
   0x1   :  { %v14026_v0 = vld [vmem:[%s18372_s1 + $0xf8] sm:$0xff]  ;;  %v14036_v2 = vld [vmem:[%s18372_s1 + $0xf0] sm:$0xff]  ;;  %20 = vst [vmem:[#allocation2] sm:$0xff] %v18378_v3  ;;  %21 = vst [vmem:[#allocation2 + $0x8] sm:$0xff] %v18378_v3  ;;  %11833 = vmatprep.mubr.f32.mxu1 %v18378_v3 }
   0x2   :  { %v14031_v1 = vld [vmem:[%s18372_s1 + $0x78] sm:$0xff]  ;;  %22 = vst [vmem:[#allocation2 + $0x10] sm:$0x3] %v18378_v3  ;;  %23 = vst [vmem:[#allocation2 + $0x1b0] sm:$0xff] %v18378_v3  ;;  %11673 = vmatprep.subr.mxu0 %v14026_v0  ;;  %v304_v4 = vld [vmem:[%s18372_s1 + $0x70] sm:$0xff] }
   0x3   :  { %24 = vst [vmem:[#allocation2 + $0x1b8] sm:$0xff] %v18378_v3  ;;  %25 = vst [vmem:[#allocation2 + $0x1c0] sm:$0x3] %v18378_v3  ;;  %11801 = vmatprep.subr.mxu1 %v14031_v1  ;;  %11674 = vmatpush3.msra.mxu0 %v14026_v0  ;;  %v9988_v5 = vld [vmem:[%s18372_s1 + $0xe8] sm:$0xff]  ;;  %v9987_v7 = vld [vmem:[%s18372_s1 + $0xe0] sm:$0xff] }
   0x4   :  { %27 = vst [vmem:[#allocation2 + $0x198] sm:$0xff] %v18378_v3  ;;  %28 = vst [vmem:[#allocation2 + $0x1a0] sm:$0xff] %v18378_v3  ;;  %11802 = vmatpush3.msra.mxu1 %v14031_v1  ;;  %v303_v6 = vld [vmem:[%s18372_s1 + $0x68] sm:$0xff]  ;;  %11675 = vmatprep.subr.mxu0 %v14036_v2  ;;  %v302_v8 = vld [vmem:[%s18372_s1 + $0x60] sm:$0xff] }
   0x5   :  { %29 = vst [vmem:[#allocation2 + $0x1a8] sm:$0x3] %v18378_v3  ;;  %30 = vst [vmem:[#allocation2 + $0x348] sm:$0xff] %v18378_v3  ;;  %11803 = vmatprep.subr.mxu1 %v304_v4  ;;  %11676 = vmatpush3.msra.mxu0 %v14036_v2  ;;  %v9986_v9 = vld [vmem:[%s18372_s1 + $0xd8] sm:$0xff]  ;;  %v9985_v11 = vld [vmem:[%s18372_s1 + $0xd0] sm:$0xff] }
   0x6   :  { %31 = vst [vmem:[#allocation2 + $0x350] sm:$0xff] %v18378_v3  ;;  %32 = vst [vmem:[#allocation2 + $0x358] sm:$0x3] %v18378_v3  ;;  %11804 = vmatpush3.msra.mxu1 %v304_v4  ;;  %11677 = vmatprep.subr.mxu0 %v9988_v5  ;;  %v301_v10 = vld [vmem:[%s18372_s1 + $0x58] sm:$0xff]  ;;  %v300_v12 = vld [vmem:[%s18372_s1 + $0x50] sm:$0xff] }
   0x7   :  { %34 = vst [vmem:[#allocation2 + $0x18] sm:$0x1] %v18378_v3  ;;  %35 = vst [vmem:[#allocation2 + $0x30] sm:$0x1] %v18378_v3  ;;  %11805 = vmatprep.subr.mxu1 %v303_v6  ;;  %11678 = vmatpush3.msra.mxu0 %v9988_v5  ;;  %v9984_v13 = vld [vmem:[%s18372_s1 + $0xc8] sm:$0xff]  ;;  %v9983_v15 = vld [vmem:[%s18372_s1 + $0xc0] sm:$0xff] }
   0x8   :  { %36 = vst [vmem:[#allocation2 + $0x48] sm:$0x1] %v18378_v3  ;;  %37 = vst [vmem:[#allocation2 + $0x60] sm:$0x1] %v18378_v3  ;;  %11806 = vmatpush3.msra.mxu1 %v303_v6  ;;  %11679 = vmatprep.subr.mxu0 %v9987_v7  ;;  %v299_v14 = vld [vmem:[%s18372_s1 + $0x48] sm:$0xff]  ;;  %v298_v16 = vld [vmem:[%s18372_s1 + $0x40] sm:$0xff] }
   0x9   :  { %38 = vst [vmem:[#allocation2 + $0x78] sm:$0x1] %v18378_v3  ;;  %39 = vst [vmem:[#allocation2 + $0x90] sm:$0x1] %v18378_v3  ;;  %11807 = vmatprep.subr.mxu1 %v302_v8  ;;  %11680 = vmatpush3.msra.mxu0 %v9987_v7  ;;  %v14163_v17 = vld [vmem:[%s18373_s0] sm:$0xff]  ;;  %v9982_v18 = vld [vmem:[%s18372_s1 + $0xb8] sm:$0xff] }
   0xa   :  { %40 = vst [vmem:[#allocation2 + $0xa8] sm:$0x1] %v18378_v3  ;;  %41 = vst [vmem:[#allocation2 + $0xc0] sm:$0x1] %v18378_v3  ;;  %11808 = vmatpush3.msra.mxu1 %v302_v8  ;;  %11681 = vmatprep.subr.mxu0 %v9986_v9  ;;  %v14172_v19 = vld [vmem:[%s18373_s0 + $0x8] sm:$0xff]  ;;  %v14177_v20 = vld [vmem:[%s18373_s0 + $0x10] sm:$0xff] }
   0xb   :  { %42 = vst [vmem:[#allocation2 + $0xd8] sm:$0x1] %v18378_v3  ;;  %43 = vst [vmem:[#allocation2 + $0xf0] sm:$0x1] %v18378_v3  ;;  %11809 = vmatprep.subr.mxu1 %v301_v10  ;;  %11682 = vmatpush3.msra.mxu0 %v9986_v9  ;;  %v14182_v21 = vld [vmem:[%s18373_s0 + $0x18] sm:$0xff]  ;;  %v14193_v23 = vld [vmem:[%s18373_s0 + $0x20] sm:$0xff] }
   0xc   :  { %44 = vst [vmem:[#allocation2 + $0x108] sm:$0x1] %v18378_v3  ;;  %45 = vst [vmem:[#allocation2 + $0x120] sm:$0x1] %v18378_v3  ;;  %11810 = vmatpush3.msra.mxu1 %v301_v10  ;;  %11683 = vmatprep.subr.mxu0 %v9985_v11  ;;  %v297_v22 = vld [vmem:[%s18372_s1 + $0x38] sm:$0xff]  ;;  %v14198_v24 = vld [vmem:[%s18373_s0 + $0x28] sm:$0xff] }
   0xd   :  { %46 = vst [vmem:[#allocation2 + $0x138] sm:$0x1] %v18378_v3  ;;  %47 = vst [vmem:[#allocation2 + $0x150] sm:$0x1] %v18378_v3  ;;  %11811 = vmatprep.subr.mxu1 %v300_v12  ;;  %11684 = vmatpush3.msra.mxu0 %v9985_v11  ;;  %v9981_v25 = vld [vmem:[%s18372_s1 + $0xb0] sm:$0xff]  ;;  %v14216_v28 = vld [vmem:[%s18373_s0 + $0x38] sm:$0xff] }
   0xe   :  { %48 = vst [vmem:[#allocation2 + $0x168] sm:$0x1] %v18378_v3  ;;  %49 = vst [vmem:[#allocation2 + $0x180] sm:$0x1] %v18378_v3  ;;  %11812 = vmatpush3.msra.mxu1 %v300_v12  ;;  %11685 = vmatprep.subr.mxu0 %v9984_v13  ;;  %v296_v26 = vld [vmem:[%s18372_s1 + $0x30] sm:$0xff]  ;;  %v14223_v29 = vld [vmem:[%s18373_s0 + $0x40] sm:$0xff] }
   0xf   :  { %50 = vst [vmem:[#allocation2 + $0x1c8] sm:$0x1] %v18378_v3  ;;  %51 = vst [vmem:[#allocation2 + $0x1e0] sm:$0x1] %v18378_v3  ;;  %11813 = vmatprep.subr.mxu1 %v299_v14  ;;  %11686 = vmatpush3.msra.mxu0 %v9984_v13  ;;  %v14211_v27 = vld [vmem:[%s18373_s0 + $0x30] sm:$0xff]  ;;  %v14228_v30 = vld [vmem:[%s18373_s0 + $0x48] sm:$0xff] }
  0x10   :  { %52 = vst [vmem:[#allocation2 + $0x1f8] sm:$0x1] %v18378_v3  ;;  %53 = vst [vmem:[#allocation2 + $0x210] sm:$0x1] %v18378_v3  ;;  %11814 = vmatpush3.msra.mxu1 %v299_v14  ;;  %11687 = vmatprep.subr.mxu0 %v9983_v15  ;;  %v14233_v31 = vld [vmem:[%s18373_s0 + $0x50] sm:$0xff]  ;;  %v9980_v32 = vld [vmem:[%s18372_s1 + $0xa8] sm:$0xff] }
  0x11   :  { %54 = vst [vmem:[#allocation2 + $0x228] sm:$0x1] %v18378_v3  ;;  %55 = vst [vmem:[#allocation2 + $0x240] sm:$0x1] %v18378_v3  ;;  %11815 = vmatprep.subr.mxu1 %v298_v16  ;;  %11688 = vmatpush3.msra.mxu0 %v9983_v15  ;;  %v14244_v33 = vld [vmem:[%s18373_s0 + $0x58] sm:$0xff]  ;;  %v14249_v34 = vld [vmem:[%s18373_s0 + $0x60] sm:$0xff] }
  0x12   :  { %56 = vst [vmem:[#allocation2 + $0x258] sm:$0x1] %v18378_v3  ;;  %57 = vst [vmem:[#allocation2 + $0x270] sm:$0x1] %v18378_v3  ;;  %11816 = vmatpush3.msra.mxu1 %v298_v16  ;;  %11689 = vmatprep.subr.mxu0 %v9982_v18  ;;  %v14256_v35 = vld [vmem:[%s18373_s0 + $0x68] sm:$0xff]  ;;  %v14261_v36 = vld [vmem:[%s18373_s0 + $0x70] sm:$0xff] }
  0x13   :  { %58 = vst [vmem:[#allocation2 + $0x288] sm:$0x1] %v18378_v3  ;;  %59 = vst [vmem:[#allocation2 + $0x2a0] sm:$0x1] %v18378_v3  ;;  %11817 = vmatprep.subr.mxu1 %v297_v22  ;;  %v14266_v37 = vld [vmem:[%s18373_s0 + $0x78] sm:$0xff]  ;;  %11690 = vmatpush3.msra.mxu0 %v9982_v18  ;;  %v295_v38 = vld [vmem:[%s18372_s1 + $0x28] sm:$0xff] }
  0x14   :  { %60 = vst [vmem:[#allocation2 + $0x2b8] sm:$0x1] %v18378_v3  ;;  %61 = vst [vmem:[#allocation2 + $0x2d0] sm:$0x1] %v18378_v3  ;;  %11818 = vmatpush3.msra.mxu1 %v297_v22  ;;  %v14277_v39 = vld [vmem:[%s18373_s0 + $0x80] sm:$0xff]  ;;  %v14282_v40 = vld [vmem:[%s18373_s0 + $0x88] sm:$0xff]  ;;  %11691 = vmatprep.subr.mxu0 %v9981_v25 }
  0x15   :  { %62 = vst [vmem:[#allocation2 + $0x2e8] sm:$0x1] %v18378_v3  ;;  %63 = vst [vmem:[#allocation2 + $0x300] sm:$0x1] %v18378_v3  ;;  %11819 = vmatprep.subr.mxu1 %v296_v26  ;;  %v14289_v41 = vld [vmem:[%s18373_s0 + $0x90] sm:$0xff]  ;;  %v14294_v42 = vld [vmem:[%s18373_s0 + $0x98] sm:$0xff]  ;;  %11692 = vmatpush3.msra.mxu0 %v9981_v25 }
  0x16   :  { %64 = vst [vmem:[#allocation2 + $0x318] sm:$0x1] %v18378_v3  ;;  %65 = vst [vmem:[#allocation2 + $0x330] sm:$0x1] %v18378_v3  ;;  %11820 = vmatpush3.msra.mxu1 %v296_v26  ;;  %v9979_v43 = vld [vmem:[%s18372_s1 + $0xa0] sm:$0xff]  ;;  %11693 = vmatprep.subr.mxu0 %v9980_v32  ;;  %v9978_v45 = vld [vmem:[%s18372_s1 + $0x98] sm:$0xff] }
  0x17   :  { %66 = vst [vmem:[#allocation2 + $0x29] sm:$0x1] %v18378_v3  ;;  %67 = vst [vmem:[#allocation2 + $0x41] sm:$0x1] %v18378_v3  ;;  %v294_v44 = vld [vmem:[%s18372_s1 + $0x20] sm:$0xff]  ;;  %11821 = vmatprep.subr.mxu1 %v295_v38  ;;  %11694 = vmatpush3.msra.mxu0 %v9980_v32  ;;  %v293_v46 = vld [vmem:[%s18372_s1 + $0x18] sm:$0xff] }
  0x18   :  { %68 = vst [vmem:[#allocation2 + $0x59] sm:$0x1] %v18378_v3  ;;  %69 = vst [vmem:[#allocation2 + $0x71] sm:$0x1] %v18378_v3  ;;  %11822 = vmatpush3.msra.mxu1 %v295_v38  ;;  %v14313_v47 = vld [vmem:[%s18373_s0 + $0xa0] sm:$0xff]  ;;  %11695 = vmatprep.subr.mxu0 %v9979_v43  ;;  %v9977_v48 = vld [vmem:[%s18372_s1 + $0x90] sm:$0xff] }
  0x19   :  { %70 = vst [vmem:[#allocation2 + $0x89] sm:$0x1] %v18378_v3  ;;  %71 = vst [vmem:[#allocation2 + $0xa1] sm:$0x1] %v18378_v3  ;;  %11823 = vmatprep.subr.mxu1 %v294_v44  ;;  %11696 = vmatpush3.msra.mxu0 %v9979_v43  ;;  %v292_v49 = vld [vmem:[%s18372_s1 + $0x10] sm:$0xff]  ;;  %v14325_v50 = vld [vmem:[%s18373_s0 + $0xa8] sm:$0xff] }
  0x1a   :  { %72 = vst [vmem:[#allocation2 + $0xb9] sm:$0x1] %v18378_v3  ;;  %73 = vst [vmem:[#allocation2 + $0xd1] sm:$0x1] %v18378_v3  ;;  %11824 = vmatpush3.msra.mxu1 %v294_v44  ;;  %11697 = vmatprep.subr.mxu0 %v9978_v45  ;;  %v9976_v51 = vld [vmem:[%s18372_s1 + $0x88] sm:$0xff]  ;;  %v14337_v53 = vld [vmem:[%s18373_s0 + $0xb0] sm:$0xff] }
  0x1b   :  { %74 = vst [vmem:[#allocation2 + $0xe9] sm:$0x1] %v18378_v3  ;;  %75 = vst [vmem:[#allocation2 + $0x101] sm:$0x1] %v18378_v3  ;;  %11825 = vmatprep.subr.mxu1 %v293_v46  ;;  %11698 = vmatpush3.msra.mxu0 %v9978_v45  ;;  %v291_v52 = vld [vmem:[%s18372_s1 + $0x8] sm:$0xff]  ;;  %v9975_v54 = vld [vmem:[%s18372_s1 + $0x80] sm:$0xff] }
  0x1c   :  { %76 = vst [vmem:[#allocation2 + $0x119] sm:$0x1] %v18378_v3  ;;  %77 = vst [vmem:[#allocation2 + $0x131] sm:$0x1] %v18378_v3  ;;  %11826 = vmatpush3.msra.mxu1 %v293_v46  ;;  %11699 = vmatprep.subr.mxu0 %v9977_v48  ;;  %v14346_v55 = vld [vmem:[%s18373_s0 + $0xb8] sm:$0xff]  ;;  %v290_v56 = vld [vmem:[%s18372_s1] sm:$0xff] }
  0x1d   :  { %78 = vst [vmem:[#allocation2 + $0x149] sm:$0x1] %v18378_v3  ;;  %79 = vst [vmem:[#allocation2 + $0x161] sm:$0x1] %v18378_v3  ;;  %11827 = vmatprep.subr.mxu1 %v292_v49  ;;  %11700 = vmatpush3.msra.mxu0 %v9977_v48  ;;  %v14355_v57 = vld [vmem:[%s18373_s0 + $0xc0] sm:$0xff]  ;;  %v14360_v58 = vld [vmem:[%s18373_s0 + $0xc8] sm:$0xff] }
  0x1e   :  { %80 = vst [vmem:[#allocation2 + $0x179] sm:$0x1] %v18378_v3  ;;  %81 = vst [vmem:[#allocation2 + $0x191] sm:$0x1] %v18378_v3  ;;  %11828 = vmatpush3.msra.mxu1 %v292_v49  ;;  %11701 = vmatprep.subr.mxu0 %v9976_v51  ;;  %v306_v59 = vld [vmem:[#allocation2 + $0x1] sm:$0xff]  ;;  %v14367_v60 = vld [vmem:[%s18373_s0 + $0xd0] sm:$0xff] }
  0x1f   :  { %82 = vst [vmem:[#allocation2 + $0x1d9] sm:$0x1] %v18378_v3  ;;  %83 = vst [vmem:[#allocation2 + $0x1f1] sm:$0x1] %v18378_v3  ;;  %11829 = vmatprep.subr.mxu1 %v291_v52  ;;  %v14372_v61 = vld [vmem:[%s18373_s0 + $0xd8] sm:$0xff]  ;;  %11702 = vmatpush3.msra.mxu0 %v9976_v51  ;;  %v307_v62 = vld [vmem:[#allocation2 + $0x9] sm:$0xff] }
  0x20   :  { %84 = vst [vmem:[#allocation2 + $0x209] sm:$0x1] %v18378_v3  ;;  %85 = vst [vmem:[#allocation2 + $0x221] sm:$0x1] %v18378_v3  ;;  %11830 = vmatpush3.msra.mxu1 %v291_v52  ;;  %v14379_v63 = vld [vmem:[%s18373_s0 + $0xe0] sm:$0xff]  ;;  %v14384_v0 = vld [vmem:[%s18373_s0 + $0xe8] sm:$0xff]  ;;  %11703 = vmatprep.subr.mxu0 %v9975_v54 }
  0x21   :  { %86 = vst [vmem:[#allocation2 + $0x239] sm:$0x1] %v18378_v3  ;;  %87 = vst [vmem:[#allocation2 + $0x251] sm:$0x1] %v18378_v3  ;;  %11831 = vmatprep.subr.mxu1 %v290_v56  ;;  %v10006_v1 = vld [vmem:[%s18372_s1 + $0x178] sm:$0xff]  ;;  %11704 = vmatpush3.msra.mxu0 %v9975_v54  ;;  %v10005_v2 = vld [vmem:[%s18372_s1 + $0x170] sm:$0xff] }
  0x22   :  { %88 = vst [vmem:[#allocation2 + $0x269] sm:$0x1] %v18378_v3  ;;  %89 = vst [vmem:[#allocation2 + $0x281] sm:$0x1] %v18378_v3  ;;  %11705 = vmatprep.mubr.f32.mxu0 %v306_v59  ;;  %v14397_v4 = vld [vmem:[%s18373_s0 + $0x100] sm:$0xff]  ;;  %v14402_v5 = vld [vmem:[%s18373_s0 + $0x108] sm:$0xff]  ;;  %11832 = vmatpush3.msra.mxu1 %v290_v56 }
  0x23   :  { %90 = vst [vmem:[#allocation2 + $0x299] sm:$0x1] %v18378_v3  ;;  %91 = vst [vmem:[#allocation2 + $0x2b1] sm:$0x1] %v18378_v3  ;;  %11706 = vmatmul.mubr.f32.vlgmr.msra.gmra.mxu0 %v307_v62  ;;  %v14411_v7 = vld [vmem:[%s18373_s0 + $0x110] sm:$0xff]  ;;  %v14416_v8 = vld [vmem:[%s18373_s0 + $0x118] sm:$0xff]  ;;  %11834 = vmatmul.mubr.f32.vlgmr.msra.gmra.mxu1 %v18378_v3 }
  0x24   :  { %92 = vst [vmem:[#allocation2 + $0x2c9] sm:$0x1] %v18378_v3  ;;  %93 = vst [vmem:[#allocation2 + $0x2e1] sm:$0x1] %v18378_v3  ;;  %11929 = vmatprep.subr.mxu0 %v10006_v1  ;;  %v14424_v9 = vld [vmem:[%s18373_s0 + $0x120] sm:$0xff]  ;;  %v14429_v10 = vld [vmem:[%s18373_s0 + $0x128] sm:$0xff]  ;;  %11708 = vmatprep.mubr.f32.mxu0 %v14163_v17 }
  0x25   :  { %94 = vst [vmem:[#allocation2 + $0x2f9] sm:$0x1] %v18378_v3  ;;  %95 = vst [vmem:[#allocation2 + $0x311] sm:$0x1] %v18378_v3  ;;  %11930 = vmatpush3.msra.mxu0 %v10006_v1  ;;  %v14439_v12 = vld [vmem:[%s18373_s0 + $0x130] sm:$0xff]  ;;  %v14444_v13 = vld [vmem:[%s18373_s0 + $0x138] sm:$0xff] }
  0x26   :  { %96 = vst [vmem:[#allocation2 + $0x329] sm:$0x1] %v18378_v3  ;;  %97 = vst [vmem:[#allocation2 + $0x341] sm:$0x1] %v18378_v3  ;;  %11931 = vmatprep.subr.mxu0 %v10005_v2  ;;  %v10004_v15 = vld [vmem:[%s18372_s1 + $0x168] sm:$0xff]  ;;  %v14458_v16 = vld [vmem:[%s18373_s0 + $0x140] sm:$0xff] }
  0x27   :  { %18457 = vst [vmem:[#allocation3_spill] sm:$0xff] %v14163_v17  ;;  %162 = vst [vmem:[#allocation2 + $0x19] sm:$0xff] %v14163_v17  ;;  %11709 = vmatmul.mubr.f32.gmra.mxu0 %v14172_v19  ;;  %v14466_v18 = vld [vmem:[%s18373_s0 + $0x148] sm:$0xff]  ;;  %v14475_v25 = vld [vmem:[%s18373_s0 + $0x150] sm:$0xff] }
  0x28   :  { %18458 = vst [vmem:[#allocation4_spill] sm:$0xff] %v14172_v19  ;;  %18459 = vst [vmem:[#allocation5_spill] sm:$0xff] %v14177_v20  ;;  %11711 = vmatprep.mubr.f32.mxu0 %v14177_v20  ;;  %11932 = vmatpush3.msra.mxu0 %v10005_v2  ;;  %v14480_v26 = vld [vmem:[%s18373_s0 + $0x158] sm:$0xff]  ;;  %v14489_v38 = vld [vmem:[%s18373_s0 + $0x160] sm:$0xff] }
  0x29   :  { %18460 = vst [vmem:[#allocation6_spill] sm:$0xff] %v14182_v21  ;;  %163 = vst [vmem:[#allocation2 + $0x21] sm:$0xff] %v14172_v19  ;;  %11933 = vmatprep.subr.mxu0 %v10004_v15  ;;  %v10003_v43 = vld [vmem:[%s18372_s1 + $0x160] sm:$0xff]  ;;  %v14499_v44 = vld [vmem:[%s18373_s0 + $0x168] sm:$0xff] }
  0x2a   :  { %164 = vst [vmem:[#allocation2 + $0x31] sm:$0xff] %v14177_v20  ;;  %165 = vst [vmem:[#allocation2 + $0x39] sm:$0xff] %v14182_v21  ;;  %v14507_v45 = vld [vmem:[%s18373_s0 + $0x170] sm:$0xff]  ;;  %11934 = vmatpush3.msra.mxu0 %v10004_v15  ;;  %v14516_v48 = vld [vmem:[%s18373_s0 + $0x178] sm:$0xff] }
  0x2b   :  { %18461 = vst [vmem:[#allocation7_spill] sm:$0xff] %v14193_v23  ;;  %18462 = vst [vmem:[#allocation8_spill] sm:$0xff] %v14198_v24  ;;  %11712 = vmatmul.mubr.f32.gmra.mxu0 %v14182_v21  ;;  %11935 = vmatprep.subr.mxu0 %v10003_v43  ;;  %v10022_v51 = vld [vmem:[%s18372_s1 + $0x1f8] sm:$0xff]  ;;  %v14527_v52 = vld [vmem:[%s18373_s0 + $0x180] sm:$0xff] }
  0x2c   :  { %166 = vst [vmem:[#allocation2 + $0x49] sm:$0xff] %v14193_v23  ;;  %167 = vst [vmem:[#allocation2 + $0x51] sm:$0xff] %v14198_v24  ;;  %11714 = vmatprep.mubr.f32.mxu0 %v14193_v23  ;;  %v10002_v54 = vld [vmem:[%s18372_s1 + $0x158] sm:$0xff]  ;;  %12057 = vmatprep.subr.mxu1 %v10022_v51  ;;  %v14537_v56 = vld [vmem:[%s18373_s0 + $0x188] sm:$0xff] }
  0x2d   :  { %18463 = vst [vmem:[#allocation9_spill] sm:$0xff] %v14211_v27  ;;  %18464 = vst [vmem:[#allocation10_spill] sm:$0xff] %v14216_v28  ;;  %v10021_v59 = vld [vmem:[%s18372_s1 + $0x1f0] sm:$0xff]  ;;  %11936 = vmatpush3.msra.mxu0 %v10003_v43  ;;  %v14557_v2 = vld [vmem:[%s18373_s0 + $0x198] sm:$0xff]  ;;  %12058 = vmatpush3.msra.mxu1 %v10022_v51 }
  0x2e   :  { %168 = vst [vmem:[#allocation2 + $0x61] sm:$0xff] %v14211_v27  ;;  %169 = vst [vmem:[#allocation2 + $0x69] sm:$0xff] %v14216_v28  ;;  %v14404_v6 = vld [vmem:[#allocation2 + $0x18] sm:$0xff]  ;;  %v14548_v62 = vld [vmem:[%s18373_s0 + $0x190] sm:$0xff]  ;;  %11937 = vmatprep.subr.mxu0 %v10002_v54  ;;  %12059 = vmatprep.subr.mxu1 %v10021_v59 }
  0x2f   :  { %18465 = vst [vmem:[#allocation11_spill] sm:$0xff] %v14223_v29  ;;  %18466 = vst [vmem:[#allocation12_spill] sm:$0xff] %v14228_v30  ;;  %11836 = vmatprep.mubr.f32.mxu1 %v14404_v6  ;;  %11715 = vmatmul.mubr.f32.gmra.mxu0 %v14198_v24  ;;  %v10001_v3 = vld [vmem:[%s18372_s1 + $0x150] sm:$0xff]  ;;  %v14569_v43 = vld [vmem:[%s18373_s0 + $0x1a0] sm:$0xff] }
  0x30   :  { %18467 = vst [vmem:[#allocation13_spill] sm:$0xff] %v14233_v31  ;;  %170 = vst [vmem:[#allocation2 + $0x79] sm:$0xff] %v14223_v29  ;;  %v14432_v11 = vld [vmem:[#allocation2 + $0x20] sm:$0xff]  ;;  %11717 = vmatprep.mubr.f32.mxu0 %v14211_v27  ;;  %v10020_v51 = vld [vmem:[%s18372_s1 + $0x1e8] sm:$0xff]  ;;  %11938 = vmatpush3.msra.mxu0 %v10002_v54 }
  0x31   :  { %171 = vst [vmem:[#allocation2 + $0x81] sm:$0xff] %v14228_v30  ;;  %172 = vst [vmem:[#allocation2 + $0x91] sm:$0xff] %v14233_v31  ;;  %v14447_v14 = vld [vmem:[#allocation2 + $0x30] sm:$0xff]  ;;  %11837 = vmatmul.mubr.f32.gmra.mxu1 %v14432_v11  ;;  %v14469_v22 = vld [vmem:[#allocation2 + $0x38] sm:$0xff]  ;;  %11939 = vmatprep.subr.mxu0 %v10001_v3 }
  0x32   :  { %18468 = vst [vmem:[#allocation14_spill] sm:$0xff] %v14244_v33  ;;  %18469 = vst [vmem:[#allocation15_spill] sm:$0xff] %v14249_v34  ;;  %11839 = vmatprep.mubr.f32.mxu1 %v14447_v14  ;;  %v14580_v27 = vld [vmem:[%s18373_s0 + $0x1a8] sm:$0xff]  ;;  %12060 = vmatpush3.msra.mxu1 %v10021_v59  ;;  %v14597_v24 = vld [vmem:[%s18373_s0 + $0x1b8] sm:$0xff] }
  0x33   :  { %173 = vst [vmem:[#allocation2 + $0x99] sm:$0xff] %v14244_v33  ;;  %174 = vst [vmem:[#allocation2 + $0xa9] sm:$0xff] %v14249_v34  ;;  %v14482_v32 = vld [vmem:[#allocation2 + $0x48] sm:$0xff]  ;;  %v14510_v46 = vld [vmem:[#allocation2 + $0x50] sm:$0xff]  ;;  %11718 = vmatmul.mubr.f32.gmra.mxu0 %v14216_v28  ;;  %12061 = vmatprep.subr.mxu1 %v10020_v51 }
  0x34   :  { %18470 = vst [vmem:[#allocation16_spill] sm:$0xff] %v14256_v35  ;;  %18471 = vst [vmem:[#allocation17_spill] sm:$0xff] %v14261_v36  ;;  %11720 = vmatprep.mubr.f32.mxu0 %v14223_v29  ;;  %v14589_v29 = vld [vmem:[%s18373_s0 + $0x1b0] sm:$0xff]  ;;  %v10000_v54 = vld [vmem:[%s18372_s1 + $0x148] sm:$0xff]  ;;  %11940 = vmatpush3.msra.mxu0 %v10001_v3 }
  0x35   :  { %18472 = vst [vmem:[#allocation18_spill] sm:$0xff] %v14266_v37  ;;  %175 = vst [vmem:[#allocation2 + $0xb1] sm:$0xff] %v14256_v35  ;;  %11840 = vmatmul.mubr.f32.gmra.mxu1 %v14469_v22  ;;  %v14518_v49 = vld [vmem:[#allocation2 + $0x60] sm:$0xff]  ;;  %v14551_v1 = vld [vmem:[#allocation2 + $0x68] sm:$0xff]  ;;  %11941 = vmatprep.subr.mxu0 %v10000_v54 }
  0x36   :  { %176 = vst [vmem:[#allocation2 + $0xc1] sm:$0xff] %v14261_v36  ;;  %177 = vst [vmem:[#allocation2 + $0xc9] sm:$0xff] %v14266_v37  ;;  %11842 = vmatprep.mubr.f32.mxu1 %v14482_v32  ;;  %v10019_v59 = vld [vmem:[%s18372_s1 + $0x1e0] sm:$0xff]  ;;  %12062 = vmatpush3.msra.mxu1 %v10020_v51  ;;  %v14629_v17 = vld [vmem:[%s18373_s0 + $0x1d0] sm:$0xff] }
  0x37   :  { %18473 = vst [vmem:[#allocation19_spill] sm:$0xff] %v14277_v39  ;;  %18474 = vst [vmem:[#allocation20_spill] sm:$0xff] %v14282_v40  ;;  %v14559_v15 = vld [vmem:[#allocation2 + $0x78] sm:$0xff]  ;;  %11721 = vmatmul.mubr.f32.gmra.mxu0 %v14228_v30  ;;  %v14612_v20 = vld [vmem:[%s18373_s0 + $0x1c0] sm:$0xff]  ;;  %12063 = vmatprep.subr.mxu1 %v10019_v59 }
  0x38   :  { %178 = vst [vmem:[#allocation2 + $0xd9] sm:$0xff] %v14277_v39  ;;  %179 = vst [vmem:[#allocation2 + $0xe1] sm:$0xff] %v14282_v40  ;;  %v14583_v28 = vld [vmem:[#allocation2 + $0x80] sm:$0xff]  ;;  %v14591_v23 = vld [vmem:[#allocation2 + $0x90] sm:$0xff]  ;;  %11723 = vmatprep.mubr.f32.mxu0 %v14233_v31  ;;  %11942 = vmatpush3.msra.mxu0 %v10000_v54 }
  0x39   :  { %18475 = vst [vmem:[#allocation21_spill] sm:$0xff] %v14289_v41  ;;  %18476 = vst [vmem:[#allocation22_spill] sm:$0xff] %v14294_v42  ;;  %11843 = vmatmul.mubr.f32.gmra.mxu1 %v14510_v46  ;;  %v14617_v30 = vld [vmem:[%s18373_s0 + $0x1c8] sm:$0xff]  ;;  %v14634_v19 = vld [vmem:[%s18373_s0 + $0x1d8] sm:$0xff] }
  0x3a   :  { %180 = vst [vmem:[#allocation2 + $0xf1] sm:$0xff] %v14289_v41  ;;  %181 = vst [vmem:[#allocation2 + $0xf9] sm:$0xff] %v14294_v42  ;;  %11845 = vmatprep.mubr.f32.mxu1 %v14518_v49  ;;  %v14620_v21 = vld [vmem:[#allocation2 + $0x98] sm:$0xff]  ;;  %v14624_v31 = vld [vmem:[#allocation2 + $0xa8] sm:$0xff]  ;;  %12064 = vmatpush3.msra.mxu1 %v10019_v59 }
  0x3b   :  { %18477 = vst [vmem:[#allocation23_spill] sm:$0xff] %v14313_v47  ;;  %182 = vst [vmem:[#allocation2 + $0x109] sm:$0xff] %v14313_v47  ;;  %11724 = vmatmul.mubr.f32.gmra.mxu0 %v14244_v33  ;;  %v9999_v3 = vld [vmem:[%s18372_s1 + $0x140] sm:$0xff]  ;;  %v10018_v51 = vld [vmem:[%s18372_s1 + $0x1d8] sm:$0xff] }
  0x3c   :  { %18478 = vst [vmem:[#allocation24_spill] sm:$0xff] %v14325_v50  ;;  %183 = vst [vmem:[#allocation2 + $0x111] sm:$0xff] %v14325_v50  ;;  %11726 = vmatprep.mubr.f32.mxu0 %v14249_v34  ;;  %v14650_v33 = vld [vmem:[%s18373_s0 + $0x1e0] sm:$0xff]  ;;  %11943 = vmatprep.subr.mxu0 %v9999_v3  ;;  %v10017_v54 = vld [vmem:[%s18372_s1 + $0x1d0] sm:$0xff] }
  0x3d   :  { %18479 = vst [vmem:[#allocation25_spill] sm:$0xff] %v14337_v53  ;;  %184 = vst [vmem:[#allocation2 + $0x121] sm:$0xff] %v14337_v53  ;;  %11846 = vmatmul.mubr.f32.gmra.mxu1 %v14551_v1  ;;  %v14662_v34 = vld [vmem:[#allocation2 + $0xc0] sm:$0xff]  ;;  %12065 = vmatprep.subr.mxu1 %v10018_v51 }
  0x3e   :  { %18480 = vst [vmem:[#allocation26_spill] sm:$0xff] %v14346_v55  ;;  %185 = vst [vmem:[#allocation2 + $0x129] sm:$0xff] %v14346_v55  ;;  %11848 = vmatprep.mubr.f32.mxu1 %v14559_v15  ;;  %11944 = vmatpush3.msra.mxu0 %v9999_v3 }
  0x3f   :  { %18481 = vst [vmem:[#allocation27_spill] sm:$0xff] %v14355_v57  ;;  %18482 = vst [vmem:[#allocation28_spill] sm:$0xff] %v14360_v58  ;;  %11727 = vmatmul.mubr.f32.gmra.mxu0 %v14256_v35  ;;  %v14676_v59 = vld [vmem:[#allocation2 + $0xd8] sm:$0xff]  ;;  %12066 = vmatpush3.msra.mxu1 %v10018_v51  ;;  %v9997_v35 = vld [vmem:[%s18372_s1 + $0x130] sm:$0xff] }
  0x40   :  { %186 = vst [vmem:[#allocation2 + $0x139] sm:$0xff] %v14355_v57  ;;  %187 = vst [vmem:[#allocation2 + $0x141] sm:$0xff] %v14360_v58  ;;  %11729 = vmatprep.mubr.f32.mxu0 %v14261_v36  ;;  %12067 = vmatprep.subr.mxu1 %v10017_v54  ;;  %v10016_v36 = vld [vmem:[%s18372_s1 + $0x1c8] sm:$0xff]  ;;  %v14688_v3 = vld [vmem:[#allocation2 + $0xe0] sm:$0xff] }
  0x41   :  { %18483 = vst [vmem:[#allocation29_spill] sm:$0xff] %v14367_v60  ;;  %18484 = vst [vmem:[#allocation30_spill] sm:$0xff] %v14372_v61  ;;  %11849 = vmatmul.mubr.f32.gmra.mxu1 %v14583_v28  ;;  %v14690_v51 = vld [vmem:[#allocation2 + $0xf0] sm:$0xff] }
  0x42   :  { %188 = vst [vmem:[#allocation2 + $0x151] sm:$0xff] %v14367_v60  ;;  %189 = vst [vmem:[#allocation2 + $0x159] sm:$0xff] %v14372_v61  ;;  %11851 = vmatprep.mubr.f32.mxu1 %v14591_v23  ;;  %12068 = vmatpush3.msra.mxu1 %v10017_v54  ;;  %v14704_v54 = vld [vmem:[#allocation2 + $0x108] sm:$0xff] }
  0x43   :  { %18485 = vst [vmem:[#allocation31_spill] sm:$0xff] %v14379_v63  ;;  %18486 = vst [vmem:[#allocation32_spill] sm:$0xff] %v14384_v0  ;;  %11730 = vmatmul.mubr.f32.gmra.mxu0 %v14266_v37  ;;  %v9996_v37 = vld [vmem:[%s18372_s1 + $0x128] sm:$0xff]  ;;  %12069 = vmatprep.subr.mxu1 %v10016_v36 }
  0x44   :  { %190 = vst [vmem:[#allocation2 + $0x169] sm:$0xff] %v14379_v63  ;;  %191 = vst [vmem:[#allocation2 + $0x171] sm:$0xff] %v14384_v0  ;;  %11732 = vmatprep.mubr.f32.mxu0 %v14277_v39  ;;  %v10015_v39 = vld [vmem:[%s18372_s1 + $0x1c0] sm:$0xff]  ;;  %12070 = vmatpush3.msra.mxu1 %v10016_v36 }
  0x45   :  { %18487 = vst [vmem:[#allocation33_spill] sm:$0xff] %v14397_v4  ;;  %18488 = vst [vmem:[#allocation34_spill] sm:$0xff] %v14402_v5  ;;  %11852 = vmatmul.mubr.f32.gmra.mxu1 %v14620_v21  ;;  %12071 = vmatprep.subr.mxu1 %v10015_v39  ;;  %v14718_v36 = vld [vmem:[#allocation2 + $0x120] sm:$0xff] }
  0x46   :  { %194 = vst [vmem:[#allocation2 + $0x1c9] sm:$0xff] %v14397_v4  ;;  %195 = vst [vmem:[#allocation2 + $0x1d1] sm:$0xff] %v14402_v5  ;;  %11854 = vmatprep.mubr.f32.mxu1 %v14624_v31  ;;  %12072 = vmatpush3.msra.mxu1 %v10015_v39 }
  0x47   :  { %18489 = vst [vmem:[#allocation35_spill] sm:$0xff] %v14411_v7  ;;  %18490 = vst [vmem:[#allocation36_spill] sm:$0xff] %v14416_v8  ;;  %11733 = vmatmul.mubr.f32.gmra.mxu0 %v14282_v40  ;;  %v9995_v40 = vld [vmem:[%s18372_s1 + $0x120] sm:$0xff]  ;;  %v14732_v39 = vld [vmem:[#allocation2 + $0x138] sm:$0xff] }
  0x48   :  { %196 = vst [vmem:[#allocation2 + $0x1e1] sm:$0xff] %v14411_v7  ;;  %197 = vst [vmem:[#allocation2 + $0x1e9] sm:$0xff] %v14416_v8  ;;  %11735 = vmatprep.mubr.f32.mxu0 %v14289_v41  ;;  %v10014_v41 = vld [vmem:[%s18372_s1 + $0x1b8] sm:$0xff] }
  0x49   :  { %18491 = vst [vmem:[#allocation37_spill] sm:$0xff] %v14424_v9  ;;  %18492 = vst [vmem:[#allocation38_spill] sm:$0xff] %v14429_v10  ;;  %12073 = vmatprep.subr.mxu1 %v10014_v41 }
  0x4a   :  { %198 = vst [vmem:[#allocation2 + $0x1f9] sm:$0xff] %v14424_v9  ;;  %199 = vst [vmem:[#allocation2 + $0x201] sm:$0xff] %v14429_v10  ;;  %12074 = vmatpush3.msra.mxu1 %v10014_v41  ;;  %v14746_v41 = vld [vmem:[#allocation2 + $0x150] sm:$0xff] }
  0x4b   :  { %18493 = vst [vmem:[#allocation39_spill] sm:$0xff] %v14439_v12  ;;  %18494 = vst [vmem:[#allocation40_spill] sm:$0xff] %v14444_v13  ;;  %11736 = vmatmul.mubr.f32.gmra.mxu0 %v14294_v42  ;;  %v9994_v42 = vld [vmem:[%s18372_s1 + $0x118] sm:$0xff] }
  0x4c   :  { %200 = vst [vmem:[#allocation2 + $0x211] sm:$0xff] %v14439_v12  ;;  %201 = vst [vmem:[#allocation2 + $0x219] sm:$0xff] %v14444_v13  ;;  %11738 = vmatprep.mubr.f32.mxu0 %v14313_v47  ;;  %v10013_v47 = vld [vmem:[%s18372_s1 + $0x1b0] sm:$0xff] }
  0x4d   :  { %18495 = vst [vmem:[#allocation41_spill] sm:$0xff] %v14458_v16  ;;  %202 = vst [vmem:[#allocation2 + $0x229] sm:$0xff] %v14458_v16  ;;  %12075 = vmatprep.subr.mxu1 %v10013_v47 }
  0x4e   :  { %18496 = vst [vmem:[#allocation42_spill] sm:$0xff] %v14466_v18  ;;  %203 = vst [vmem:[#allocation2 + $0x231] sm:$0xff] %v14466_v18  ;;  %12076 = vmatpush3.msra.mxu1 %v10013_v47  ;;  %v14763_v47 = vld [vmem:[#allocation2 + $0x158] sm:$0xff] }
  0x4f   :  { %18497 = vst [vmem:[#allocation43_spill] sm:$0xff] %v14475_v25  ;;  %18498 = vst [vmem:[#allocation44_spill] sm:$0xff] %v14480_v26  ;;  %11739 = vmatmul.mubr.f32.gmra.mxu0 %v14325_v50  ;;  %v9993_v50 = vld [vmem:[%s18372_s1 + $0x110] sm:$0xff] }
  0x50   :  { %204 = vst [vmem:[#allocation2 + $0x241] sm:$0xff] %v14475_v25  ;;  %205 = vst [vmem:[#allocation2 + $0x249] sm:$0xff] %v14480_v26  ;;  %11741 = vmatprep.mubr.f32.mxu0 %v14337_v53  ;;  %v10012_v53 = vld [vmem:[%s18372_s1 + $0x1a8] sm:$0xff] }
  0x51   :  { %18499 = vst [vmem:[#allocation45_spill] sm:$0xff] %v14489_v38  ;;  %206 = vst [vmem:[#allocation2 + $0x259] sm:$0xff] %v14489_v38  ;;  %12077 = vmatprep.subr.mxu1 %v10012_v53 }
  0x52   :  { %18500 = vst [vmem:[#allocation46_spill] sm:$0xff] %v14499_v44  ;;  %207 = vst [vmem:[#allocation2 + $0x261] sm:$0xff] %v14499_v44  ;;  %12078 = vmatpush3.msra.mxu1 %v10012_v53  ;;  %v14784_v53 = vld [vmem:[#allocation2 + $0x170] sm:$0xff] }
  0x53   :  { %18501 = vst [vmem:[#allocation47_spill] sm:$0xff] %v14507_v45  ;;  %208 = vst [vmem:[#allocation2 + $0x271] sm:$0xff] %v14507_v45  ;;  %11742 = vmatmul.mubr.f32.gmra.mxu0 %v14346_v55  ;;  %v9992_v55 = vld [vmem:[%s18372_s1 + $0x108] sm:$0xff] }
  0x54   :  { %18502 = vst [vmem:[#allocation48_spill] sm:$0xff] %v14516_v48  ;;  %209 = vst [vmem:[#allocation2 + $0x279] sm:$0xff] %v14516_v48  ;;  %11744 = vmatprep.mubr.f32.mxu0 %v14355_v57  ;;  %v10011_v57 = vld [vmem:[%s18372_s1 + $0x1a0] sm:$0xff] }
  0x55   :  { %18503 = vst [vmem:[#allocation49_spill] sm:$0xff] %v14527_v52  ;;  %210 = vst [vmem:[#allocation2 + $0x289] sm:$0xff] %v14527_v52  ;;  %12079 = vmatprep.subr.mxu1 %v10011_v57 }
  0x56   :  { %18504 = vst [vmem:[#allocation50_spill] sm:$0xff] %v14537_v56  ;;  %211 = vst [vmem:[#allocation2 + $0x291] sm:$0xff] %v14537_v56  ;;  %12080 = vmatpush3.msra.mxu1 %v10011_v57  ;;  %v10008_v57 = vld [vmem:[%s18372_s1 + $0x188] sm:$0xff] }
  0x57   :  { %18505 = vst [vmem:[#allocation51_spill] sm:$0xff] %v14548_v62  ;;  %212 = vst [vmem:[#allocation2 + $0x2a1] sm:$0xff] %v14548_v62  ;;  %11745 = vmatmul.mubr.f32.gmra.mxu0 %v14360_v58  ;;  %v14771_v58 = vld [vmem:[#allocation2 + $0x168] sm:$0xff] }
  0x58   :  { %18506 = vst [vmem:[#allocation52_spill] sm:$0xff] %v14557_v2  ;;  %213 = vst [vmem:[#allocation2 + $0x2a9] sm:$0xff] %v14557_v2  ;;  %11747 = vmatprep.mubr.f32.mxu0 %v14367_v60  ;;  %v14769_v60 = vld [vmem:[%s18373_s0 + $0xf8] sm:$0xff] }
  0x59   :  { %18507 = vst [vmem:[#allocation53_spill] sm:$0xff] %v14569_v43  ;;  %214 = vst [vmem:[#allocation2 + $0x2b9] sm:$0xff] %v14569_v43 }
  0x5a   :  { %18508 = vst [vmem:[#allocation54_spill] sm:$0xff] %v14580_v27  ;;  %18509 = vst [vmem:[#allocation55_spill] sm:$0xff] %v14583_v28  ;;  %v14658_v28 = vld [vmem:[#allocation2 + $0xb0] sm:$0xff] }
  0x5b   :  { %215 = vst [vmem:[#allocation2 + $0x2c1] sm:$0xff] %v14580_v27  ;;  %18510 = vst [vmem:[#allocation56_spill] sm:$0xff] %v14589_v29  ;;  %11855 = vmatmul.mubr.f32.gmra.mxu1 %v14658_v28  ;;  %11748 = vmatmul.mubr.f32.gmra.mxu0 %v14372_v61  ;;  %v10009_v61 = vld [vmem:[%s18372_s1 + $0x190] sm:$0xff] }
  0x5c   :  { %18511 = vst [vmem:[#allocation57_spill] sm:$0xff] %v14591_v23  ;;  %216 = vst [vmem:[#allocation2 + $0x2d1] sm:$0xff] %v14589_v29  ;;  %v14655_v23 = vld [vmem:[%s18373_s0 + $0x1e8] sm:$0xff]  ;;  %11857 = vmatprep.mubr.f32.mxu1 %v14662_v34  ;;  %11750 = vmatprep.mubr.f32.mxu0 %v14379_v63  ;;  %v339_v63 = vld [vmem:[#allocation2 + $0x1b9] sm:$0xff] }
  0x5d   :  { %18512 = vst [vmem:[#allocation58_spill] sm:$0xff] %v14597_v24  ;;  %217 = vst [vmem:[#allocation2 + $0x2d9] sm:$0xff] %v14597_v24 }
  0x5e   :  { %18513 = vst [vmem:[#allocation59_spill] sm:$0xff] %v14612_v20  ;;  %18514 = vst [vmem:[#allocation60_spill] sm:$0xff] %v14617_v30 }
  0x5f   :  { %18515 = vst [vmem:[#allocation61_spill] sm:$0xff] %v14620_v21  ;;  %218 = vst [vmem:[#allocation2 + $0x2e9] sm:$0xff] %v14612_v20  ;;  %v9998_v21 = vld [vmem:[%s18372_s1 + $0x138] sm:$0xff]  ;;  %11751 = vmatmul.mubr.f32.gmra.mxu0 %v14384_v0 }
  0x60   :  { %219 = vst [vmem:[#allocation2 + $0x2f1] sm:$0xff] %v14617_v30  ;;  %18516 = vst [vmem:[#allocation62_spill] sm:$0xff] %v14624_v31  ;;  %v14674_v31 = vld [vmem:[#allocation2 + $0xc8] sm:$0xff]  ;;  %11945 = vmatprep.subr.mxu0 %v9998_v21  ;;  %v15019_v0 = vld [vmem:[#allocation2 + $0x9a] sm:$0xff] }
  0x61   :  { %18517 = vst [vmem:[#allocation63_spill] sm:$0xff] %v14629_v17  ;;  %18518 = vst [vmem:[#allocation64_spill] sm:$0xff] %v14634_v19  ;;  %11858 = vmatmul.mubr.f32.gmra.mxu1 %v14674_v31  ;;  %11946 = vmatpush3.msra.mxu0 %v9998_v21  ;;  %v14702_v21 = vld [vmem:[#allocation2 + $0xf8] sm:$0xff] }
  0x62   :  { %220 = vst [vmem:[#allocation2 + $0x301] sm:$0xff] %v14629_v17  ;;  %221 = vst [vmem:[#allocation2 + $0x309] sm:$0xff] %v14634_v19  ;;  %11860 = vmatprep.mubr.f32.mxu1 %v14676_v59  ;;  %11947 = vmatprep.subr.mxu0 %v9997_v35 }
  0x63   :  { %18519 = vst [vmem:[#allocation65_spill] sm:$0xff] %v14650_v33  ;;  %18520 = vst [vmem:[#allocation66_spill] sm:$0xff] %v14655_v23  ;;  %11948 = vmatpush3.msra.mxu0 %v9997_v35  ;;  %v14716_v35 = vld [vmem:[#allocation2 + $0x110] sm:$0xff] }
  0x64   :  { %222 = vst [vmem:[#allocation2 + $0x319] sm:$0xff] %v14650_v33  ;;  %223 = vst [vmem:[#allocation2 + $0x321] sm:$0xff] %v14655_v23  ;;  %11949 = vmatprep.subr.mxu0 %v9996_v37 }
  0x65   :  { %11861 = vmatmul.mubr.f32.gmra.mxu1 %v14688_v3  ;;  %11950 = vmatpush3.msra.mxu0 %v9996_v37  ;;  %v14730_v37 = vld [vmem:[#allocation2 + $0x128] sm:$0xff]  ;;  %18521 = vst [vmem:[#allocation67_spill] sm:$0xff] %v14746_v41  ;;  %18523 = vst [vmem:[#allocation69_spill] sm:$0xff] %v14769_v60 }
  0x66   :  { %11863 = vmatprep.mubr.f32.mxu1 %v14690_v51  ;;  %11951 = vmatprep.subr.mxu0 %v9995_v40  ;;  %18524 = vst [vmem:[#allocation70_spill] sm:$0xff] %v14771_v58  ;;  %193 = vst [vmem:[#allocation2 + $0x189] sm:$0xff] %v14769_v60  ;;  %v14790_v60 = vld [vmem:[%s18372_s1 + $0x278] sm:$0xff] }
  0x67   :  { %11952 = vmatpush3.msra.mxu0 %v9995_v40  ;;  %v14744_v40 = vld [vmem:[#allocation2 + $0x140] sm:$0xff] }
  0x68   :  { %11953 = vmatprep.subr.mxu0 %v9994_v42 }
  0x69   :  { %11864 = vmatmul.mubr.f32.gmra.mxu1 %v14702_v21  ;;  %11954 = vmatpush3.msra.mxu0 %v9994_v42  ;;  %v14760_v42 = vld [vmem:[%s18373_s0 + $0xf0] sm:$0xff] }
  0x6a   :  { %11866 = vmatprep.mubr.f32.mxu1 %v14704_v54  ;;  %11955 = vmatprep.subr.mxu0 %v9993_v50  ;;  %18522 = vst [vmem:[#allocation68_spill] sm:$0xff] %v14760_v42  ;;  %192 = vst [vmem:[#allocation2 + $0x181] sm:$0xff] %v14760_v42  ;;  %v338_v42 = vld [vmem:[#allocation2 + $0x1b1] sm:$0xff] }
  0x6b   :  { %11956 = vmatpush3.msra.mxu0 %v9993_v50  ;;  %v10010_v50 = vld [vmem:[%s18372_s1 + $0x198] sm:$0xff]  ;;  %11753 = vmatprep.mubr.f32.mxu0 %v338_v42  ;;  %v14806_v42 = vld [vmem:[#allocation2 + $0x1d0] sm:$0xff] }
  0x6c   :  { %11957 = vmatprep.subr.mxu0 %v9992_v55  ;;  %12081 = vmatprep.subr.mxu1 %v10010_v50 }
  0x6d   :  { %11867 = vmatmul.mubr.f32.gmra.mxu1 %v14716_v35  ;;  %11958 = vmatpush3.msra.mxu0 %v9992_v55  ;;  %v14797_v55 = vld [vmem:[#allocation2 + $0x1c8] sm:$0xff] }
  0x6e   :  { %11869 = vmatprep.mubr.f32.mxu1 %v14718_v36  ;;  %12082 = vmatpush3.msra.mxu1 %v10010_v50  ;;  %v14825_v50 = vld [vmem:[#allocation2 + $0x200] sm:$0xff] }
  0x6f   :  { %11754 = vmatmul.mubr.f32.gmra.mxu0 %v339_v63  ;;  %12083 = vmatprep.subr.mxu1 %v10009_v61  ;;  %v10007_v63 = vld [vmem:[%s18372_s1 + $0x180] sm:$0xff] }
  0x70   :  { %11756 = vmatprep.mubr.f32.mxu0 %v14397_v4  ;;  %12084 = vmatpush3.msra.mxu1 %v10009_v61  ;;  %v14819_v61 = vld [vmem:[#allocation2 + $0x1f8] sm:$0xff]  ;;  %v1158_v4 = vld [vmem:[#allocation2 + $0xa] sm:$0xff] }
  0x71   :  { %11870 = vmatmul.mubr.f32.gmra.mxu1 %v14730_v37  ;;  %12085 = vmatprep.subr.mxu1 %v10008_v57 }
  0x72   :  { %11872 = vmatprep.mubr.f32.mxu1 %v14732_v39  ;;  %12086 = vmatpush3.msra.mxu1 %v10008_v57  ;;  %v14827_v57 = vld [vmem:[#allocation2 + $0x210] sm:$0xff] }
  0x73   :  { %11757 = vmatmul.mubr.f32.gmra.mxu0 %v14402_v5  ;;  %12087 = vmatprep.subr.mxu1 %v10007_v63  ;;  %v18531_v5 = vld [vmem:[#allocation61_spill] sm:$0xff] }
  0x74   :  { %11759 = vmatprep.mubr.f32.mxu0 %v14411_v7  ;;  %12088 = vmatpush3.msra.mxu1 %v10007_v63  ;;  %v14833_v63 = vld [vmem:[#allocation2 + $0x218] sm:$0xff]  ;;  %v14835_v7 = vld [vmem:[#allocation2 + $0x228] sm:$0xff] }
  0x75   :  { %11873 = vmatmul.mubr.f32.gmra.mxu1 %v14744_v40 }
  0x76   :  { %11875 = vmatprep.mubr.f32.mxu1 %v14746_v41  ;;  %v9991_v41 = vld [vmem:[%s18372_s1 + $0x100] sm:$0xff] }
  0x77   :  { %11959 = vmatprep.subr.mxu0 %v9991_v41  ;;  %11760 = vmatmul.mubr.f32.gmra.mxu0 %v14416_v8  ;;  %v14892_v8 = vld [vmem:[#allocation2 + $0x2c0] sm:$0xff] }
  0x78   :  { %11960 = vmatpush3.msra.mxu0 %v9991_v41  ;;  %v14808_v41 = vld [vmem:[#allocation2 + $0x1e0] sm:$0xff]  ;;  %11762 = vmatprep.mubr.f32.mxu0 %v14424_v9  ;;  %v14841_v9 = vld [vmem:[#allocation2 + $0x230] sm:$0xff] }
  0x79   :  { %11876 = vmatmul.mubr.f32.gmra.mxu1 %v14763_v47  ;;  %12185 = vmatprep.subr.mxu0 %v14790_v60 }
  0x7a   :  { %11878 = vmatprep.mubr.f32.mxu1 %v14771_v58  ;;  %v18525_v58 = vmov 0.0  }
  0x7b   :  { %11763 = vmatmul.mubr.f32.gmra.mxu0 %v14429_v10  ;;  %v14843_v10 = vld [vmem:[#allocation2 + $0x240] sm:$0xff] }
  0x7c   :  { %11765 = vmatprep.mubr.f32.mxu0 %v14439_v12  ;;  %v14849_v12 = vld [vmem:[#allocation2 + $0x248] sm:$0xff] }
  0x7d   :  { %11879 = vmatmul.mubr.f32.gmra.mxu1 %v14784_v53 }
  0x7e   :  { %11881 = vmatprep.mubr.f32.mxu1 %v18525_v58 }
  0x7f   :  { %11766 = vmatmul.mubr.f32.gmra.mxu0 %v14444_v13  ;;  %v14851_v13 = vld [vmem:[#allocation2 + $0x258] sm:$0xff] }
  0x80   :  { %11768 = vmatprep.mubr.f32.mxu0 %v14458_v16  ;;  %v14857_v16 = vld [vmem:[#allocation2 + $0x260] sm:$0xff] }
  0x81   :  { %11882 = vmatmul.mubr.f32.gmra.mxu1 %v18525_v58  ;;  %v14817_v58 = vld [vmem:[#allocation2 + $0x1e8] sm:$0xff] }
  0x82   :  { %11884 = vmatprep.mubr.f32.mxu1 %v14797_v55 }
  0x83   :  { %11769 = vmatmul.mubr.f32.gmra.mxu0 %v14466_v18  ;;  %v14859_v18 = vld [vmem:[#allocation2 + $0x270] sm:$0xff] }
  0x84   :  { %11771 = vmatprep.mubr.f32.mxu0 %v14475_v25  ;;  %v14865_v25 = vld [vmem:[#allocation2 + $0x278] sm:$0xff] }
  0x85   :  { %11885 = vmatmul.mubr.f32.gmra.mxu1 %v14806_v42 }
  0x86   :  { %11887 = vmatprep.mubr.f32.mxu1 %v14808_v41 }
  0x87   :  { %11772 = vmatmul.mubr.f32.gmra.mxu0 %v14480_v26  ;;  %v14867_v26 = vld [vmem:[#allocation2 + $0x288] sm:$0xff] }
  0x88   :  { %11774 = vmatprep.mubr.f32.mxu0 %v14489_v38  ;;  %v14873_v38 = vld [vmem:[#allocation2 + $0x290] sm:$0xff] }
  0x89   :  { %11888 = vmatmul.mubr.f32.gmra.mxu1 %v14817_v58 }
  0x8a   :  { %11890 = vmatprep.mubr.f32.mxu1 %v14819_v61 }
  0x8b   :  { %11775 = vmatmul.mubr.f32.gmra.mxu0 %v14499_v44  ;;  %v14878_v44 = vld [vmem:[#allocation2 + $0x2a0] sm:$0xff] }
  0x8c   :  { %11777 = vmatprep.mubr.f32.mxu0 %v14507_v45  ;;  %v10054_v45 = vld [vmem:[%s18372_s1 + $0x2f8] sm:$0xff] }
  0x8d   :  { %11891 = vmatmul.mubr.f32.gmra.mxu1 %v14825_v50  ;;  %12313 = vmatprep.subr.mxu1 %v10054_v45 }
  0x8e   :  { %11893 = vmatprep.mubr.f32.mxu1 %v14827_v57 }
  0x8f   :  { %11778 = vmatmul.mubr.f32.gmra.mxu0 %v14516_v48  ;;  %v14886_v48 = vld [vmem:[#allocation2 + $0x2b8] sm:$0xff] }
  0x90   :  { %11780 = vmatprep.mubr.f32.mxu0 %v14527_v52  ;;  %v14884_v52 = vld [vmem:[#allocation2 + $0x2a8] sm:$0xff] }
  0x91   :  { %11894 = vmatmul.mubr.f32.gmra.mxu1 %v14833_v63 }
  0x92   :  { %11896 = vmatprep.mubr.f32.mxu1 %v14835_v7 }
  0x93   :  { %11781 = vmatmul.mubr.f32.gmra.mxu0 %v14537_v56  ;;  %v14894_v56 = vld [vmem:[#allocation2 + $0x2d0] sm:$0xff] }
  0x94   :  { %11783 = vmatprep.mubr.f32.mxu0 %v14548_v62  ;;  %v14900_v62 = vld [vmem:[#allocation2 + $0x2d8] sm:$0xff] }
  0x95   :  { %11897 = vmatmul.mubr.f32.gmra.mxu1 %v14841_v9 }
  0x96   :  { %11899 = vmatprep.mubr.f32.mxu1 %v14843_v10 }
  0x97   :  { %11784 = vmatmul.mubr.f32.gmra.mxu0 %v14557_v2  ;;  %v14902_v2 = vld [vmem:[#allocation2 + $0x2e8] sm:$0xff] }
  0x98   :  { %11786 = vmatprep.mubr.f32.mxu0 %v14569_v43  ;;  %v14908_v43 = vld [vmem:[#allocation2 + $0x2f0] sm:$0xff] }
  0x99   :  { %11900 = vmatmul.mubr.f32.gmra.mxu1 %v14849_v12 }
  0x9a   :  { %11902 = vmatprep.mubr.f32.mxu1 %v14851_v13 }
  0x9b   :  { %11787 = vmatmul.mubr.f32.gmra.mxu0 %v14580_v27  ;;  %v14910_v27 = vld [vmem:[#allocation2 + $0x300] sm:$0xff] }
  0x9c   :  { %11789 = vmatprep.mubr.f32.mxu0 %v14589_v29  ;;  %v14918_v29 = vld [vmem:[%s18373_s0 + $0x1f0] sm:$0xff] }
  0x9d   :  { %11903 = vmatmul.mubr.f32.gmra.mxu1 %v14857_v16  ;;  %18526 = vst [vmem:[#allocation71_spill] sm:$0xff] %v14918_v29  ;;  %224 = vst [vmem:[#allocation2 + $0x331] sm:$0xff] %v14918_v29  ;;  %v1157_v29 = vld [vmem:[#allocation2 + $0x2] sm:$0xff] }
  0x9e   :  { %11905 = vmatprep.mubr.f32.mxu1 %v14859_v18 }
  0x9f   :  { %11790 = vmatmul.mubr.f32.gmra.mxu0 %v14597_v24  ;;  %v14927_v24 = vld [vmem:[%s18373_s0 + $0x1f8] sm:$0xff] }
  0xa0   :  { %11792 = vmatprep.mubr.f32.mxu0 %v14612_v20  ;;  %v14921_v20 = vld [vmem:[#allocation2 + $0x308] sm:$0xff]  ;;  %18527 = vst [vmem:[#allocation72_spill] sm:$0xff] %v14927_v24  ;;  %225 = vst [vmem:[#allocation2 + $0x339] sm:$0xff] %v14927_v24  ;;  %v14941_v24 = vld [vmem:[#allocation2 + $0x1a] sm:$0xff] }
  0xa1   :  { %11906 = vmatmul.mubr.f32.gmra.mxu1 %v14865_v25 }
  0xa2   :  { %11908 = vmatprep.mubr.f32.mxu1 %v14867_v26 }
  0xa3   :  { %11793 = vmatmul.mubr.f32.gmra.mxu0 %v14617_v30  ;;  %v14929_v30 = vld [vmem:[#allocation2 + $0x318] sm:$0xff] }
  0xa4   :  { %11795 = vmatprep.mubr.f32.mxu0 %v14629_v17  ;;  %v14936_v17 = vld [vmem:[#allocation2 + $0x320] sm:$0xff] }
  0xa5   :  { %11909 = vmatmul.mubr.f32.gmra.mxu1 %v14873_v38 }
  0xa6   :  { %11911 = vmatprep.mubr.f32.mxu1 %v14878_v44 }
  0xa7   :  { %11796 = vmatmul.mubr.f32.gmra.mxu0 %v14634_v19  ;;  %v14948_v19 = vld [vmem:[#allocation2 + $0x22] sm:$0xff] }
  0xa8   :  { %11798 = vmatprep.mubr.f32.mxu0 %v14650_v33  ;;  %v10037_v33 = vld [vmem:[%s18372_s1 + $0x270] sm:$0xff] }
  0xa9   :  { %11912 = vmatmul.mubr.f32.gmra.mxu1 %v14884_v52 }
  0xaa   :  { %11914 = vmatprep.mubr.f32.mxu1 %v14886_v48 }
  0xab   :  { %11799 = vmatmul.mubr.f32.gmra.mxu0 %v14655_v23  ;;  %v15005_v23 = vld [vmem:[#allocation2 + $0x82] sm:$0xff] }
  0xac   :  { %11961 = vmatprep.mubr.f32.mxu0 %v1157_v29  ;;  %v10053_v29 = vld [vmem:[%s18372_s1 + $0x2f0] sm:$0xff] }
  0xad   :  { %11915 = vmatmul.mubr.f32.gmra.mxu1 %v14892_v8 }
  0xae   :  { %11917 = vmatprep.mubr.f32.mxu1 %v14894_v56 }
  0xaf   :  { %11962 = vmatmul.mubr.f32.vlgmr.msra.gmra.mxu0 %v1158_v4  ;;  %v14963_v4 = vld [vmem:[#allocation2 + $0x3a] sm:$0xff] }
  0xb0   :  { %12186 = vmatpush3.msra.mxu0 %v14790_v60  ;;  %11964 = vmatprep.mubr.f32.mxu0 %v14941_v24  ;;  %v10036_v60 = vld [vmem:[%s18372_s1 + $0x268] sm:$0xff] }
  0xb1   :  { %11918 = vmatmul.mubr.f32.gmra.mxu1 %v14900_v62  ;;  %12187 = vmatprep.subr.mxu0 %v10037_v33 }
  0xb2   :  { %11920 = vmatprep.mubr.f32.mxu1 %v14902_v2  ;;  %12188 = vmatpush3.msra.mxu0 %v10037_v33  ;;  %v10051_v33 = vld [vmem:[%s18372_s1 + $0x2e0] sm:$0xff] }
  0xb3   :  { %11965 = vmatmul.mubr.f32.gmra.mxu0 %v14948_v19  ;;  %12189 = vmatprep.subr.mxu0 %v10036_v60 }
  0xb4   :  { %12190 = vmatpush3.msra.mxu0 %v10036_v60  ;;  %v14997_v60 = vld [vmem:[#allocation2 + $0x7a] sm:$0xff] }
  0xb5   :  { %11921 = vmatmul.mubr.f32.gmra.mxu1 %v14908_v43 }
  0xb6   :  { %11923 = vmatprep.mubr.f32.mxu1 %v14910_v27 }
  0xb9   :  { %11924 = vmatmul.mubr.f32.gmra.mxu1 %v14921_v20 }
  0xba   :  { %11926 = vmatprep.mubr.f32.mxu1 %v14929_v30 }
  0xbd   :  { %11927 = vmatmul.mubr.f32.gmra.mxu1 %v14936_v17 }
  0xbe   :  { %12089 = vmatprep.mubr.f32.mxu1 %v14404_v6  ;;  %v14955_v6 = vld [vmem:[#allocation2 + $0x32] sm:$0xff] }
  0xbf   :  { %11967 = vmatprep.mubr.f32.mxu0 %v14955_v6 }
  0xc0   :  { %11968 = vmatmul.mubr.f32.gmra.mxu0 %v14963_v4 }
  0xc1   :  { %12090 = vmatmul.mubr.f32.vlgmr.msra.gmra.mxu1 %v14432_v11  ;;  %v10052_v11 = vld [vmem:[%s18372_s1 + $0x2e8] sm:$0xff] }
  0xc2   :  { %12092 = vmatprep.mubr.f32.mxu1 %v14447_v14  ;;  %12314 = vmatpush3.msra.mxu1 %v10054_v45  ;;  %v14969_v14 = vld [vmem:[#allocation2 + $0x4a] sm:$0xff]  ;;  %v14977_v45 = vld [vmem:[#allocation2 + $0x52] sm:$0xff] }
  0xc3   :  { %12315 = vmatprep.subr.mxu1 %v10053_v29  ;;  %11970 = vmatprep.mubr.f32.mxu0 %v14969_v14 }
  0xc4   :  { %12316 = vmatpush3.msra.mxu1 %v10053_v29  ;;  %11971 = vmatmul.mubr.f32.gmra.mxu0 %v14977_v45  ;;  %v14991_v29 = vld [vmem:[#allocation2 + $0x6a] sm:$0xff] }
  0xc5   :  { %12093 = vmatmul.mubr.f32.gmra.mxu1 %v14469_v22  ;;  %v10035_v22 = vld [vmem:[%s18372_s1 + $0x260] sm:$0xff]  ;;  %12317 = vmatprep.subr.mxu1 %v10052_v11 }
  0xc6   :  { %12095 = vmatprep.mubr.f32.mxu1 %v14482_v32  ;;  %v14983_v32 = vld [vmem:[#allocation2 + $0x62] sm:$0xff]  ;;  %12191 = vmatprep.subr.mxu0 %v10035_v22 }
  0xc7   :  { %12318 = vmatpush3.msra.mxu1 %v10052_v11  ;;  %11973 = vmatprep.mubr.f32.mxu0 %v14983_v32  ;;  %v18528_v11 = vld [vmem:[#allocation55_spill] sm:$0xff] }
  0xc8   :  { %12319 = vmatprep.subr.mxu1 %v10051_v33  ;;  %12192 = vmatpush3.msra.mxu0 %v10035_v22  ;;  %v18529_v22 = vld [vmem:[#allocation57_spill] sm:$0xff] }
  0xc9   :  { %12096 = vmatmul.mubr.f32.gmra.mxu1 %v14510_v46  ;;  %v10034_v46 = vld [vmem:[%s18372_s1 + $0x258] sm:$0xff]  ;;  %11974 = vmatmul.mubr.f32.gmra.mxu0 %v14991_v29 }
  0xca   :  { %12098 = vmatprep.mubr.f32.mxu1 %v14518_v49  ;;  %v10050_v49 = vld [vmem:[%s18372_s1 + $0x2d8] sm:$0xff]  ;;  %12193 = vmatprep.subr.mxu0 %v10034_v46 }
  0xcb   :  { %12320 = vmatpush3.msra.mxu1 %v10051_v33  ;;  %11976 = vmatprep.mubr.f32.mxu0 %v14997_v60  ;;  %v15011_v33 = vld [vmem:[#allocation2 + $0x92] sm:$0xff] }
  0xcc   :  { %12321 = vmatprep.subr.mxu1 %v10050_v49  ;;  %18530 = vst [vmem:[#allocation55_spill] sm:$0xff] %v15011_v33  ;;  %12194 = vmatpush3.msra.mxu0 %v10034_v46  ;;  %v18532_v46 = vld [vmem:[#allocation62_spill] sm:$0xff] }
  0xcd   :  { %12099 = vmatmul.mubr.f32.gmra.mxu1 %v14551_v1  ;;  %v10033_v1 = vld [vmem:[%s18372_s1 + $0x250] sm:$0xff]  ;;  %11977 = vmatmul.mubr.f32.gmra.mxu0 %v15005_v23 }
  0xce   :  { %12101 = vmatprep.mubr.f32.mxu1 %v14559_v15  ;;  %v10049_v15 = vld [vmem:[%s18372_s1 + $0x2d0] sm:$0xff]  ;;  %12195 = vmatprep.subr.mxu0 %v10033_v1 }
  0xcf   :  { %12322 = vmatpush3.msra.mxu1 %v10050_v49  ;;  %11979 = vmatprep.mubr.f32.mxu0 %v15011_v33  ;;  %v15025_v49 = vld [vmem:[#allocation2 + $0xaa] sm:$0xff]  ;;  %v15033_v33 = vld [vmem:[#allocation2 + $0xb2] sm:$0xff] }
  0xd0   :  { %12323 = vmatprep.subr.mxu1 %v10049_v15  ;;  %12196 = vmatpush3.msra.mxu0 %v10033_v1  ;;  %v15039_v1 = vld [vmem:[#allocation2 + $0xc2] sm:$0xff] }
  0xd1   :  { %12102 = vmatmul.mubr.f32.gmra.mxu1 %v18528_v11  ;;  %v10032_v11 = vld [vmem:[%s18372_s1 + $0x248] sm:$0xff]  ;;  %11980 = vmatmul.mubr.f32.gmra.mxu0 %v15019_v0 }
  0xd2   :  { %12104 = vmatprep.mubr.f32.mxu1 %v18529_v22  ;;  %v10048_v22 = vld [vmem:[%s18372_s1 + $0x2c8] sm:$0xff]  ;;  %12197 = vmatprep.subr.mxu0 %v10032_v11 }
  0xd3   :  { %12324 = vmatpush3.msra.mxu1 %v10049_v15  ;;  %11982 = vmatprep.mubr.f32.mxu0 %v15025_v49  ;;  %v15047_v15 = vld [vmem:[#allocation2 + $0xca] sm:$0xff] }
  0xd4   :  { %12325 = vmatprep.subr.mxu1 %v10048_v22  ;;  %12198 = vmatpush3.msra.mxu0 %v10032_v11  ;;  %v15053_v11 = vld [vmem:[#allocation2 + $0xda] sm:$0xff] }
  0xd5   :  { %12105 = vmatmul.mubr.f32.gmra.mxu1 %v18531_v5  ;;  %v10031_v5 = vld [vmem:[%s18372_s1 + $0x240] sm:$0xff]  ;;  %11983 = vmatmul.mubr.f32.gmra.mxu0 %v15033_v33 }
  0xd6   :  { %12107 = vmatprep.mubr.f32.mxu1 %v18532_v46  ;;  %v10047_v46 = vld [vmem:[%s18372_s1 + $0x2c0] sm:$0xff]  ;;  %12199 = vmatprep.subr.mxu0 %v10031_v5 }
  0xd7   :  { %12326 = vmatpush3.msra.mxu1 %v10048_v22  ;;  %11985 = vmatprep.mubr.f32.mxu0 %v15039_v1  ;;  %v15061_v22 = vld [vmem:[#allocation2 + $0xe2] sm:$0xff] }
  0xd8   :  { %12327 = vmatprep.subr.mxu1 %v10047_v46  ;;  %12200 = vmatpush3.msra.mxu0 %v10031_v5  ;;  %v15067_v5 = vld [vmem:[#allocation2 + $0xf2] sm:$0xff] }
  0xd9   :  { %12108 = vmatmul.mubr.f32.gmra.mxu1 %v14658_v28  ;;  %v10030_v28 = vld [vmem:[%s18372_s1 + $0x238] sm:$0xff]  ;;  %11986 = vmatmul.mubr.f32.gmra.mxu0 %v15047_v15  ;;  %18533 = vst [vmem:[#allocation57_spill] sm:$0xff] %v15067_v5 }
  0xda   :  { %12110 = vmatprep.mubr.f32.mxu1 %v14662_v34  ;;  %v10046_v34 = vld [vmem:[%s18372_s1 + $0x2b8] sm:$0xff]  ;;  %12201 = vmatprep.subr.mxu0 %v10030_v28 }
  0xdb   :  { %12328 = vmatpush3.msra.mxu1 %v10047_v46  ;;  %11988 = vmatprep.mubr.f32.mxu0 %v15053_v11  ;;  %v15075_v46 = vld [vmem:[#allocation2 + $0xfa] sm:$0xff] }
  0xdc   :  { %12329 = vmatprep.subr.mxu1 %v10046_v34  ;;  %12202 = vmatpush3.msra.mxu0 %v10030_v28  ;;  %v1179_v28 = vld [vmem:[#allocation2 + $0x10a] sm:$0xff] }
  0xdd   :  { %12111 = vmatmul.mubr.f32.gmra.mxu1 %v14674_v31  ;;  %v10029_v31 = vld [vmem:[%s18372_s1 + $0x230] sm:$0xff]  ;;  %11989 = vmatmul.mubr.f32.gmra.mxu0 %v15061_v22 }
  0xde   :  { %12113 = vmatprep.mubr.f32.mxu1 %v14676_v59  ;;  %v10045_v59 = vld [vmem:[%s18372_s1 + $0x2b0] sm:$0xff]  ;;  %12203 = vmatprep.subr.mxu0 %v10029_v31 }
  0xdf   :  { %12330 = vmatpush3.msra.mxu1 %v10046_v34  ;;  %11991 = vmatprep.mubr.f32.mxu0 %v15067_v5  ;;  %v1180_v34 = vld [vmem:[#allocation2 + $0x112] sm:$0xff]  ;;  %v10043_v5 = vld [vmem:[%s18372_s1 + $0x2a0] sm:$0xff] }
  0xe0   :  { %12331 = vmatprep.subr.mxu1 %v10045_v59  ;;  %12204 = vmatpush3.msra.mxu0 %v10029_v31  ;;  %v10026_v31 = vld [vmem:[%s18372_s1 + $0x218] sm:$0xff] }
  0xe1   :  { %12114 = vmatmul.mubr.f32.gmra.mxu1 %v14688_v3  ;;  %v10028_v3 = vld [vmem:[%s18372_s1 + $0x228] sm:$0xff]  ;;  %11992 = vmatmul.mubr.f32.gmra.mxu0 %v15075_v46 }
  0xe2   :  { %12116 = vmatprep.mubr.f32.mxu1 %v14690_v51  ;;  %v10044_v51 = vld [vmem:[%s18372_s1 + $0x2a8] sm:$0xff]  ;;  %12205 = vmatprep.subr.mxu0 %v10028_v3 }
  0xe3   :  { %12332 = vmatpush3.msra.mxu1 %v10045_v59  ;;  %11994 = vmatprep.mubr.f32.mxu0 %v1179_v28  ;;  %v10042_v59 = vld [vmem:[%s18372_s1 + $0x298] sm:$0xff]  ;;  %v18534_v28 = vld [vmem:[#allocation67_spill] sm:$0xff] }
  0xe4   :  { %12333 = vmatprep.subr.mxu1 %v10044_v51  ;;  %12206 = vmatpush3.msra.mxu0 %v10028_v3  ;;  %v10025_v3 = vld [vmem:[%s18372_s1 + $0x210] sm:$0xff] }
  0xe5   :  { %12117 = vmatmul.mubr.f32.gmra.mxu1 %v14702_v21  ;;  %v10027_v21 = vld [vmem:[%s18372_s1 + $0x220] sm:$0xff]  ;;  %11995 = vmatmul.mubr.f32.gmra.mxu0 %v1180_v34  ;;  %v18535_v34 = vld [vmem:[#allocation70_spill] sm:$0xff] }
  0xe6   :  { %12119 = vmatprep.mubr.f32.mxu1 %v14704_v54  ;;  %v1181_v54 = vld [vmem:[#allocation2 + $0x122] sm:$0xff]  ;;  %12207 = vmatprep.subr.mxu0 %v10027_v21 }
  0xe7   :  { %12334 = vmatpush3.msra.mxu1 %v10044_v51  ;;  %11997 = vmatprep.mubr.f32.mxu0 %v1181_v54  ;;  %v10041_v51 = vld [vmem:[%s18372_s1 + $0x290] sm:$0xff] }
  0xe8   :  { %12335 = vmatprep.subr.mxu1 %v10043_v5  ;;  %12208 = vmatpush3.msra.mxu0 %v10027_v21  ;;  %v10040_v21 = vld [vmem:[%s18372_s1 + $0x288] sm:$0xff] }
  0xe9   :  { %12120 = vmatmul.mubr.f32.gmra.mxu1 %v14716_v35  ;;  %v1182_v35 = vld [vmem:[#allocation2 + $0x12a] sm:$0xff]  ;;  %12209 = vmatprep.subr.mxu0 %v10026_v31 }
  0xea   :  { %12122 = vmatprep.mubr.f32.mxu1 %v14718_v36  ;;  %v1183_v36 = vld [vmem:[#allocation2 + $0x13a] sm:$0xff]  ;;  %12336 = vmatpush3.msra.mxu1 %v10043_v5  ;;  %v10024_v5 = vld [vmem:[%s18372_s1 + $0x208] sm:$0xff] }
  0xeb   :  { %11998 = vmatmul.mubr.f32.gmra.mxu0 %v1182_v35  ;;  %12337 = vmatprep.subr.mxu1 %v10042_v59  ;;  %v1187_v54 = vld [vmem:[#allocation2 + $0x16a] sm:$0xff]  ;;  %v10023_v35 = vld [vmem:[%s18372_s1 + $0x200] sm:$0xff] }
  0xec   :  { %12000 = vmatprep.mubr.f32.mxu0 %v1183_v36  ;;  %12210 = vmatpush3.msra.mxu0 %v10026_v31  ;;  %v1717_v31 = vld [vmem:[#allocation2 + $0x180] sm:$0xff]  ;;  %v1718_v36 = vld [vmem:[#allocation2 + $0x188] sm:$0xff] }
  0xed   :  { %12123 = vmatmul.mubr.f32.gmra.mxu1 %v14730_v37  ;;  %v1184_v37 = vld [vmem:[#allocation2 + $0x142] sm:$0xff]  ;;  %12211 = vmatprep.subr.mxu0 %v10025_v3 }
  0xee   :  { %12125 = vmatprep.mubr.f32.mxu1 %v14732_v39  ;;  %v1185_v39 = vld [vmem:[#allocation2 + $0x152] sm:$0xff]  ;;  %12338 = vmatpush3.msra.mxu1 %v10042_v59  ;;  %v10039_v59 = vld [vmem:[%s18372_s1 + $0x280] sm:$0xff] }
  0xef   :  { %12001 = vmatmul.mubr.f32.gmra.mxu0 %v1184_v37  ;;  %12339 = vmatprep.subr.mxu1 %v10041_v51  ;;  %v15124_v37 = vld [vmem:[%s18372_s1 + $0x378] sm:$0xff] }
  0xf0   :  { %12003 = vmatprep.mubr.f32.mxu0 %v1185_v39  ;;  %12212 = vmatpush3.msra.mxu0 %v10025_v3  ;;  %v1189_v3 = vld [vmem:[#allocation2 + $0x1b2] sm:$0xff]  ;;  %v11835_v39 = vpop.f32.mrf.mxu1 }
  0xf1   :  { %12126 = vmatmul.mubr.f32.gmra.mxu1 %v14744_v40  ;;  %v1186_v40 = vld [vmem:[#allocation2 + $0x15a] sm:$0xff]  ;;  %12213 = vmatprep.subr.mxu0 %v10024_v5 }
  0xf2   :  { %12128 = vmatprep.mubr.f32.mxu1 %v18534_v28  ;;  %12340 = vmatpush3.msra.mxu1 %v10041_v51  ;;  %v1191_v51 = vld [vmem:[#allocation2 + $0x1ca] sm:$0xff]  ;;  %v11707_v28 = vpop.f32.mrf.mxu0 }
  0xf3   :  { %12004 = vmatmul.mubr.f32.gmra.mxu0 %v1186_v40  ;;  %12341 = vmatprep.subr.mxu1 %v10040_v21  ;;  %v15129_v40 = vadd.f32 %v11835_v39, %v11707_v28  ;;  %v1196_v28 = vld [vmem:[#allocation2 + $0x202] sm:$0xff] }
  0xf4   :  { %12006 = vmatprep.mubr.f32.mxu0 %v1187_v54  ;;  %12214 = vmatpush3.msra.mxu0 %v10024_v5  ;;  %v1192_v5 = vld [vmem:[#allocation2 + $0x1d2] sm:$0xff]  ;;  %v838_v54 = vpop.f32.mrf.mxu1 }
  0xf5   :  { %12129 = vmatmul.mubr.f32.gmra.mxu1 %v14763_v47  ;;  %v1188_v47 = vld [vmem:[#allocation2 + $0x172] sm:$0xff]  ;;  %12215 = vmatprep.subr.mxu0 %v10023_v35 }
  0xf6   :  { %12131 = vmatprep.mubr.f32.mxu1 %v18535_v34  ;;  %12342 = vmatpush3.msra.mxu1 %v10040_v21  ;;  %v453_v21 = vpop.f32.mrf.mxu0  ;;  %v1193_v34 = vld [vmem:[#allocation2 + $0x1e2] sm:$0xff] }
  0xf7   :  { %12007 = vmatmul.mubr.f32.gmra.mxu0 %v1188_v47  ;;  %12343 = vmatprep.subr.mxu1 %v10039_v59  ;;  %v1194_v47 = vld [vmem:[#allocation2 + $0x1ea] sm:$0xff] }
  0xf8   :  { %12009 = vmatprep.mubr.f32.mxu0 %v1189_v3  ;;  %12216 = vmatpush3.msra.mxu0 %v10023_v35  ;;  %v11838_v35 = vpop.f32.mrf.mxu1 }
  0xf9   :  { %12132 = vmatmul.mubr.f32.gmra.mxu1 %v14784_v53  ;;  %v1190_v53 = vld [vmem:[#allocation2 + $0x1ba] sm:$0xff]  ;;  %12441 = vmatprep.subr.mxu0 %v15124_v37 }
  0xfa   :  { %12134 = vmatprep.mubr.f32.mxu1 %v1717_v31  ;;  %12344 = vmatpush3.msra.mxu1 %v10039_v59  ;;  %v11710_v31 = vpop.f32.mrf.mxu0  ;;  %v848_v3 = vpop.f32.mrf.mxu1 }
  0xfb   :  { %12010 = vmatmul.mubr.f32.gmra.mxu0 %v1190_v53  ;;  %v15135_v59 = vadd.f32 %v11838_v35, %v11710_v31  ;;  %v1198_v31 = vld [vmem:[#allocation2 + $0x21a] sm:$0xff] }
  0xfc   :  { %12012 = vmatprep.mubr.f32.mxu0 %v1191_v51  ;;  %v11841_v51 = vpop.f32.mrf.mxu1 }
  0xfd   :  { %12135 = vmatmul.mubr.f32.gmra.mxu1 %v1718_v36  ;;  %v1195_v36 = vld [vmem:[#allocation2 + $0x1fa] sm:$0xff] }
  0xfe   :  { %12137 = vmatprep.mubr.f32.mxu1 %v14797_v55  ;;  %v15132_v55 = vadd.f32 %v838_v54, %v453_v21  ;;  %v858_v21 = vpop.f32.mrf.mxu1 }
  0xff   :  { %12013 = vmatmul.mubr.f32.gmra.mxu0 %v1192_v5  ;;  %v1197_v5 = vld [vmem:[#allocation2 + $0x212] sm:$0xff] }
 0x100   :  { %12015 = vmatprep.mubr.f32.mxu0 %v1193_v34  ;;  %v11844_v54 = vpop.f32.mrf.mxu1 }
 0x101   :  { %12138 = vmatmul.mubr.f32.gmra.mxu1 %v14806_v42  ;;  %v463_v42 = vpop.f32.mrf.mxu0 }
 0x102   :  { %12140 = vmatprep.mubr.f32.mxu1 %v14808_v41  ;;  %v15138_v53 = vadd.f32 %v848_v3, %v463_v42  ;;  %v868_v42 = vpop.f32.mrf.mxu1 }
 0x103   :  { %v11713_v41 = vpop.f32.mrf.mxu0  ;;  %12016 = vmatmul.mubr.f32.gmra.mxu0 %v1194_v47  ;;  %v1199_v47 = vld [vmem:[#allocation2 + $0x22a] sm:$0xff] }
 0x104   :  { %12018 = vmatprep.mubr.f32.mxu0 %v1195_v36  ;;  %v15141_v39 = vadd.f32 %v11841_v51, %v11713_v41  ;;  %v11847_v3 = vpop.f32.mrf.mxu1  ;;  %v1200_v41 = vld [vmem:[#allocation2 + $0x232] sm:$0xff] }
 0x105   :  { %12141 = vmatmul.mubr.f32.gmra.mxu1 %v14817_v58  ;;  %v473_v58 = vpop.f32.mrf.mxu0 }
 0x106   :  { %12143 = vmatprep.mubr.f32.mxu1 %v14819_v61  ;;  %v15144_v34 = vadd.f32 %v858_v21, %v473_v58  ;;  %v878_v58 = vpop.f32.mrf.mxu1 }
 0x107   :  { %v11716_v61 = vpop.f32.mrf.mxu0  ;;  %12019 = vmatmul.mubr.f32.gmra.mxu0 %v1196_v28  ;;  %v1201_v28 = vld [vmem:[#allocation2 + $0x242] sm:$0xff] }
 0x108   :  { %12021 = vmatprep.mubr.f32.mxu0 %v1197_v5  ;;  %v15147_v35 = vadd.f32 %v11844_v54, %v11716_v61  ;;  %v11850_v21 = vpop.f32.mrf.mxu1  ;;  %v1202_v61 = vld [vmem:[#allocation2 + $0x24a] sm:$0xff] }
 0x109   :  { %12144 = vmatmul.mubr.f32.gmra.mxu1 %v14825_v50  ;;  %v483_v50 = vpop.f32.mrf.mxu0 }
 0x10a   :  { %12146 = vmatprep.mubr.f32.mxu1 %v14827_v57  ;;  %v15150_v36 = vadd.f32 %v868_v42, %v483_v50  ;;  %v888_v50 = vpop.f32.mrf.mxu1 }
 0x10b   :  { %v11719_v57 = vpop.f32.mrf.mxu0  ;;  %12022 = vmatmul.mubr.f32.gmra.mxu0 %v1198_v31  ;;  %v1203_v31 = vld [vmem:[#allocation2 + $0x25a] sm:$0xff] }
 0x10c   :  { %12024 = vmatprep.mubr.f32.mxu0 %v1199_v47  ;;  %v15153_v51 = vadd.f32 %v11847_v3, %v11719_v57  ;;  %v11853_v42 = vpop.f32.mrf.mxu1  ;;  %v1204_v57 = vld [vmem:[#allocation2 + $0x262] sm:$0xff] }
 0x10d   :  { %12147 = vmatmul.mubr.f32.gmra.mxu1 %v14833_v63  ;;  %v493_v63 = vpop.f32.mrf.mxu0 }
 0x10e   :  { %12149 = vmatprep.mubr.f32.mxu1 %v14835_v7  ;;  %v15156_v5 = vadd.f32 %v878_v58, %v493_v63  ;;  %v898_v63 = vpop.f32.mrf.mxu1 }
 0x10f   :  { %v11722_v7 = vpop.f32.mrf.mxu0  ;;  %12025 = vmatmul.mubr.f32.gmra.mxu0 %v1200_v41  ;;  %v1205_v41 = vld [vmem:[#allocation2 + $0x272] sm:$0xff] }
 0x110   :  { %12027 = vmatprep.mubr.f32.mxu0 %v1201_v28  ;;  %v15159_v54 = vadd.f32 %v11850_v21, %v11722_v7  ;;  %v1206_v7 = vld [vmem:[#allocation2 + $0x27a] sm:$0xff] }
 0x111   :  { %12150 = vmatmul.mubr.f32.gmra.mxu1 %v14841_v9  ;;  %v503_v9 = vpop.f32.mrf.mxu0 }
 0x112   :  { %12152 = vmatprep.mubr.f32.mxu1 %v14843_v10  ;;  %v15162_v47 = vadd.f32 %v888_v50, %v503_v9 }
 0x113   :  { %v11725_v10 = vpop.f32.mrf.mxu0  ;;  %12028 = vmatmul.mubr.f32.gmra.mxu0 %v1202_v61  ;;  %v1207_v61 = vld [vmem:[#allocation2 + $0x28a] sm:$0xff] }
 0x114   :  { %12030 = vmatprep.mubr.f32.mxu0 %v1203_v31  ;;  %v15165_v3 = vadd.f32 %v11853_v42, %v11725_v10  ;;  %v1208_v10 = vld [vmem:[#allocation2 + $0x292] sm:$0xff] }
 0x115   :  { %12153 = vmatmul.mubr.f32.gmra.mxu1 %v14849_v12  ;;  %v513_v12 = vpop.f32.mrf.mxu0 }
 0x116   :  { %12155 = vmatprep.mubr.f32.mxu1 %v14851_v13  ;;  %v15168_v28 = vadd.f32 %v898_v63, %v513_v12 }
 0x117   :  { %v11728_v13 = vpop.f32.mrf.mxu0  ;;  %12031 = vmatmul.mubr.f32.gmra.mxu0 %v1204_v57  ;;  %v1209_v57 = vld [vmem:[#allocation2 + $0x2a2] sm:$0xff] }
 0x118   :  { %12033 = vmatprep.mubr.f32.mxu0 %v1205_v41 }
 0x119   :  { %12156 = vmatmul.mubr.f32.gmra.mxu1 %v14857_v16  ;;  %v523_v16 = vpop.f32.mrf.mxu0 }
 0x11a   :  { %12158 = vmatprep.mubr.f32.mxu1 %v14859_v18 }
 0x11b   :  { %v11856_v58 = vpop.f32.mrf.mxu1  ;;  %v11731_v18 = vpop.f32.mrf.mxu0  ;;  %12034 = vmatmul.mubr.f32.gmra.mxu0 %v1206_v7  ;;  %v1211_v7 = vld [vmem:[#allocation2 + $0x2ba] sm:$0xff] }
 0x11c   :  { %v15171_v21 = vadd.f32 %v11856_v58, %v11728_v13  ;;  %12036 = vmatprep.mubr.f32.mxu0 %v1207_v61  ;;  %v1210_v13 = vld [vmem:[#allocation2 + $0x2aa] sm:$0xff] }
 0x11d   :  { %12159 = vmatmul.mubr.f32.gmra.mxu1 %v14865_v25  ;;  %v908_v9 = vpop.f32.mrf.mxu1  ;;  %v533_v25 = vpop.f32.mrf.mxu0 }
 0x11e   :  { %12161 = vmatprep.mubr.f32.mxu1 %v14867_v26  ;;  %v15174_v31 = vadd.f32 %v908_v9, %v523_v16  ;;  %v15183_v26 = vld [vmem:[%s18372_s1 + $0x3f8] sm:$0xff] }
 0x11f   :  { %12569 = vmatprep.subr.mxu1 %v15183_v26  ;;  %v11734_v63 = vpop.f32.mrf.mxu0  ;;  %12037 = vmatmul.mubr.f32.gmra.mxu0 %v1208_v10 }
 0x120   :  { %12039 = vmatprep.mubr.f32.mxu0 %v1209_v57 }
 0x121   :  { %v11859_v50 = vpop.f32.mrf.mxu1  ;;  %12162 = vmatmul.mubr.f32.gmra.mxu1 %v14873_v38 }
 0x122   :  { %v15177_v42 = vadd.f32 %v11859_v50, %v11731_v18  ;;  %12164 = vmatprep.mubr.f32.mxu1 %v14878_v44  ;;  %v543_v44 = vpop.f32.mrf.mxu0  ;;  %v1212_v50 = vld [vmem:[#allocation2 + $0x2c2] sm:$0xff] }
 0x123   :  { %v918_v12 = vpop.f32.mrf.mxu1  ;;  %12040 = vmatmul.mubr.f32.gmra.mxu0 %v1210_v13 }
 0x124   :  { %v15186_v41 = vadd.f32 %v918_v12, %v533_v25  ;;  %v11737_v9 = vpop.f32.mrf.mxu0  ;;  %12042 = vmatprep.mubr.f32.mxu0 %v1211_v7  ;;  %v1213_v25 = vld [vmem:[#allocation2 + $0x2d2] sm:$0xff] }
 0x125   :  { %v11862_v38 = vpop.f32.mrf.mxu1  ;;  %12165 = vmatmul.mubr.f32.gmra.mxu1 %v14884_v52 }
 0x126   :  { %v15189_v58 = vadd.f32 %v11862_v38, %v11734_v63  ;;  %12167 = vmatprep.mubr.f32.mxu1 %v14886_v48  ;;  %v553_v52 = vpop.f32.mrf.mxu0  ;;  %v1214_v38 = vld [vmem:[#allocation2 + $0x2da] sm:$0xff] }
 0x127   :  { %v928_v16 = vpop.f32.mrf.mxu1  ;;  %12043 = vmatmul.mubr.f32.gmra.mxu0 %v1212_v50 }
 0x128   :  { %v15192_v61 = vadd.f32 %v928_v16, %v543_v44  ;;  %v11740_v48 = vpop.f32.mrf.mxu0  ;;  %12045 = vmatprep.mubr.f32.mxu0 %v1213_v25  ;;  %v1215_v44 = vld [vmem:[#allocation2 + $0x2ea] sm:$0xff] }
 0x129   :  { %v11865_v18 = vpop.f32.mrf.mxu1  ;;  %12168 = vmatmul.mubr.f32.gmra.mxu1 %v14892_v8 }
 0x12a   :  { %v15195_v10 = vadd.f32 %v11865_v18, %v11737_v9  ;;  %12170 = vmatprep.mubr.f32.mxu1 %v14894_v56  ;;  %v563_v8 = vpop.f32.mrf.mxu0  ;;  %v1216_v18 = vld [vmem:[#allocation2 + $0x2f2] sm:$0xff] }
 0x12b   :  { %v938_v57 = vpop.f32.mrf.mxu1  ;;  %12046 = vmatmul.mubr.f32.gmra.mxu0 %v1214_v38 }
 0x12c   :  { %v15198_v12 = vadd.f32 %v938_v57, %v553_v52  ;;  %v11743_v56 = vpop.f32.mrf.mxu0  ;;  %12048 = vmatprep.mubr.f32.mxu0 %v1215_v44  ;;  %v1217_v52 = vld [vmem:[#allocation2 + $0x302] sm:$0xff] }
 0x12d   :  { %v11868_v63 = vpop.f32.mrf.mxu1  ;;  %12171 = vmatmul.mubr.f32.gmra.mxu1 %v14900_v62 }
 0x12e   :  { %v15201_v13 = vadd.f32 %v11868_v63, %v11740_v48  ;;  %12173 = vmatprep.mubr.f32.mxu1 %v14902_v2  ;;  %v573_v62 = vpop.f32.mrf.mxu0  ;;  %v1218_v63 = vld [vmem:[#allocation2 + $0x30a] sm:$0xff] }
 0x12f   :  { %v948_v7 = vpop.f32.mrf.mxu1  ;;  %12049 = vmatmul.mubr.f32.gmra.mxu0 %v1216_v18  ;;  %v1220_v18 = vld [vmem:[#allocation2 + $0x322] sm:$0xff] }
 0x130   :  { %v15204_v16 = vadd.f32 %v948_v7, %v563_v8  ;;  %v11746_v2 = vpop.f32.mrf.mxu0  ;;  %12051 = vmatprep.mubr.f32.mxu0 %v1217_v52  ;;  %v1219_v8 = vld [vmem:[#allocation2 + $0x31a] sm:$0xff]  ;;  %v1749_v7 = vld [vmem:[#allocation2 + $0x330] sm:$0xff] }
 0x131   :  { %v11871_v9 = vpop.f32.mrf.mxu1  ;;  %12174 = vmatmul.mubr.f32.gmra.mxu1 %v14908_v43  ;;  %v1750_v52 = vld [vmem:[#allocation2 + $0x338] sm:$0xff] }
 0x132   :  { %v15207_v50 = vadd.f32 %v11871_v9, %v11743_v56  ;;  %12176 = vmatprep.mubr.f32.mxu1 %v14910_v27  ;;  %v583_v43 = vpop.f32.mrf.mxu0 }
 0x133   :  { %v958_v25 = vpop.f32.mrf.mxu1  ;;  %12052 = vmatmul.mubr.f32.gmra.mxu0 %v1218_v63  ;;  %v2218_v63 = vld [vmem:[#allocation2 + $0x21] sm:$0xff] }
 0x134   :  { %v15210_v57 = vadd.f32 %v958_v25, %v573_v62  ;;  %v11749_v56 = vpop.f32.mrf.mxu0  ;;  %12054 = vmatprep.mubr.f32.mxu0 %v1219_v8  ;;  %v2217_v25 = vld [vmem:[#allocation2 + $0x19] sm:$0xff] }
 0x135   :  { %v11874_v48 = vpop.f32.mrf.mxu1  ;;  %12177 = vmatmul.mubr.f32.gmra.mxu1 %v14921_v20 }
 0x136   :  { %v15213_v38 = vadd.f32 %v11874_v48, %v11746_v2  ;;  %12179 = vmatprep.mubr.f32.mxu1 %v14929_v30  ;;  %v593_v62 = vpop.f32.mrf.mxu0 }
 0x137   :  { %v968_v44 = vpop.f32.mrf.mxu1  ;;  %12055 = vmatmul.mubr.f32.gmra.mxu0 %v1220_v18 }
 0x138   :  { %v15216_v27 = vadd.f32 %v968_v44, %v583_v43  ;;  %v11752_v48 = vpop.f32.mrf.mxu0  ;;  %12217 = vmatprep.mubr.f32.mxu0 %v2217_v25 }
 0x139   :  { %v11877_v9 = vpop.f32.mrf.mxu1  ;;  %12180 = vmatmul.mubr.f32.gmra.mxu1 %v14936_v17 }
 0x13a   :  { %v15219_v20 = vadd.f32 %v11877_v9, %v11749_v56  ;;  %12182 = vmatprep.mubr.f32.mxu1 %v1749_v7  ;;  %v603_v17 = vpop.f32.mrf.mxu0  ;;  %v2219_v56 = vld [vmem:[#allocation2 + $0x31] sm:$0xff] }
 0x13b   :  { %v978_v2 = vpop.f32.mrf.mxu1  ;;  %12218 = vmatmul.mubr.f32.vlgmr.msra.gmra.mxu0 %v2218_v63 }
 0x13c   :  { %v15221_v30 = vadd.f32 %v978_v2, %v593_v62  ;;  %v11755_v7 = vpop.f32.mrf.mxu0  ;;  %v10069_v62 = vld [vmem:[%s18372_s1 + $0x370] sm:$0xff]  ;;  %12442 = vmatpush3.msra.mxu0 %v15124_v37  ;;  %12220 = vmatprep.mubr.f32.mxu0 %v2219_v56 }
 0x13d   :  { %v11880_v43 = vpop.f32.mrf.mxu1  ;;  %12183 = vmatmul.mubr.f32.gmra.mxu1 %v1750_v52  ;;  %v2220_v52 = vld [vmem:[#allocation2 + $0x39] sm:$0xff]  ;;  %12443 = vmatprep.subr.mxu0 %v10069_v62 }
 0x13e   :  { %v15223_v44 = vadd.f32 %v11880_v43, %v11752_v48  ;;  %12345 = vmatprep.mubr.f32.mxu1 %v14941_v24  ;;  %v10085_v24 = vld [vmem:[%s18372_s1 + $0x3f0] sm:$0xff]  ;;  %v613_v2 = vpop.f32.mrf.mxu0  ;;  %12444 = vmatpush3.msra.mxu0 %v10069_v62 }
 0x13f   :  { %v988_v8 = vpop.f32.mrf.mxu1  ;;  %v2221_v48 = vld [vmem:[#allocation2 + $0x49] sm:$0xff]  ;;  %12221 = vmatmul.mubr.f32.gmra.mxu0 %v2220_v52 }
 0x140   :  { %v15226_v9 = vadd.f32 %v988_v8, %v603_v17  ;;  %v11758_v37 = vpop.f32.mrf.mxu0  ;;  %12223 = vmatprep.mubr.f32.mxu0 %v2221_v48  ;;  %v2222_v8 = vld [vmem:[#allocation2 + $0x51] sm:$0xff] }
 0x141   :  { %v11883_v18 = vpop.f32.mrf.mxu1  ;;  %12346 = vmatmul.mubr.f32.vlgmr.msra.gmra.mxu1 %v14948_v19  ;;  %v10068_v19 = vld [vmem:[%s18372_s1 + $0x368] sm:$0xff] }
 0x142   :  { %v15236_v25 = vadd.f32 %v11883_v18, %v11755_v7  ;;  %12348 = vmatprep.mubr.f32.mxu1 %v14955_v6  ;;  %12570 = vmatpush3.msra.mxu1 %v15183_v26  ;;  %v10084_v6 = vld [vmem:[%s18372_s1 + $0x3e8] sm:$0xff]  ;;  %v623_v26 = vpop.f32.mrf.mxu0 }
 0x143   :  { %v998_v43 = vpop.f32.mrf.mxu1  ;;  %12571 = vmatprep.subr.mxu1 %v10085_v24  ;;  %v2223_v7 = vld [vmem:[#allocation2 + $0x61] sm:$0xff]  ;;  %12445 = vmatprep.subr.mxu0 %v10068_v19 }
 0x144   :  { %v15240_v63 = vadd.f32 %v998_v43, %v613_v2  ;;  %12572 = vmatpush3.msra.mxu1 %v10085_v24  ;;  %v11761_v2 = vpop.f32.mrf.mxu0  ;;  %12224 = vmatmul.mubr.f32.gmra.mxu0 %v2222_v8  ;;  %v2224_v43 = vld [vmem:[#allocation2 + $0x69] sm:$0xff] }
 0x145   :  { %v11886_v17 = vpop.f32.mrf.mxu1  ;;  %12349 = vmatmul.mubr.f32.gmra.mxu1 %v14963_v4  ;;  %v10067_v4 = vld [vmem:[%s18372_s1 + $0x360] sm:$0xff]  ;;  %12573 = vmatprep.subr.mxu1 %v10084_v6 }
 0x146   :  { %v15249_v56 = vadd.f32 %v11886_v17, %v11758_v37  ;;  %12351 = vmatprep.mubr.f32.mxu1 %v14969_v14  ;;  %12226 = vmatprep.mubr.f32.mxu0 %v2223_v7  ;;  %v10083_v14 = vld [vmem:[%s18372_s1 + $0x3e0] sm:$0xff]  ;;  %v633_v24 = vpop.f32.mrf.mxu0 }
 0x147   :  { %v1008_v18 = vpop.f32.mrf.mxu1  ;;  %v2225_v37 = vld [vmem:[#allocation2 + $0x79] sm:$0xff]  ;;  %12446 = vmatpush3.msra.mxu0 %v10068_v19  ;;  %12574 = vmatpush3.msra.mxu1 %v10084_v6 }
 0x148   :  { %v15252_v52 = vadd.f32 %v1008_v18, %v623_v26  ;;  %12447 = vmatprep.subr.mxu0 %v10067_v4  ;;  %v11764_v26 = vpop.f32.mrf.mxu0  ;;  %12227 = vmatmul.mubr.f32.gmra.mxu0 %v2224_v43  ;;  %v2226_v18 = vld [vmem:[#allocation2 + $0x81] sm:$0xff] }
 0x149   :  { %v11889_v48 = vpop.f32.mrf.mxu1  ;;  %12352 = vmatmul.mubr.f32.gmra.mxu1 %v14977_v45  ;;  %v10066_v45 = vld [vmem:[%s18372_s1 + $0x358] sm:$0xff]  ;;  %12575 = vmatprep.subr.mxu1 %v10083_v14 }
 0x14a   :  { %v15261_v62 = vadd.f32 %v11889_v48, %v11761_v2  ;;  %12354 = vmatprep.mubr.f32.mxu1 %v14983_v32  ;;  %12229 = vmatprep.mubr.f32.mxu0 %v2225_v37  ;;  %v10082_v32 = vld [vmem:[%s18372_s1 + $0x3d8] sm:$0xff]  ;;  %v643_v6 = vpop.f32.mrf.mxu0 }
 0x14b   :  { %v1018_v17 = vpop.f32.mrf.mxu1  ;;  %v2227_v2 = vld [vmem:[#allocation2 + $0x91] sm:$0xff]  ;;  %12448 = vmatpush3.msra.mxu0 %v10067_v4  ;;  %12576 = vmatpush3.msra.mxu1 %v10083_v14 }
 0x14c   :  { %v15264_v8 = vadd.f32 %v1018_v17, %v633_v24  ;;  %12449 = vmatprep.subr.mxu0 %v10066_v45  ;;  %v11767_v24 = vpop.f32.mrf.mxu0  ;;  %12230 = vmatmul.mubr.f32.gmra.mxu0 %v2226_v18  ;;  %v2228_v17 = vld [vmem:[#allocation2 + $0x99] sm:$0xff] }
 0x14d   :  { %v11892_v7 = vpop.f32.mrf.mxu1  ;;  %12355 = vmatmul.mubr.f32.gmra.mxu1 %v14991_v29  ;;  %v10065_v29 = vld [vmem:[%s18372_s1 + $0x350] sm:$0xff]  ;;  %12577 = vmatprep.subr.mxu1 %v10082_v32 }
 0x14e   :  { %v15273_v19 = vadd.f32 %v11892_v7, %v11764_v26  ;;  %12357 = vmatprep.mubr.f32.mxu1 %v14997_v60  ;;  %12232 = vmatprep.mubr.f32.mxu0 %v2227_v2  ;;  %v10081_v60 = vld [vmem:[%s18372_s1 + $0x3d0] sm:$0xff]  ;;  %v653_v14 = vpop.f32.mrf.mxu0  ;;  %v18536_v26 = vld [vmem:[#allocation55_spill] sm:$0xff] }
 0x14f   :  { %v1028_v48 = vpop.f32.mrf.mxu1  ;;  %v2229_v7 = vld [vmem:[#allocation2 + $0xa9] sm:$0xff]  ;;  %12450 = vmatpush3.msra.mxu0 %v10066_v45  ;;  %12578 = vmatpush3.msra.mxu1 %v10082_v32 }
 0x150   :  { %v15276_v43 = vadd.f32 %v1028_v48, %v643_v6  ;;  %12451 = vmatprep.subr.mxu0 %v10065_v29  ;;  %v11770_v48 = vpop.f32.mrf.mxu0  ;;  %12233 = vmatmul.mubr.f32.gmra.mxu0 %v2228_v17  ;;  %v10080_v45 = vld [vmem:[%s18372_s1 + $0x3c8] sm:$0xff] }
 0x151   :  { %v11895_v37 = vpop.f32.mrf.mxu1  ;;  %12358 = vmatmul.mubr.f32.gmra.mxu1 %v15005_v23  ;;  %v10064_v23 = vld [vmem:[%s18372_s1 + $0x348] sm:$0xff]  ;;  %12579 = vmatprep.subr.mxu1 %v10081_v60 }
 0x152   :  { %v15285_v4 = vadd.f32 %v11895_v37, %v11767_v24  ;;  %12360 = vmatprep.mubr.f32.mxu1 %v18536_v26  ;;  %12235 = vmatprep.mubr.f32.mxu0 %v2229_v7  ;;  %v2230_v24 = vld [vmem:[#allocation2 + $0xb1] sm:$0xff]  ;;  %v663_v32 = vpop.f32.mrf.mxu0  ;;  %v2231_v17 = vld [vmem:[#allocation2 + $0xc1] sm:$0xff] }
 0x153   :  { %v1038_v18 = vpop.f32.mrf.mxu1  ;;  %12452 = vmatpush3.msra.mxu0 %v10065_v29  ;;  %12580 = vmatpush3.msra.mxu1 %v10081_v60 }
 0x154   :  { %v15288_v6 = vadd.f32 %v1038_v18, %v653_v14  ;;  %12453 = vmatprep.subr.mxu0 %v10064_v23  ;;  %v11773_v18 = vpop.f32.mrf.mxu0  ;;  %12236 = vmatmul.mubr.f32.gmra.mxu0 %v2230_v24 }
 0x155   :  { %v11898_v2 = vpop.f32.mrf.mxu1  ;;  %12361 = vmatmul.mubr.f32.gmra.mxu1 %v15019_v0  ;;  %v10063_v0 = vld [vmem:[%s18372_s1 + $0x340] sm:$0xff]  ;;  %12581 = vmatprep.subr.mxu1 %v10080_v45 }
 0x156   :  { %v15297_v37 = vadd.f32 %v11898_v2, %v11770_v48  ;;  %12363 = vmatprep.mubr.f32.mxu1 %v15025_v49  ;;  %12238 = vmatprep.mubr.f32.mxu0 %v2231_v17  ;;  %v2232_v48 = vld [vmem:[#allocation2 + $0xc9] sm:$0xff]  ;;  %v10079_v49 = vld [vmem:[%s18372_s1 + $0x3c0] sm:$0xff]  ;;  %v673_v60 = vpop.f32.mrf.mxu0 }
 0x157   :  { %v1048_v14 = vpop.f32.mrf.mxu1  ;;  %v2233_v2 = vld [vmem:[#allocation2 + $0xd9] sm:$0xff]  ;;  %12454 = vmatpush3.msra.mxu0 %v10064_v23  ;;  %12582 = vmatpush3.msra.mxu1 %v10080_v45 }
 0x158   :  { %v15300_v26 = vadd.f32 %v1048_v14, %v663_v32  ;;  %12455 = vmatprep.subr.mxu0 %v10063_v0  ;;  %v11776_v14 = vpop.f32.mrf.mxu0  ;;  %12239 = vmatmul.mubr.f32.gmra.mxu0 %v2232_v48 }
 0x159   :  { %v11901_v7 = vpop.f32.mrf.mxu1  ;;  %12364 = vmatmul.mubr.f32.gmra.mxu1 %v15033_v33  ;;  %v10062_v33 = vld [vmem:[%s18372_s1 + $0x338] sm:$0xff]  ;;  %12583 = vmatprep.subr.mxu1 %v10079_v49 }
 0x15a   :  { %v15309_v29 = vadd.f32 %v11901_v7, %v11773_v18  ;;  %12366 = vmatprep.mubr.f32.mxu1 %v15039_v1  ;;  %12241 = vmatprep.mubr.f32.mxu0 %v2233_v2  ;;  %v2234_v18 = vld [vmem:[#allocation2 + $0xe1] sm:$0xff]  ;;  %v10078_v1 = vld [vmem:[%s18372_s1 + $0x3b8] sm:$0xff]  ;;  %v683_v45 = vpop.f32.mrf.mxu0 }
 0x15b   :  { %v1058_v24 = vpop.f32.mrf.mxu1  ;;  %v2235_v7 = vld [vmem:[#allocation2 + $0xf1] sm:$0xff]  ;;  %12456 = vmatpush3.msra.mxu0 %v10063_v0  ;;  %12584 = vmatpush3.msra.mxu1 %v10079_v49 }
 0x15c   :  { %v15312_v32 = vadd.f32 %v1058_v24, %v673_v60  ;;  %12457 = vmatprep.subr.mxu0 %v10062_v33  ;;  %v11779_v24 = vpop.f32.mrf.mxu0  ;;  %12242 = vmatmul.mubr.f32.gmra.mxu0 %v2234_v18  ;;  %v2237_v18 = vld [vmem:[#allocation2 + $0x109] sm:$0xff] }
 0x15d   :  { %v11904_v17 = vpop.f32.mrf.mxu1  ;;  %12367 = vmatmul.mubr.f32.gmra.mxu1 %v15047_v15  ;;  %v10061_v15 = vld [vmem:[%s18372_s1 + $0x330] sm:$0xff]  ;;  %12585 = vmatprep.subr.mxu1 %v10078_v1 }
 0x15e   :  { %18537 = vst [vmem:[#allocation61_spill] sm:$0xff] %v15312_v32  ;;  %v15321_v23 = vadd.f32 %v11904_v17, %v11776_v14  ;;  %12369 = vmatprep.mubr.f32.mxu1 %v15053_v11  ;;  %12244 = vmatprep.mubr.f32.mxu0 %v2235_v7  ;;  %v2236_v14 = vld [vmem:[#allocation2 + $0xf9] sm:$0xff]  ;;  %v10077_v11 = vld [vmem:[%s18372_s1 + $0x3b0] sm:$0xff]  ;;  %v693_v49 = vpop.f32.mrf.mxu0  ;;  %v10060_v7 = vld [vmem:[%s18372_s1 + $0x328] sm:$0xff] }
 0x15f   :  { %v1068_v48 = vpop.f32.mrf.mxu1  ;;  %v18541_v17 = vld [vmem:[#allocation57_spill] sm:$0xff]  ;;  %12458 = vmatpush3.msra.mxu0 %v10062_v33  ;;  %12586 = vmatpush3.msra.mxu1 %v10078_v1  ;;  %v10076_v33 = vld [vmem:[%s18372_s1 + $0x3a8] sm:$0xff] }
 0x160   :  { %18538 = vst [vmem:[#allocation62_spill] sm:$0xff] %v15321_v23  ;;  %v15324_v60 = vadd.f32 %v1068_v48, %v683_v45  ;;  %v2767_v48 = vld [vmem:[#allocation2 + $0x10a] sm:$0xff]  ;;  %12459 = vmatprep.subr.mxu0 %v10061_v15  ;;  %12245 = vmatmul.mubr.f32.gmra.mxu0 %v2236_v14  ;;  %v2239_v14 = vld [vmem:[#allocation2 + $0x121] sm:$0xff] }
 0x161   :  { %v11907_v2 = vpop.f32.mrf.mxu1  ;;  %12370 = vmatmul.mubr.f32.gmra.mxu1 %v15061_v22  ;;  %v11782_v22 = vpop.f32.mrf.mxu0  ;;  %12587 = vmatprep.subr.mxu1 %v10077_v11 }
 0x162   :  { %18539 = vst [vmem:[#allocation67_spill] sm:$0xff] %v15324_v60  ;;  %v15333_v0 = vadd.f32 %v11907_v2, %v11779_v24  ;;  %12372 = vmatprep.mubr.f32.mxu1 %v18541_v17  ;;  %12247 = vmatprep.mubr.f32.mxu0 %v2237_v18  ;;  %v2238_v2 = vld [vmem:[#allocation2 + $0x111] sm:$0xff]  ;;  %v10059_v18 = vld [vmem:[%s18372_s1 + $0x320] sm:$0xff] }
 0x163   :  { %v1078_v45 = vpop.f32.mrf.mxu1  ;;  %v703_v1 = vpop.f32.mrf.mxu0  ;;  %12460 = vmatpush3.msra.mxu0 %v10061_v15  ;;  %12588 = vmatpush3.msra.mxu1 %v10077_v11  ;;  %v10075_v15 = vld [vmem:[%s18372_s1 + $0x3a0] sm:$0xff] }
 0x164   :  { %18540 = vst [vmem:[#allocation70_spill] sm:$0xff] %v15333_v0  ;;  %v15336_v60 = vadd.f32 %v1078_v45, %v693_v49  ;;  %v2768_v49 = vld [vmem:[#allocation2 + $0x112] sm:$0xff]  ;;  %12461 = vmatprep.subr.mxu0 %v10060_v7  ;;  %12248 = vmatmul.mubr.f32.gmra.mxu0 %v2238_v2 }
 0x165   :  { %v11910_v24 = vpop.f32.mrf.mxu1  ;;  %12373 = vmatmul.mubr.f32.gmra.mxu1 %v15075_v46  ;;  %v11785_v46 = vpop.f32.mrf.mxu0  ;;  %12589 = vmatprep.subr.mxu1 %v10076_v33 }
 0x166   :  { %18542 = vst [vmem:[#allocation55_spill] sm:$0xff] %v15336_v60  ;;  %v15345_v17 = vadd.f32 %v11910_v24, %v11782_v22  ;;  %12375 = vmatprep.mubr.f32.mxu1 %v2767_v48  ;;  %v2769_v60 = vld [vmem:[#allocation2 + $0x122] sm:$0xff]  ;;  %12250 = vmatprep.mubr.f32.mxu0 %v2239_v14  ;;  %v10058_v14 = vld [vmem:[%s18372_s1 + $0x318] sm:$0xff] }
 0x167   :  { %v1088_v45 = vpop.f32.mrf.mxu1  ;;  %v2240_v48 = vld [vmem:[#allocation2 + $0x129] sm:$0xff]  ;;  %v713_v11 = vpop.f32.mrf.mxu0  ;;  %12462 = vmatpush3.msra.mxu0 %v10060_v7  ;;  %12590 = vmatpush3.msra.mxu1 %v10076_v33  ;;  %v10074_v7 = vld [vmem:[%s18372_s1 + $0x398] sm:$0xff] }
 0x168   :  { %18543 = vst [vmem:[#allocation57_spill] sm:$0xff] %v15345_v17  ;;  %v15347_v0 = vadd.f32 %v1088_v45, %v703_v1  ;;  %v2770_v1 = vld [vmem:[#allocation2 + $0x12a] sm:$0xff]  ;;  %v2241_v45 = vld [vmem:[#allocation2 + $0x139] sm:$0xff]  ;;  %12463 = vmatprep.subr.mxu0 %v10059_v18  ;;  %12251 = vmatmul.mubr.f32.gmra.mxu0 %v2240_v48 }
 0x169   :  { %v11913_v22 = vpop.f32.mrf.mxu1  ;;  %12376 = vmatmul.mubr.f32.gmra.mxu1 %v2768_v49  ;;  %v11788_v49 = vpop.f32.mrf.mxu0  ;;  %12591 = vmatprep.subr.mxu1 %v10075_v15 }
 0x16a   :  { %18544 = vst [vmem:[#allocation73_spill] sm:$0xff] %v15347_v0  ;;  %v15355_v24 = vadd.f32 %v11913_v22, %v11785_v46  ;;  %12378 = vmatprep.mubr.f32.mxu1 %v2769_v60  ;;  %v2771_v0 = vld [vmem:[#allocation2 + $0x13a] sm:$0xff]  ;;  %12253 = vmatprep.mubr.f32.mxu0 %v2241_v45  ;;  %v10057_v45 = vld [vmem:[%s18372_s1 + $0x310] sm:$0xff] }
 0x16b   :  { %v1098_v2 = vpop.f32.mrf.mxu1  ;;  %v2242_v60 = vld [vmem:[#allocation2 + $0x141] sm:$0xff]  ;;  %v723_v33 = vpop.f32.mrf.mxu0  ;;  %12464 = vmatpush3.msra.mxu0 %v10059_v18  ;;  %12592 = vmatpush3.msra.mxu1 %v10075_v15  ;;  %v10073_v18 = vld [vmem:[%s18372_s1 + $0x390] sm:$0xff] }
 0x16c   :  { %18545 = vst [vmem:[#allocation74_spill] sm:$0xff] %v15355_v24  ;;  %v15357_v17 = vadd.f32 %v1098_v2, %v713_v11  ;;  %v2772_v11 = vld [vmem:[#allocation2 + $0x142] sm:$0xff]  ;;  %v2243_v2 = vld [vmem:[#allocation2 + $0x151] sm:$0xff]  ;;  %12465 = vmatprep.subr.mxu0 %v10058_v14  ;;  %12254 = vmatmul.mubr.f32.gmra.mxu0 %v2242_v60 }
 0x16d   :  { %v11916_v46 = vpop.f32.mrf.mxu1  ;;  %12379 = vmatmul.mubr.f32.gmra.mxu1 %v2770_v1  ;;  %v11791_v1 = vpop.f32.mrf.mxu0  ;;  %12593 = vmatprep.subr.mxu1 %v10074_v7 }
 0x16e   :  { %18546 = vst [vmem:[#allocation75_spill] sm:$0xff] %v15357_v17  ;;  %v15365_v22 = vadd.f32 %v11916_v46, %v11788_v49  ;;  %12381 = vmatprep.mubr.f32.mxu1 %v2771_v0  ;;  %v2773_v17 = vld [vmem:[#allocation2 + $0x152] sm:$0xff]  ;;  %12256 = vmatprep.mubr.f32.mxu0 %v2243_v2  ;;  %v10056_v2 = vld [vmem:[%s18372_s1 + $0x308] sm:$0xff] }
 0x16f   :  { %v1108_v48 = vpop.f32.mrf.mxu1  ;;  %v2244_v0 = vld [vmem:[#allocation2 + $0x159] sm:$0xff]  ;;  %v733_v15 = vpop.f32.mrf.mxu0  ;;  %12466 = vmatpush3.msra.mxu0 %v10058_v14  ;;  %12594 = vmatpush3.msra.mxu1 %v10074_v7  ;;  %v10072_v14 = vld [vmem:[%s18372_s1 + $0x388] sm:$0xff] }
 0x170   :  { %18547 = vst [vmem:[#allocation76_spill] sm:$0xff] %v15365_v22  ;;  %v15367_v24 = vadd.f32 %v1108_v48, %v723_v33  ;;  %v2774_v33 = vld [vmem:[#allocation2 + $0x15a] sm:$0xff]  ;;  %v2245_v48 = vld [vmem:[#allocation2 + $0x169] sm:$0xff]  ;;  %12467 = vmatprep.subr.mxu0 %v10057_v45  ;;  %12257 = vmatmul.mubr.f32.gmra.mxu0 %v2244_v0 }
 0x171   :  { %v11919_v49 = vpop.f32.mrf.mxu1  ;;  %12382 = vmatmul.mubr.f32.gmra.mxu1 %v2772_v11  ;;  %v11794_v11 = vpop.f32.mrf.mxu0  ;;  %12595 = vmatprep.subr.mxu1 %v10073_v18 }
 0x172   :  { %18548 = vst [vmem:[#allocation77_spill] sm:$0xff] %v15367_v24  ;;  %v15375_v46 = vadd.f32 %v11919_v49, %v11791_v1  ;;  %12384 = vmatprep.mubr.f32.mxu1 %v2773_v17  ;;  %v2775_v24 = vld [vmem:[#allocation2 + $0x16a] sm:$0xff]  ;;  %12259 = vmatprep.mubr.f32.mxu0 %v2245_v48  ;;  %v10055_v48 = vld [vmem:[%s18372_s1 + $0x300] sm:$0xff] }
 0x173   :  { %v1118_v60 = vpop.f32.mrf.mxu1  ;;  %v2246_v17 = vld [vmem:[#allocation2 + $0x171] sm:$0xff]  ;;  %v743_v7 = vpop.f32.mrf.mxu0  ;;  %12468 = vmatpush3.msra.mxu0 %v10057_v45  ;;  %12596 = vmatpush3.msra.mxu1 %v10073_v18  ;;  %v10071_v45 = vld [vmem:[%s18372_s1 + $0x380] sm:$0xff] }
 0x174   :  { %18549 = vst [vmem:[#allocation78_spill] sm:$0xff] %v15375_v46  ;;  %v15377_v22 = vadd.f32 %v1118_v60, %v733_v15  ;;  %v2776_v15 = vld [vmem:[#allocation2 + $0x172] sm:$0xff]  ;;  %v2247_v60 = vld [vmem:[#allocation2 + $0x181] sm:$0xff]  ;;  %12469 = vmatprep.subr.mxu0 %v10056_v2  ;;  %12260 = vmatmul.mubr.f32.gmra.mxu0 %v2246_v17 }
 0x175   :  { %v11922_v1 = vpop.f32.mrf.mxu1  ;;  %12385 = vmatmul.mubr.f32.gmra.mxu1 %v2774_v33  ;;  %v11797_v33 = vpop.f32.mrf.mxu0  ;;  %12597 = vmatprep.subr.mxu1 %v10072_v14 }
 0x176   :  { %18550 = vst [vmem:[#allocation79_spill] sm:$0xff] %v15377_v22  ;;  %v15385_v49 = vadd.f32 %v11922_v1, %v11794_v11  ;;  %12387 = vmatprep.mubr.f32.mxu1 %v2775_v24  ;;  %v2777_v22 = vld [vmem:[#allocation2 + $0x182] sm:$0xff]  ;;  %12262 = vmatprep.mubr.f32.mxu0 %v2247_v60  ;;  %v15402_v60 = vld [vmem:[%s18372_s1 + $0x478] sm:$0xff] }
 0x177   :  { %v1128_v0 = vpop.f32.mrf.mxu1  ;;  %v2248_v24 = vld [vmem:[#allocation2 + $0x189] sm:$0xff]  ;;  %v753_v18 = vpop.f32.mrf.mxu0  ;;  %12470 = vmatpush3.msra.mxu0 %v10056_v2  ;;  %12598 = vmatpush3.msra.mxu1 %v10072_v14  ;;  %v2251_v14 = vld [vmem:[#allocation2 + $0x1e1] sm:$0xff] }
 0x178   :  { %18551 = vst [vmem:[#allocation80_spill] sm:$0xff] %v15385_v49  ;;  %v15387_v46 = vadd.f32 %v1128_v0, %v743_v7  ;;  %v2778_v7 = vld [vmem:[#allocation2 + $0x18a] sm:$0xff]  ;;  %12471 = vmatprep.subr.mxu0 %v10055_v48  ;;  %12263 = vmatmul.mubr.f32.gmra.mxu0 %v2248_v24 }
 0x179   :  { %v11925_v11 = vpop.f32.mrf.mxu1  ;;  %12388 = vmatmul.mubr.f32.gmra.mxu1 %v2776_v15  ;;  %v2249_v0 = vld [vmem:[#allocation2 + $0x1c9] sm:$0xff]  ;;  %v11800_v15 = vpop.f32.mrf.mxu0  ;;  %12599 = vmatprep.subr.mxu1 %v10071_v45 }
 0x17a   :  { %18552 = vst [vmem:[#allocation81_spill] sm:$0xff] %v15387_v46  ;;  %v15395_v1 = vadd.f32 %v11925_v11, %v11797_v33  ;;  %12390 = vmatprep.mubr.f32.mxu1 %v2777_v22  ;;  %v2779_v46 = vld [vmem:[#allocation2 + $0x1ca] sm:$0xff]  ;;  %12265 = vmatprep.mubr.f32.mxu0 %v2249_v0 }
 0x17b   :  { %v1138_v17 = vpop.f32.mrf.mxu1  ;;  %v2250_v22 = vld [vmem:[#allocation2 + $0x1d1] sm:$0xff]  ;;  %v763_v2 = vpop.f32.mrf.mxu0  ;;  %12472 = vmatpush3.msra.mxu0 %v10055_v48  ;;  %12600 = vmatpush3.msra.mxu1 %v10071_v45  ;;  %v2783_v45 = vld [vmem:[#allocation2 + $0x1fa] sm:$0xff] }
 0x17c   :  { %18553 = vst [vmem:[#allocation82_spill] sm:$0xff] %v15395_v1  ;;  %v15397_v49 = vadd.f32 %v1138_v17, %v753_v18  ;;  %v2780_v1 = vld [vmem:[#allocation2 + $0x1d2] sm:$0xff]  ;;  %v2781_v17 = vld [vmem:[#allocation2 + $0x1e2] sm:$0xff]  ;;  %12697 = vmatprep.subr.mxu0 %v15402_v60  ;;  %12266 = vmatmul.mubr.f32.gmra.mxu0 %v2250_v22 }
 0x17d   :  { %v11928_v33 = vpop.f32.mrf.mxu1  ;;  %12391 = vmatmul.mubr.f32.gmra.mxu1 %v2778_v7  ;;  %12268 = vmatprep.mubr.f32.mxu0 %v2251_v14  ;;  %v2784_v14 = vld [vmem:[#allocation2 + $0x202] sm:$0xff] }
 0x17e   :  { %18554 = vst [vmem:[#allocation83_spill] sm:$0xff] %v15397_v49  ;;  %v15404_v11 = vadd.f32 %v11928_v33, %v11800_v15  ;;  %12393 = vmatprep.mubr.f32.mxu1 %v2779_v46  ;;  %v11963_v49 = vpop.f32.mrf.mxu0  ;;  %v2252_v15 = vld [vmem:[#allocation2 + $0x1e9] sm:$0xff] }
 0x17f   :  { %v1148_v18 = vpop.f32.mrf.mxu1  ;;  %v1624_v7 = vadd.f32 %v11963_v49, %v15129_v40  ;;  %v2782_v46 = vld [vmem:[#allocation2 + $0x1ea] sm:$0xff]  ;;  %v2254_v49 = vld [vmem:[#allocation2 + $0x201] sm:$0xff] }
 0x180   :  { %18555 = vst [vmem:[#allocation84_spill] sm:$0xff] %v15404_v11  ;;  %v15407_v24 = vadd.f32 %v1148_v18, %v763_v2  ;;  %v1304_v33 = vpop.f32.mrf.mxu0  ;;  %v2253_v11 = vld [vmem:[#allocation2 + $0x1f9] sm:$0xff]  ;;  %12269 = vmatmul.mubr.f32.gmra.mxu0 %v2252_v15 }
 0x181   :  { %v12091_v0 = vpop.f32.mrf.mxu1  ;;  %12394 = vmatmul.mubr.f32.gmra.mxu1 %v2780_v1  ;;  %v1623_v48 = vadd.f32 %v1304_v33, %v15132_v55  ;;  %12271 = vmatprep.mubr.f32.mxu0 %v2253_v11  ;;  %v2785_v33 = vld [vmem:[#allocation2 + $0x212] sm:$0xff] }
 0x182   :  { %12396 = vmatprep.mubr.f32.mxu1 %v2781_v17  ;;  %v15411_v23 = vadd.f32 %v12091_v0, %v1624_v7  ;;  %v11966_v2 = vpop.f32.mrf.mxu0  ;;  %v2255_v17 = vld [vmem:[#allocation2 + $0x211] sm:$0xff]  ;;  %v2256_v11 = vld [vmem:[#allocation2 + $0x219] sm:$0xff] }
 0x183   :  { %v1834_v32 = vpop.f32.mrf.mxu1  ;;  %v1626_v22 = vadd.f32 %v11966_v2, %v15135_v59 }
 0x184   :  { %18556 = vst [vmem:[#allocation85_spill] sm:$0xff] %v15411_v23  ;;  %v15414_v18 = vadd.f32 %v1834_v32, %v1623_v48  ;;  %v1314_v1 = vpop.f32.mrf.mxu0  ;;  %12272 = vmatmul.mubr.f32.gmra.mxu0 %v2254_v49  ;;  %v2786_v48 = vld [vmem:[#allocation2 + $0x21a] sm:$0xff] }
 0x185   :  { %v12094_v40 = vpop.f32.mrf.mxu1  ;;  %12397 = vmatmul.mubr.f32.gmra.mxu1 %v2782_v46  ;;  %v1625_v55 = vadd.f32 %v1314_v1, %v15138_v53  ;;  %12274 = vmatprep.mubr.f32.mxu0 %v2255_v17 }
 0x186   :  { %12399 = vmatprep.mubr.f32.mxu1 %v2783_v45  ;;  %v15417_v7 = vadd.f32 %v12094_v40, %v1626_v22  ;;  %v11969_v23 = vpop.f32.mrf.mxu0  ;;  %v2257_v45 = vld [vmem:[#allocation2 + $0x229] sm:$0xff] }
 0x187   :  { %v1844_v0 = vpop.f32.mrf.mxu1  ;;  %v1628_v59 = vadd.f32 %v11969_v23, %v15141_v39  ;;  %v2787_v40 = vld [vmem:[#allocation2 + $0x22a] sm:$0xff] }
 0x188   :  { %v15420_v32 = vadd.f32 %v1844_v0, %v1625_v55  ;;  %v1324_v46 = vpop.f32.mrf.mxu0  ;;  %12275 = vmatmul.mubr.f32.gmra.mxu0 %v2256_v11  ;;  %v2788_v55 = vld [vmem:[#allocation2 + $0x232] sm:$0xff]  ;;  %v2259_v0 = vld [vmem:[#allocation2 + $0x241] sm:$0xff] }
 0x189   :  { %v12097_v15 = vpop.f32.mrf.mxu1  ;;  %12400 = vmatmul.mubr.f32.gmra.mxu1 %v2784_v14  ;;  %v1627_v53 = vadd.f32 %v1324_v46, %v15144_v34  ;;  %12277 = vmatprep.mubr.f32.mxu0 %v2257_v45  ;;  %v2258_v14 = vld [vmem:[#allocation2 + $0x231] sm:$0xff] }
 0x18a   :  { %12402 = vmatprep.mubr.f32.mxu1 %v2785_v33  ;;  %v15423_v2 = vadd.f32 %v12097_v15, %v1628_v59  ;;  %v11972_v1 = vpop.f32.mrf.mxu0  ;;  %v2789_v15 = vld [vmem:[#allocation2 + $0x242] sm:$0xff] }
 0x18b   :  { %v1854_v22 = vpop.f32.mrf.mxu1  ;;  %v1630_v39 = vadd.f32 %v11972_v1, %v15147_v35 }
 0x18c   :  { %v15426_v23 = vadd.f32 %v1854_v22, %v1627_v53  ;;  %v1334_v17 = vpop.f32.mrf.mxu0  ;;  %12278 = vmatmul.mubr.f32.gmra.mxu0 %v2258_v14  ;;  %v2790_v22 = vld [vmem:[#allocation2 + $0x24a] sm:$0xff] }
 0x18d   :  { %v12100_v49 = vpop.f32.mrf.mxu1  ;;  %12403 = vmatmul.mubr.f32.gmra.mxu1 %v2786_v48  ;;  %v1629_v34 = vadd.f32 %v1334_v17, %v15150_v36  ;;  %12280 = vmatprep.mubr.f32.mxu0 %v2259_v0  ;;  %v2260_v48 = vld [vmem:[#allocation2 + $0x249] sm:$0xff] }
 0x18e   :  { %12405 = vmatprep.mubr.f32.mxu1 %v2787_v40  ;;  %v15429_v33 = vadd.f32 %v12100_v49, %v1630_v39  ;;  %v11975_v46 = vpop.f32.mrf.mxu0  ;;  %v2261_v40 = vld [vmem:[#allocation2 + $0x259] sm:$0xff] }
 0x18f   :  { %v1864_v59 = vpop.f32.mrf.mxu1  ;;  %v1632_v35 = vadd.f32 %v11975_v46, %v15153_v51  ;;  %v2791_v49 = vld [vmem:[#allocation2 + $0x25a] sm:$0xff] }
 0x190   :  { %v15432_v11 = vadd.f32 %v1864_v59, %v1629_v34  ;;  %v1344_v45 = vpop.f32.mrf.mxu0  ;;  %12281 = vmatmul.mubr.f32.gmra.mxu0 %v2260_v48  ;;  %v2792_v59 = vld [vmem:[#allocation2 + $0x262] sm:$0xff] }
 0x191   :  { %v12103_v53 = vpop.f32.mrf.mxu1  ;;  %12406 = vmatmul.mubr.f32.gmra.mxu1 %v2788_v55  ;;  %v1631_v36 = vadd.f32 %v1344_v45, %v15156_v5  ;;  %12283 = vmatprep.mubr.f32.mxu0 %v2261_v40  ;;  %v2262_v55 = vld [vmem:[#allocation2 + $0x261] sm:$0xff] }
 0x192   :  { %12408 = vmatprep.mubr.f32.mxu1 %v2789_v15  ;;  %v15435_v1 = vadd.f32 %v12103_v53, %v1632_v35  ;;  %v11978_v17 = vpop.f32.mrf.mxu0  ;;  %v2263_v15 = vld [vmem:[#allocation2 + $0x271] sm:$0xff] }
 0x193   :  { %v1874_v39 = vpop.f32.mrf.mxu1  ;;  %v1634_v51 = vadd.f32 %v11978_v17, %v15159_v54  ;;  %v2793_v53 = vld [vmem:[#allocation2 + $0x272] sm:$0xff] }
 0x194   :  { %v15438_v14 = vadd.f32 %v1874_v39, %v1631_v36  ;;  %v1354_v0 = vpop.f32.mrf.mxu0  ;;  %12284 = vmatmul.mubr.f32.gmra.mxu0 %v2262_v55  ;;  %v2794_v39 = vld [vmem:[#allocation2 + $0x27a] sm:$0xff] }
 0x195   :  { %v12106_v34 = vpop.f32.mrf.mxu1  ;;  %12409 = vmatmul.mubr.f32.gmra.mxu1 %v2790_v22  ;;  %v1633_v5 = vadd.f32 %v1354_v0, %v15162_v47  ;;  %12286 = vmatprep.mubr.f32.mxu0 %v2263_v15  ;;  %v2264_v22 = vld [vmem:[#allocation2 + $0x279] sm:$0xff] }
 0x196   :  { %12411 = vmatprep.mubr.f32.mxu1 %v2791_v49  ;;  %v15441_v46 = vadd.f32 %v12106_v34, %v1634_v51  ;;  %v11981_v45 = vpop.f32.mrf.mxu0  ;;  %v2265_v49 = vld [vmem:[#allocation2 + $0x289] sm:$0xff] }
 0x197   :  { %v1884_v35 = vpop.f32.mrf.mxu1  ;;  %v1636_v54 = vadd.f32 %v11981_v45, %v15165_v3  ;;  %v2795_v34 = vld [vmem:[#allocation2 + $0x28a] sm:$0xff] }
 0x198   :  { %v15444_v48 = vadd.f32 %v1884_v35, %v1633_v5  ;;  %v1364_v40 = vpop.f32.mrf.mxu0  ;;  %12287 = vmatmul.mubr.f32.gmra.mxu0 %v2264_v22  ;;  %v2796_v35 = vld [vmem:[#allocation2 + $0x292] sm:$0xff] }
 0x199   :  { %v12109_v36 = vpop.f32.mrf.mxu1  ;;  %12412 = vmatmul.mubr.f32.gmra.mxu1 %v2792_v59  ;;  %v1635_v47 = vadd.f32 %v1364_v40, %v15168_v28  ;;  %12289 = vmatprep.mubr.f32.mxu0 %v2265_v49  ;;  %v2266_v59 = vld [vmem:[#allocation2 + $0x291] sm:$0xff] }
 0x19a   :  { %12414 = vmatprep.mubr.f32.mxu1 %v2793_v53  ;;  %v15447_v17 = vadd.f32 %v12109_v36, %v1636_v54  ;;  %v11984_v0 = vpop.f32.mrf.mxu0  ;;  %v2267_v53 = vld [vmem:[#allocation2 + $0x2a1] sm:$0xff] }
 0x19b   :  { %v1894_v51 = vpop.f32.mrf.mxu1  ;;  %v1638_v3 = vadd.f32 %v11984_v0, %v15171_v21  ;;  %v2797_v36 = vld [vmem:[#allocation2 + $0x2a2] sm:$0xff] }
 0x19c   :  { %v15450_v55 = vadd.f32 %v1894_v51, %v1635_v47  ;;  %v1374_v15 = vpop.f32.mrf.mxu0  ;;  %12290 = vmatmul.mubr.f32.gmra.mxu0 %v2266_v59  ;;  %v2798_v51 = vld [vmem:[#allocation2 + $0x2aa] sm:$0xff] }
 0x19d   :  { %v12112_v5 = vpop.f32.mrf.mxu1  ;;  %12415 = vmatmul.mubr.f32.gmra.mxu1 %v2794_v39  ;;  %v1637_v28 = vadd.f32 %v1374_v15, %v15174_v31  ;;  %12292 = vmatprep.mubr.f32.mxu0 %v2267_v53  ;;  %v2268_v39 = vld [vmem:[#allocation2 + $0x2a9] sm:$0xff] }
 0x19e   :  { %12417 = vmatprep.mubr.f32.mxu1 %v2795_v34  ;;  %v15453_v45 = vadd.f32 %v12112_v5, %v1638_v3  ;;  %v11987_v40 = vpop.f32.mrf.mxu0  ;;  %v2269_v34 = vld [vmem:[#allocation2 + $0x2b9] sm:$0xff] }
 0x19f   :  { %v1904_v54 = vpop.f32.mrf.mxu1  ;;  %v1640_v21 = vadd.f32 %v11987_v40, %v15177_v42  ;;  %v2799_v5 = vld [vmem:[#allocation2 + $0x2ba] sm:$0xff] }
 0x1a0   :  { %v15456_v22 = vadd.f32 %v1904_v54, %v1637_v28  ;;  %v1384_v49 = vpop.f32.mrf.mxu0  ;;  %12293 = vmatmul.mubr.f32.gmra.mxu0 %v2268_v39  ;;  %v2800_v54 = vld [vmem:[#allocation2 + $0x2c2] sm:$0xff] }
 0x1a1   :  { %v12115_v47 = vpop.f32.mrf.mxu1  ;;  %12418 = vmatmul.mubr.f32.gmra.mxu1 %v2796_v35  ;;  %v1639_v31 = vadd.f32 %v1384_v49, %v15186_v41  ;;  %12295 = vmatprep.mubr.f32.mxu0 %v2269_v34  ;;  %v2270_v35 = vld [vmem:[#allocation2 + $0x2c1] sm:$0xff] }
 0x1a2   :  { %12420 = vmatprep.mubr.f32.mxu1 %v2797_v36  ;;  %v15459_v0 = vadd.f32 %v12115_v47, %v1640_v21  ;;  %v11990_v15 = vpop.f32.mrf.mxu0  ;;  %v2271_v36 = vld [vmem:[#allocation2 + $0x2d1] sm:$0xff] }
 0x1a3   :  { %v1914_v3 = vpop.f32.mrf.mxu1  ;;  %v1642_v42 = vadd.f32 %v11990_v15, %v15189_v58  ;;  %v2801_v47 = vld [vmem:[#allocation2 + $0x2d2] sm:$0xff] }
 0x1a4   :  { %v15462_v59 = vadd.f32 %v1914_v3, %v1639_v31  ;;  %v1394_v53 = vpop.f32.mrf.mxu0  ;;  %12296 = vmatmul.mubr.f32.gmra.mxu0 %v2270_v35  ;;  %v2802_v3 = vld [vmem:[#allocation2 + $0x2da] sm:$0xff] }
 0x1a5   :  { %v12118_v28 = vpop.f32.mrf.mxu1  ;;  %12421 = vmatmul.mubr.f32.gmra.mxu1 %v2798_v51  ;;  %v1641_v41 = vadd.f32 %v1394_v53, %v15192_v61  ;;  %12298 = vmatprep.mubr.f32.mxu0 %v2271_v36  ;;  %v2272_v51 = vld [vmem:[#allocation2 + $0x2d9] sm:$0xff] }
 0x1a6   :  { %12423 = vmatprep.mubr.f32.mxu1 %v2799_v5  ;;  %v15465_v40 = vadd.f32 %v12118_v28, %v1642_v42  ;;  %v11993_v49 = vpop.f32.mrf.mxu0  ;;  %v2273_v5 = vld [vmem:[#allocation2 + $0x2e9] sm:$0xff] }
 0x1a7   :  { %v1924_v21 = vpop.f32.mrf.mxu1  ;;  %v1644_v58 = vadd.f32 %v11993_v49, %v15195_v10  ;;  %v2803_v28 = vld [vmem:[#allocation2 + $0x2ea] sm:$0xff] }
 0x1a8   :  { %v15468_v39 = vadd.f32 %v1924_v21, %v1641_v41  ;;  %v1404_v34 = vpop.f32.mrf.mxu0  ;;  %12299 = vmatmul.mubr.f32.gmra.mxu0 %v2272_v51  ;;  %v2804_v21 = vld [vmem:[#allocation2 + $0x2f2] sm:$0xff] }
 0x1a9   :  { %v12121_v31 = vpop.f32.mrf.mxu1  ;;  %12424 = vmatmul.mubr.f32.gmra.mxu1 %v2800_v54  ;;  %v1643_v61 = vadd.f32 %v1404_v34, %v15198_v12  ;;  %12301 = vmatprep.mubr.f32.mxu0 %v2273_v5  ;;  %v2274_v54 = vld [vmem:[#allocation2 + $0x2f1] sm:$0xff] }
 0x1aa   :  { %12426 = vmatprep.mubr.f32.mxu1 %v2801_v47  ;;  %v15471_v15 = vadd.f32 %v12121_v31, %v1644_v58  ;;  %v11996_v53 = vpop.f32.mrf.mxu0  ;;  %v2275_v47 = vld [vmem:[#allocation2 + $0x301] sm:$0xff] }
 0x1ab   :  { %v1934_v42 = vpop.f32.mrf.mxu1  ;;  %v1646_v10 = vadd.f32 %v11996_v53, %v15201_v13  ;;  %v2805_v31 = vld [vmem:[#allocation2 + $0x302] sm:$0xff] }
 0x1ac   :  { %v15474_v35 = vadd.f32 %v1934_v42, %v1643_v61  ;;  %v1414_v36 = vpop.f32.mrf.mxu0  ;;  %12302 = vmatmul.mubr.f32.gmra.mxu0 %v2274_v54  ;;  %v2806_v42 = vld [vmem:[#allocation2 + $0x30a] sm:$0xff] }
 0x1ad   :  { %v12124_v41 = vpop.f32.mrf.mxu1  ;;  %12427 = vmatmul.mubr.f32.gmra.mxu1 %v2802_v3  ;;  %v1645_v12 = vadd.f32 %v1414_v36, %v15204_v16  ;;  %12304 = vmatprep.mubr.f32.mxu0 %v2275_v47  ;;  %v2276_v3 = vld [vmem:[#allocation2 + $0x309] sm:$0xff] }
 0x1ae   :  { %12429 = vmatprep.mubr.f32.mxu1 %v2803_v28  ;;  %v15477_v49 = vadd.f32 %v12124_v41, %v1646_v10  ;;  %v11999_v34 = vpop.f32.mrf.mxu0  ;;  %v2277_v28 = vld [vmem:[#allocation2 + $0x319] sm:$0xff] }
 0x1af   :  { %v1944_v58 = vpop.f32.mrf.mxu1  ;;  %v1648_v13 = vadd.f32 %v11999_v34, %v15207_v50  ;;  %v2807_v41 = vld [vmem:[#allocation2 + $0x31a] sm:$0xff] }
 0x1b0   :  { %v15480_v51 = vadd.f32 %v1944_v58, %v1645_v12  ;;  %v1424_v5 = vpop.f32.mrf.mxu0  ;;  %12305 = vmatmul.mubr.f32.gmra.mxu0 %v2276_v3  ;;  %v2808_v58 = vld [vmem:[#allocation2 + $0x322] sm:$0xff] }
 0x1b1   :  { %v12127_v61 = vpop.f32.mrf.mxu1  ;;  %12430 = vmatmul.mubr.f32.gmra.mxu1 %v2804_v21  ;;  %v1647_v16 = vadd.f32 %v1424_v5, %v15210_v57  ;;  %12307 = vmatprep.mubr.f32.mxu0 %v2277_v28  ;;  %v2278_v21 = vld [vmem:[#allocation2 + $0x321] sm:$0xff] }
 0x1b2   :  { %12432 = vmatprep.mubr.f32.mxu1 %v2805_v31  ;;  %v15483_v53 = vadd.f32 %v12127_v61, %v1648_v13  ;;  %v12002_v36 = vpop.f32.mrf.mxu0  ;;  %v2279_v31 = vld [vmem:[#allocation2 + $0x331] sm:$0xff] }
 0x1b3   :  { %v1954_v10 = vpop.f32.mrf.mxu1  ;;  %v1650_v50 = vadd.f32 %v12002_v36, %v15213_v38  ;;  %v2809_v61 = vld [vmem:[#allocation2 + $0x332] sm:$0xff] }
 0x1b4   :  { %v15486_v54 = vadd.f32 %v1954_v10, %v1647_v16  ;;  %v1434_v47 = vpop.f32.mrf.mxu0  ;;  %12308 = vmatmul.mubr.f32.gmra.mxu0 %v2278_v21  ;;  %v2810_v10 = vld [vmem:[#allocation2 + $0x33a] sm:$0xff] }
 0x1b5   :  { %v12130_v12 = vpop.f32.mrf.mxu1  ;;  %12433 = vmatmul.mubr.f32.gmra.mxu1 %v2806_v42  ;;  %v1649_v57 = vadd.f32 %v1434_v47, %v15216_v27  ;;  %12310 = vmatprep.mubr.f32.mxu0 %v2279_v31  ;;  %v2280_v42 = vld [vmem:[#allocation2 + $0x339] sm:$0xff] }
 0x1b6   :  { %12435 = vmatprep.mubr.f32.mxu1 %v2807_v41  ;;  %v15489_v34 = vadd.f32 %v12130_v12, %v1650_v50  ;;  %v12005_v5 = vpop.f32.mrf.mxu0  ;;  %v3278_v41 = vld [vmem:[#allocation2 + $0x30] sm:$0xff] }
 0x1b7   :  { %v1964_v13 = vpop.f32.mrf.mxu1  ;;  %v1652_v38 = vadd.f32 %v12005_v5, %v15219_v20  ;;  %v3808_v12 = vld [vmem:[#allocation2 + $0x31] sm:$0xff] }
 0x1b8   :  { %v15492_v3 = vadd.f32 %v1964_v13, %v1649_v57  ;;  %v1444_v28 = vpop.f32.mrf.mxu0  ;;  %12311 = vmatmul.mubr.f32.gmra.mxu0 %v2280_v42  ;;  %v3809_v13 = vld [vmem:[#allocation2 + $0x39] sm:$0xff] }
 0x1b9   :  { %v12133_v16 = vpop.f32.mrf.mxu1  ;;  %12436 = vmatmul.mubr.f32.gmra.mxu1 %v2808_v58  ;;  %v1651_v27 = vadd.f32 %v1444_v28, %v15221_v30  ;;  %12473 = vmatprep.mubr.f32.mxu0 %v3278_v41  ;;  %v3279_v58 = vld [vmem:[#allocation2 + $0x38] sm:$0xff] }
 0x1ba   :  { %12438 = vmatprep.mubr.f32.mxu1 %v2809_v61  ;;  %v15495_v36 = vadd.f32 %v12133_v16, %v1652_v38  ;;  %v12008_v47 = vpop.f32.mrf.mxu0  ;;  %v3280_v38 = vld [vmem:[#allocation2 + $0x48] sm:$0xff] }
 0x1bb   :  { %v1974_v50 = vpop.f32.mrf.mxu1  ;;  %v1654_v20 = vadd.f32 %v12008_v47, %v15223_v44  ;;  %v3810_v16 = vld [vmem:[#allocation2 + $0x49] sm:$0xff] }
 0x1bc   :  { %v15498_v21 = vadd.f32 %v1974_v50, %v1651_v27  ;;  %v1454_v31 = vpop.f32.mrf.mxu0  ;;  %12474 = vmatmul.mubr.f32.vlgmr.msra.gmra.mxu0 %v3279_v58  ;;  %v10101_v44 = vld [vmem:[%s18372_s1 + $0x470] sm:$0xff]  ;;  %v3812_v58 = vld [vmem:[#allocation2 + $0x61] sm:$0xff] }
 0x1bd   :  { %v12136_v57 = vpop.f32.mrf.mxu1  ;;  %12439 = vmatmul.mubr.f32.gmra.mxu1 %v2810_v10  ;;  %v1653_v61 = vadd.f32 %v1454_v31, %v15226_v9  ;;  %12698 = vmatpush3.msra.mxu0 %v15402_v60  ;;  %v3281_v9 = vld [vmem:[#allocation2 + $0x50] sm:$0xff]  ;;  %v10100_v60 = vld [vmem:[%s18372_s1 + $0x468] sm:$0xff] }
 0x1be   :  { %12601 = vmatprep.mubr.f32.mxu1 %v3808_v12  ;;  %v15501_v30 = vadd.f32 %v12136_v57, %v1654_v20  ;;  %v12011_v28 = vpop.f32.mrf.mxu0  ;;  %12476 = vmatprep.mubr.f32.mxu0 %v3280_v38  ;;  %v3811_v50 = vld [vmem:[#allocation2 + $0x51] sm:$0xff]  ;;  %v3282_v12 = vld [vmem:[#allocation2 + $0x60] sm:$0xff]  ;;  %v3813_v38 = vld [vmem:[#allocation2 + $0x69] sm:$0xff] }
 0x1bf   :  { %v1984_v5 = vpop.f32.mrf.mxu1  ;;  %v1656_v42 = vadd.f32 %v12011_v28, %v15236_v25  ;;  %12699 = vmatprep.subr.mxu0 %v10101_v44 }
 0x1c0   :  { %v15507_v10 = vadd.f32 %v1984_v5, %v1653_v61  ;;  %v1464_v27 = vpop.f32.mrf.mxu0  ;;  %12477 = vmatmul.mubr.f32.gmra.mxu0 %v3281_v9  ;;  %v3283_v5 = vld [vmem:[#allocation2 + $0x68] sm:$0xff]  ;;  %v3814_v9 = vld [vmem:[#allocation2 + $0x79] sm:$0xff] }
 0x1c1   :  { %v12139_v41 = vpop.f32.mrf.mxu1  ;;  %12602 = vmatmul.mubr.f32.vlgmr.msra.gmra.mxu1 %v3809_v13  ;;  %v1655_v47 = vadd.f32 %v1464_v27, %v15240_v63  ;;  %12479 = vmatprep.mubr.f32.mxu0 %v3282_v12 }
 0x1c2   :  { %12604 = vmatprep.mubr.f32.mxu1 %v3810_v16  ;;  %v15511_v20 = vadd.f32 %v12139_v41, %v1656_v42  ;;  %v12014_v25 = vpop.f32.mrf.mxu0  ;;  %12700 = vmatpush3.msra.mxu0 %v10101_v44  ;;  %v3284_v16 = vld [vmem:[#allocation2 + $0x78] sm:$0xff] }
 0x1c3   :  { %v1994_v57 = vpop.f32.mrf.mxu1  ;;  %v1658_v31 = vadd.f32 %v12014_v25, %v15249_v56  ;;  %12701 = vmatprep.subr.mxu0 %v10100_v60  ;;  %v10099_v56 = vld [vmem:[%s18372_s1 + $0x460] sm:$0xff] }
 0x1c4   :  { %v15517_v13 = vadd.f32 %v1994_v57, %v1655_v47  ;;  %v1474_v63 = vpop.f32.mrf.mxu0  ;;  %12480 = vmatmul.mubr.f32.gmra.mxu0 %v3283_v5  ;;  %v3285_v47 = vld [vmem:[#allocation2 + $0x80] sm:$0xff]  ;;  %v3816_v5 = vld [vmem:[#allocation2 + $0x91] sm:$0xff] }
 0x1c5   :  { %v12142_v61 = vpop.f32.mrf.mxu1  ;;  %12605 = vmatmul.mubr.f32.gmra.mxu1 %v3811_v50  ;;  %v1657_v28 = vadd.f32 %v1474_v63, %v15252_v52  ;;  %12482 = vmatprep.mubr.f32.mxu0 %v3284_v16  ;;  %v3815_v57 = vld [vmem:[#allocation2 + $0x81] sm:$0xff] }
 0x1c6   :  { %12607 = vmatprep.mubr.f32.mxu1 %v3812_v58  ;;  %v15520_v42 = vadd.f32 %v12142_v61, %v1658_v31  ;;  %v12017_v27 = vpop.f32.mrf.mxu0  ;;  %v3286_v58 = vld [vmem:[#allocation2 + $0x90] sm:$0xff]  ;;  %12702 = vmatpush3.msra.mxu0 %v10100_v60  ;;  %v3287_v60 = vld [vmem:[#allocation2 + $0x98] sm:$0xff] }
 0x1c7   :  { %v2004_v41 = vpop.f32.mrf.mxu1  ;;  %v1660_v50 = vadd.f32 %v12017_v27, %v15261_v62  ;;  %12703 = vmatprep.subr.mxu0 %v10099_v56  ;;  %v10098_v62 = vld [vmem:[%s18372_s1 + $0x458] sm:$0xff] }
 0x1c8   :  { %v15526_v12 = vadd.f32 %v2004_v41, %v1657_v28  ;;  %v1484_v52 = vpop.f32.mrf.mxu0  ;;  %12483 = vmatmul.mubr.f32.gmra.mxu0 %v3285_v47  ;;  %v3817_v41 = vld [vmem:[#allocation2 + $0x99] sm:$0xff]  ;;  %v3818_v47 = vld [vmem:[#allocation2 + $0xa9] sm:$0xff] }
 0x1c9   :  { %v12145_v44 = vpop.f32.mrf.mxu1  ;;  %12608 = vmatmul.mubr.f32.gmra.mxu1 %v3813_v38  ;;  %v1659_v25 = vadd.f32 %v1484_v52, %v15264_v8  ;;  %12485 = vmatprep.mubr.f32.mxu0 %v3286_v58 }
 0x1ca   :  { %12610 = vmatprep.mubr.f32.mxu1 %v3814_v9  ;;  %v15529_v31 = vadd.f32 %v12145_v44, %v1660_v50  ;;  %v12020_v63 = vpop.f32.mrf.mxu0  ;;  %v3288_v9 = vld [vmem:[#allocation2 + $0xa8] sm:$0xff]  ;;  %12704 = vmatpush3.msra.mxu0 %v10099_v56  ;;  %v3289_v56 = vld [vmem:[#allocation2 + $0xb0] sm:$0xff] }
 0x1cb   :  { %v2014_v61 = vpop.f32.mrf.mxu1  ;;  %v1662_v38 = vadd.f32 %v12020_v63, %v15273_v19  ;;  %12705 = vmatprep.subr.mxu0 %v10098_v62  ;;  %v10097_v19 = vld [vmem:[%s18372_s1 + $0x450] sm:$0xff] }
 0x1cc   :  { %v15535_v16 = vadd.f32 %v2014_v61, %v1659_v25  ;;  %v1494_v8 = vpop.f32.mrf.mxu0  ;;  %12486 = vmatmul.mubr.f32.gmra.mxu0 %v3287_v60  ;;  %v3819_v61 = vld [vmem:[#allocation2 + $0xb1] sm:$0xff]  ;;  %v3820_v60 = vld [vmem:[#allocation2 + $0xc1] sm:$0xff] }
 0x1cd   :  { %v12148_v28 = vpop.f32.mrf.mxu1  ;;  %12611 = vmatmul.mubr.f32.gmra.mxu1 %v3815_v57  ;;  %v1661_v27 = vadd.f32 %v1494_v8, %v15276_v43  ;;  %12488 = vmatprep.mubr.f32.mxu0 %v3288_v9 }
 0x1ce   :  { %12613 = vmatprep.mubr.f32.mxu1 %v3816_v5  ;;  %v15538_v50 = vadd.f32 %v12148_v28, %v1662_v38  ;;  %v12023_v52 = vpop.f32.mrf.mxu0  ;;  %v3290_v5 = vld [vmem:[#allocation2 + $0xc0] sm:$0xff]  ;;  %12706 = vmatpush3.msra.mxu0 %v10098_v62  ;;  %v3291_v62 = vld [vmem:[#allocation2 + $0xc8] sm:$0xff] }
 0x1cf   :  { %v2024_v44 = vpop.f32.mrf.mxu1  ;;  %v1664_v57 = vadd.f32 %v12023_v52, %v15285_v4  ;;  %12707 = vmatprep.subr.mxu0 %v10097_v19  ;;  %v10096_v4 = vld [vmem:[%s18372_s1 + $0x448] sm:$0xff] }
 0x1d0   :  { %v15544_v58 = vadd.f32 %v2024_v44, %v1661_v27  ;;  %v1504_v43 = vpop.f32.mrf.mxu0  ;;  %12489 = vmatmul.mubr.f32.gmra.mxu0 %v3289_v56  ;;  %v3821_v44 = vld [vmem:[#allocation2 + $0xc9] sm:$0xff]  ;;  %v3822_v56 = vld [vmem:[#allocation2 + $0xd9] sm:$0xff] }
 0x1d1   :  { %v12151_v25 = vpop.f32.mrf.mxu1  ;;  %12614 = vmatmul.mubr.f32.gmra.mxu1 %v3817_v41  ;;  %v1663_v63 = vadd.f32 %v1504_v43, %v15288_v6  ;;  %12491 = vmatprep.mubr.f32.mxu0 %v3290_v5 }
 0x1d2   :  { %12616 = vmatprep.mubr.f32.mxu1 %v3818_v47  ;;  %v15547_v38 = vadd.f32 %v12151_v25, %v1664_v57  ;;  %v12026_v8 = vpop.f32.mrf.mxu0  ;;  %v3292_v47 = vld [vmem:[#allocation2 + $0xd8] sm:$0xff]  ;;  %12708 = vmatpush3.msra.mxu0 %v10097_v19  ;;  %v3293_v19 = vld [vmem:[#allocation2 + $0xe0] sm:$0xff] }
 0x1d3   :  { %v2034_v28 = vpop.f32.mrf.mxu1  ;;  %v1666_v41 = vadd.f32 %v12026_v8, %v15297_v37  ;;  %12709 = vmatprep.subr.mxu0 %v10096_v4  ;;  %v10095_v37 = vld [vmem:[%s18372_s1 + $0x440] sm:$0xff]  ;;  %v18559_v8 = vld [vmem:[#allocation61_spill] sm:$0xff] }
 0x1d4   :  { %v15553_v9 = vadd.f32 %v2034_v28, %v1663_v63  ;;  %v1514_v6 = vpop.f32.mrf.mxu0  ;;  %12492 = vmatmul.mubr.f32.gmra.mxu0 %v3291_v62  ;;  %v3823_v28 = vld [vmem:[#allocation2 + $0xe1] sm:$0xff] }
 0x1d5   :  { %v12154_v27 = vpop.f32.mrf.mxu1  ;;  %12617 = vmatmul.mubr.f32.gmra.mxu1 %v3819_v61  ;;  %v1665_v52 = vadd.f32 %v1514_v6, %v15300_v26  ;;  %12494 = vmatprep.mubr.f32.mxu0 %v3292_v47  ;;  %v3824_v6 = vld [vmem:[#allocation2 + $0xf1] sm:$0xff] }
 0x1d6   :  { %12619 = vmatprep.mubr.f32.mxu1 %v3820_v60  ;;  %v15556_v57 = vadd.f32 %v12154_v27, %v1666_v41  ;;  %v12029_v43 = vpop.f32.mrf.mxu0  ;;  %v3294_v60 = vld [vmem:[#allocation2 + $0xf0] sm:$0xff]  ;;  %12710 = vmatpush3.msra.mxu0 %v10096_v4  ;;  %v3295_v4 = vld [vmem:[#allocation2 + $0xf8] sm:$0xff] }
 0x1d7   :  { %v2044_v25 = vpop.f32.mrf.mxu1  ;;  %v1668_v61 = vadd.f32 %v12029_v43, %v15309_v29  ;;  %12711 = vmatprep.subr.mxu0 %v10095_v37  ;;  %v10094_v29 = vld [vmem:[%s18372_s1 + $0x438] sm:$0xff] }
 0x1d8   :  { %18557 = vst [vmem:[#allocation86_spill] sm:$0xff] %v15556_v57  ;;  %v15562_v5 = vadd.f32 %v2044_v25, %v1665_v52  ;;  %v1524_v26 = vpop.f32.mrf.mxu0  ;;  %12495 = vmatmul.mubr.f32.gmra.mxu0 %v3293_v19  ;;  %v3825_v43 = vld [vmem:[#allocation2 + $0xf9] sm:$0xff] }
 0x1d9   :  { %v12157_v63 = vpop.f32.mrf.mxu1  ;;  %12620 = vmatmul.mubr.f32.gmra.mxu1 %v3821_v44  ;;  %v1667_v41 = vadd.f32 %v1524_v26, %v18559_v8  ;;  %v18561_v44 = vld [vmem:[#allocation62_spill] sm:$0xff]  ;;  %12497 = vmatprep.mubr.f32.mxu0 %v3294_v60 }
 0x1da   :  { %18558 = vst [vmem:[#allocation87_spill] sm:$0xff] %v15562_v5  ;;  %12622 = vmatprep.mubr.f32.mxu1 %v3822_v56  ;;  %v15565_v27 = vadd.f32 %v12157_v63, %v1668_v61  ;;  %v12032_v57 = vpop.f32.mrf.mxu0  ;;  %v3296_v61 = vld [vmem:[#allocation2 + $0x108] sm:$0xff]  ;;  %12712 = vmatpush3.msra.mxu0 %v10095_v37  ;;  %v18563_v63 = vld [vmem:[#allocation67_spill] sm:$0xff]  ;;  %v3297_v37 = vld [vmem:[#allocation2 + $0x110] sm:$0xff] }
 0x1db   :  { %v2054_v62 = vpop.f32.mrf.mxu1  ;;  %v1670_v47 = vadd.f32 %v12032_v57, %v18561_v44  ;;  %12713 = vmatprep.subr.mxu0 %v10094_v29  ;;  %v10093_v57 = vld [vmem:[%s18372_s1 + $0x430] sm:$0xff] }
 0x1dc   :  { %18560 = vst [vmem:[#allocation61_spill] sm:$0xff] %v15565_v27  ;;  %v15571_v52 = vadd.f32 %v2054_v62, %v1667_v41  ;;  %v1534_v56 = vpop.f32.mrf.mxu0  ;;  %v3826_v27 = vld [vmem:[#allocation2 + $0x109] sm:$0xff]  ;;  %12498 = vmatmul.mubr.f32.gmra.mxu0 %v3295_v4  ;;  %v3827_v44 = vld [vmem:[#allocation2 + $0x111] sm:$0xff] }
 0x1dd   :  { %v12160_v25 = vpop.f32.mrf.mxu1  ;;  %12623 = vmatmul.mubr.f32.gmra.mxu1 %v3823_v28  ;;  %v1669_v26 = vadd.f32 %v1534_v56, %v18563_v63  ;;  %v18565_v28 = vld [vmem:[#allocation70_spill] sm:$0xff]  ;;  %12500 = vmatprep.mubr.f32.mxu0 %v3296_v61 }
 0x1de   :  { %18562 = vst [vmem:[#allocation62_spill] sm:$0xff] %v15571_v52  ;;  %12625 = vmatprep.mubr.f32.mxu1 %v3824_v6  ;;  %v15574_v19 = vadd.f32 %v12160_v25, %v1670_v47  ;;  %v12035_v5 = vpop.f32.mrf.mxu0  ;;  %v3298_v47 = vld [vmem:[#allocation2 + $0x120] sm:$0xff]  ;;  %12714 = vmatpush3.msra.mxu0 %v10094_v29  ;;  %v3299_v29 = vld [vmem:[#allocation2 + $0x128] sm:$0xff] }
 0x1df   :  { %v2064_v8 = vpop.f32.mrf.mxu1  ;;  %v1672_v60 = vadd.f32 %v12035_v5, %v18565_v28  ;;  %v18567_v25 = vld [vmem:[#allocation55_spill] sm:$0xff]  ;;  %12715 = vmatprep.subr.mxu0 %v10093_v57  ;;  %v10092_v5 = vld [vmem:[%s18372_s1 + $0x428] sm:$0xff] }
 0x1e0   :  { %18564 = vst [vmem:[#allocation67_spill] sm:$0xff] %v15574_v19  ;;  %v15580_v41 = vadd.f32 %v2064_v8, %v1669_v26  ;;  %v1544_v6 = vpop.f32.mrf.mxu0  ;;  %v3828_v19 = vld [vmem:[#allocation2 + $0x121] sm:$0xff]  ;;  %12501 = vmatmul.mubr.f32.gmra.mxu0 %v3297_v37  ;;  %v3829_v28 = vld [vmem:[#allocation2 + $0x129] sm:$0xff] }
 0x1e1   :  { %v12163_v62 = vpop.f32.mrf.mxu1  ;;  %12626 = vmatmul.mubr.f32.gmra.mxu1 %v3825_v43  ;;  %v1671_v56 = vadd.f32 %v1544_v6, %v18567_v25  ;;  %v18569_v43 = vld [vmem:[#allocation57_spill] sm:$0xff]  ;;  %12503 = vmatprep.mubr.f32.mxu0 %v3298_v47 }
 0x1e2   :  { %18566 = vst [vmem:[#allocation70_spill] sm:$0xff] %v15580_v41  ;;  %12628 = vmatprep.mubr.f32.mxu1 %v3826_v27  ;;  %v15583_v4 = vadd.f32 %v12163_v62, %v1672_v60  ;;  %v12038_v52 = vpop.f32.mrf.mxu0  ;;  %v3300_v60 = vld [vmem:[#allocation2 + $0x138] sm:$0xff]  ;;  %12716 = vmatpush3.msra.mxu0 %v10093_v57  ;;  %v18571_v62 = vld [vmem:[#allocation73_spill] sm:$0xff]  ;;  %v3301_v57 = vld [vmem:[#allocation2 + $0x140] sm:$0xff] }
 0x1e3   :  { %v2074_v63 = vpop.f32.mrf.mxu1  ;;  %v1674_v61 = vadd.f32 %v12038_v52, %v18569_v43  ;;  %12717 = vmatprep.subr.mxu0 %v10092_v5  ;;  %v10091_v52 = vld [vmem:[%s18372_s1 + $0x420] sm:$0xff] }
 0x1e4   :  { %18568 = vst [vmem:[#allocation55_spill] sm:$0xff] %v15583_v4  ;;  %v15589_v26 = vadd.f32 %v2074_v63, %v1671_v56  ;;  %v1554_v8 = vpop.f32.mrf.mxu0  ;;  %v3830_v4 = vld [vmem:[#allocation2 + $0x139] sm:$0xff]  ;;  %12504 = vmatmul.mubr.f32.gmra.mxu0 %v3299_v29  ;;  %v3831_v43 = vld [vmem:[#allocation2 + $0x141] sm:$0xff] }
 0x1e5   :  { %v12166_v27 = vpop.f32.mrf.mxu1  ;;  %12629 = vmatmul.mubr.f32.gmra.mxu1 %v3827_v44  ;;  %v1673_v6 = vadd.f32 %v1554_v8, %v18571_v62  ;;  %v18573_v44 = vld [vmem:[#allocation74_spill] sm:$0xff]  ;;  %12506 = vmatprep.mubr.f32.mxu0 %v3300_v60 }
 0x1e6   :  { %18570 = vst [vmem:[#allocation57_spill] sm:$0xff] %v15589_v26  ;;  %12631 = vmatprep.mubr.f32.mxu1 %v3828_v19  ;;  %v15592_v37 = vadd.f32 %v12166_v27, %v1674_v61  ;;  %v12041_v41 = vpop.f32.mrf.mxu0  ;;  %v3302_v61 = vld [vmem:[#allocation2 + $0x150] sm:$0xff]  ;;  %12718 = vmatpush3.msra.mxu0 %v10092_v5  ;;  %v18575_v27 = vld [vmem:[#allocation75_spill] sm:$0xff]  ;;  %v3303_v5 = vld [vmem:[#allocation2 + $0x158] sm:$0xff] }
 0x1e7   :  { %v2084_v25 = vpop.f32.mrf.mxu1  ;;  %v1676_v47 = vadd.f32 %v12041_v41, %v18573_v44  ;;  %12719 = vmatprep.subr.mxu0 %v10091_v52  ;;  %v10090_v41 = vld [vmem:[%s18372_s1 + $0x418] sm:$0xff] }
 0x1e8   :  { %18572 = vst [vmem:[#allocation73_spill] sm:$0xff] %v15592_v37  ;;  %v15598_v56 = vadd.f32 %v2084_v25, %v1673_v6  ;;  %v1564_v63 = vpop.f32.mrf.mxu0  ;;  %v3832_v37 = vld [vmem:[#allocation2 + $0x151] sm:$0xff]  ;;  %12507 = vmatmul.mubr.f32.gmra.mxu0 %v3301_v57  ;;  %v3833_v44 = vld [vmem:[#allocation2 + $0x159] sm:$0xff] }
 0x1e9   :  { %v12169_v19 = vpop.f32.mrf.mxu1  ;;  %12632 = vmatmul.mubr.f32.gmra.mxu1 %v3829_v28  ;;  %v1675_v8 = vadd.f32 %v1564_v63, %v18575_v27  ;;  %v18577_v28 = vld [vmem:[#allocation76_spill] sm:$0xff]  ;;  %12509 = vmatprep.mubr.f32.mxu0 %v3302_v61 }
 0x1ea   :  { %18574 = vst [vmem:[#allocation74_spill] sm:$0xff] %v15598_v56  ;;  %12634 = vmatprep.mubr.f32.mxu1 %v3830_v4  ;;  %v15601_v29 = vadd.f32 %v12169_v19, %v1676_v47  ;;  %v12044_v26 = vpop.f32.mrf.mxu0  ;;  %v3304_v47 = vld [vmem:[#allocation2 + $0x168] sm:$0xff]  ;;  %12720 = vmatpush3.msra.mxu0 %v10091_v52  ;;  %v18579_v19 = vld [vmem:[#allocation77_spill] sm:$0xff] }
 0x1eb   :  { %v2094_v62 = vpop.f32.mrf.mxu1  ;;  %v1678_v60 = vadd.f32 %v12044_v26, %v18577_v28  ;;  %12721 = vmatprep.subr.mxu0 %v10090_v41  ;;  %v10089_v26 = vld [vmem:[%s18372_s1 + $0x410] sm:$0xff] }
 0x1ec   :  { %18576 = vst [vmem:[#allocation75_spill] sm:$0xff] %v15601_v29  ;;  %v15607_v6 = vadd.f32 %v2094_v62, %v1675_v8  ;;  %v1574_v25 = vpop.f32.mrf.mxu0  ;;  %v3834_v29 = vld [vmem:[#allocation2 + $0x169] sm:$0xff]  ;;  %12510 = vmatmul.mubr.f32.gmra.mxu0 %v3303_v5  ;;  %v3835_v28 = vld [vmem:[#allocation2 + $0x171] sm:$0xff] }
 0x1ed   :  { %v12172_v4 = vpop.f32.mrf.mxu1  ;;  %12635 = vmatmul.mubr.f32.gmra.mxu1 %v3831_v43  ;;  %v1677_v63 = vadd.f32 %v1574_v25, %v18579_v19  ;;  %v18581_v43 = vld [vmem:[#allocation78_spill] sm:$0xff]  ;;  %12512 = vmatprep.mubr.f32.mxu0 %v3304_v47  ;;  %v3305_v52 = vld [vmem:[#allocation2 + $0x170] sm:$0xff] }
 0x1ee   :  { %18578 = vst [vmem:[#allocation76_spill] sm:$0xff] %v15607_v6  ;;  %12637 = vmatprep.mubr.f32.mxu1 %v3832_v37  ;;  %v15610_v57 = vadd.f32 %v12172_v4, %v1678_v60  ;;  %v12047_v56 = vpop.f32.mrf.mxu0  ;;  %v3306_v60 = vld [vmem:[#allocation2 + $0x180] sm:$0xff]  ;;  %12722 = vmatpush3.msra.mxu0 %v10090_v41  ;;  %v3307_v41 = vld [vmem:[#allocation2 + $0x188] sm:$0xff] }
 0x1ef   :  { %v2104_v27 = vpop.f32.mrf.mxu1  ;;  %v1680_v61 = vadd.f32 %v12047_v56, %v18581_v43  ;;  %v18582_v4 = vld [vmem:[#allocation79_spill] sm:$0xff]  ;;  %12723 = vmatprep.subr.mxu0 %v10089_v26  ;;  %v10088_v56 = vld [vmem:[%s18372_s1 + $0x408] sm:$0xff] }
 0x1f0   :  { %18580 = vst [vmem:[#allocation77_spill] sm:$0xff] %v15610_v57  ;;  %v15616_v8 = vadd.f32 %v2104_v27, %v1677_v63  ;;  %v1584_v62 = vpop.f32.mrf.mxu0  ;;  %v3836_v57 = vld [vmem:[#allocation2 + $0x181] sm:$0xff]  ;;  %12513 = vmatmul.mubr.f32.gmra.mxu0 %v3305_v52  ;;  %v3837_v43 = vld [vmem:[#allocation2 + $0x189] sm:$0xff] }
 0x1f1   :  { %v12175_v37 = vpop.f32.mrf.mxu1  ;;  %12638 = vmatmul.mubr.f32.gmra.mxu1 %v3833_v44  ;;  %v1679_v25 = vadd.f32 %v1584_v62, %v18582_v4  ;;  %v18584_v44 = vld [vmem:[#allocation80_spill] sm:$0xff]  ;;  %12515 = vmatprep.mubr.f32.mxu0 %v3306_v60  ;;  %v3838_v4 = vld [vmem:[#allocation2 + $0x199] sm:$0xff] }
 0x1f2   :  { %12640 = vmatprep.mubr.f32.mxu1 %v3834_v29  ;;  %v15619_v5 = vadd.f32 %v12175_v37, %v1680_v61  ;;  %v12050_v6 = vpop.f32.mrf.mxu0  ;;  %12724 = vmatpush3.msra.mxu0 %v10089_v26  ;;  %v18586_v61 = vld [vmem:[#allocation81_spill] sm:$0xff]  ;;  %v15636_v26 = vld [vmem:[#allocation2] sm:$0xff] }
 0x1f3   :  { %v2114_v19 = vpop.f32.mrf.mxu1  ;;  %v1682_v47 = vadd.f32 %v12050_v6, %v18584_v44  ;;  %12725 = vmatprep.subr.mxu0 %v10088_v56  ;;  %v10087_v6 = vld [vmem:[%s18372_s1 + $0x400] sm:$0xff] }
 0x1f4   :  { %18583 = vst [vmem:[#allocation78_spill] sm:$0xff] %v15619_v5  ;;  %v15625_v63 = vadd.f32 %v2114_v19, %v1679_v25  ;;  %v1594_v27 = vpop.f32.mrf.mxu0  ;;  %12516 = vmatmul.mubr.f32.gmra.mxu0 %v3307_v41  ;;  %v3839_v44 = vld [vmem:[#allocation2 + $0x1a1] sm:$0xff] }
 0x1f5   :  { %v12178_v29 = vpop.f32.mrf.mxu1  ;;  %12641 = vmatmul.mubr.f32.gmra.mxu1 %v3835_v28  ;;  %v1681_v37 = vadd.f32 %v1594_v27, %v18586_v61  ;;  %v18588_v28 = vld [vmem:[#allocation82_spill] sm:$0xff]  ;;  %12518 = vmatprep.mubr.f32.mxu0 %v15636_v26 }
 0x1f6   :  { %18585 = vst [vmem:[#allocation79_spill] sm:$0xff] %v15625_v63  ;;  %12643 = vmatprep.mubr.f32.mxu1 %v3836_v57  ;;  %v15628_v62 = vadd.f32 %v12178_v29, %v1682_v47  ;;  %v12053_v5 = vpop.f32.mrf.mxu0  ;;  %v3310_v47 = vld [vmem:[#allocation2 + $0x1e0] sm:$0xff]  ;;  %12726 = vmatpush3.msra.mxu0 %v10088_v56  ;;  %v3841_v56 = vld [vmem:[#allocation2 + $0x1e9] sm:$0xff] }
 0x1f7   :  { %v2124_v52 = vpop.f32.mrf.mxu1  ;;  %v1684_v60 = vadd.f32 %v12053_v5, %v18588_v28  ;;  %v18590_v29 = vld [vmem:[#allocation83_spill] sm:$0xff]  ;;  %12727 = vmatprep.subr.mxu0 %v10087_v6 }
 0x1f8   :  { %18587 = vst [vmem:[#allocation80_spill] sm:$0xff] %v15628_v62  ;;  %v15634_v25 = vadd.f32 %v2124_v52, %v1681_v37  ;;  %v1604_v19 = vpop.f32.mrf.mxu0  ;;  %v3840_v62 = vld [vmem:[#allocation2 + $0x1e1] sm:$0xff]  ;;  %12519 = vmatmul.mubr.f32.gmra.mxu0 %v15636_v26 }
 0x1f9   :  { %v12181_v57 = vpop.f32.mrf.mxu1  ;;  %12644 = vmatmul.mubr.f32.gmra.mxu1 %v3837_v43  ;;  %v1683_v41 = vadd.f32 %v1604_v19, %v18590_v29  ;;  %v18592_v43 = vld [vmem:[#allocation84_spill] sm:$0xff]  ;;  %12521 = vmatprep.mubr.f32.mxu0 %v3310_v47  ;;  %v3312_v19 = vld [vmem:[#allocation2 + $0x1f8] sm:$0xff]  ;;  %v3313_v47 = vld [vmem:[#allocation2 + $0x200] sm:$0xff] }
 0x1fa   :  { %18589 = vst [vmem:[#allocation81_spill] sm:$0xff] %v15634_v25  ;;  %12646 = vmatprep.mubr.f32.mxu1 %v3838_v4  ;;  %v15640_v27 = vadd.f32 %v12181_v57, %v1684_v60  ;;  %v12056_v5 = vpop.f32.mrf.mxu0  ;;  %v3311_v4 = vld [vmem:[#allocation2 + $0x1e8] sm:$0xff]  ;;  %12728 = vmatpush3.msra.mxu0 %v10087_v6  ;;  %v3314_v6 = vld [vmem:[#allocation2 + $0x210] sm:$0xff] }
 0x1fb   :  { %v2134_v61 = vpop.f32.mrf.mxu1  ;;  %v1686_v37 = vadd.f32 %v12056_v5, %v18592_v43  ;;  %v3843_v43 = vld [vmem:[#allocation2 + $0x201] sm:$0xff] }
 0x1fc   :  { %18591 = vst [vmem:[#allocation82_spill] sm:$0xff] %v15640_v27  ;;  %v15644_v52 = vadd.f32 %v2134_v61, %v1683_v41  ;;  %v1614_v25 = vpop.f32.mrf.mxu0  ;;  %v3842_v27 = vld [vmem:[#allocation2 + $0x1f9] sm:$0xff]  ;;  %12522 = vmatmul.mubr.f32.gmra.mxu0 %v3311_v4  ;;  %v18594_v41 = vld [vmem:[#allocation85_spill] sm:$0xff] }
 0x1fd   :  { %v12184_v28 = vpop.f32.mrf.mxu1  ;;  %12647 = vmatmul.mubr.f32.gmra.mxu1 %v3839_v44  ;;  %v1685_v60 = vadd.f32 %v1614_v25, %v15407_v24  ;;  %12524 = vmatprep.mubr.f32.mxu0 %v3312_v19 }
 0x1fe   :  { %12649 = vmatprep.mubr.f32.mxu1 %v3840_v62  ;;  %v15647_v57 = vadd.f32 %v12184_v28, %v1686_v37  ;;  %v12219_v63 = vpop.f32.mrf.mxu0  ;;  %v3844_v28 = vld [vmem:[#allocation2 + $0x211] sm:$0xff] }
 0x1ff   :  { %v2144_v29 = vpop.f32.mrf.mxu1  ;;  %v2684_v61 = vadd.f32 %v12219_v63, %v18594_v41 }
 0x200   :  { %18593 = vst [vmem:[#allocation83_spill] sm:$0xff] %v15647_v57  ;;  %v15649_v5 = vadd.f32 %v2144_v29, %v1685_v60  ;;  %v2364_v62 = vpop.f32.mrf.mxu0  ;;  %12525 = vmatmul.mubr.f32.gmra.mxu0 %v3313_v47  ;;  %v3316_v29 = vld [vmem:[#allocation2 + $0x228] sm:$0xff] }
 0x201   :  { %v12347_v44 = vpop.f32.mrf.mxu1  ;;  %12650 = vmatmul.mubr.f32.gmra.mxu1 %v3841_v56  ;;  %v2683_v24 = vadd.f32 %v2364_v62, %v15414_v18  ;;  %12527 = vmatprep.mubr.f32.mxu0 %v3314_v6  ;;  %v3315_v56 = vld [vmem:[#allocation2 + $0x218] sm:$0xff] }
 0x202   :  { %12652 = vmatprep.mubr.f32.mxu1 %v3842_v27  ;;  %v15653_v25 = vadd.f32 %v12347_v44, %v2684_v61  ;;  %v12222_v57 = vpop.f32.mrf.mxu0  ;;  %v3845_v27 = vld [vmem:[#allocation2 + $0x219] sm:$0xff]  ;;  %v3846_v44 = vld [vmem:[#allocation2 + $0x229] sm:$0xff] }
 0x203   :  { %v2894_v37 = vpop.f32.mrf.mxu1  ;;  %v2686_v4 = vadd.f32 %v12222_v57, %v15417_v7 }
 0x204   :  { %v15656_v60 = vadd.f32 %v2894_v37, %v2683_v24  ;;  %v2374_v19 = vpop.f32.mrf.mxu0  ;;  %12528 = vmatmul.mubr.f32.gmra.mxu0 %v3315_v56  ;;  %v3847_v24 = vld [vmem:[#allocation2 + $0x231] sm:$0xff]  ;;  %v3318_v37 = vld [vmem:[#allocation2 + $0x240] sm:$0xff] }
 0x205   :  { %v12350_v63 = vpop.f32.mrf.mxu1  ;;  %12653 = vmatmul.mubr.f32.gmra.mxu1 %v3843_v43  ;;  %v2685_v18 = vadd.f32 %v2374_v19, %v15420_v32  ;;  %12530 = vmatprep.mubr.f32.mxu0 %v3316_v29  ;;  %v3317_v43 = vld [vmem:[#allocation2 + $0x230] sm:$0xff] }
 0x206   :  { %12655 = vmatprep.mubr.f32.mxu1 %v3844_v28  ;;  %v15659_v41 = vadd.f32 %v12350_v63, %v2686_v4  ;;  %v12225_v62 = vpop.f32.mrf.mxu0  ;;  %v3848_v63 = vld [vmem:[#allocation2 + $0x241] sm:$0xff] }
 0x207   :  { %v2904_v61 = vpop.f32.mrf.mxu1  ;;  %v2688_v7 = vadd.f32 %v12225_v62, %v15423_v2 }
 0x208   :  { %v15662_v57 = vadd.f32 %v2904_v61, %v2685_v18  ;;  %v2384_v6 = vpop.f32.mrf.mxu0  ;;  %12531 = vmatmul.mubr.f32.gmra.mxu0 %v3317_v43  ;;  %v3849_v61 = vld [vmem:[#allocation2 + $0x249] sm:$0xff] }
 0x209   :  { %v12353_v47 = vpop.f32.mrf.mxu1  ;;  %12656 = vmatmul.mubr.f32.gmra.mxu1 %v3845_v27  ;;  %v2687_v32 = vadd.f32 %v2384_v6, %v15426_v23  ;;  %12533 = vmatprep.mubr.f32.mxu0 %v3318_v37  ;;  %v3319_v27 = vld [vmem:[#allocation2 + $0x248] sm:$0xff] }
 0x20a   :  { %12658 = vmatprep.mubr.f32.mxu1 %v3846_v44  ;;  %v15665_v28 = vadd.f32 %v12353_v47, %v2688_v7  ;;  %v12228_v19 = vpop.f32.mrf.mxu0  ;;  %v3320_v44 = vld [vmem:[#allocation2 + $0x258] sm:$0xff] }
 0x20b   :  { %v2914_v4 = vpop.f32.mrf.mxu1  ;;  %v2690_v2 = vadd.f32 %v12228_v19, %v15429_v33  ;;  %v3850_v47 = vld [vmem:[#allocation2 + $0x259] sm:$0xff] }
 0x20c   :  { %v15668_v56 = vadd.f32 %v2914_v4, %v2687_v32  ;;  %v2394_v29 = vpop.f32.mrf.mxu0  ;;  %12534 = vmatmul.mubr.f32.gmra.mxu0 %v3319_v27  ;;  %v10119_v33 = vld [vmem:[%s18374_s2 + $0xf8] sm:$0xff]  ;;  %v3321_v32 = vld [vmem:[#allocation2 + $0x260] sm:$0xff] }
 0x20d   :  { %v12356_v18 = vpop.f32.mrf.mxu1  ;;  %12659 = vmatmul.mubr.f32.gmra.mxu1 %v3847_v24  ;;  %v2689_v23 = vadd.f32 %v2394_v29, %v15432_v11  ;;  %12536 = vmatprep.mubr.f32.mxu0 %v3320_v44  ;;  %v3851_v11 = vld [vmem:[#allocation2 + $0x261] sm:$0xff]  ;;  %v3852_v27 = vld [vmem:[#allocation2 + $0x271] sm:$0xff] }
 0x20e   :  { %12661 = vmatprep.mubr.f32.mxu1 %v3848_v63  ;;  %v15671_v62 = vadd.f32 %v12356_v18, %v2690_v2  ;;  %v12231_v6 = vpop.f32.mrf.mxu0  ;;  %v3322_v63 = vld [vmem:[#allocation2 + $0x270] sm:$0xff]  ;;  %12825 = vmatprep.subr.mxu1 %v10119_v33  ;;  %v3323_v44 = vld [vmem:[#allocation2 + $0x278] sm:$0xff] }
 0x20f   :  { %v2924_v7 = vpop.f32.mrf.mxu1  ;;  %v2692_v43 = vadd.f32 %v12231_v6, %v15435_v1  ;;  %12826 = vmatpush3.msra.mxu1 %v10119_v33  ;;  %v3324_v6 = vld [vmem:[#allocation2 + $0x288] sm:$0xff] }
 0x210   :  { %v15677_v24 = vadd.f32 %v2924_v7, %v2689_v23  ;;  %v2404_v4 = vpop.f32.mrf.mxu0  ;;  %12537 = vmatmul.mubr.f32.gmra.mxu0 %v3321_v32  ;;  %v3854_v33 = vld [vmem:[#allocation2 + $0x289] sm:$0xff] }
 0x211   :  { %v12359_v37 = vpop.f32.mrf.mxu1  ;;  %12662 = vmatmul.mubr.f32.gmra.mxu1 %v3849_v61  ;;  %v2691_v19 = vadd.f32 %v2404_v4, %v15438_v14  ;;  %12539 = vmatprep.mubr.f32.mxu0 %v3322_v63 }
 0x212   :  { %12664 = vmatprep.mubr.f32.mxu1 %v3850_v47  ;;  %v15680_v2 = vadd.f32 %v12359_v37, %v2692_v43  ;;  %v12234_v29 = vpop.f32.mrf.mxu0  ;;  %v3853_v47 = vld [vmem:[#allocation2 + $0x279] sm:$0xff] }
 0x213   :  { %v2934_v18 = vpop.f32.mrf.mxu1  ;;  %v2694_v1 = vadd.f32 %v12234_v29, %v15441_v46  ;;  %v10118_v46 = vld [vmem:[%s18374_s2 + $0xf0] sm:$0xff] }
 0x214   :  { %v15683_v23 = vadd.f32 %v2934_v18, %v2691_v19  ;;  %v2414_v7 = vpop.f32.mrf.mxu0  ;;  %12540 = vmatmul.mubr.f32.gmra.mxu0 %v3323_v44  ;;  %12827 = vmatprep.subr.mxu1 %v10118_v46  ;;  %v3325_v19 = vld [vmem:[#allocation2 + $0x290] sm:$0xff]  ;;  %v3856_v44 = vld [vmem:[#allocation2 + $0x2a1] sm:$0xff] }
 0x215   :  { %v12362_v61 = vpop.f32.mrf.mxu1  ;;  %12665 = vmatmul.mubr.f32.gmra.mxu1 %v3851_v11  ;;  %v2693_v14 = vadd.f32 %v2414_v7, %v15444_v48  ;;  %12542 = vmatprep.mubr.f32.mxu0 %v3324_v6  ;;  %v3855_v18 = vld [vmem:[#allocation2 + $0x291] sm:$0xff]  ;;  %v3327_v6 = vld [vmem:[#allocation2 + $0x2a8] sm:$0xff] }
 0x216   :  { %12667 = vmatprep.mubr.f32.mxu1 %v3852_v27  ;;  %v15686_v43 = vadd.f32 %v12362_v61, %v2694_v1  ;;  %v12237_v32 = vpop.f32.mrf.mxu0  ;;  %v3326_v27 = vld [vmem:[#allocation2 + $0x2a0] sm:$0xff]  ;;  %12828 = vmatpush3.msra.mxu1 %v10118_v46  ;;  %v3328_v46 = vld [vmem:[#allocation2 + $0x2b8] sm:$0xff] }
 0x217   :  { %v2944_v37 = vpop.f32.mrf.mxu1  ;;  %v2696_v4 = vadd.f32 %v12237_v32, %v15447_v17 }
 0x218   :  { %v15692_v11 = vadd.f32 %v2944_v37, %v2693_v14  ;;  %v2424_v48 = vpop.f32.mrf.mxu0  ;;  %12543 = vmatmul.mubr.f32.gmra.mxu0 %v3325_v19 }
 0x219   :  { %v12365_v63 = vpop.f32.mrf.mxu1  ;;  %12668 = vmatmul.mubr.f32.gmra.mxu1 %v3853_v47  ;;  %v2695_v29 = vadd.f32 %v2424_v48, %v15450_v55  ;;  %12545 = vmatprep.mubr.f32.mxu0 %v3326_v27 }
 0x21a   :  { %12670 = vmatprep.mubr.f32.mxu1 %v3854_v33  ;;  %v15695_v1 = vadd.f32 %v12365_v63, %v2696_v4  ;;  %v12240_v7 = vpop.f32.mrf.mxu0  ;;  %v3857_v33 = vld [vmem:[#allocation2 + $0x2a9] sm:$0xff]  ;;  %v3858_v63 = vld [vmem:[#allocation2 + $0x2b9] sm:$0xff] }
 0x21b   :  { %v2954_v61 = vpop.f32.mrf.mxu1  ;;  %v2698_v17 = vadd.f32 %v12240_v7, %v15453_v45  ;;  %v10117_v45 = vld [vmem:[%s18374_s2 + $0xe8] sm:$0xff] }
 0x21c   :  { %v15698_v14 = vadd.f32 %v2954_v61, %v2695_v29  ;;  %v2434_v37 = vpop.f32.mrf.mxu0  ;;  %12546 = vmatmul.mubr.f32.gmra.mxu0 %v3327_v6  ;;  %12829 = vmatprep.subr.mxu1 %v10117_v45  ;;  %v3329_v29 = vld [vmem:[#allocation2 + $0x2c0] sm:$0xff]  ;;  %v3860_v6 = vld [vmem:[#allocation2 + $0x2d1] sm:$0xff] }
 0x21d   :  { %v12368_v47 = vpop.f32.mrf.mxu1  ;;  %12671 = vmatmul.mubr.f32.gmra.mxu1 %v3855_v18  ;;  %v2697_v55 = vadd.f32 %v2434_v37, %v15456_v22  ;;  %12548 = vmatprep.mubr.f32.mxu0 %v3328_v46  ;;  %v3859_v61 = vld [vmem:[#allocation2 + $0x2c1] sm:$0xff]  ;;  %v3331_v46 = vld [vmem:[#allocation2 + $0x2d8] sm:$0xff] }
 0x21e   :  { %12673 = vmatprep.mubr.f32.mxu1 %v3856_v44  ;;  %v15701_v32 = vadd.f32 %v12368_v47, %v2698_v17  ;;  %v12243_v19 = vpop.f32.mrf.mxu0  ;;  %v3330_v44 = vld [vmem:[#allocation2 + $0x2d0] sm:$0xff]  ;;  %12830 = vmatpush3.msra.mxu1 %v10117_v45 }
 0x21f   :  { %v2964_v4 = vpop.f32.mrf.mxu1  ;;  %v2700_v48 = vadd.f32 %v12243_v19, %v15459_v0 }
 0x220   :  { %v15707_v18 = vadd.f32 %v2964_v4, %v2697_v55  ;;  %v2444_v22 = vpop.f32.mrf.mxu0  ;;  %12549 = vmatmul.mubr.f32.gmra.mxu0 %v3329_v29  ;;  %v3861_v4 = vld [vmem:[#allocation2 + $0x2d9] sm:$0xff] }
 0x221   :  { %v12371_v27 = vpop.f32.mrf.mxu1  ;;  %12674 = vmatmul.mubr.f32.gmra.mxu1 %v3857_v33  ;;  %v15710_v7 = vadd.f32 %v2444_v22, %v15462_v59  ;;  %12551 = vmatprep.mubr.f32.mxu0 %v3330_v44  ;;  %v3863_v44 = vld [vmem:[#allocation2 + $0x2f1] sm:$0xff] }
 0x222   :  { %12676 = vmatprep.mubr.f32.mxu1 %v3858_v63  ;;  %v15712_v17 = vadd.f32 %v12371_v27, %v2700_v48  ;;  %v12246_v0 = vpop.f32.mrf.mxu0  ;;  %v3332_v63 = vld [vmem:[#allocation2 + $0x2e8] sm:$0xff] }
 0x223   :  { %v15714_v47 = vpop.f32.mrf.mxu1  ;;  %v2702_v37 = vadd.f32 %v12246_v0, %v15465_v40  ;;  %v3862_v48 = vld [vmem:[#allocation2 + $0x2e9] sm:$0xff]  ;;  %v10116_v40 = vld [vmem:[%s18374_s2 + $0xe0] sm:$0xff] }
 0x224   :  { %v2454_v55 = vpop.f32.mrf.mxu0  ;;  %12552 = vmatmul.mubr.f32.gmra.mxu0 %v3331_v46  ;;  %12831 = vmatprep.subr.mxu1 %v10116_v40  ;;  %v3864_v46 = vld [vmem:[#allocation2 + $0x301] sm:$0xff] }
 0x225   :  { %v12374_v33 = vpop.f32.mrf.mxu1  ;;  %12677 = vmatmul.mubr.f32.gmra.mxu1 %v3859_v61  ;;  %v15718_v59 = vadd.f32 %v2454_v55, %v15468_v39  ;;  %12554 = vmatprep.mubr.f32.mxu0 %v3332_v63  ;;  %v3333_v61 = vld [vmem:[#allocation2 + $0x2f0] sm:$0xff]  ;;  %v3335_v63 = vld [vmem:[#allocation2 + $0x308] sm:$0xff] }
 0x226   :  { %12679 = vmatprep.mubr.f32.mxu1 %v3860_v6  ;;  %v15720_v45 = vadd.f32 %v12374_v33, %v2702_v37  ;;  %v12249_v27 = vpop.f32.mrf.mxu0  ;;  %v3334_v6 = vld [vmem:[#allocation2 + $0x300] sm:$0xff]  ;;  %12832 = vmatpush3.msra.mxu1 %v10116_v40  ;;  %v3336_v40 = vld [vmem:[#allocation2 + $0x318] sm:$0xff] }
 0x227   :  { %18595 = vst [vmem:[#allocation84_spill] sm:$0xff] %v15718_v59  ;;  %v15722_v19 = vpop.f32.mrf.mxu1  ;;  %v2704_v29 = vadd.f32 %v12249_v27, %v15471_v15  ;;  %v3865_v27 = vld [vmem:[#allocation2 + $0x309] sm:$0xff] }
 0x228   :  { %18596 = vst [vmem:[#allocation85_spill] sm:$0xff] %v15722_v19  ;;  %v2464_v39 = vpop.f32.mrf.mxu0  ;;  %12555 = vmatmul.mubr.f32.gmra.mxu0 %v3333_v61  ;;  %v4390_v19 = vld [vmem:[#allocation2 + $0x2d2] sm:$0xff] }
 0x229   :  { %v12377_v22 = vpop.f32.mrf.mxu1  ;;  %12680 = vmatmul.mubr.f32.gmra.mxu1 %v3861_v4  ;;  %v15729_v0 = vadd.f32 %v2464_v39, %v15474_v35  ;;  %12557 = vmatprep.mubr.f32.mxu0 %v3334_v6  ;;  %v3866_v39 = vld [vmem:[#allocation2 + $0x319] sm:$0xff] }
 0x22a   :  { %12682 = vmatprep.mubr.f32.mxu1 %v3862_v48  ;;  %v15731_v37 = vadd.f32 %v12377_v22, %v2704_v29  ;;  %v12252_v55 = vpop.f32.mrf.mxu0 }
 0x22b   :  { %18597 = vst [vmem:[#allocation88_spill] sm:$0xff] %v15729_v0  ;;  %v15733_v33 = vpop.f32.mrf.mxu1  ;;  %v2706_v15 = vadd.f32 %v12252_v55, %v15477_v49  ;;  %v10115_v49 = vld [vmem:[%s18374_s2 + $0xd8] sm:$0xff]  ;;  %v3867_v55 = vld [vmem:[#allocation2 + $0x321] sm:$0xff] }
 0x22c   :  { %18598 = vst [vmem:[#allocation89_spill] sm:$0xff] %v15733_v33  ;;  %v2474_v48 = vpop.f32.mrf.mxu0  ;;  %12558 = vmatmul.mubr.f32.gmra.mxu0 %v3335_v63  ;;  %12833 = vmatprep.subr.mxu1 %v10115_v49  ;;  %v3868_v63 = vld [vmem:[#allocation2 + $0x331] sm:$0xff] }
 0x22d   :  { %v12380_v4 = vpop.f32.mrf.mxu1  ;;  %12683 = vmatmul.mubr.f32.gmra.mxu1 %v3863_v44  ;;  %v15737_v35 = vadd.f32 %v2474_v48, %v15480_v51  ;;  %12560 = vmatprep.mubr.f32.mxu0 %v3336_v40  ;;  %v3339_v40 = vld [vmem:[#allocation2 + $0x338] sm:$0xff] }
 0x22e   :  { %12685 = vmatprep.mubr.f32.mxu1 %v3864_v46  ;;  %v15739_v29 = vadd.f32 %v12380_v4, %v2706_v15  ;;  %v12255_v61 = vpop.f32.mrf.mxu0  ;;  %v3337_v46 = vld [vmem:[#allocation2 + $0x320] sm:$0xff]  ;;  %v3338_v15 = vld [vmem:[#allocation2 + $0x330] sm:$0xff]  ;;  %12834 = vmatpush3.msra.mxu1 %v10115_v49 }
 0x22f   :  { %18599 = vst [vmem:[#allocation90_spill] sm:$0xff] %v15737_v35  ;;  %v15741_v22 = vpop.f32.mrf.mxu1  ;;  %v2708_v44 = vadd.f32 %v12255_v61, %v15483_v53  ;;  %v3869_v61 = vld [vmem:[#allocation2 + $0x339] sm:$0xff] }
 0x230   :  { %18600 = vst [vmem:[#allocation91_spill] sm:$0xff] %v15741_v22  ;;  %v2484_v51 = vpop.f32.mrf.mxu0  ;;  %12561 = vmatmul.mubr.f32.gmra.mxu0 %v3337_v46  ;;  %v10114_v46 = vld [vmem:[%s18374_s2 + $0xd0] sm:$0xff] }
 0x231   :  { %v12383_v6 = vpop.f32.mrf.mxu1  ;;  %12686 = vmatmul.mubr.f32.gmra.mxu1 %v3865_v27  ;;  %v15748_v4 = vadd.f32 %v2484_v51, %v15486_v54  ;;  %12563 = vmatprep.mubr.f32.mxu0 %v3338_v15  ;;  %v4338_v15 = vld [vmem:[#allocation2 + $0x32] sm:$0xff] }
 0x232   :  { %12688 = vmatprep.mubr.f32.mxu1 %v3866_v39  ;;  %v15750_v48 = vadd.f32 %v12383_v6, %v2708_v44  ;;  %v12258_v35 = vpop.f32.mrf.mxu0  ;;  %v3870_v6 = vld [vmem:[#allocation2 + $0x349] sm:$0xff]  ;;  %12835 = vmatprep.subr.mxu1 %v10114_v46 }
 0x233   :  { %18601 = vst [vmem:[#allocation92_spill] sm:$0xff] %v15748_v4  ;;  %v15752_v22 = vpop.f32.mrf.mxu1  ;;  %v2710_v53 = vadd.f32 %v12258_v35, %v15489_v34  ;;  %12836 = vmatpush3.msra.mxu1 %v10114_v46 }
 0x234   :  { %18602 = vst [vmem:[#allocation93_spill] sm:$0xff] %v15752_v22  ;;  %v2494_v39 = vpop.f32.mrf.mxu0  ;;  %12564 = vmatmul.mubr.f32.gmra.mxu0 %v3339_v40  ;;  %v4380_v22 = vld [vmem:[#allocation2 + $0x25a] sm:$0xff] }
 0x235   :  { %v12386_v27 = vpop.f32.mrf.mxu1  ;;  %12689 = vmatmul.mubr.f32.gmra.mxu1 %v3867_v55  ;;  %v15756_v49 = vadd.f32 %v2494_v39, %v15492_v3  ;;  %12566 = vmatprep.mubr.f32.mxu0 %v15636_v26  ;;  %v3871_v55 = vld [vmem:[#allocation2 + $0x351] sm:$0xff] }
 0x236   :  { %12691 = vmatprep.mubr.f32.mxu1 %v3868_v63  ;;  %v15758_v54 = vadd.f32 %v12386_v27, %v2710_v53  ;;  %v12261_v34 = vpop.f32.mrf.mxu0 }
 0x237   :  { %18603 = vst [vmem:[#allocation94_spill] sm:$0xff] %v15756_v49  ;;  %v15760_v44 = vpop.f32.mrf.mxu1  ;;  %v2712_v35 = vadd.f32 %v12261_v34, %v15495_v36  ;;  %v4340_v34 = vld [vmem:[#allocation2 + $0x4a] sm:$0xff] }
 0x238   :  { %18604 = vst [vmem:[#allocation95_spill] sm:$0xff] %v15760_v44  ;;  %v2504_v3 = vpop.f32.mrf.mxu0  ;;  %12567 = vmatmul.mubr.f32.gmra.mxu0 %v15636_v26  ;;  %v4367_v44 = vld [vmem:[#allocation2 + $0x18a] sm:$0xff] }
 0x239   :  { %v12389_v51 = vpop.f32.mrf.mxu1  ;;  %12692 = vmatmul.mubr.f32.gmra.mxu1 %v3869_v61  ;;  %v15768_v63 = vadd.f32 %v2504_v3, %v15498_v21  ;;  %12729 = vmatprep.mubr.f32.mxu0 %v4338_v15  ;;  %v4339_v61 = vld [vmem:[#allocation2 + $0x3a] sm:$0xff]  ;;  %v4371_v49 = vld [vmem:[#allocation2 + $0x1ea] sm:$0xff] }
 0x23a   :  { %12694 = vmatprep.mubr.f32.mxu1 %v3870_v6  ;;  %v15770_v53 = vadd.f32 %v12389_v51, %v2712_v35  ;;  %v12264_v40 = vpop.f32.mrf.mxu0  ;;  %v10113_v51 = vld [vmem:[%s18374_s2 + $0xc8] sm:$0xff] }
 0x23b   :  { %18605 = vst [vmem:[#allocation96_spill] sm:$0xff] %v15768_v63  ;;  %v15772_v27 = vpop.f32.mrf.mxu1  ;;  %v2714_v36 = vadd.f32 %v12264_v40, %v15501_v30  ;;  %12837 = vmatprep.subr.mxu1 %v10113_v51  ;;  %v4363_v63 = vld [vmem:[#allocation2 + $0x15a] sm:$0xff] }
 0x23c   :  { %18606 = vst [vmem:[#allocation97_spill] sm:$0xff] %v15772_v27  ;;  %v2514_v6 = vpop.f32.mrf.mxu0  ;;  %12730 = vmatmul.mubr.f32.vlgmr.msra.gmra.mxu0 %v4339_v61  ;;  %12838 = vmatpush3.msra.mxu1 %v10113_v51  ;;  %v5143_v27 = vld [vmem:[%s18374_s2 + $0x60] sm:$0xff] }
 0x23d   :  { %v12392_v39 = vpop.f32.mrf.mxu1  ;;  %12695 = vmatmul.mubr.f32.gmra.mxu1 %v3871_v55  ;;  %v15777_v46 = vadd.f32 %v2514_v6, %v15507_v10  ;;  %12732 = vmatprep.mubr.f32.mxu0 %v4340_v34  ;;  %v4341_v55 = vld [vmem:[#allocation2 + $0x52] sm:$0xff]  ;;  %v4342_v10 = vld [vmem:[#allocation2 + $0x62] sm:$0xff]  ;;  %v4344_v34 = vld [vmem:[#allocation2 + $0x7a] sm:$0xff] }
 0x23e   :  { %v15779_v21 = vadd.f32 %v12392_v39, %v2714_v36  ;;  %v12267_v26 = vpop.f32.mrf.mxu0 }
 0x23f   :  { %18607 = vst [vmem:[#allocation98_spill] sm:$0xff] %v15777_v46  ;;  %v15781_v35 = vpop.f32.mrf.mxu1  ;;  %v2716_v30 = vadd.f32 %v12267_v26, %v15511_v20  ;;  %v4343_v20 = vld [vmem:[#allocation2 + $0x6a] sm:$0xff] }
 0x240   :  { %18608 = vst [vmem:[#allocation99_spill] sm:$0xff] %v15781_v35  ;;  %v2524_v15 = vpop.f32.mrf.mxu0  ;;  %12733 = vmatmul.mubr.f32.gmra.mxu0 %v4341_v55 }
 0x241   :  { %v12395_v3 = vpop.f32.mrf.mxu1  ;;  %v15788_v40 = vadd.f32 %v2524_v15, %v15517_v13  ;;  %12735 = vmatprep.mubr.f32.mxu0 %v4342_v10  ;;  %v4345_v15 = vld [vmem:[#allocation2 + $0x82] sm:$0xff] }
 0x242   :  { %v15790_v36 = vadd.f32 %v12395_v3, %v2716_v30  ;;  %v12270_v6 = vpop.f32.mrf.mxu0  ;;  %v10112_v30 = vld [vmem:[%s18374_s2 + $0xc0] sm:$0xff] }
 0x243   :  { %18609 = vst [vmem:[#allocation100_spill] sm:$0xff] %v15788_v40  ;;  %v15792_v39 = vpop.f32.mrf.mxu1  ;;  %v2718_v61 = vadd.f32 %v12270_v6, %v15520_v42  ;;  %12839 = vmatprep.subr.mxu1 %v10112_v30 }
 0x244   :  { %18610 = vst [vmem:[#allocation101_spill] sm:$0xff] %v15792_v39  ;;  %v2534_v26 = vpop.f32.mrf.mxu0  ;;  %12736 = vmatmul.mubr.f32.gmra.mxu0 %v4343_v20  ;;  %12840 = vmatpush3.msra.mxu1 %v10112_v30  ;;  %v18628_v39 = vld [vmem:[#allocation70_spill] sm:$0xff] }
 0x245   :  { %v12398_v35 = vpop.f32.mrf.mxu1  ;;  %v15796_v51 = vadd.f32 %v2534_v26, %v15526_v12  ;;  %12738 = vmatprep.mubr.f32.mxu0 %v4344_v34  ;;  %v4346_v12 = vld [vmem:[#allocation2 + $0x92] sm:$0xff]  ;;  %v4348_v34 = vld [vmem:[#allocation2 + $0xaa] sm:$0xff] }
 0x246   :  { %v15798_v46 = vadd.f32 %v12398_v35, %v2718_v61  ;;  %v12273_v3 = vpop.f32.mrf.mxu0 }
 0x247   :  { %18611 = vst [vmem:[#allocation102_spill] sm:$0xff] %v15796_v51  ;;  %v15800_v13 = vpop.f32.mrf.mxu1  ;;  %v2720_v42 = vadd.f32 %v12273_v3, %v15529_v31  ;;  %v4347_v31 = vld [vmem:[#allocation2 + $0x9a] sm:$0xff] }
 0x248   :  { %18612 = vst [vmem:[#allocation103_spill] sm:$0xff] %v15800_v13  ;;  %v2544_v10 = vpop.f32.mrf.mxu0  ;;  %12739 = vmatmul.mubr.f32.gmra.mxu0 %v4345_v15 }
 0x249   :  { %v12401_v55 = vpop.f32.mrf.mxu1  ;;  %v15807_v35 = vadd.f32 %v2544_v10, %v15535_v16  ;;  %12741 = vmatprep.mubr.f32.mxu0 %v4346_v12  ;;  %v4349_v10 = vld [vmem:[#allocation2 + $0xb2] sm:$0xff] }
 0x24a   :  { %v15809_v6 = vadd.f32 %v12401_v55, %v2720_v42  ;;  %v12276_v26 = vpop.f32.mrf.mxu0  ;;  %v10111_v42 = vld [vmem:[%s18374_s2 + $0xb8] sm:$0xff] }
 0x24b   :  { %18613 = vst [vmem:[#allocation104_spill] sm:$0xff] %v15807_v35  ;;  %v15811_v61 = vpop.f32.mrf.mxu1  ;;  %v2722_v20 = vadd.f32 %v12276_v26, %v15538_v50  ;;  %12841 = vmatprep.subr.mxu1 %v10111_v42 }
 0x24c   :  { %18614 = vst [vmem:[#allocation105_spill] sm:$0xff] %v15811_v61  ;;  %v2554_v3 = vpop.f32.mrf.mxu0  ;;  %12742 = vmatmul.mubr.f32.gmra.mxu0 %v4347_v31  ;;  %12842 = vmatpush3.msra.mxu1 %v10111_v42  ;;  %v18620_v61 = vld [vmem:[#allocation87_spill] sm:$0xff] }
 0x24d   :  { %v12404_v13 = vpop.f32.mrf.mxu1  ;;  %v15815_v30 = vadd.f32 %v2554_v3, %v15544_v58  ;;  %12744 = vmatprep.mubr.f32.mxu0 %v4348_v34  ;;  %v4350_v58 = vld [vmem:[#allocation2 + $0xc2] sm:$0xff]  ;;  %v4352_v34 = vld [vmem:[#allocation2 + $0xda] sm:$0xff] }
 0x24e   :  { %v15817_v51 = vadd.f32 %v12404_v13, %v2722_v20  ;;  %v12279_v55 = vpop.f32.mrf.mxu0 }
 0x24f   :  { %18615 = vst [vmem:[#allocation106_spill] sm:$0xff] %v15815_v30  ;;  %v15819_v16 = vpop.f32.mrf.mxu1  ;;  %v2724_v50 = vadd.f32 %v12279_v55, %v15547_v38  ;;  %v4351_v38 = vld [vmem:[#allocation2 + $0xca] sm:$0xff] }
 0x250   :  { %18616 = vst [vmem:[#allocation107_spill] sm:$0xff] %v15819_v16  ;;  %v2564_v12 = vpop.f32.mrf.mxu0  ;;  %12745 = vmatmul.mubr.f32.gmra.mxu0 %v4349_v10  ;;  %v18619_v16 = vld [vmem:[#allocation86_spill] sm:$0xff] }
 0x251   :  { %v12407_v15 = vpop.f32.mrf.mxu1  ;;  %v15826_v13 = vadd.f32 %v2564_v12, %v15553_v9  ;;  %12747 = vmatprep.mubr.f32.mxu0 %v4350_v58  ;;  %v4353_v58 = vld [vmem:[#allocation2 + $0xe2] sm:$0xff] }
 0x252   :  { %v15828_v26 = vadd.f32 %v12407_v15, %v2724_v50  ;;  %v12282_v3 = vpop.f32.mrf.mxu0  ;;  %v10110_v50 = vld [vmem:[%s18374_s2 + $0xb0] sm:$0xff] }
 0x253   :  { %18617 = vst [vmem:[#allocation108_spill] sm:$0xff] %v15826_v13  ;;  %v15830_v20 = vpop.f32.mrf.mxu1  ;;  %v2726_v31 = vadd.f32 %v12282_v3, %v18619_v16  ;;  %12843 = vmatprep.subr.mxu1 %v10110_v50  ;;  %v18623_v16 = vld [vmem:[#allocation61_spill] sm:$0xff] }
 0x254   :  { %18618 = vst [vmem:[#allocation109_spill] sm:$0xff] %v15830_v20  ;;  %v2574_v55 = vpop.f32.mrf.mxu0  ;;  %12748 = vmatmul.mubr.f32.gmra.mxu0 %v4351_v38  ;;  %12844 = vmatpush3.msra.mxu1 %v10110_v50  ;;  %v18627_v20 = vld [vmem:[#allocation67_spill] sm:$0xff] }
 0x255   :  { %v12410_v30 = vpop.f32.mrf.mxu1  ;;  %v15834_v42 = vadd.f32 %v2574_v55, %v18620_v61  ;;  %12750 = vmatprep.mubr.f32.mxu0 %v4352_v34  ;;  %v4354_v61 = vld [vmem:[#allocation2 + $0xf2] sm:$0xff]  ;;  %v4356_v34 = vld [vmem:[#allocation2 + $0x10a] sm:$0xff] }
 0x256   :  { %v15836_v35 = vadd.f32 %v12410_v30, %v2726_v31  ;;  %v12285_v15 = vpop.f32.mrf.mxu0  ;;  %v18624_v55 = vld [vmem:[#allocation62_spill] sm:$0xff] }
 0x257   :  { %18621 = vst [vmem:[#allocation86_spill] sm:$0xff] %v15834_v42  ;;  %v15838_v9 = vpop.f32.mrf.mxu1  ;;  %v2728_v10 = vadd.f32 %v12285_v15, %v18623_v16  ;;  %v4355_v15 = vld [vmem:[#allocation2 + $0xfa] sm:$0xff] }
 0x258   :  { %18622 = vst [vmem:[#allocation87_spill] sm:$0xff] %v15838_v9  ;;  %v2584_v3 = vpop.f32.mrf.mxu0  ;;  %12751 = vmatmul.mubr.f32.gmra.mxu0 %v4353_v58 }
 0x259   :  { %v12413_v12 = vpop.f32.mrf.mxu1  ;;  %v15845_v30 = vadd.f32 %v2584_v3, %v18624_v55  ;;  %12753 = vmatprep.mubr.f32.mxu0 %v4354_v61  ;;  %v4357_v61 = vld [vmem:[#allocation2 + $0x112] sm:$0xff] }
 0x25a   :  { %v15847_v31 = vadd.f32 %v12413_v12, %v2728_v10  ;;  %v12288_v42 = vpop.f32.mrf.mxu0  ;;  %v10109_v10 = vld [vmem:[%s18374_s2 + $0xa8] sm:$0xff] }
 0x25b   :  { %18625 = vst [vmem:[#allocation61_spill] sm:$0xff] %v15845_v30  ;;  %v15849_v9 = vpop.f32.mrf.mxu1  ;;  %v2730_v38 = vadd.f32 %v12288_v42, %v18627_v20  ;;  %12845 = vmatprep.subr.mxu1 %v10109_v10  ;;  %v18631_v20 = vld [vmem:[#allocation55_spill] sm:$0xff] }
 0x25c   :  { %18626 = vst [vmem:[#allocation62_spill] sm:$0xff] %v15849_v9  ;;  %v2594_v16 = vpop.f32.mrf.mxu0  ;;  %12754 = vmatmul.mubr.f32.gmra.mxu0 %v4355_v15  ;;  %12846 = vmatpush3.msra.mxu1 %v10109_v10  ;;  %v5146_v15 = vld [vmem:[%s18374_s2 + $0x78] sm:$0xff]  ;;  %v4359_v10 = vld [vmem:[#allocation2 + $0x12a] sm:$0xff] }
 0x25d   :  { %v12416_v13 = vpop.f32.mrf.mxu1  ;;  %v15853_v50 = vadd.f32 %v2594_v16, %v18628_v39  ;;  %12756 = vmatprep.mubr.f32.mxu0 %v4356_v34  ;;  %v4358_v39 = vld [vmem:[#allocation2 + $0x122] sm:$0xff]  ;;  %v18632_v16 = vld [vmem:[#allocation57_spill] sm:$0xff]  ;;  %12953 = vmatprep.subr.mxu0 %v5146_v15  ;;  %v4360_v30 = vld [vmem:[#allocation2 + $0x13a] sm:$0xff] }
 0x25e   :  { %v15855_v40 = vadd.f32 %v12416_v13, %v2730_v38  ;;  %v12291_v12 = vpop.f32.mrf.mxu0  ;;  %12954 = vmatpush3.msra.mxu0 %v5146_v15  ;;  %v5144_v15 = vld [vmem:[%s18374_s2 + $0x68] sm:$0xff] }
 0x25f   :  { %18629 = vst [vmem:[#allocation67_spill] sm:$0xff] %v15853_v50  ;;  %v15857_v3 = vpop.f32.mrf.mxu1  ;;  %v2732_v42 = vadd.f32 %v12291_v12, %v18631_v20  ;;  %v18635_v12 = vld [vmem:[#allocation73_spill] sm:$0xff] }
 0x260   :  { %18630 = vst [vmem:[#allocation70_spill] sm:$0xff] %v15857_v3  ;;  %v2604_v55 = vpop.f32.mrf.mxu0  ;;  %12757 = vmatmul.mubr.f32.gmra.mxu0 %v4357_v61 }
 0x261   :  { %v12419_v58 = vpop.f32.mrf.mxu1  ;;  %v15864_v13 = vadd.f32 %v2604_v55, %v18632_v16  ;;  %12759 = vmatprep.mubr.f32.mxu0 %v4358_v39 }
 0x262   :  { %v15866_v38 = vadd.f32 %v12419_v58, %v2732_v42  ;;  %v12294_v50 = vpop.f32.mrf.mxu0  ;;  %v5145_v42 = vld [vmem:[%s18374_s2 + $0x70] sm:$0xff]  ;;  %v18636_v58 = vld [vmem:[#allocation74_spill] sm:$0xff] }
 0x263   :  { %18633 = vst [vmem:[#allocation55_spill] sm:$0xff] %v15864_v13  ;;  %v15868_v3 = vpop.f32.mrf.mxu1  ;;  %v2734_v20 = vadd.f32 %v12294_v50, %v18635_v12  ;;  %v10108_v50 = vld [vmem:[%s18374_s2 + $0xa0] sm:$0xff]  ;;  %12955 = vmatprep.subr.mxu0 %v5145_v42 }
 0x264   :  { %18634 = vst [vmem:[#allocation57_spill] sm:$0xff] %v15868_v3  ;;  %v2614_v9 = vpop.f32.mrf.mxu0  ;;  %12760 = vmatmul.mubr.f32.gmra.mxu0 %v4359_v10  ;;  %12847 = vmatprep.subr.mxu1 %v10108_v50  ;;  %v18639_v12 = vld [vmem:[#allocation75_spill] sm:$0xff] }
 0x265   :  { %v12422_v34 = vpop.f32.mrf.mxu1  ;;  %v15878_v55 = vadd.f32 %v2614_v9, %v18636_v58  ;;  %12762 = vmatprep.mubr.f32.mxu0 %v4360_v30  ;;  %12848 = vmatpush3.msra.mxu1 %v10108_v50  ;;  %v4362_v58 = vld [vmem:[#allocation2 + $0x152] sm:$0xff] }
 0x266   :  { %v15880_v61 = vadd.f32 %v12422_v34, %v2734_v20  ;;  %v12297_v39 = vpop.f32.mrf.mxu0  ;;  %v4361_v20 = vld [vmem:[#allocation2 + $0x142] sm:$0xff]  ;;  %12956 = vmatpush3.msra.mxu0 %v5145_v42  ;;  %v18643_v30 = vld [vmem:[#allocation77_spill] sm:$0xff] }
 0x267   :  { %18637 = vst [vmem:[#allocation73_spill] sm:$0xff] %v15878_v55  ;;  %v15882_v16 = vpop.f32.mrf.mxu1  ;;  %v2736_v3 = vadd.f32 %v12297_v39, %v18639_v12  ;;  %12957 = vmatprep.subr.mxu0 %v5144_v15 }
 0x268   :  { %18638 = vst [vmem:[#allocation74_spill] sm:$0xff] %v15882_v16  ;;  %v2624_v34 = vpop.f32.mrf.mxu0  ;;  %v18640_v16 = vld [vmem:[#allocation76_spill] sm:$0xff]  ;;  %12763 = vmatmul.mubr.f32.gmra.mxu0 %v4361_v20  ;;  %v10107_v20 = vld [vmem:[%s18374_s2 + $0x98] sm:$0xff] }
 0x269   :  { %v12425_v9 = vpop.f32.mrf.mxu1  ;;  %v15892_v55 = vadd.f32 %v2624_v34, %v18640_v16  ;;  %12765 = vmatprep.mubr.f32.mxu0 %v4362_v58  ;;  %12958 = vmatpush3.msra.mxu0 %v5144_v15  ;;  %v4364_v16 = vld [vmem:[#allocation2 + $0x16a] sm:$0xff]  ;;  %v5142_v58 = vld [vmem:[%s18374_s2 + $0x58] sm:$0xff] }
 0x26a   :  { %v15894_v13 = vadd.f32 %v12425_v9, %v2736_v3  ;;  %v12300_v39 = vpop.f32.mrf.mxu0  ;;  %12959 = vmatprep.subr.mxu0 %v5143_v27  ;;  %12849 = vmatprep.subr.mxu1 %v10107_v20 }
 0x26b   :  { %18641 = vst [vmem:[#allocation75_spill] sm:$0xff] %v15892_v55  ;;  %v15896_v10 = vpop.f32.mrf.mxu1  ;;  %v2738_v12 = vadd.f32 %v12300_v39, %v18643_v30  ;;  %12960 = vmatpush3.msra.mxu0 %v5143_v27  ;;  %v18646_v39 = vld [vmem:[#allocation78_spill] sm:$0xff]  ;;  %12850 = vmatpush3.msra.mxu1 %v10107_v20  ;;  %v18647_v27 = vld [vmem:[#allocation79_spill] sm:$0xff] }
 0x26c   :  { %18642 = vst [vmem:[#allocation76_spill] sm:$0xff] %v15896_v10  ;;  %v2634_v42 = vpop.f32.mrf.mxu0  ;;  %12766 = vmatmul.mubr.f32.gmra.mxu0 %v4363_v63  ;;  %12961 = vmatprep.subr.mxu0 %v5142_v58 }
 0x26d   :  { %v12428_v50 = vpop.f32.mrf.mxu1  ;;  %v15903_v3 = vadd.f32 %v2634_v42, %v15616_v8  ;;  %12768 = vmatprep.mubr.f32.mxu0 %v4364_v16  ;;  %12962 = vmatpush3.msra.mxu0 %v5142_v58  ;;  %v5140_v16 = vld [vmem:[%s18374_s2 + $0x48] sm:$0xff] }
 0x26e   :  { %v15905_v9 = vadd.f32 %v12428_v50, %v2738_v12  ;;  %v12303_v15 = vpop.f32.mrf.mxu0  ;;  %v4365_v12 = vld [vmem:[#allocation2 + $0x172] sm:$0xff] }
 0x26f   :  { %18644 = vst [vmem:[#allocation77_spill] sm:$0xff] %v15903_v3  ;;  %v15907_v34 = vpop.f32.mrf.mxu1  ;;  %v2740_v30 = vadd.f32 %v12303_v15, %v18646_v39  ;;  %v5141_v50 = vld [vmem:[%s18374_s2 + $0x50] sm:$0xff]  ;;  %v18650_v15 = vld [vmem:[#allocation80_spill] sm:$0xff] }
 0x270   :  { %18645 = vst [vmem:[#allocation110_spill] sm:$0xff] %v15907_v34  ;;  %v2644_v42 = vpop.f32.mrf.mxu0  ;;  %v4366_v34 = vld [vmem:[#allocation2 + $0x182] sm:$0xff]  ;;  %12769 = vmatmul.mubr.f32.gmra.mxu0 %v4365_v12  ;;  %12963 = vmatprep.subr.mxu0 %v5141_v50  ;;  %v10106_v12 = vld [vmem:[%s18374_s2 + $0x90] sm:$0xff] }
 0x271   :  { %v12431_v8 = vpop.f32.mrf.mxu1  ;;  %v15920_v3 = vadd.f32 %v2644_v42, %v18647_v27  ;;  %12771 = vmatprep.mubr.f32.mxu0 %v4366_v34  ;;  %12964 = vmatpush3.msra.mxu0 %v5141_v50  ;;  %v4368_v27 = vld [vmem:[#allocation2 + $0x19a] sm:$0xff] }
 0x272   :  { %v15922_v10 = vadd.f32 %v12431_v8, %v2740_v30  ;;  %v12306_v20 = vpop.f32.mrf.mxu0  ;;  %12965 = vmatprep.subr.mxu0 %v5140_v16  ;;  %v18651_v30 = vld [vmem:[#allocation81_spill] sm:$0xff]  ;;  %v5139_v34 = vld [vmem:[%s18374_s2 + $0x40] sm:$0xff]  ;;  %12851 = vmatprep.subr.mxu1 %v10106_v12 }
 0x273   :  { %18648 = vst [vmem:[#allocation78_spill] sm:$0xff] %v15920_v3  ;;  %v15924_v63 = vpop.f32.mrf.mxu1  ;;  %v2742_v39 = vadd.f32 %v12306_v20, %v18650_v15  ;;  %12966 = vmatpush3.msra.mxu0 %v5140_v16  ;;  %v18654_v20 = vld [vmem:[#allocation82_spill] sm:$0xff]  ;;  %12852 = vmatpush3.msra.mxu1 %v10106_v12 }
 0x274   :  { %18649 = vst [vmem:[#allocation79_spill] sm:$0xff] %v15924_v63  ;;  %v2654_v42 = vpop.f32.mrf.mxu0  ;;  %12772 = vmatmul.mubr.f32.gmra.mxu0 %v4367_v44  ;;  %12967 = vmatprep.subr.mxu0 %v5139_v34 }
 0x275   :  { %v12434_v55 = vpop.f32.mrf.mxu1  ;;  %v15931_v8 = vadd.f32 %v2654_v42, %v18651_v30  ;;  %12774 = vmatprep.mubr.f32.mxu0 %v4368_v27  ;;  %12968 = vmatpush3.msra.mxu0 %v5139_v34  ;;  %v5137_v27 = vld [vmem:[%s18374_s2 + $0x30] sm:$0xff] }
 0x276   :  { %v15933_v58 = vadd.f32 %v12434_v55, %v2742_v39  ;;  %v12309_v50 = vpop.f32.mrf.mxu0  ;;  %v4369_v55 = vld [vmem:[#allocation2 + $0x1a2] sm:$0xff]  ;;  %v5138_v39 = vld [vmem:[%s18374_s2 + $0x38] sm:$0xff] }
 0x277   :  { %18652 = vst [vmem:[#allocation80_spill] sm:$0xff] %v15931_v8  ;;  %v15935_v63 = vpop.f32.mrf.mxu1  ;;  %v2744_v15 = vadd.f32 %v12309_v50, %v18654_v20  ;;  %12969 = vmatprep.subr.mxu0 %v5138_v39  ;;  %v18657_v50 = vld [vmem:[#allocation83_spill] sm:$0xff] }
 0x278   :  { %18653 = vst [vmem:[#allocation81_spill] sm:$0xff] %v15935_v63  ;;  %v2664_v30 = vpop.f32.mrf.mxu0  ;;  %v4370_v63 = vld [vmem:[#allocation2 + $0x1e2] sm:$0xff]  ;;  %12775 = vmatmul.mubr.f32.gmra.mxu0 %v4369_v55 }
 0x279   :  { %v12437_v42 = vpop.f32.mrf.mxu1  ;;  %v15948_v16 = vadd.f32 %v2664_v30, %v15644_v52  ;;  %12777 = vmatprep.mubr.f32.mxu0 %v4370_v63  ;;  %12970 = vmatpush3.msra.mxu0 %v5138_v39  ;;  %v4372_v30 = vld [vmem:[#allocation2 + $0x1fa] sm:$0xff]  ;;  %v10105_v55 = vld [vmem:[%s18374_s2 + $0x88] sm:$0xff] }
 0x27a   :  { %v15950_v8 = vadd.f32 %v12437_v42, %v2744_v15  ;;  %v12312_v12 = vpop.f32.mrf.mxu0  ;;  %12971 = vmatprep.subr.mxu0 %v5137_v27  ;;  %v5136_v63 = vld [vmem:[%s18374_s2 + $0x28] sm:$0xff]  ;;  %12853 = vmatprep.subr.mxu1 %v10105_v55 }
 0x27b   :  { %18655 = vst [vmem:[#allocation82_spill] sm:$0xff] %v15948_v16  ;;  %v15952_v44 = vpop.f32.mrf.mxu1  ;;  %v2746_v20 = vadd.f32 %v12312_v12, %v18657_v50  ;;  %12972 = vmatpush3.msra.mxu0 %v5137_v27  ;;  %12854 = vmatpush3.msra.mxu1 %v10105_v55  ;;  %v5135_v50 = vld [vmem:[%s18374_s2 + $0x20] sm:$0xff]  ;;  %v4377_v16 = vld [vmem:[#allocation2 + $0x232] sm:$0xff] }
 0x27c   :  { %18656 = vst [vmem:[#allocation111_spill] sm:$0xff] %v15952_v44  ;;  %v2674_v52 = vpop.f32.mrf.mxu0  ;;  %12778 = vmatmul.mubr.f32.gmra.mxu0 %v4371_v49  ;;  %12973 = vmatprep.subr.mxu0 %v5136_v63  ;;  %v10104_v49 = vld [vmem:[%s18374_s2 + $0x80] sm:$0xff]  ;;  %v4376_v44 = vld [vmem:[#allocation2 + $0x22a] sm:$0xff] }
 0x27d   :  { %v12440_v3 = vpop.f32.mrf.mxu1  ;;  %v15959_v15 = vadd.f32 %v2674_v52, %v15649_v5  ;;  %12780 = vmatprep.mubr.f32.mxu0 %v4372_v30  ;;  %12974 = vmatpush3.msra.mxu0 %v5136_v63  ;;  %v5134_v30 = vld [vmem:[%s18374_s2 + $0x18] sm:$0xff] }
 0x27e   :  { %v15961_v34 = vadd.f32 %v12440_v3, %v2746_v20  ;;  %v12475_v39 = vpop.f32.mrf.mxu0  ;;  %v4373_v3 = vld [vmem:[#allocation2 + $0x202] sm:$0xff]  ;;  %v4374_v20 = vld [vmem:[#allocation2 + $0x212] sm:$0xff]  ;;  %12855 = vmatprep.subr.mxu1 %v10104_v49  ;;  %12975 = vmatprep.subr.mxu0 %v5135_v50 }
 0x27f   :  { %18658 = vst [vmem:[#allocation83_spill] sm:$0xff] %v15959_v15  ;;  %v15963_v42 = vpop.f32.mrf.mxu1  ;;  %v15972_v12 = vadd.f32 %v12475_v39, %v15653_v25  ;;  %v5147_v39 = vld [vmem:[#allocation2 + $0x1] sm:$0xff]  ;;  %12976 = vmatpush3.msra.mxu0 %v5135_v50  ;;  %12856 = vmatpush3.msra.mxu1 %v10104_v49  ;;  %v5148_v50 = vld [vmem:[#allocation2 + $0x9] sm:$0xff] }
 0x280   :  { %18659 = vst [vmem:[#allocation112_spill] sm:$0xff] %v15963_v42  ;;  %v3425_v27 = vpop.f32.mrf.mxu0  ;;  %12781 = vmatmul.mubr.f32.gmra.mxu0 %v4373_v3  ;;  %v4375_v15 = vld [vmem:[#allocation2 + $0x21a] sm:$0xff]  ;;  %12977 = vmatprep.subr.mxu0 %v5134_v30 }
 0x281   :  { %v15974_v5 = vpop.f32.mrf.mxu1  ;;  %v15983_v52 = vadd.f32 %v3425_v27, %v15656_v60  ;;  %12783 = vmatprep.mubr.f32.mxu0 %v4374_v20  ;;  %v5133_v60 = vld [vmem:[%s18374_s2 + $0x10] sm:$0xff]  ;;  %12978 = vmatpush3.msra.mxu0 %v5134_v30 }
 0x282   :  { %v12478_v55 = vpop.f32.mrf.mxu0  ;;  %12857 = vmatprep.mubr.f32.mxu1 %v5147_v39  ;;  %12979 = vmatprep.subr.mxu0 %v5133_v60 }
 0x283   :  { %v15985_v25 = vpop.f32.mrf.mxu1  ;;  %v15991_v42 = vadd.f32 %v12478_v55, %v15659_v41  ;;  %v5132_v41 = vld [vmem:[%s18374_s2 + $0x8] sm:$0xff]  ;;  %12980 = vmatpush3.msra.mxu0 %v5133_v60  ;;  %12858 = vmatmul.mubr.f32.vlgmr.msra.gmra.mxu1 %v5148_v50 }
 0x284   :  { %v3435_v63 = vpop.f32.mrf.mxu0  ;;  %12784 = vmatmul.mubr.f32.gmra.mxu0 %v4375_v15  ;;  %12981 = vmatprep.subr.mxu0 %v5132_v41 }
 0x285   :  { %v15996_v27 = vpop.f32.mrf.mxu1  ;;  %v15999_v3 = vadd.f32 %v3435_v63, %v15662_v57  ;;  %12786 = vmatprep.mubr.f32.mxu0 %v4376_v44  ;;  %v5131_v57 = vld [vmem:[%s18374_s2] sm:$0xff]  ;;  %12982 = vmatpush3.msra.mxu0 %v5132_v41  ;;  %v4379_v44 = vld [vmem:[#allocation2 + $0x24a] sm:$0xff] }
 0x286   :  { %v12481_v20 = vpop.f32.mrf.mxu0  ;;  %v4378_v63 = vld [vmem:[#allocation2 + $0x242] sm:$0xff]  ;;  %12983 = vmatprep.subr.mxu0 %v5131_v57 }
 0x287   :  { %v16005_v55 = vadd.f32 %v12481_v20, %v15665_v28  ;;  %v16010_v49 = vpop.f32.mrf.mxu1  ;;  %12984 = vmatpush3.msra.mxu0 %v5131_v57 }
 0x288   :  { %v3445_v30 = vpop.f32.mrf.mxu0  ;;  %12787 = vmatmul.mubr.f32.gmra.mxu0 %v4377_v16  ;;  %v4381_v16 = vld [vmem:[#allocation2 + $0x262] sm:$0xff] }
 0x289   :  { %v16013_v39 = vadd.f32 %v3445_v30, %v15668_v56  ;;  %12789 = vmatprep.mubr.f32.mxu0 %v4378_v63  ;;  %v16018_v60 = vpop.f32.mrf.mxu1  ;;  %v4382_v30 = vld [vmem:[#allocation2 + $0x272] sm:$0xff] }
 0x28a   :  { %v12484_v15 = vpop.f32.mrf.mxu0 }
 0x28b   :  { %v16016_v28 = vadd.f32 %v12484_v15, %v15671_v62  ;;  %v16026_v41 = vpop.f32.mrf.mxu1 }
 0x28c   :  { %v3455_v20 = vpop.f32.mrf.mxu0  ;;  %12790 = vmatmul.mubr.f32.gmra.mxu0 %v4379_v44 }
 0x28d   :  { %v16021_v4 = vadd.f32 %v3455_v20, %v15677_v24  ;;  %12792 = vmatprep.mubr.f32.mxu0 %v4380_v22  ;;  %v4383_v24 = vld [vmem:[#allocation2 + $0x27a] sm:$0xff]  ;;  %v16037_v22 = vpop.f32.mrf.mxu1  ;;  %v4384_v20 = vld [vmem:[#allocation2 + $0x28a] sm:$0xff] }
 0x28e   :  { %v12487_v50 = vpop.f32.mrf.mxu0 }
 0x28f   :  { %v16024_v56 = vadd.f32 %v12487_v50, %v15680_v2  ;;  %v10135_v2 = vld [vmem:[%s18374_s2 + $0x178] sm:$0xff] }
 0x290   :  { %v3465_v62 = vpop.f32.mrf.mxu0  ;;  %12793 = vmatmul.mubr.f32.gmra.mxu0 %v4381_v16  ;;  %13081 = vmatprep.subr.mxu1 %v10135_v2  ;;  %v4385_v16 = vld [vmem:[#allocation2 + $0x292] sm:$0xff] }
 0x291   :  { %v16029_v57 = vadd.f32 %v3465_v62, %v15683_v23  ;;  %12795 = vmatprep.mubr.f32.mxu0 %v4382_v30  ;;  %13082 = vmatpush3.msra.mxu1 %v10135_v2  ;;  %v16045_v62 = vpop.f32.mrf.mxu1  ;;  %v4387_v2 = vld [vmem:[#allocation2 + $0x2aa] sm:$0xff] }
 0x292   :  { %v12490_v63 = vpop.f32.mrf.mxu0 }
 0x293   :  { %v16032_v15 = vadd.f32 %v12490_v63, %v15686_v43  ;;  %v4386_v63 = vld [vmem:[#allocation2 + $0x2a2] sm:$0xff] }
 0x294   :  { %v3475_v44 = vpop.f32.mrf.mxu0  ;;  %12796 = vmatmul.mubr.f32.gmra.mxu0 %v4383_v24  ;;  %v16056_v24 = vpop.f32.mrf.mxu1 }
 0x295   :  { %v16040_v50 = vadd.f32 %v3475_v44, %v15692_v11  ;;  %12798 = vmatprep.mubr.f32.mxu0 %v4384_v20  ;;  %v4388_v20 = vld [vmem:[#allocation2 + $0x2ba] sm:$0xff] }
 0x296   :  { %v12493_v23 = vpop.f32.mrf.mxu0 }
 0x297   :  { %v16043_v43 = vadd.f32 %v12493_v23, %v15695_v1  ;;  %v10134_v1 = vld [vmem:[%s18374_s2 + $0x170] sm:$0xff] }
 0x298   :  { %v3485_v30 = vpop.f32.mrf.mxu0  ;;  %12799 = vmatmul.mubr.f32.gmra.mxu0 %v4385_v16  ;;  %13083 = vmatprep.subr.mxu1 %v10134_v1  ;;  %v4389_v16 = vld [vmem:[#allocation2 + $0x2c2] sm:$0xff] }
 0x299   :  { %v16048_v33 = vadd.f32 %v3485_v30, %v15698_v14  ;;  %12801 = vmatprep.mubr.f32.mxu0 %v4386_v63  ;;  %13084 = vmatpush3.msra.mxu1 %v10134_v1  ;;  %v16066_v30 = vpop.f32.mrf.mxu1  ;;  %v4392_v1 = vld [vmem:[#allocation2 + $0x2ea] sm:$0xff] }
 0x29a   :  { %v12496_v0 = vpop.f32.mrf.mxu0 }
 0x29b   :  { %v16051_v11 = vadd.f32 %v12496_v0, %v15701_v32  ;;  %v3229_v32 = vadd.f32 %v15714_v47, %v15710_v7  ;;  %v10133_v7 = vld [vmem:[%s18374_s2 + $0x168] sm:$0xff] }
 0x29c   :  { %v3495_v44 = vpop.f32.mrf.mxu0  ;;  %12802 = vmatmul.mubr.f32.gmra.mxu0 %v4387_v2  ;;  %v4391_v2 = vld [vmem:[#allocation2 + $0x2da] sm:$0xff]  ;;  %13085 = vmatprep.subr.mxu1 %v10133_v7 }
 0x29d   :  { %18660 = vst [vmem:[#allocation113_spill] sm:$0xff] %v16051_v11  ;;  %v16059_v23 = vadd.f32 %v3495_v44, %v15707_v18  ;;  %12804 = vmatprep.mubr.f32.mxu0 %v4388_v20  ;;  %13086 = vmatpush3.msra.mxu1 %v10133_v7 }
 0x29e   :  { %v12499_v14 = vpop.f32.mrf.mxu0 }
 0x29f   :  { %v16064_v0 = vadd.f32 %v12499_v14, %v15712_v17  ;;  %v16076_v17 = vpop.f32.mrf.mxu1  ;;  %v4394_v14 = vld [vmem:[#allocation2 + $0x302] sm:$0xff] }
 0x2a0   :  { %v3505_v63 = vpop.f32.mrf.mxu0  ;;  %12805 = vmatmul.mubr.f32.gmra.mxu0 %v4389_v16 }
 0x2a1   :  { %v16068_v59 = vadd.f32 %v3505_v63, %v3229_v32  ;;  %12807 = vmatprep.mubr.f32.mxu0 %v4390_v19  ;;  %v16083_v19 = vpop.f32.mrf.mxu1  ;;  %v4395_v63 = vld [vmem:[#allocation2 + $0x30a] sm:$0xff] }
 0x2a2   :  { %v12502_v11 = vpop.f32.mrf.mxu0 }
 0x2a3   :  { %v16071_v18 = vadd.f32 %v12502_v11, %v15720_v45  ;;  %v4393_v45 = vld [vmem:[#allocation2 + $0x2f2] sm:$0xff] }
 0x2a4   :  { %v16078_v47 = vpop.f32.mrf.mxu0  ;;  %12808 = vmatmul.mubr.f32.gmra.mxu0 %v4391_v2  ;;  %v10132_v2 = vld [vmem:[%s18374_s2 + $0x160] sm:$0xff] }
 0x2a5   :  { %12810 = vmatprep.mubr.f32.mxu0 %v4392_v1  ;;  %v4396_v1 = vld [vmem:[#allocation2 + $0x31a] sm:$0xff]  ;;  %13087 = vmatprep.subr.mxu1 %v10132_v2 }
 0x2a6   :  { %v12505_v44 = vpop.f32.mrf.mxu0  ;;  %13088 = vmatpush3.msra.mxu1 %v10132_v2 }
 0x2a7   :  { %v16081_v20 = vadd.f32 %v12505_v44, %v15731_v37  ;;  %v16093_v37 = vpop.f32.mrf.mxu1 }
 0x2a8   :  { %v16085_v11 = vpop.f32.mrf.mxu0  ;;  %12811 = vmatmul.mubr.f32.gmra.mxu0 %v4393_v45 }
 0x2a9   :  { %18661 = vst [vmem:[#allocation114_spill] sm:$0xff] %v16081_v20  ;;  %18662 = vst [vmem:[#allocation115_spill] sm:$0xff] %v16085_v11  ;;  %12813 = vmatprep.mubr.f32.mxu0 %v4394_v14  ;;  %v16100_v14 = vpop.f32.mrf.mxu1 }
 0x2aa   :  { %v12508_v32 = vpop.f32.mrf.mxu0 }
 0x2ab   :  { %v16088_v16 = vadd.f32 %v12508_v32, %v15739_v29  ;;  %v4397_v29 = vld [vmem:[#allocation2 + $0x322] sm:$0xff] }
 0x2ac   :  { %v16095_v7 = vpop.f32.mrf.mxu0  ;;  %12814 = vmatmul.mubr.f32.gmra.mxu0 %v4395_v63  ;;  %v10131_v63 = vld [vmem:[%s18374_s2 + $0x158] sm:$0xff] }
 0x2ad   :  { %18663 = vst [vmem:[#allocation116_spill] sm:$0xff] %v16088_v16  ;;  %18664 = vst [vmem:[#allocation117_spill] sm:$0xff] %v16095_v7  ;;  %12816 = vmatprep.mubr.f32.mxu0 %v4396_v1  ;;  %v4398_v16 = vld [vmem:[#allocation2 + $0x332] sm:$0xff]  ;;  %v4399_v7 = vld [vmem:[#allocation2 + $0x33a] sm:$0xff]  ;;  %13089 = vmatprep.subr.mxu1 %v10131_v63 }
 0x2ae   :  { %v12511_v44 = vpop.f32.mrf.mxu0  ;;  %v4400_v1 = vld [vmem:[#allocation2 + $0x34a] sm:$0xff]  ;;  %13090 = vmatpush3.msra.mxu1 %v10131_v63 }
 0x2af   :  { %v16098_v45 = vadd.f32 %v12511_v44, %v15750_v48  ;;  %v16110_v48 = vpop.f32.mrf.mxu1 }
 0x2b0   :  { %v16102_v32 = vpop.f32.mrf.mxu0  ;;  %12817 = vmatmul.mubr.f32.gmra.mxu0 %v4397_v29 }
 0x2b1   :  { %18665 = vst [vmem:[#allocation118_spill] sm:$0xff] %v16098_v45  ;;  %12819 = vmatprep.mubr.f32.mxu0 %v4398_v16 }
 0x2b2   :  { %v12514_v20 = vpop.f32.mrf.mxu0 }
 0x2b3   :  { %v16105_v11 = vadd.f32 %v12514_v20, %v15758_v54  ;;  %v4401_v54 = vld [vmem:[#allocation2 + $0x352] sm:$0xff]  ;;  %v16117_v20 = vpop.f32.mrf.mxu1 }
 0x2b4   :  { %v16112_v2 = vpop.f32.mrf.mxu0  ;;  %12820 = vmatmul.mubr.f32.gmra.mxu0 %v4399_v7  ;;  %v10130_v7 = vld [vmem:[%s18374_s2 + $0x150] sm:$0xff] }
 0x2b5   :  { %18666 = vst [vmem:[#allocation119_spill] sm:$0xff] %v16105_v11  ;;  %18667 = vst [vmem:[#allocation120_spill] sm:$0xff] %v16112_v2  ;;  %12822 = vmatprep.mubr.f32.mxu0 %v4400_v1  ;;  %v13979_v2 = vld [vmem:[#allocation2] sm:$0xff]  ;;  %v16127_v63 = vpop.f32.mrf.mxu1  ;;  %13091 = vmatprep.subr.mxu1 %v10130_v7 }
 0x2b6   :  { %v12517_v44 = vpop.f32.mrf.mxu0  ;;  %13092 = vmatpush3.msra.mxu1 %v10130_v7 }
 0x2b7   :  { %v16115_v29 = vadd.f32 %v12517_v44, %v15770_v53 }
 0x2b8   :  { %v16119_v16 = vpop.f32.mrf.mxu0  ;;  %12823 = vmatmul.mubr.f32.gmra.mxu0 %v4401_v54  ;;  %v16134_v54 = vpop.f32.mrf.mxu1 }
 0x2b9   :  { %18668 = vst [vmem:[#allocation121_spill] sm:$0xff] %v16115_v29  ;;  %12985 = vmatprep.mubr.f32.mxu0 %v13979_v2  ;;  %v10129_v29 = vld [vmem:[%s18374_s2 + $0x148] sm:$0xff] }
 0x2ba   :  { %v12520_v11 = vpop.f32.mrf.mxu0  ;;  %13093 = vmatprep.subr.mxu1 %v10129_v29 }
 0x2bb   :  { %v16122_v45 = vadd.f32 %v12520_v11, %v15779_v21  ;;  %13094 = vmatpush3.msra.mxu1 %v10129_v29 }
 0x2bc   :  { %v16129_v53 = vpop.f32.mrf.mxu0  ;;  %12986 = vmatmul.mubr.f32.vlgmr.msra.gmra.mxu0 %v13979_v2 }
 0x2bd   :  { %18669 = vst [vmem:[#allocation122_spill] sm:$0xff] %v16122_v45  ;;  %18670 = vst [vmem:[#allocation123_spill] sm:$0xff] %v16129_v53  ;;  %v16144_v53 = vpop.f32.mrf.mxu1 }
 0x2be   :  { %v12523_v1 = vpop.f32.mrf.mxu0 }
 0x2bf   :  { %v16132_v44 = vadd.f32 %v12523_v1, %v15790_v36  ;;  %v16151_v1 = vpop.f32.mrf.mxu1 }
 0x2c0   :  { %v16136_v21 = vpop.f32.mrf.mxu0 }
 0x2c1   :  { %18671 = vst [vmem:[#allocation124_spill] sm:$0xff] %v16132_v44  ;;  %18672 = vst [vmem:[#allocation125_spill] sm:$0xff] %v16136_v21  ;;  %v16161_v21 = vpop.f32.mrf.mxu1 }
 0x2c2   :  { %v12526_v11 = vpop.f32.mrf.mxu0 }
 0x2c3   :  { %v16139_v45 = vadd.f32 %v12526_v11, %v15798_v46 }
 0x2c4   :  { %v16146_v7 = vpop.f32.mrf.mxu0 }
 0x2c5   :  { %18673 = vst [vmem:[#allocation126_spill] sm:$0xff] %v16139_v45  ;;  %18674 = vst [vmem:[#allocation127_spill] sm:$0xff] %v16146_v7  ;;  %v10128_v45 = vld [vmem:[%s18374_s2 + $0x140] sm:$0xff] }
 0x2c6   :  { %v12529_v36 = vpop.f32.mrf.mxu0  ;;  %13095 = vmatprep.subr.mxu1 %v10128_v45 }
 0x2c7   :  { %v16149_v2 = vadd.f32 %v12529_v36, %v15809_v6  ;;  %13096 = vmatpush3.msra.mxu1 %v10128_v45  ;;  %v16168_v36 = vpop.f32.mrf.mxu1 }
 0x2c8   :  { %v16153_v44 = vpop.f32.mrf.mxu0 }
 0x2c9   :  { %18675 = vst [vmem:[#allocation128_spill] sm:$0xff] %v16149_v2  ;;  %18676 = vst [vmem:[#allocation129_spill] sm:$0xff] %v16153_v44  ;;  %v16178_v44 = vpop.f32.mrf.mxu1 }
 0x2ca   :  { %v12532_v46 = vpop.f32.mrf.mxu0 }
 0x2cb   :  { %v16156_v11 = vadd.f32 %v12532_v46, %v15817_v51 }
 0x2cc   :  { %v16163_v7 = vpop.f32.mrf.mxu0 }
 0x2cd   :  { %18677 = vst [vmem:[#allocation130_spill] sm:$0xff] %v16156_v11  ;;  %18678 = vst [vmem:[#allocation131_spill] sm:$0xff] %v16163_v7  ;;  %v10127_v11 = vld [vmem:[%s18374_s2 + $0x138] sm:$0xff] }
 0x2ce   :  { %v12535_v6 = vpop.f32.mrf.mxu0  ;;  %13097 = vmatprep.subr.mxu1 %v10127_v11 }
 0x2cf   :  { %v16166_v29 = vadd.f32 %v12535_v6, %v15828_v26  ;;  %13098 = vmatpush3.msra.mxu1 %v10127_v11  ;;  %v16185_v6 = vpop.f32.mrf.mxu1 }
 0x2d0   :  { %v16170_v2 = vpop.f32.mrf.mxu0 }
 0x2d1   :  { %18679 = vst [vmem:[#allocation132_spill] sm:$0xff] %v16166_v29  ;;  %18680 = vst [vmem:[#allocation133_spill] sm:$0xff] %v16170_v2  ;;  %v16195_v2 = vpop.f32.mrf.mxu1 }
 0x2d2   :  { %v12538_v51 = vpop.f32.mrf.mxu0 }
 0x2d3   :  { %v16173_v46 = vadd.f32 %v12538_v51, %v15836_v35 }
 0x2d4   :  { %v16180_v7 = vpop.f32.mrf.mxu0 }
 0x2d5   :  { %18681 = vst [vmem:[#allocation134_spill] sm:$0xff] %v16173_v46  ;;  %18682 = vst [vmem:[#allocation135_spill] sm:$0xff] %v16180_v7  ;;  %v10126_v46 = vld [vmem:[%s18374_s2 + $0x130] sm:$0xff] }
 0x2d6   :  { %v12541_v26 = vpop.f32.mrf.mxu0  ;;  %13099 = vmatprep.subr.mxu1 %v10126_v46 }
 0x2d7   :  { %v16183_v45 = vadd.f32 %v12541_v26, %v15847_v31  ;;  %13100 = vmatpush3.msra.mxu1 %v10126_v46  ;;  %v16202_v26 = vpop.f32.mrf.mxu1 }
 0x2d8   :  { %v16187_v29 = vpop.f32.mrf.mxu0 }
 0x2d9   :  { %18683 = vst [vmem:[#allocation136_spill] sm:$0xff] %v16183_v45  ;;  %18684 = vst [vmem:[#allocation137_spill] sm:$0xff] %v16187_v29  ;;  %v16212_v29 = vpop.f32.mrf.mxu1 }
 0x2da   :  { %v12544_v35 = vpop.f32.mrf.mxu0 }
 0x2db   :  { %v16190_v51 = vadd.f32 %v12544_v35, %v15855_v40 }
 0x2dc   :  { %v16197_v7 = vpop.f32.mrf.mxu0 }
 0x2dd   :  { %18685 = vst [vmem:[#allocation138_spill] sm:$0xff] %v16190_v51  ;;  %18686 = vst [vmem:[#allocation139_spill] sm:$0xff] %v16197_v7  ;;  %v10125_v51 = vld [vmem:[%s18374_s2 + $0x128] sm:$0xff] }
 0x2de   :  { %v12547_v31 = vpop.f32.mrf.mxu0  ;;  %13101 = vmatprep.subr.mxu1 %v10125_v51 }
 0x2df   :  { %v16200_v11 = vadd.f32 %v12547_v31, %v15866_v38  ;;  %13102 = vmatpush3.msra.mxu1 %v10125_v51  ;;  %v16219_v31 = vpop.f32.mrf.mxu1 }
 0x2e0   :  { %v16204_v45 = vpop.f32.mrf.mxu0 }
 0x2e1   :  { %18687 = vst [vmem:[#allocation140_spill] sm:$0xff] %v16200_v11  ;;  %18688 = vst [vmem:[#allocation141_spill] sm:$0xff] %v16204_v45  ;;  %v16229_v45 = vpop.f32.mrf.mxu1 }
 0x2e2   :  { %v12550_v40 = vpop.f32.mrf.mxu0 }
 0x2e3   :  { %v16207_v35 = vadd.f32 %v12550_v40, %v15880_v61 }
 0x2e4   :  { %v16214_v7 = vpop.f32.mrf.mxu0 }
 0x2e5   :  { %18689 = vst [vmem:[#allocation142_spill] sm:$0xff] %v16207_v35  ;;  %18690 = vst [vmem:[#allocation143_spill] sm:$0xff] %v16214_v7  ;;  %v10124_v35 = vld [vmem:[%s18374_s2 + $0x120] sm:$0xff] }
 0x2e6   :  { %v12553_v38 = vpop.f32.mrf.mxu0  ;;  %13103 = vmatprep.subr.mxu1 %v10124_v35 }
 0x2e7   :  { %v16217_v46 = vadd.f32 %v12553_v38, %v15894_v13  ;;  %v10151_v13 = vld [vmem:[%s18374_s2 + $0x1f8] sm:$0xff]  ;;  %13104 = vmatpush3.msra.mxu1 %v10124_v35  ;;  %v10149_v35 = vld [vmem:[%s18374_s2 + $0x1e8] sm:$0xff] }
 0x2e8   :  { %v16221_v11 = vpop.f32.mrf.mxu0  ;;  %13209 = vmatprep.subr.mxu0 %v10151_v13 }
 0x2e9   :  { %18691 = vst [vmem:[#allocation144_spill] sm:$0xff] %v16217_v46  ;;  %18692 = vst [vmem:[#allocation145_spill] sm:$0xff] %v16221_v11  ;;  %13210 = vmatpush3.msra.mxu0 %v10151_v13  ;;  %v10148_v13 = vld [vmem:[%s18374_s2 + $0x1e0] sm:$0xff] }
 0x2ea   :  { %v12556_v61 = vpop.f32.mrf.mxu0 }
 0x2eb   :  { %v16224_v40 = vadd.f32 %v12556_v61, %v15905_v9  ;;  %v10150_v9 = vld [vmem:[%s18374_s2 + $0x1f0] sm:$0xff]  ;;  %v16242_v61 = vpop.f32.mrf.mxu1 }
 0x2ec   :  { %v16231_v7 = vpop.f32.mrf.mxu0  ;;  %13211 = vmatprep.subr.mxu0 %v10150_v9 }
 0x2ed   :  { %18693 = vst [vmem:[#allocation146_spill] sm:$0xff] %v16224_v40  ;;  %18694 = vst [vmem:[#allocation147_spill] sm:$0xff] %v16231_v7  ;;  %13212 = vmatpush3.msra.mxu0 %v10150_v9  ;;  %v16258_v9 = vpop.f32.mrf.mxu1 }
 0x2ee   :  { %v12559_v51 = vpop.f32.mrf.mxu0  ;;  %13213 = vmatprep.subr.mxu0 %v10149_v35 }
 0x2ef   :  { %v16240_v38 = vadd.f32 %v12559_v51, %v15922_v10  ;;  %13214 = vmatpush3.msra.mxu0 %v10149_v35  ;;  %v10123_v51 = vld [vmem:[%s18374_s2 + $0x118] sm:$0xff] }
 0x2f0   :  { %v16244_v40 = vpop.f32.mrf.mxu0  ;;  %13215 = vmatprep.subr.mxu0 %v10148_v13  ;;  %13105 = vmatprep.subr.mxu1 %v10123_v51  ;;  %v10147_v35 = vld [vmem:[%s18374_s2 + $0x1d8] sm:$0xff] }
 0x2f1   :  { %18695 = vst [vmem:[#allocation148_spill] sm:$0xff] %v16240_v38  ;;  %18696 = vst [vmem:[#allocation149_spill] sm:$0xff] %v16244_v40  ;;  %13216 = vmatpush3.msra.mxu0 %v10148_v13  ;;  %13106 = vmatpush3.msra.mxu1 %v10123_v51  ;;  %v10145_v13 = vld [vmem:[%s18374_s2 + $0x1c8] sm:$0xff] }
 0x2f2   :  { %v12562_v7 = vpop.f32.mrf.mxu0  ;;  %13217 = vmatprep.subr.mxu0 %v10147_v35 }
 0x2f3   :  { %v16253_v10 = vadd.f32 %v12562_v7, %v15933_v58  ;;  %13218 = vmatpush3.msra.mxu0 %v10147_v35  ;;  %v10146_v58 = vld [vmem:[%s18374_s2 + $0x1d0] sm:$0xff]  ;;  %v10144_v35 = vld [vmem:[%s18374_s2 + $0x1c0] sm:$0xff] }
 0x2f4   :  { %v16260_v38 = vpop.f32.mrf.mxu0  ;;  %13219 = vmatprep.subr.mxu0 %v10146_v58 }
 0x2f5   :  { %18697 = vst [vmem:[#allocation150_spill] sm:$0xff] %v16253_v10  ;;  %18698 = vst [vmem:[#allocation151_spill] sm:$0xff] %v16260_v38  ;;  %v16271_v10 = vpop.f32.mrf.mxu1  ;;  %13220 = vmatpush3.msra.mxu0 %v10146_v58 }
 0x2f6   :  { %v12565_v40 = vpop.f32.mrf.mxu0  ;;  %13221 = vmatprep.subr.mxu0 %v10145_v13 }
 0x2f7   :  { %v16269_v7 = vadd.f32 %v12565_v40, %v15950_v8  ;;  %13222 = vmatpush3.msra.mxu0 %v10145_v13  ;;  %v10122_v40 = vld [vmem:[%s18374_s2 + $0x110] sm:$0xff]  ;;  %v16287_v58 = vpop.f32.mrf.mxu1  ;;  %v10143_v13 = vld [vmem:[%s18374_s2 + $0x1b8] sm:$0xff] }
 0x2f8   :  { %v16273_v38 = vpop.f32.mrf.mxu0  ;;  %13223 = vmatprep.subr.mxu0 %v10144_v35  ;;  %13107 = vmatprep.subr.mxu1 %v10122_v40 }
 0x2f9   :  { %18699 = vst [vmem:[#allocation152_spill] sm:$0xff] %v16269_v7  ;;  %18700 = vst [vmem:[#allocation153_spill] sm:$0xff] %v16273_v38  ;;  %13224 = vmatpush3.msra.mxu0 %v10144_v35  ;;  %v4275_v38 = vadd.f32 %v15974_v5, %v15972_v12  ;;  %13108 = vmatpush3.msra.mxu1 %v10122_v40  ;;  %v10142_v35 = vld [vmem:[%s18374_s2 + $0x1b0] sm:$0xff]  ;;  %v16306_v46 = vpop.f32.mrf.mxu1  ;;  %v10121_v5 = vld [vmem:[%s18374_s2 + $0x108] sm:$0xff] }
 0x2fa   :  { %v12568_v51 = vpop.f32.mrf.mxu0  ;;  %13225 = vmatprep.subr.mxu0 %v10143_v13  ;;  %18703 = vst [vmem:[#allocation156_spill] sm:$0xff] %v16306_v46  ;;  %v10141_v40 = vld [vmem:[%s18374_s2 + $0x1a8] sm:$0xff]  ;;  %13109 = vmatprep.subr.mxu1 %v10121_v5 }
 0x2fb   :  { %v16282_v8 = vadd.f32 %v12568_v51, %v15961_v34  ;;  %v16299_v51 = vld [vmem:[%s18375_s3] ss:$0 sm:$0xff]  ;;  %13226 = vmatpush3.msra.mxu0 %v10143_v13  ;;  %v4277_v13 = vadd.f32 %v15996_v27, %v15991_v42  ;;  %13110 = vmatpush3.msra.mxu1 %v10121_v5  ;;  %v10139_v5 = vld [vmem:[%s18374_s2 + $0x198] sm:$0xff] }
 0x2fc   :  { %v16289_v7 = vpop.f32.mrf.mxu0  ;;  %13227 = vmatprep.subr.mxu0 %v10142_v35 }
 0x2fd   :  { %18701 = vst [vmem:[#allocation154_spill] sm:$0xff] %v16282_v8  ;;  %18702 = vst [vmem:[#allocation155_spill] sm:$0xff] %v16289_v7  ;;  %v4274_v8 = vadd.f32 %v15985_v25, %v15983_v52  ;;  %13228 = vmatpush3.msra.mxu0 %v10142_v35  ;;  %v4276_v35 = vadd.f32 %v16010_v49, %v15999_v3  ;;  %v4279_v3 = vadd.f32 %v16018_v60, %v16005_v55  ;;  %v10137_v60 = vld [vmem:[%s18374_s2 + $0x188] sm:$0xff] }
 0x2fe   :  { %v12731_v34 = vpop.f32.mrf.mxu0  ;;  %13229 = vmatprep.subr.mxu0 %v10141_v40 }
 0x2ff   :  { %v4805_v7 = vadd.f32 %v12731_v34, %v4275_v38  ;;  %13230 = vmatpush3.msra.mxu0 %v10141_v40  ;;  %v10140_v38 = vld [vmem:[%s18374_s2 + $0x1a0] sm:$0xff]  ;;  %v10138_v40 = vld [vmem:[%s18374_s2 + $0x190] sm:$0xff] }
 0x300   :  { %v4485_v12 = vpop.f32.mrf.mxu0  ;;  %v10120_v34 = vld [vmem:[%s18374_s2 + $0x100] sm:$0xff]  ;;  %13231 = vmatprep.subr.mxu0 %v10140_v38 }
 0x301   :  { %v4876_v11 = vadd.f32 %v16299_v51, %v4805_v7  ;;  %v4804_v52 = vadd.f32 %v4485_v12, %v4274_v8  ;;  %13111 = vmatprep.subr.mxu1 %v10120_v34  ;;  %v16326_v8 = vpop.f32.mrf.mxu1  ;;  %13232 = vmatpush3.msra.mxu0 %v10140_v38 }
 0x302   :  { %v12734_v25 = vpop.f32.mrf.mxu0  ;;  %18704 = vst [vmem:[#allocation157_spill] sm:$0xff] %v16326_v8  ;;  %13112 = vmatpush3.msra.mxu1 %v10120_v34  ;;  %13233 = vmatprep.subr.mxu0 %v10139_v5 }
 0x303   :  { %v4940_v42 = vmax.f32 %v4876_v11, 0.0  ;;  %v4875_v27 = vadd.f32 %v16299_v51, %v4804_v52  ;;  %v4807_v7 = vadd.f32 %v12734_v25, %v4277_v13  ;;  %13234 = vmatpush3.msra.mxu0 %v10139_v5  ;;  %v4278_v25 = vadd.f32 %v16026_v41, %v16013_v39  ;;  %v16340_v46 = vpop.f32.mrf.mxu1 }
 0x304   :  { %v4495_v12 = vpop.f32.mrf.mxu0  ;;  %13235 = vmatprep.subr.mxu0 %v10138_v40 }
 0x305   :  { %5004 = vst [vmem:[#allocation2 + $0x21] sm:$0xff] %v4940_v42  ;;  %v4939_v49 = vmax.f32 %v4875_v27, 0.0  ;;  %v4878_v11 = vadd.f32 %v16299_v51, %v4807_v7  ;;  %v4806_v13 = vadd.f32 %v4495_v12, %v4276_v35  ;;  %13236 = vmatpush3.msra.mxu0 %v10138_v40  ;;  %v4281_v35 = vadd.f32 %v16037_v22, %v16016_v28  ;;  %v10136_v7 = vld [vmem:[%s18374_s2 + $0x180] sm:$0xff]  ;;  %v16354_v22 = vpop.f32.mrf.mxu1 }
 0x306   :  { %v12737_v52 = vpop.f32.mrf.mxu0  ;;  %13237 = vmatprep.subr.mxu0 %v10137_v60 }
 0x307   :  { %5003 = vst [vmem:[#allocation2 + $0x19] sm:$0xff] %v4939_v49  ;;  %v4942_v38 = vmax.f32 %v4878_v11, 0.0  ;;  %v4877_v34 = vadd.f32 %v16299_v51, %v4806_v13  ;;  %v4809_v8 = vadd.f32 %v12737_v52, %v4279_v3  ;;  %12860 = vmatprep.mubr.f32.mxu1 %v4939_v49  ;;  %13238 = vmatpush3.msra.mxu0 %v10137_v60  ;;  %v10167_v3 = vld [vmem:[%s18374_s2 + $0x278] sm:$0xff] }
 0x308   :  { %v4505_v55 = vpop.f32.mrf.mxu0  ;;  %12861 = vmatmul.mubr.f32.gmra.mxu1 %v4940_v42  ;;  %v4280_v42 = vadd.f32 %v16045_v62, %v16021_v4  ;;  %13239 = vmatprep.subr.mxu0 %v10136_v7  ;;  %v4283_v49 = vadd.f32 %v16056_v24, %v16024_v56  ;;  %v16365_v56 = vpop.f32.mrf.mxu1 }
 0x309   :  { %5006 = vst [vmem:[#allocation2 + $0x39] sm:$0xff] %v4942_v38  ;;  %v4941_v39 = vmax.f32 %v4877_v34, 0.0  ;;  %v4880_v41 = vadd.f32 %v16299_v51, %v4809_v8  ;;  %v4808_v27 = vadd.f32 %v4505_v55, %v4278_v25  ;;  %13240 = vmatpush3.msra.mxu0 %v10136_v7  ;;  %13337 = vmatprep.subr.mxu1 %v10167_v3 }
 0x30a   :  { %v12740_v12 = vpop.f32.mrf.mxu0 }
 0x30b   :  { %5005 = vst [vmem:[#allocation2 + $0x31] sm:$0xff] %v4941_v39  ;;  %v4944_v5 = vmax.f32 %v4880_v41, 0.0  ;;  %v4879_v40 = vadd.f32 %v16299_v51, %v4808_v27  ;;  %v4811_v28 = vadd.f32 %v12740_v12, %v4281_v35  ;;  %12863 = vmatprep.mubr.f32.mxu1 %v4941_v39  ;;  %v4285_v35 = vadd.f32 %v16076_v17, %v16032_v15 }
 0x30c   :  { %v4515_v8 = vpop.f32.mrf.mxu0  ;;  %12864 = vmatmul.mubr.f32.gmra.mxu1 %v4942_v38  ;;  %v4282_v38 = vadd.f32 %v16066_v30, %v16029_v57  ;;  %v4284_v12 = vadd.f32 %v16083_v19, %v16040_v50  ;;  %v4287_v17 = vadd.f32 %v16093_v37, %v16043_v43  ;;  %v18705_v37 = vld [vmem:[#allocation113_spill] sm:$0xff] }
 0x30d   :  { %5008 = vst [vmem:[#allocation2 + $0x51] sm:$0xff] %v4944_v5  ;;  %v4943_v4 = vmax.f32 %v4879_v40, 0.0  ;;  %v4882_v62 = vadd.f32 %v16299_v51, %v4811_v28  ;;  %v4810_v11 = vadd.f32 %v4515_v8, %v4280_v42 }
 0x30e   :  { %v12743_v13 = vpop.f32.mrf.mxu0  ;;  %v5069_v52 = vld [vmem:[#allocation2 + $0x18] sm:$0xff]  ;;  %v5070_v25 = vld [vmem:[#allocation2 + $0x20] sm:$0xff] }
 0x30f   :  { %5007 = vst [vmem:[#allocation2 + $0x49] sm:$0xff] %v4943_v4  ;;  %v4946_v34 = vmax.f32 %v4882_v62, 0.0  ;;  %v4881_v55 = vadd.f32 %v16299_v51, %v4810_v11  ;;  %v4813_v60 = vadd.f32 %v12743_v13, %v4283_v49  ;;  %12988 = vmatprep.mubr.f32.mxu0 %v5069_v52  ;;  %12866 = vmatprep.mubr.f32.mxu1 %v4943_v4 }
 0x310   :  { %v4525_v24 = vpop.f32.mrf.mxu0  ;;  %12989 = vmatmul.mubr.f32.gmra.mxu0 %v5070_v25  ;;  %12867 = vmatmul.mubr.f32.gmra.mxu1 %v4944_v5  ;;  %v16373_v5 = vpop.f32.mrf.mxu1  ;;  %v4286_v62 = vadd.f32 %v16100_v14, %v16048_v33 }
 0x311   :  { %5010 = vst [vmem:[#allocation2 + $0x69] sm:$0xff] %v4946_v34  ;;  %v4945_v39 = vmax.f32 %v4881_v55, 0.0  ;;  %v4884_v41 = vadd.f32 %v16299_v51, %v4813_v60  ;;  %v4812_v57 = vadd.f32 %v4525_v24, %v4282_v38  ;;  %v4289_v38 = vadd.f32 %v16110_v48, %v18705_v37  ;;  %v18707_v48 = vld [vmem:[#allocation85_spill] sm:$0xff] }
 0x312   :  { %v12746_v30 = vpop.f32.mrf.mxu0  ;;  %v5071_v27 = vld [vmem:[#allocation2 + $0x30] sm:$0xff]  ;;  %v5072_v7 = vld [vmem:[#allocation2 + $0x38] sm:$0xff]  ;;  %v16381_v25 = vpop.f32.mrf.mxu1 }
 0x313   :  { %5009 = vst [vmem:[#allocation2 + $0x61] sm:$0xff] %v4945_v39  ;;  %v4948_v42 = vmax.f32 %v4884_v41, 0.0  ;;  %v4883_v40 = vadd.f32 %v16299_v51, %v4812_v57  ;;  %v4815_v28 = vadd.f32 %v12746_v30, %v4285_v35  ;;  %12991 = vmatprep.mubr.f32.mxu0 %v5071_v27  ;;  %12869 = vmatprep.mubr.f32.mxu1 %v4945_v39  ;;  %v18706_v30 = vld [vmem:[#allocation84_spill] sm:$0xff] }
 0x314   :  { %v4535_v15 = vpop.f32.mrf.mxu0  ;;  %12992 = vmatmul.mubr.f32.gmra.mxu0 %v5072_v7  ;;  %12870 = vmatmul.mubr.f32.gmra.mxu1 %v4946_v34  ;;  %v4288_v35 = vadd.f32 %v16117_v20, %v16059_v23  ;;  %v3231_v27 = vadd.f32 %v18707_v48, %v18706_v30  ;;  %v16391_v7 = vpop.f32.mrf.mxu1 }
 0x315   :  { %5012 = vst [vmem:[#allocation2 + $0x81] sm:$0xff] %v4948_v42  ;;  %v4947_v8 = vmax.f32 %v4883_v40, 0.0  ;;  %v4886_v3 = vadd.f32 %v16299_v51, %v4815_v28  ;;  %v4814_v50 = vadd.f32 %v4535_v15, %v4284_v12  ;;  %v4290_v28 = vadd.f32 %v16134_v54, %v16068_v59 }
 0x316   :  { %v12749_v19 = vpop.f32.mrf.mxu0  ;;  %v5073_v49 = vld [vmem:[#allocation2 + $0x48] sm:$0xff]  ;;  %v5074_v4 = vld [vmem:[#allocation2 + $0x50] sm:$0xff]  ;;  %v4293_v59 = vadd.f32 %v16144_v53, %v16071_v18  ;;  %v18711_v18 = vld [vmem:[#allocation90_spill] sm:$0xff] }
 0x317   :  { %5011 = vst [vmem:[#allocation2 + $0x79] sm:$0xff] %v4947_v8  ;;  %v4950_v11 = vmax.f32 %v4886_v3, 0.0  ;;  %v4885_v13 = vadd.f32 %v16299_v51, %v4814_v50  ;;  %v4817_v52 = vadd.f32 %v12749_v19, %v4287_v17  ;;  %12994 = vmatprep.mubr.f32.mxu0 %v5073_v49  ;;  %12872 = vmatprep.mubr.f32.mxu1 %v4947_v8  ;;  %v18712_v53 = vld [vmem:[#allocation91_spill] sm:$0xff] }
 0x318   :  { %v4545_v43 = vpop.f32.mrf.mxu0  ;;  %12995 = vmatmul.mubr.f32.gmra.mxu0 %v5074_v4  ;;  %12873 = vmatmul.mubr.f32.gmra.mxu1 %v4948_v42  ;;  %v4291_v42 = vadd.f32 %v16127_v63, %v16064_v0  ;;  %v3762_v3 = vadd.f32 %v16078_v47, %v3231_v27  ;;  %v18708_v0 = vld [vmem:[#allocation88_spill] sm:$0xff]  ;;  %v18709_v63 = vld [vmem:[#allocation89_spill] sm:$0xff] }
 0x319   :  { %5014 = vst [vmem:[#allocation2 + $0x99] sm:$0xff] %v4950_v11  ;;  %v4949_v34 = vmax.f32 %v4885_v13, 0.0  ;;  %v4888_v55 = vadd.f32 %v16299_v51, %v4817_v52  ;;  %v4816_v33 = vadd.f32 %v4545_v43, %v4286_v62  ;;  %v3233_v4 = vadd.f32 %v18709_v63, %v18708_v0  ;;  %v16402_v62 = vpop.f32.mrf.mxu1  ;;  %v18710_v52 = vld [vmem:[#allocation115_spill] sm:$0xff] }
 0x31a   :  { %v12752_v14 = vpop.f32.mrf.mxu0  ;;  %v5075_v60 = vld [vmem:[#allocation2 + $0x60] sm:$0xff]  ;;  %v5076_v24 = vld [vmem:[#allocation2 + $0x68] sm:$0xff] }
 0x31b   :  { %5013 = vst [vmem:[#allocation2 + $0x91] sm:$0xff] %v4949_v34  ;;  %v4952_v39 = vmax.f32 %v4888_v55, 0.0  ;;  %v4887_v41 = vadd.f32 %v16299_v51, %v4816_v33  ;;  %v4819_v57 = vadd.f32 %v12752_v14, %v4289_v38  ;;  %12997 = vmatprep.mubr.f32.mxu0 %v5075_v60  ;;  %12875 = vmatprep.mubr.f32.mxu1 %v4949_v34 }
 0x31c   :  { %v4555_v12 = vpop.f32.mrf.mxu0  ;;  %12998 = vmatmul.mubr.f32.gmra.mxu0 %v5076_v24  ;;  %12876 = vmatmul.mubr.f32.gmra.mxu1 %v4950_v11  ;;  %v3764_v43 = vadd.f32 %v18710_v52, %v3233_v4  ;;  %v4292_v55 = vadd.f32 %v16151_v1, %v3762_v3  ;;  %v3235_v24 = vadd.f32 %v18712_v53, %v18711_v18 }
 0x31d   :  { %5016 = vst [vmem:[#allocation2 + $0xb1] sm:$0xff] %v4952_v39  ;;  %v4951_v23 = vmax.f32 %v4887_v41, 0.0  ;;  %v4890_v20 = vadd.f32 %v16299_v51, %v4819_v57  ;;  %v4818_v40 = vadd.f32 %v4555_v12, %v4288_v35  ;;  %v16412_v35 = vpop.f32.mrf.mxu1  ;;  %v18713_v41 = vld [vmem:[#allocation114_spill] sm:$0xff] }
 0x31e   :  { %v12755_v15 = vpop.f32.mrf.mxu0  ;;  %v5077_v17 = vld [vmem:[#allocation2 + $0x78] sm:$0xff]  ;;  %v5078_v8 = vld [vmem:[#allocation2 + $0x80] sm:$0xff]  ;;  %v4295_v57 = vadd.f32 %v16161_v21, %v18713_v41  ;;  %v4294_v27 = vadd.f32 %v16168_v36, %v3764_v43  ;;  %v18715_v21 = vld [vmem:[#allocation92_spill] sm:$0xff] }
 0x31f   :  { %5015 = vst [vmem:[#allocation2 + $0xa9] sm:$0xff] %v4951_v23  ;;  %v4954_v50 = vmax.f32 %v4890_v20, 0.0  ;;  %v4889_v19 = vadd.f32 %v16299_v51, %v4818_v40  ;;  %v4821_v49 = vadd.f32 %v12755_v15, %v4291_v42  ;;  %13000 = vmatprep.mubr.f32.mxu0 %v5077_v17  ;;  %12878 = vmatprep.mubr.f32.mxu1 %v4951_v23  ;;  %v18714_v20 = vld [vmem:[#allocation117_spill] sm:$0xff]  ;;  %v18717_v36 = vld [vmem:[#allocation116_spill] sm:$0xff] }
 0x320   :  { %v4565_v11 = vpop.f32.mrf.mxu0  ;;  %13001 = vmatmul.mubr.f32.gmra.mxu0 %v5078_v8  ;;  %12879 = vmatmul.mubr.f32.gmra.mxu1 %v4952_v39  ;;  %v3766_v40 = vadd.f32 %v18714_v20, %v3235_v24  ;;  %v18716_v8 = vld [vmem:[#allocation93_spill] sm:$0xff] }
 0x321   :  { %5018 = vst [vmem:[#allocation2 + $0xc9] sm:$0xff] %v4954_v50  ;;  %v4953_v47 = vmax.f32 %v4889_v19, 0.0  ;;  %v4892_v54 = vadd.f32 %v16299_v51, %v4821_v49  ;;  %v4820_v13 = vadd.f32 %v4565_v11, %v4290_v28  ;;  %v3237_v3 = vadd.f32 %v18716_v8, %v18715_v21 }
 0x322   :  { %v12758_v37 = vpop.f32.mrf.mxu0  ;;  %v5079_v38 = vld [vmem:[#allocation2 + $0x90] sm:$0xff]  ;;  %v5080_v34 = vld [vmem:[#allocation2 + $0x98] sm:$0xff]  ;;  %v4297_v49 = vadd.f32 %v16178_v44, %v18717_v36 }
 0x323   :  { %5017 = vst [vmem:[#allocation2 + $0xc1] sm:$0xff] %v4953_v47  ;;  %v4956_v33 = vmax.f32 %v4892_v54, 0.0  ;;  %v4891_v14 = vadd.f32 %v16299_v51, %v4820_v13  ;;  %v4823_v60 = vadd.f32 %v12758_v37, %v4293_v59  ;;  %13003 = vmatprep.mubr.f32.mxu0 %v5079_v38  ;;  %12881 = vmatprep.mubr.f32.mxu1 %v4953_v47  ;;  %v18718_v44 = vld [vmem:[#allocation94_spill] sm:$0xff]  ;;  %v18719_v38 = vld [vmem:[#allocation95_spill] sm:$0xff] }
 0x324   :  { %v4575_v39 = vpop.f32.mrf.mxu0  ;;  %13004 = vmatmul.mubr.f32.gmra.mxu0 %v5080_v34  ;;  %12882 = vmatmul.mubr.f32.gmra.mxu1 %v4954_v50  ;;  %v16422_v50 = vpop.f32.mrf.mxu1  ;;  %v3768_v11 = vadd.f32 %v16102_v32, %v3237_v3  ;;  %v4296_v13 = vadd.f32 %v16185_v6, %v3766_v40  ;;  %v3239_v34 = vadd.f32 %v18719_v38, %v18718_v44  ;;  %v18720_v32 = vld [vmem:[#allocation118_spill] sm:$0xff] }
 0x325   :  { %5020 = vst [vmem:[#allocation2 + $0xe1] sm:$0xff] %v4956_v33  ;;  %v4955_v1 = vmax.f32 %v4891_v14, 0.0  ;;  %v4894_v30 = vadd.f32 %v16299_v51, %v4823_v60  ;;  %v4822_v48 = vadd.f32 %v4575_v39, %v4292_v55  ;;  %v4299_v14 = vadd.f32 %v16195_v2, %v18720_v32  ;;  %v18722_v2 = vld [vmem:[#allocation96_spill] sm:$0xff] }
 0x326   :  { %v12761_v12 = vpop.f32.mrf.mxu0  ;;  %v5081_v42 = vld [vmem:[#allocation2 + $0xa8] sm:$0xff]  ;;  %v5082_v23 = vld [vmem:[#allocation2 + $0xb0] sm:$0xff]  ;;  %v16432_v55 = vpop.f32.mrf.mxu1  ;;  %v4298_v53 = vadd.f32 %v16202_v26, %v3768_v11  ;;  %v18724_v26 = vld [vmem:[#allocation119_spill] sm:$0xff] }
 0x327   :  { %5019 = vst [vmem:[#allocation2 + $0xd9] sm:$0xff] %v4955_v1  ;;  %v4958_v28 = vmax.f32 %v4894_v30, 0.0  ;;  %v4893_v15 = vadd.f32 %v16299_v51, %v4822_v48  ;;  %v4825_v17 = vadd.f32 %v12761_v12, %v4295_v57  ;;  %13006 = vmatprep.mubr.f32.mxu0 %v5081_v42  ;;  %12884 = vmatprep.mubr.f32.mxu1 %v4955_v1  ;;  %v18721_v57 = vld [vmem:[#allocation120_spill] sm:$0xff]  ;;  %v18723_v12 = vld [vmem:[#allocation97_spill] sm:$0xff] }
 0x328   :  { %v4585_v19 = vpop.f32.mrf.mxu0  ;;  %13007 = vmatmul.mubr.f32.gmra.mxu0 %v5082_v23  ;;  %12885 = vmatmul.mubr.f32.gmra.mxu1 %v4956_v33  ;;  %v3770_v1 = vadd.f32 %v18721_v57, %v3239_v34  ;;  %v3241_v42 = vadd.f32 %v18723_v12, %v18722_v2  ;;  %v16442_v23 = vpop.f32.mrf.mxu1  ;;  %v4301_v40 = vadd.f32 %v16212_v29, %v18724_v26  ;;  %v18725_v29 = vld [vmem:[#allocation98_spill] sm:$0xff]  ;;  %v18728_v34 = vld [vmem:[#allocation123_spill] sm:$0xff] }
 0x329   :  { %5022 = vst [vmem:[#allocation2 + $0xf9] sm:$0xff] %v4958_v28  ;;  %v4957_v0 = vmax.f32 %v4893_v15, 0.0  ;;  %v4896_v63 = vadd.f32 %v16299_v51, %v4825_v17  ;;  %v4824_v4 = vadd.f32 %v4585_v19, %v4294_v27 }
 0x32a   :  { %v12764_v59 = vpop.f32.mrf.mxu0  ;;  %v5083_v47 = vld [vmem:[#allocation2 + $0xc0] sm:$0xff]  ;;  %v5084_v54 = vld [vmem:[#allocation2 + $0xc8] sm:$0xff]  ;;  %v3772_v21 = vadd.f32 %v16119_v16, %v3241_v42  ;;  %v4300_v36 = vadd.f32 %v16219_v31, %v3770_v1  ;;  %v18727_v16 = vld [vmem:[#allocation121_spill] sm:$0xff] }
 0x32b   :  { %5021 = vst [vmem:[#allocation2 + $0xf1] sm:$0xff] %v4957_v0  ;;  %v4960_v52 = vmax.f32 %v4896_v63, 0.0  ;;  %v4895_v43 = vadd.f32 %v16299_v51, %v4824_v4  ;;  %v4827_v37 = vadd.f32 %v12764_v59, %v4297_v49  ;;  %13009 = vmatprep.mubr.f32.mxu0 %v5083_v47  ;;  %12887 = vmatprep.mubr.f32.mxu1 %v4957_v0  ;;  %v18726_v4 = vld [vmem:[#allocation99_spill] sm:$0xff]  ;;  %v16452_v59 = vpop.f32.mrf.mxu1 }
 0x32c   :  { %v4595_v33 = vpop.f32.mrf.mxu0  ;;  %13010 = vmatmul.mubr.f32.gmra.mxu0 %v5084_v54  ;;  %12888 = vmatmul.mubr.f32.gmra.mxu1 %v4958_v28  ;;  %v3243_v11 = vadd.f32 %v18726_v4, %v18725_v29  ;;  %v4303_v54 = vadd.f32 %v16229_v45, %v18727_v16  ;;  %v18729_v45 = vld [vmem:[#allocation100_spill] sm:$0xff] }
 0x32d   :  { %5024 = vst [vmem:[#allocation2 + $0x111] sm:$0xff] %v4960_v52  ;;  %v4959_v6 = vmax.f32 %v4895_v43, 0.0  ;;  %v4898_v60 = vadd.f32 %v16299_v51, %v4827_v37  ;;  %v4826_v18 = vadd.f32 %v4595_v33, %v4296_v13  ;;  %v4302_v43 = vadd.f32 %v16242_v61, %v3772_v21  ;;  %v18731_v61 = vld [vmem:[#allocation122_spill] sm:$0xff] }
 0x32e   :  { %v12767_v24 = vpop.f32.mrf.mxu0  ;;  %v5085_v39 = vld [vmem:[#allocation2 + $0xd8] sm:$0xff]  ;;  %v5086_v41 = vld [vmem:[#allocation2 + $0xe0] sm:$0xff]  ;;  %v3774_v33 = vadd.f32 %v18728_v34, %v3243_v11  ;;  %v18741_v34 = vld [vmem:[#allocation157_spill] sm:$0xff] }
 0x32f   :  { %5023 = vst [vmem:[#allocation2 + $0x109] sm:$0xff] %v4959_v6  ;;  %v4962_v30 = vmax.f32 %v4898_v60, 0.0  ;;  %v4897_v48 = vadd.f32 %v16299_v51, %v4826_v18  ;;  %v4829_v27 = vadd.f32 %v12767_v24, %v4299_v14  ;;  %13012 = vmatprep.mubr.f32.mxu0 %v5085_v39  ;;  %12890 = vmatprep.mubr.f32.mxu1 %v4959_v6  ;;  %v18730_v60 = vld [vmem:[#allocation101_spill] sm:$0xff] }
 0x330   :  { %v4605_v20 = vpop.f32.mrf.mxu0  ;;  %13013 = vmatmul.mubr.f32.gmra.mxu0 %v5086_v41  ;;  %12891 = vmatmul.mubr.f32.gmra.mxu1 %v4960_v52  ;;  %v3245_v18 = vadd.f32 %v18730_v60, %v18729_v45  ;;  %v4305_v39 = vadd.f32 %v16258_v9, %v18731_v61  ;;  %v4304_v42 = vadd.f32 %v16271_v10, %v3774_v33  ;;  %v18733_v9 = vld [vmem:[#allocation102_spill] sm:$0xff]  ;;  %v18742_v60 = vld [vmem:[#allocation129_spill] sm:$0xff] }
 0x331   :  { %5026 = vst [vmem:[#allocation2 + $0x129] sm:$0xff] %v4962_v30  ;;  %v4961_v28 = vmax.f32 %v4897_v48, 0.0  ;;  %v4900_v15 = vadd.f32 %v16299_v51, %v4829_v27  ;;  %v4828_v17 = vadd.f32 %v4605_v20, %v4298_v53  ;;  %v16462_v53 = vpop.f32.mrf.mxu1  ;;  %v5179_v11 = vld [vmem:[#allocation2 + $0x1b1] sm:$0xff]  ;;  %v5180_v45 = vld [vmem:[#allocation2 + $0x1b9] sm:$0xff] }
 0x332   :  { %v12770_v8 = vpop.f32.mrf.mxu0  ;;  %v5087_v3 = vld [vmem:[#allocation2 + $0xf0] sm:$0xff]  ;;  %v5088_v19 = vld [vmem:[#allocation2 + $0xf8] sm:$0xff] }
 0x333   :  { %5025 = vst [vmem:[#allocation2 + $0x121] sm:$0xff] %v4961_v28  ;;  %v4964_v49 = vmax.f32 %v4900_v15, 0.0  ;;  %v4899_v0 = vadd.f32 %v16299_v51, %v4828_v17  ;;  %v4831_v63 = vadd.f32 %v12770_v8, %v4301_v40  ;;  %13015 = vmatprep.mubr.f32.mxu0 %v5087_v3  ;;  %12893 = vmatprep.mubr.f32.mxu1 %v4961_v28  ;;  %v18734_v28 = vld [vmem:[#allocation103_spill] sm:$0xff]  ;;  %v16472_v17 = vpop.f32.mrf.mxu1  ;;  %v18735_v8 = vld [vmem:[#allocation124_spill] sm:$0xff] }
 0x334   :  { %v4615_v47 = vpop.f32.mrf.mxu0  ;;  %13016 = vmatmul.mubr.f32.gmra.mxu0 %v5088_v19  ;;  %12894 = vmatmul.mubr.f32.gmra.mxu1 %v4962_v30  ;;  %v18732_v30 = vld [vmem:[#allocation125_spill] sm:$0xff]  ;;  %v3247_v15 = vadd.f32 %v18734_v28, %v18733_v9  ;;  %v4307_v3 = vadd.f32 %v16287_v58, %v18735_v8  ;;  %v18738_v58 = vld [vmem:[#allocation104_spill] sm:$0xff] }
 0x335   :  { %5028 = vst [vmem:[#allocation2 + $0x141] sm:$0xff] %v4964_v49  ;;  %v4963_v31 = vmax.f32 %v4899_v0, 0.0  ;;  %v4902_v13 = vadd.f32 %v16299_v51, %v4831_v63  ;;  %v4830_v52 = vadd.f32 %v4615_v47, %v4300_v36  ;;  %v3776_v48 = vadd.f32 %v18732_v30, %v3245_v18  ;;  %v18737_v47 = vld [vmem:[#allocation127_spill] sm:$0xff] }
 0x336   :  { %v12773_v37 = vpop.f32.mrf.mxu0  ;;  %v5089_v44 = vld [vmem:[#allocation2 + $0x108] sm:$0xff]  ;;  %v5090_v38 = vld [vmem:[#allocation2 + $0x110] sm:$0xff]  ;;  %v3778_v16 = vadd.f32 %v18737_v47, %v3247_v15 }
 0x337   :  { %5027 = vst [vmem:[#allocation2 + $0x139] sm:$0xff] %v4963_v31  ;;  %v4966_v32 = vmax.f32 %v4902_v13, 0.0  ;;  %v4901_v14 = vadd.f32 %v16299_v51, %v4830_v52  ;;  %v4833_v6 = vadd.f32 %v12773_v37, %v4303_v54  ;;  %13018 = vmatprep.mubr.f32.mxu0 %v5089_v44  ;;  %12896 = vmatprep.mubr.f32.mxu1 %v4963_v31  ;;  %v18739_v52 = vld [vmem:[#allocation105_spill] sm:$0xff]  ;;  %v16482_v37 = vpop.f32.mrf.mxu1 }
 0x338   :  { %v4625_v24 = vpop.f32.mrf.mxu0  ;;  %13019 = vmatmul.mubr.f32.gmra.mxu0 %v5090_v38  ;;  %12897 = vmatmul.mubr.f32.gmra.mxu1 %v4964_v49  ;;  %v18736_v49 = vld [vmem:[#allocation156_spill] sm:$0xff]  ;;  %v18740_v38 = vld [vmem:[#allocation126_spill] sm:$0xff] }
 0x339   :  { %5030 = vst [vmem:[#allocation2 + $0x159] sm:$0xff] %v4966_v32  ;;  %v4965_v41 = vmax.f32 %v4901_v14, 0.0  ;;  %v4904_v57 = vadd.f32 %v16299_v51, %v4833_v6  ;;  %v4832_v1 = vadd.f32 %v4625_v24, %v4302_v43  ;;  %v4306_v0 = vadd.f32 %v18736_v49, %v3776_v48  ;;  %v18743_v48 = vld [vmem:[#allocation106_spill] sm:$0xff] }
 0x33a   :  { %v12776_v27 = vpop.f32.mrf.mxu0  ;;  %v5091_v2 = vld [vmem:[#allocation2 + $0x120] sm:$0xff]  ;;  %v5092_v12 = vld [vmem:[#allocation2 + $0x128] sm:$0xff]  ;;  %v3249_v43 = vadd.f32 %v18739_v52, %v18738_v58  ;;  %v4309_v33 = vadd.f32 %v18741_v34, %v18740_v38 }
 0x33b   :  { %5029 = vst [vmem:[#allocation2 + $0x151] sm:$0xff] %v4965_v41  ;;  %v4968_v20 = vmax.f32 %v4904_v57, 0.0  ;;  %v4903_v26 = vadd.f32 %v16299_v51, %v4832_v1  ;;  %v4835_v40 = vadd.f32 %v12776_v27, %v4305_v39  ;;  %13021 = vmatprep.mubr.f32.mxu0 %v5091_v2  ;;  %12899 = vmatprep.mubr.f32.mxu1 %v4965_v41  ;;  %v18744_v27 = vld [vmem:[#allocation107_spill] sm:$0xff] }
 0x33c   :  { %v4635_v21 = vpop.f32.mrf.mxu0  ;;  %13022 = vmatmul.mubr.f32.gmra.mxu0 %v5092_v12  ;;  %12900 = vmatmul.mubr.f32.gmra.mxu1 %v4966_v32  ;;  %v3780_v18 = vadd.f32 %v18742_v60, %v3249_v43  ;;  %v4308_v41 = vadd.f32 %v16340_v46, %v3778_v16  ;;  %v3251_v2 = vadd.f32 %v18744_v27, %v18743_v48  ;;  %v16492_v12 = vpop.f32.mrf.mxu1 }
 0x33d   :  { %5032 = vst [vmem:[#allocation2 + $0x171] sm:$0xff] %v4968_v20  ;;  %v4967_v10 = vmax.f32 %v4903_v26, 0.0  ;;  %v4906_v19 = vadd.f32 %v16299_v51, %v4835_v40  ;;  %v4834_v36 = vadd.f32 %v4635_v21, %v4304_v42 }
 0x33e   :  { %v12779_v63 = vpop.f32.mrf.mxu0  ;;  %v5093_v29 = vld [vmem:[#allocation2 + $0x138] sm:$0xff]  ;;  %v5094_v4 = vld [vmem:[#allocation2 + $0x140] sm:$0xff]  ;;  %v4310_v28 = vadd.f32 %v16365_v56, %v3780_v18 }
 0x33f   :  { %5031 = vst [vmem:[#allocation2 + $0x169] sm:$0xff] %v4967_v10  ;;  %v4970_v54 = vmax.f32 %v4906_v19, 0.0  ;;  %v4905_v31 = vadd.f32 %v16299_v51, %v4834_v36  ;;  %v4837_v13 = vadd.f32 %v12779_v63, %v4307_v3  ;;  %13024 = vmatprep.mubr.f32.mxu0 %v5093_v29  ;;  %12902 = vmatprep.mubr.f32.mxu1 %v4967_v10  ;;  %v18746_v3 = vld [vmem:[#allocation131_spill] sm:$0xff]  ;;  %v16505_v29 = vpop.f32.mrf.mxu1 }
 0x340   :  { %v4645_v44 = vpop.f32.mrf.mxu0  ;;  %13025 = vmatmul.mubr.f32.gmra.mxu0 %v5094_v4  ;;  %12903 = vmatmul.mubr.f32.gmra.mxu1 %v4968_v20  ;;  %v18745_v20 = vld [vmem:[#allocation128_spill] sm:$0xff]  ;;  %v3782_v10 = vadd.f32 %v18746_v3, %v3251_v2  ;;  %v18749_v4 = vld [vmem:[#allocation130_spill] sm:$0xff] }
 0x341   :  { %5034 = vst [vmem:[#allocation2 + $0x189] sm:$0xff] %v4970_v54  ;;  %v4969_v32 = vmax.f32 %v4905_v31, 0.0  ;;  %v4908_v14 = vadd.f32 %v16299_v51, %v4837_v13  ;;  %v4836_v6 = vadd.f32 %v4645_v44, %v4306_v0  ;;  %12905 = vmatprep.mubr.f32.mxu1 %v5179_v11  ;;  %v4311_v26 = vadd.f32 %v16354_v22, %v18745_v20  ;;  %v18747_v22 = vld [vmem:[#allocation108_spill] sm:$0xff]  ;;  %v18748_v0 = vld [vmem:[#allocation109_spill] sm:$0xff]  ;;  %v13980_v31 = vld [vmem:[#allocation2] sm:$0xff] }
 0x342   :  { %v12782_v24 = vpop.f32.mrf.mxu0  ;;  %v5095_v61 = vld [vmem:[#allocation2 + $0x150] sm:$0xff]  ;;  %v5096_v39 = vld [vmem:[#allocation2 + $0x158] sm:$0xff]  ;;  %v3253_v63 = vadd.f32 %v18748_v0, %v18747_v22  ;;  %v4313_v11 = vadd.f32 %v16373_v5, %v18749_v4  ;;  %v4312_v43 = vadd.f32 %v16381_v25, %v3782_v10  ;;  %v18752_v5 = vld [vmem:[#allocation87_spill] sm:$0xff] }
 0x343   :  { %5033 = vst [vmem:[#allocation2 + $0x181] sm:$0xff] %v4969_v32  ;;  %v4972_v57 = vmax.f32 %v4908_v14, 0.0  ;;  %v4907_v1 = vadd.f32 %v16299_v51, %v4836_v6  ;;  %v4839_v30 = vadd.f32 %v12782_v24, %v4309_v33  ;;  %13027 = vmatprep.mubr.f32.mxu0 %v5095_v61  ;;  %v18750_v13 = vld [vmem:[#allocation133_spill] sm:$0xff]  ;;  %v18751_v33 = vld [vmem:[#allocation86_spill] sm:$0xff]  ;;  %v16515_v14 = vpop.f32.mrf.mxu1 }
 0x344   :  { %v4655_v42 = vpop.f32.mrf.mxu0  ;;  %13028 = vmatmul.mubr.f32.gmra.mxu0 %v5096_v39  ;;  %12906 = vmatmul.mubr.f32.gmra.mxu1 %v5180_v45  ;;  %v3784_v58 = vadd.f32 %v18750_v13, %v3253_v63  ;;  %v3255_v32 = vadd.f32 %v18752_v5, %v18751_v33  ;;  %v18753_v45 = vld [vmem:[#allocation132_spill] sm:$0xff] }
 0x345   :  { %5036 = vst [vmem:[#allocation2 + $0x1d1] sm:$0xff] %v4972_v57  ;;  %v4971_v40 = vmax.f32 %v4907_v1, 0.0  ;;  %v4910_v46 = vadd.f32 %v16299_v51, %v4839_v30  ;;  %v4838_v9 = vadd.f32 %v4655_v42, %v4308_v41  ;;  %v4315_v60 = vadd.f32 %v16391_v7, %v18753_v45  ;;  %v18754_v1 = vld [vmem:[#allocation135_spill] sm:$0xff]  ;;  %v18755_v7 = vld [vmem:[#allocation61_spill] sm:$0xff]  ;;  %v18756_v42 = vld [vmem:[#allocation62_spill] sm:$0xff] }
 0x346   :  { %v12785_v15 = vpop.f32.mrf.mxu0  ;;  %v16498_v21 = vld [vmem:[#allocation2 + $0x168] sm:$0xff]  ;;  %v5098_v8 = vld [vmem:[#allocation2 + $0x170] sm:$0xff]  ;;  %v4314_v61 = vadd.f32 %v16402_v62, %v3784_v58  ;;  %v3786_v30 = vadd.f32 %v18754_v1, %v3255_v32  ;;  %v3257_v20 = vadd.f32 %v18756_v42, %v18755_v7 }
 0x347   :  { %5035 = vst [vmem:[#allocation2 + $0x1c9] sm:$0xff] %v4971_v40  ;;  %v4974_v19 = vmax.f32 %v4910_v46, 0.0  ;;  %v4909_v36 = vadd.f32 %v16299_v51, %v4838_v9  ;;  %v4841_v49 = vadd.f32 %v12785_v15, %v4311_v26  ;;  %13030 = vmatprep.mubr.f32.mxu0 %v16498_v21  ;;  %12908 = vmatprep.mubr.f32.mxu1 %v4971_v40  ;;  %v16530_v26 = vpop.f32.mrf.mxu1  ;;  %v18757_v40 = vld [vmem:[#allocation134_spill] sm:$0xff]  ;;  %v18766_v1 = vld [vmem:[#allocation141_spill] sm:$0xff] }
 0x348   :  { %v4665_v56 = vpop.f32.mrf.mxu0  ;;  %13031 = vmatmul.mubr.f32.gmra.mxu0 %v5098_v8  ;;  %12909 = vmatmul.mubr.f32.gmra.mxu1 %v4972_v57  ;;  %v4317_v46 = vadd.f32 %v16412_v35, %v18757_v40  ;;  %v18758_v8 = vld [vmem:[#allocation137_spill] sm:$0xff]  ;;  %v18759_v35 = vld [vmem:[#allocation67_spill] sm:$0xff]  ;;  %v18768_v40 = vld [vmem:[#allocation74_spill] sm:$0xff] }
 0x349   :  { %5038 = vst [vmem:[#allocation2 + $0x1e9] sm:$0xff] %v4974_v19  ;;  %v4973_v47 = vmax.f32 %v4909_v36, 0.0  ;;  %v4912_v16 = vadd.f32 %v16299_v51, %v4841_v49  ;;  %v4840_v54 = vadd.f32 %v4665_v56, %v4310_v28  ;;  %13033 = vmatprep.mubr.f32.mxu0 %v13980_v31  ;;  %v3788_v3 = vadd.f32 %v18758_v8, %v3257_v20  ;;  %v18760_v56 = vld [vmem:[#allocation70_spill] sm:$0xff] }
 0x34a   :  { %v12788_v52 = vpop.f32.mrf.mxu0  ;;  %v4316_v49 = vadd.f32 %v16422_v50, %v3786_v30  ;;  %v3259_v4 = vadd.f32 %v18760_v56, %v18759_v35  ;;  %v18770_v35 = vld [vmem:[#allocation143_spill] sm:$0xff] }
 0x34b   :  { %5037 = vst [vmem:[#allocation2 + $0x1e1] sm:$0xff] %v4973_v47  ;;  %v4976_v44 = vmax.f32 %v4912_v16, 0.0  ;;  %v4911_v38 = vadd.f32 %v16299_v51, %v4840_v54  ;;  %v4843_v34 = vadd.f32 %v12788_v52, %v4313_v11  ;;  %12911 = vmatprep.mubr.f32.mxu1 %v4973_v47  ;;  %v16546_v11 = vpop.f32.mrf.mxu1  ;;  %v18761_v16 = vld [vmem:[#allocation136_spill] sm:$0xff]  ;;  %v4318_v58 = vadd.f32 %v16442_v23, %v3788_v3 }
 0x34c   :  { %v4675_v6 = vpop.f32.mrf.mxu0  ;;  %13034 = vmatmul.mubr.f32.gmra.mxu0 %v13980_v31  ;;  %12912 = vmatmul.mubr.f32.gmra.mxu1 %v4974_v19  ;;  %v4319_v50 = vadd.f32 %v16432_v55, %v18761_v16  ;;  %v18763_v55 = vld [vmem:[#allocation55_spill] sm:$0xff] }
 0x34d   :  { %5040 = vst [vmem:[#allocation2 + $0x201] sm:$0xff] %v4976_v44  ;;  %v4975_v18 = vmax.f32 %v4911_v38, 0.0  ;;  %v4914_v25 = vadd.f32 %v16299_v51, %v4843_v34  ;;  %v4842_v24 = vadd.f32 %v4675_v6, %v4312_v43  ;;  %v18762_v38 = vld [vmem:[#allocation139_spill] sm:$0xff]  ;;  %v18764_v6 = vld [vmem:[#allocation57_spill] sm:$0xff] }
 0x34e   :  { %v12791_v39 = vpop.f32.mrf.mxu0  ;;  %v16521_v41 = vld [vmem:[#allocation2 + $0x1c8] sm:$0xff]  ;;  %v16523_v57 = vld [vmem:[#allocation2 + $0x1d0] sm:$0xff]  ;;  %v3790_v34 = vadd.f32 %v18762_v38, %v3259_v4  ;;  %v3261_v45 = vadd.f32 %v18764_v6, %v18763_v55 }
 0x34f   :  { %5039 = vst [vmem:[#allocation2 + $0x1f9] sm:$0xff] %v4975_v18  ;;  %v4978_v48 = vmax.f32 %v4914_v25, 0.0  ;;  %v4913_v27 = vadd.f32 %v16299_v51, %v4842_v24  ;;  %v4845_v2 = vadd.f32 %v12791_v39, %v4315_v60  ;;  %13036 = vmatprep.mubr.f32.mxu0 %v16521_v41  ;;  %12914 = vmatprep.mubr.f32.mxu1 %v4975_v18  ;;  %v16562_v60 = vpop.f32.mrf.mxu1  ;;  %v18765_v18 = vld [vmem:[#allocation138_spill] sm:$0xff] }
 0x350   :  { %v4685_v62 = vpop.f32.mrf.mxu0  ;;  %13037 = vmatmul.mubr.f32.gmra.mxu0 %v16523_v57  ;;  %12915 = vmatmul.mubr.f32.gmra.mxu1 %v4976_v44  ;;  %v4321_v25 = vadd.f32 %v16452_v59, %v18765_v18  ;;  %v3792_v30 = vadd.f32 %v18766_v1, %v3261_v45  ;;  %v4320_v7 = vadd.f32 %v16462_v53, %v3790_v34  ;;  %v18767_v59 = vld [vmem:[#allocation73_spill] sm:$0xff] }
 0x351   :  { %5042 = vst [vmem:[#allocation2 + $0x219] sm:$0xff] %v4978_v48  ;;  %v4977_v9 = vmax.f32 %v4913_v27, 0.0  ;;  %v4916_v28 = vadd.f32 %v16299_v51, %v4845_v2  ;;  %v4844_v15 = vadd.f32 %v4685_v62, %v4314_v61 }
 0x352   :  { %v12794_v10 = vpop.f32.mrf.mxu0  ;;  %v16537_v19 = vld [vmem:[#allocation2 + $0x1e0] sm:$0xff]  ;;  %v16539_v36 = vld [vmem:[#allocation2 + $0x1e8] sm:$0xff] }
 0x353   :  { %5041 = vst [vmem:[#allocation2 + $0x211] sm:$0xff] %v4977_v9  ;;  %v4980_v22 = vmax.f32 %v4916_v28, 0.0  ;;  %v4915_v0 = vadd.f32 %v16299_v51, %v4844_v15  ;;  %v4847_v63 = vadd.f32 %v12794_v10, %v4317_v46  ;;  %13039 = vmatprep.mubr.f32.mxu0 %v16537_v19  ;;  %12917 = vmatprep.mubr.f32.mxu1 %v4977_v9  ;;  %v16578_v9 = vpop.f32.mrf.mxu1  ;;  %v18769_v15 = vld [vmem:[#allocation140_spill] sm:$0xff] }
 0x354   :  { %v4695_v47 = vpop.f32.mrf.mxu0  ;;  %13040 = vmatmul.mubr.f32.gmra.mxu0 %v16539_v36  ;;  %12918 = vmatmul.mubr.f32.gmra.mxu1 %v4978_v48  ;;  %v3263_v46 = vadd.f32 %v18768_v40, %v18767_v59  ;;  %v4323_v53 = vadd.f32 %v16472_v17, %v18769_v15  ;;  %v18771_v17 = vld [vmem:[#allocation75_spill] sm:$0xff] }
 0x355   :  { %5044 = vst [vmem:[#allocation2 + $0x231] sm:$0xff] %v4980_v22  ;;  %v4979_v54 = vmax.f32 %v4915_v0, 0.0  ;;  %v4918_v31 = vadd.f32 %v16299_v51, %v4847_v63  ;;  %v4846_v13 = vadd.f32 %v4695_v47, %v4316_v49  ;;  %v4322_v49 = vadd.f32 %v16482_v37, %v3792_v30  ;;  %v18777_v30 = vld [vmem:[#allocation144_spill] sm:$0xff] }
 0x356   :  { %v12797_v52 = vpop.f32.mrf.mxu0  ;;  %v16553_v43 = vld [vmem:[#allocation2 + $0x1f8] sm:$0xff]  ;;  %v16555_v44 = vld [vmem:[#allocation2 + $0x200] sm:$0xff]  ;;  %v3794_v56 = vadd.f32 %v18770_v35, %v3263_v46 }
 0x357   :  { %5043 = vst [vmem:[#allocation2 + $0x229] sm:$0xff] %v4979_v54  ;;  %v4982_v33 = vmax.f32 %v4918_v31, 0.0  ;;  %v4917_v5 = vadd.f32 %v16299_v51, %v4846_v13  ;;  %v4849_v32 = vadd.f32 %v12797_v52, %v4319_v50  ;;  %13042 = vmatprep.mubr.f32.mxu0 %v16553_v43  ;;  %12920 = vmatprep.mubr.f32.mxu1 %v4979_v54  ;;  %v18772_v50 = vld [vmem:[#allocation76_spill] sm:$0xff]  ;;  %v16594_v31 = vpop.f32.mrf.mxu1  ;;  %v18773_v13 = vld [vmem:[#allocation142_spill] sm:$0xff]  ;;  %v18778_v46 = vld [vmem:[#allocation147_spill] sm:$0xff] }
 0x358   :  { %v4705_v23 = vpop.f32.mrf.mxu0  ;;  %13043 = vmatmul.mubr.f32.gmra.mxu0 %v16555_v44  ;;  %12921 = vmatmul.mubr.f32.gmra.mxu1 %v4980_v22  ;;  %v3265_v54 = vadd.f32 %v18772_v50, %v18771_v17  ;;  %v4324_v45 = vadd.f32 %v16505_v29, %v3794_v56  ;;  %v4327_v29 = vadd.f32 %v16515_v14, %v18777_v30  ;;  %v18779_v14 = vld [vmem:[#allocation78_spill] sm:$0xff] }
 0x359   :  { %5046 = vst [vmem:[#allocation2 + $0x249] sm:$0xff] %v4982_v33  ;;  %v4981_v24 = vmax.f32 %v4917_v5, 0.0  ;;  %v4920_v61 = vadd.f32 %v16299_v51, %v4849_v32  ;;  %v4848_v39 = vadd.f32 %v4705_v23, %v4318_v58  ;;  %v4325_v58 = vadd.f32 %v16492_v12, %v18773_v13 }
 0x35a   :  { %v12800_v48 = vpop.f32.mrf.mxu0  ;;  %v16569_v27 = vld [vmem:[#allocation2 + $0x210] sm:$0xff]  ;;  %v16571_v2 = vld [vmem:[#allocation2 + $0x218] sm:$0xff] }
 0x35b   :  { %5045 = vst [vmem:[#allocation2 + $0x241] sm:$0xff] %v4981_v24  ;;  %v4984_v42 = vmax.f32 %v4920_v61, 0.0  ;;  %v4919_v20 = vadd.f32 %v16299_v51, %v4848_v39  ;;  %v4851_v62 = vadd.f32 %v12800_v48, %v4321_v25  ;;  %13045 = vmatprep.mubr.f32.mxu0 %v16569_v27  ;;  %12923 = vmatprep.mubr.f32.mxu1 %v4981_v24  ;;  %v18775_v25 = vld [vmem:[#allocation77_spill] sm:$0xff]  ;;  %v18776_v24 = vld [vmem:[#allocation110_spill] sm:$0xff]  ;;  %v16615_v39 = vpop.f32.mrf.mxu1 }
 0x35c   :  { %v4715_v28 = vpop.f32.mrf.mxu0  ;;  %13046 = vmatmul.mubr.f32.gmra.mxu0 %v16571_v2  ;;  %12924 = vmatmul.mubr.f32.gmra.mxu1 %v4982_v33  ;;  %v18774_v33 = vld [vmem:[#allocation145_spill] sm:$0xff]  ;;  %v3267_v61 = vadd.f32 %v18776_v24, %v18775_v25 }
 0x35d   :  { %5048 = vst [vmem:[#allocation2 + $0x261] sm:$0xff] %v4984_v42  ;;  %v4983_v8 = vmax.f32 %v4919_v20, 0.0  ;;  %v4922_v3 = vadd.f32 %v16299_v51, %v4851_v62  ;;  %v4850_v10 = vadd.f32 %v4715_v28, %v4320_v7  ;;  %v3796_v5 = vadd.f32 %v18774_v33, %v3265_v54 }
 0x35e   :  { %v12803_v22 = vpop.f32.mrf.mxu0  ;;  %v16585_v0 = vld [vmem:[#allocation2 + $0x228] sm:$0xff]  ;;  %v16587_v63 = vld [vmem:[#allocation2 + $0x230] sm:$0xff]  ;;  %v3798_v28 = vadd.f32 %v18778_v46, %v3267_v61 }
 0x35f   :  { %5047 = vst [vmem:[#allocation2 + $0x259] sm:$0xff] %v4983_v8  ;;  %v4986_v4 = vmax.f32 %v4922_v3, 0.0  ;;  %v4921_v47 = vadd.f32 %v16299_v51, %v4850_v10  ;;  %v4853_v16 = vadd.f32 %v12803_v22, %v4323_v53  ;;  %13048 = vmatprep.mubr.f32.mxu0 %v16585_v0  ;;  %12926 = vmatprep.mubr.f32.mxu1 %v4983_v8  ;;  %v16602_v51 = vld [vmem:[%s18375_s3] ss:$0 sm:$0xff]  ;;  %v18781_v22 = vld [vmem:[#allocation146_spill] sm:$0xff] }
 0x360   :  { %v4725_v37 = vpop.f32.mrf.mxu0  ;;  %13049 = vmatmul.mubr.f32.gmra.mxu0 %v16587_v63  ;;  %12927 = vmatmul.mubr.f32.gmra.mxu1 %v4984_v42  ;;  %v4326_v20 = vadd.f32 %v16530_v26, %v3796_v5  ;;  %v18780_v3 = vld [vmem:[#allocation79_spill] sm:$0xff]  ;;  %v4329_v35 = vadd.f32 %v16546_v11, %v18781_v22  ;;  %v4328_v13 = vadd.f32 %v16562_v60, %v3798_v28  ;;  %v18783_v11 = vld [vmem:[#allocation80_spill] sm:$0xff]  ;;  %v16649_v60 = vld [vmem:[%s18374_s2 + $0x2f8] sm:$0xff] }
 0x361   :  { %5050 = vst [vmem:[#allocation2 + $0x279] sm:$0xff] %v4986_v4  ;;  %v4985_v52 = vmax.f32 %v4921_v47, 0.0  ;;  %v4924_v38 = vadd.f32 %v16602_v51, %v4853_v16  ;;  %v4852_v34 = vadd.f32 %v4725_v37, %v4322_v49  ;;  %v3269_v10 = vadd.f32 %v18780_v3, %v18779_v14  ;;  %v4245_v49 = vpop.f32.mrf.mxu1  ;;  %v18782_v16 = vld [vmem:[#allocation149_spill] sm:$0xff]  ;;  %13465 = vmatprep.subr.mxu0 %v16649_v60 }
 0x362   :  { %v12806_v32 = vpop.f32.mrf.mxu0  ;;  %v16606_v55 = vld [vmem:[#allocation2 + $0x240] sm:$0xff]  ;;  %v16608_v6 = vld [vmem:[#allocation2 + $0x248] sm:$0xff] }
 0x363   :  { %5049 = vst [vmem:[#allocation2 + $0x271] sm:$0xff] %v4985_v52  ;;  %v4988_v12 = vmax.f32 %v4924_v38, 0.0  ;;  %v4923_v23 = vadd.f32 %v16602_v51, %v4852_v34  ;;  %v4855_v18 = vadd.f32 %v12806_v32, %v4325_v58  ;;  %13051 = vmatprep.mubr.f32.mxu0 %v16606_v55  ;;  %12929 = vmatprep.mubr.f32.mxu1 %v4985_v52  ;;  %v18784_v34 = vld [vmem:[#allocation81_spill] sm:$0xff]  ;;  %v12693_v5 = vpop.f32.mrf.mxu1 }
 0x364   :  { %v4735_v1 = vpop.f32.mrf.mxu0  ;;  %13052 = vmatmul.mubr.f32.gmra.mxu0 %v16608_v6  ;;  %12930 = vmatmul.mubr.f32.gmra.mxu1 %v4986_v4  ;;  %v3800_v17 = vadd.f32 %v18782_v16, %v3269_v10  ;;  %v3271_v33 = vadd.f32 %v18784_v34, %v18783_v11  ;;  %v18790_v10 = vld [vmem:[#allocation153_spill] sm:$0xff] }
 0x365   :  { %5052 = vst [vmem:[#allocation2 + $0x291] sm:$0xff] %v4988_v12  ;;  %v4987_v48 = vmax.f32 %v4923_v23, 0.0  ;;  %v4926_v7 = vadd.f32 %v16602_v51, %v4855_v18  ;;  %v4854_v42 = vadd.f32 %v4735_v1, %v4324_v45  ;;  %v18785_v45 = vld [vmem:[#allocation148_spill] sm:$0xff]  ;;  %v4255_v28 = vpop.f32.mrf.mxu1 }
 0x366   :  { %v12809_v62 = vpop.f32.mrf.mxu0  ;;  %v16622_v59 = vld [vmem:[#allocation2 + $0x258] sm:$0xff]  ;;  %v16624_v40 = vld [vmem:[#allocation2 + $0x260] sm:$0xff]  ;;  %v4330_v24 = vadd.f32 %v16594_v31, %v3800_v17 }
 0x367   :  { %5051 = vst [vmem:[#allocation2 + $0x289] sm:$0xff] %v4987_v48  ;;  %v4990_v15 = vmax.f32 %v4926_v7, 0.0  ;;  %v4925_v53 = vadd.f32 %v16602_v51, %v4854_v42  ;;  %v4857_v8 = vadd.f32 %v12809_v62, %v4327_v29  ;;  %13054 = vmatprep.mubr.f32.mxu0 %v16622_v59  ;;  %12932 = vmatprep.mubr.f32.mxu1 %v4987_v48  ;;  %v18786_v29 = vld [vmem:[#allocation151_spill] sm:$0xff] }
 0x368   :  { %v4745_v26 = vpop.f32.mrf.mxu0  ;;  %13055 = vmatmul.mubr.f32.gmra.mxu0 %v16624_v40  ;;  %12933 = vmatmul.mubr.f32.gmra.mxu1 %v4988_v12  ;;  %v4331_v12 = vadd.f32 %v16578_v9, %v18785_v45  ;;  %v3802_v48 = vadd.f32 %v18786_v29, %v3271_v33  ;;  %v18788_v62 = vld [vmem:[#allocation111_spill] sm:$0xff] }
 0x369   :  { %5054 = vst [vmem:[#allocation2 + $0x2a9] sm:$0xff] %v4990_v15  ;;  %v4989_v56 = vmax.f32 %v4925_v53, 0.0  ;;  %v4928_v4 = vadd.f32 %v16602_v51, %v4857_v8  ;;  %v4856_v47 = vadd.f32 %v4745_v26, %v4326_v20  ;;  %v18787_v20 = vld [vmem:[#allocation82_spill] sm:$0xff] }
 0x36a   :  { %v12812_v50 = vpop.f32.mrf.mxu0  ;;  %v16636_v54 = vld [vmem:[#allocation2 + $0x270] sm:$0xff]  ;;  %v16638_v37 = vld [vmem:[#allocation2 + $0x278] sm:$0xff]  ;;  %v3273_v46 = vadd.f32 %v18788_v62, %v18787_v20 }
 0x36b   :  { %5053 = vst [vmem:[#allocation2 + $0x2a1] sm:$0xff] %v4989_v56  ;;  %v4992_v58 = vmax.f32 %v4928_v4, 0.0  ;;  %v4927_v52 = vadd.f32 %v16602_v51, %v4856_v47  ;;  %v4859_v38 = vadd.f32 %v12812_v50, %v4329_v35  ;;  %13057 = vmatprep.mubr.f32.mxu0 %v16636_v54  ;;  %12935 = vmatprep.mubr.f32.mxu1 %v4989_v56  ;;  %v18792_v50 = vld [vmem:[#allocation112_spill] sm:$0xff] }
 0x36c   :  { %v4755_v32 = vpop.f32.mrf.mxu0  ;;  %13058 = vmatmul.mubr.f32.gmra.mxu0 %v16638_v37  ;;  %12936 = vmatmul.mubr.f32.gmra.mxu1 %v4990_v15  ;;  %v18789_v15 = vld [vmem:[#allocation150_spill] sm:$0xff]  ;;  %v3804_v26 = vadd.f32 %v18790_v10, %v3273_v46  ;;  %v4332_v4 = vadd.f32 %v4245_v49, %v3802_v48 }
 0x36d   :  { %5056 = vst [vmem:[#allocation2 + $0x2c1] sm:$0xff] %v4992_v58  ;;  %v4991_v23 = vmax.f32 %v4927_v52, 0.0  ;;  %v4930_v18 = vadd.f32 %v16602_v51, %v4859_v38  ;;  %v4858_v25 = vadd.f32 %v4755_v32, %v4328_v13  ;;  %v4333_v53 = vadd.f32 %v16615_v39, %v18789_v15  ;;  %v18791_v39 = vld [vmem:[#allocation83_spill] sm:$0xff]  ;;  %v18793_v38 = vld [vmem:[#allocation152_spill] sm:$0xff] }
 0x36e   :  { %v12815_v61 = vpop.f32.mrf.mxu0  ;;  %v16656_v1 = vld [vmem:[#allocation2 + $0x288] sm:$0xff]  ;;  %v16658_v30 = vld [vmem:[#allocation2 + $0x290] sm:$0xff]  ;;  %v3275_v13 = vadd.f32 %v18792_v50, %v18791_v39  ;;  %v4335_v11 = vadd.f32 %v12693_v5, %v18793_v38  ;;  %v4334_v32 = vadd.f32 %v4255_v28, %v3804_v26 }
 0x36f   :  { %5055 = vst [vmem:[#allocation2 + $0x2b9] sm:$0xff] %v4991_v23  ;;  %v4994_v7 = vmax.f32 %v4930_v18, 0.0  ;;  %v4929_v9 = vadd.f32 %v16602_v51, %v4858_v25  ;;  %v4861_v42 = vadd.f32 %v12815_v61, %v4331_v12  ;;  %13060 = vmatprep.mubr.f32.mxu0 %v16656_v1  ;;  %12938 = vmatprep.mubr.f32.mxu1 %v4991_v23  ;;  %v18794_v18 = vld [vmem:[#allocation155_spill] sm:$0xff]  ;;  %v5999_v38 = vld [vmem:[#allocation2 + $0xa] sm:$0xff] }
 0x370   :  { %v4765_v31 = vpop.f32.mrf.mxu0  ;;  %13061 = vmatmul.mubr.f32.gmra.mxu0 %v16658_v30  ;;  %12939 = vmatmul.mubr.f32.gmra.mxu1 %v4992_v58  ;;  %v12696_v58 = vpop.f32.mrf.mxu1  ;;  %v3806_v25 = vadd.f32 %v18794_v18, %v3275_v13  ;;  %v16728_v18 = vld [vmem:[#allocation2 + $0x22] sm:$0xff] }
 0x371   :  { %5058 = vst [vmem:[#allocation2 + $0x2d9] sm:$0xff] %v4994_v7  ;;  %v4993_v8 = vmax.f32 %v4929_v9, 0.0  ;;  %v4932_v14 = vadd.f32 %v16602_v51, %v4861_v42  ;;  %v4860_v3 = vadd.f32 %v4765_v31, %v4330_v24 }
 0x372   :  { %v12818_v22 = vpop.f32.mrf.mxu0  ;;  %v16670_v35 = vld [vmem:[#allocation2 + $0x2a0] sm:$0xff]  ;;  %v16672_v56 = vld [vmem:[#allocation2 + $0x2a8] sm:$0xff]  ;;  %v4265_v5 = vpop.f32.mrf.mxu1 }
 0x373   :  { %5057 = vst [vmem:[#allocation2 + $0x2d1] sm:$0xff] %v4993_v8  ;;  %v4996_v47 = vmax.f32 %v4932_v14, 0.0  ;;  %v4931_v16 = vadd.f32 %v16602_v51, %v4860_v3  ;;  %v4863_v17 = vadd.f32 %v12818_v22, %v4333_v53  ;;  %13063 = vmatprep.mubr.f32.mxu0 %v16670_v35  ;;  %12941 = vmatprep.mubr.f32.mxu1 %v4993_v8 }
 0x374   :  { %v4775_v52 = vpop.f32.mrf.mxu0  ;;  %13064 = vmatmul.mubr.f32.gmra.mxu0 %v16672_v56  ;;  %12942 = vmatmul.mubr.f32.gmra.mxu1 %v4994_v7  ;;  %v18795_v7 = vld [vmem:[#allocation154_spill] sm:$0xff]  ;;  %v4336_v15 = vadd.f32 %v4265_v5, %v3806_v25  ;;  %v10165_v25 = vld [vmem:[%s18374_s2 + $0x268] sm:$0xff] }
 0x375   :  { %5060 = vst [vmem:[#allocation2 + $0x2f1] sm:$0xff] %v4996_v47  ;;  %v4995_v49 = vmax.f32 %v4931_v16, 0.0  ;;  %v4934_v34 = vadd.f32 %v16602_v51, %v4863_v17  ;;  %v4862_v33 = vadd.f32 %v4775_v52, %v4332_v4  ;;  %v4337_v9 = vadd.f32 %v12696_v58, %v18795_v7  ;;  %v5998_v16 = vld [vmem:[#allocation2 + $0x2] sm:$0xff]  ;;  %v12859_v17 = vpop.f32.mrf.mxu1  ;;  %v16738_v5 = vld [vmem:[#allocation2 + $0x3a] sm:$0xff]  ;;  %v6530_v7 = vld [vmem:[#allocation2 + $0x30] sm:$0xff] }
 0x376   :  { %v12821_v45 = vpop.f32.mrf.mxu0  ;;  %v16681_v12 = vld [vmem:[#allocation2 + $0x2b8] sm:$0xff]  ;;  %v16683_v23 = vld [vmem:[#allocation2 + $0x2c0] sm:$0xff] }
 0x377   :  { %5059 = vst [vmem:[#allocation2 + $0x2e9] sm:$0xff] %v4995_v49  ;;  %v4998_v24 = vmax.f32 %v4934_v34, 0.0  ;;  %v4933_v61 = vadd.f32 %v16602_v51, %v4862_v33  ;;  %v4865_v29 = vadd.f32 %v12821_v45, %v4335_v11  ;;  %13066 = vmatprep.mubr.f32.mxu0 %v16681_v12  ;;  %12944 = vmatprep.mubr.f32.mxu1 %v4995_v49  ;;  %v16717_v34 = vld [vmem:[#allocation2 + $0x1a] sm:$0xff] }
 0x378   :  { %v4785_v48 = vpop.f32.mrf.mxu0  ;;  %13067 = vmatmul.mubr.f32.gmra.mxu0 %v16683_v23  ;;  %12945 = vmatmul.mubr.f32.gmra.mxu1 %v4996_v47  ;;  %v13982_v33 = vld [vmem:[%s18374_s2 + $0x278] sm:$0xff] }
 0x379   :  { %5062 = vst [vmem:[#allocation2 + $0x309] sm:$0xff] %v4998_v24  ;;  %v4997_v42 = vmax.f32 %v4933_v61, 0.0  ;;  %v4936_v20 = vadd.f32 %v16602_v51, %v4865_v29  ;;  %v4864_v62 = vadd.f32 %v4785_v48, %v4334_v32  ;;  %v16735_v61 = vld [vmem:[#allocation2 + $0x32] sm:$0xff]  ;;  %v6529_v29 = vld [vmem:[#allocation2 + $0x20] sm:$0xff] }
 0x37a   :  { %v12824_v46 = vpop.f32.mrf.mxu0  ;;  %v16691_v28 = vld [vmem:[#allocation2 + $0x2d0] sm:$0xff]  ;;  %v16693_v31 = vld [vmem:[#allocation2 + $0x2d8] sm:$0xff]  ;;  %v10164_v48 = vld [vmem:[%s18374_s2 + $0x260] sm:$0xff] }
 0x37b   :  { %5061 = vst [vmem:[#allocation2 + $0x301] sm:$0xff] %v4997_v42  ;;  %v5000_v53 = vmax.f32 %v4936_v20, 0.0  ;;  %v4935_v8 = vadd.f32 %v16602_v51, %v4864_v62  ;;  %v4867_v14 = vadd.f32 %v12824_v46, %v4337_v9  ;;  %13069 = vmatprep.mubr.f32.mxu0 %v16691_v28  ;;  %12947 = vmatprep.mubr.f32.mxu1 %v4997_v42  ;;  %v16744_v9 = vld [vmem:[#allocation2 + $0x4a] sm:$0xff]  ;;  %v6531_v20 = vld [vmem:[#allocation2 + $0x38] sm:$0xff] }
 0x37c   :  { %v4795_v3 = vpop.f32.mrf.mxu0  ;;  %13070 = vmatmul.mubr.f32.gmra.mxu0 %v16693_v31  ;;  %12948 = vmatmul.mubr.f32.gmra.mxu1 %v4998_v24  ;;  %v6528_v24 = vld [vmem:[#allocation2 + $0x18] sm:$0xff]  ;;  %v10182_v42 = vld [vmem:[%s18374_s2 + $0x2f0] sm:$0xff] }
 0x37d   :  { %5064 = vst [vmem:[#allocation2 + $0x321] sm:$0xff] %v5000_v53  ;;  %v4999_v10 = vmax.f32 %v4935_v8, 0.0  ;;  %v4938_v26 = vadd.f32 %v16602_v51, %v4867_v14  ;;  %v4866_v22 = vadd.f32 %v4795_v3, %v4336_v15  ;;  %v16751_v62 = vld [vmem:[#allocation2 + $0x52] sm:$0xff]  ;;  %v6532_v15 = vld [vmem:[#allocation2 + $0x48] sm:$0xff] }
 0x37e   :  { %v16699_v4 = vld [vmem:[#allocation2 + $0x2e8] sm:$0xff]  ;;  %v16701_v47 = vld [vmem:[#allocation2 + $0x2f0] sm:$0xff]  ;;  %v12987_v39 = vpop.f32.mrf.mxu0  ;;  %v10163_v46 = vld [vmem:[%s18374_s2 + $0x258] sm:$0xff] }
 0x37f   :  { %5063 = vst [vmem:[#allocation2 + $0x319] sm:$0xff] %v4999_v10  ;;  %v5002_v50 = vmax.f32 %v4938_v26, 0.0  ;;  %v4937_v13 = vadd.f32 %v16602_v51, %v4866_v22  ;;  %13072 = vmatprep.mubr.f32.mxu0 %v16699_v4  ;;  %12950 = vmatprep.mubr.f32.mxu1 %v4999_v10  ;;  %v16705_v58 = vadd.f32 %v12987_v39, %v12859_v17  ;;  %v10166_v51 = vld [vmem:[%s18374_s2 + $0x270] sm:$0xff]  ;;  %v10181_v8 = vld [vmem:[%s18374_s2 + $0x2e8] sm:$0xff]  ;;  %v6534_v10 = vld [vmem:[#allocation2 + $0x60] sm:$0xff] }
 0x380   :  { %13073 = vmatmul.mubr.f32.gmra.mxu0 %v16701_v47  ;;  %12951 = vmatmul.mubr.f32.gmra.mxu1 %v5000_v53  ;;  %v16757_v53 = vld [vmem:[#allocation2 + $0x62] sm:$0xff]  ;;  %v16763_v14 = vld [vmem:[#allocation2 + $0x6a] sm:$0xff]  ;;  %v16769_v26 = vld [vmem:[#allocation2 + $0x7a] sm:$0xff] }
 0x381   :  { %18796 = vst [vmem:[#allocation113_spill] sm:$0xff] %v16705_v58  ;;  %5066 = vst [vmem:[#allocation2 + $0x339] sm:$0xff] %v5002_v50  ;;  %v5001_v52 = vmax.f32 %v4937_v13, 0.0  ;;  %13113 = vmatprep.mubr.f32.mxu1 %v5998_v16  ;;  %v10162_v3 = vld [vmem:[%s18374_s2 + $0x250] sm:$0xff]  ;;  %v10180_v22 = vld [vmem:[%s18374_s2 + $0x2e0] sm:$0xff] }
 0x382   :  { %v16708_v11 = vld [vmem:[#allocation2 + $0x300] sm:$0xff]  ;;  %v16710_v49 = vld [vmem:[#allocation2 + $0x308] sm:$0xff]  ;;  %v6536_v50 = vld [vmem:[#allocation2 + $0x78] sm:$0xff] }
 0x383   :  { %5065 = vst [vmem:[#allocation2 + $0x331] sm:$0xff] %v5001_v52  ;;  %13075 = vmatprep.mubr.f32.mxu0 %v16708_v11  ;;  %v6535_v16 = vld [vmem:[#allocation2 + $0x68] sm:$0xff]  ;;  %v16781_v13 = vld [vmem:[#allocation2 + $0x92] sm:$0xff] }
 0x384   :  { %13076 = vmatmul.mubr.f32.gmra.mxu0 %v16710_v49  ;;  %13114 = vmatmul.mubr.f32.vlgmr.msra.gmra.mxu1 %v5999_v38  ;;  %v16775_v17 = vld [vmem:[#allocation2 + $0x82] sm:$0xff]  ;;  %v10179_v52 = vld [vmem:[%s18374_s2 + $0x2d8] sm:$0xff] }
 0x385   :  { %13116 = vmatprep.mubr.f32.mxu1 %v16717_v34  ;;  %13338 = vmatpush3.msra.mxu1 %v13982_v33  ;;  %v10161_v39 = vld [vmem:[%s18374_s2 + $0x248] sm:$0xff]  ;;  %v6537_v38 = vld [vmem:[#allocation2 + $0x80] sm:$0xff]  ;;  %v6026_v58 = vld [vmem:[#allocation2 + $0x152] sm:$0xff] }
 0x386   :  { %v16723_v32 = vld [vmem:[#allocation2 + $0x318] sm:$0xff]  ;;  %v16725_v45 = vld [vmem:[#allocation2 + $0x320] sm:$0xff]  ;;  %13339 = vmatprep.subr.mxu1 %v10166_v51 }
 0x387   :  { %13078 = vmatprep.mubr.f32.mxu0 %v16723_v32  ;;  %13340 = vmatpush3.msra.mxu1 %v10166_v51  ;;  %v16787_v51 = vld [vmem:[#allocation2 + $0x9a] sm:$0xff] }
 0x388   :  { %13079 = vmatmul.mubr.f32.gmra.mxu0 %v16725_v45  ;;  %13117 = vmatmul.mubr.f32.gmra.mxu1 %v16728_v18  ;;  %v10160_v33 = vld [vmem:[%s18374_s2 + $0x240] sm:$0xff] }
 0x389   :  { %13241 = vmatprep.mubr.f32.mxu0 %v6528_v24  ;;  %13119 = vmatprep.mubr.f32.mxu1 %v16735_v61  ;;  %v16793_v24 = vld [vmem:[#allocation2 + $0xaa] sm:$0xff] }
 0x38a   :  { %13341 = vmatprep.subr.mxu1 %v10165_v25 }
 0x38b   :  { %13342 = vmatpush3.msra.mxu1 %v10165_v25  ;;  %v6538_v25 = vld [vmem:[#allocation2 + $0x90] sm:$0xff] }
 0x38c   :  { %13242 = vmatmul.mubr.f32.vlgmr.msra.gmra.mxu0 %v6529_v29  ;;  %13120 = vmatmul.mubr.f32.gmra.mxu1 %v16738_v5  ;;  %v10178_v29 = vld [vmem:[%s18374_s2 + $0x2d0] sm:$0xff] }
 0x38d   :  { %13244 = vmatprep.mubr.f32.mxu0 %v6530_v7  ;;  %13122 = vmatprep.mubr.f32.mxu1 %v16744_v9  ;;  %v16799_v7 = vld [vmem:[#allocation2 + $0xb2] sm:$0xff] }
 0x38e   :  { %13343 = vmatprep.subr.mxu1 %v10164_v48  ;;  %13466 = vmatpush3.msra.mxu0 %v16649_v60  ;;  %v6533_v60 = vld [vmem:[#allocation2 + $0x50] sm:$0xff] }
 0x38f   :  { %13344 = vmatpush3.msra.mxu1 %v10164_v48  ;;  %13467 = vmatprep.subr.mxu0 %v10182_v42  ;;  %v6539_v48 = vld [vmem:[#allocation2 + $0x98] sm:$0xff] }
 0x390   :  { %13245 = vmatmul.mubr.f32.gmra.mxu0 %v6531_v20  ;;  %13123 = vmatmul.mubr.f32.gmra.mxu1 %v16751_v62  ;;  %v6540_v20 = vld [vmem:[#allocation2 + $0xa8] sm:$0xff] }
 0x391   :  { %13247 = vmatprep.mubr.f32.mxu0 %v6532_v15  ;;  %13125 = vmatprep.mubr.f32.mxu1 %v16757_v53  ;;  %v10177_v15 = vld [vmem:[%s18374_s2 + $0x2c8] sm:$0xff] }
 0x392   :  { %13345 = vmatprep.subr.mxu1 %v10163_v46  ;;  %13468 = vmatpush3.msra.mxu0 %v10182_v42  ;;  %v10159_v42 = vld [vmem:[%s18374_s2 + $0x238] sm:$0xff] }
 0x393   :  { %13346 = vmatpush3.msra.mxu1 %v10163_v46  ;;  %13469 = vmatprep.subr.mxu0 %v10181_v8  ;;  %v16805_v46 = vld [vmem:[#allocation2 + $0xc2] sm:$0xff] }
 0x394   :  { %13248 = vmatmul.mubr.f32.gmra.mxu0 %v6533_v60  ;;  %13126 = vmatmul.mubr.f32.gmra.mxu1 %v16763_v14  ;;  %v16811_v60 = vld [vmem:[#allocation2 + $0xca] sm:$0xff] }
 0x395   :  { %13250 = vmatprep.mubr.f32.mxu0 %v6534_v10  ;;  %13128 = vmatprep.mubr.f32.mxu1 %v16769_v26  ;;  %v6542_v10 = vld [vmem:[#allocation2 + $0xc0] sm:$0xff] }
 0x396   :  { %13347 = vmatprep.subr.mxu1 %v10162_v3  ;;  %13470 = vmatpush3.msra.mxu0 %v10181_v8  ;;  %v6541_v8 = vld [vmem:[#allocation2 + $0xb0] sm:$0xff] }
 0x397   :  { %13348 = vmatpush3.msra.mxu1 %v10162_v3  ;;  %13471 = vmatprep.subr.mxu0 %v10180_v22  ;;  %v10158_v3 = vld [vmem:[%s18374_s2 + $0x230] sm:$0xff] }
 0x398   :  { %13251 = vmatmul.mubr.f32.gmra.mxu0 %v6535_v16  ;;  %13129 = vmatmul.mubr.f32.gmra.mxu1 %v16775_v17  ;;  %v10176_v16 = vld [vmem:[%s18374_s2 + $0x2c0] sm:$0xff] }
 0x399   :  { %13253 = vmatprep.mubr.f32.mxu0 %v6536_v50  ;;  %13131 = vmatprep.mubr.f32.mxu1 %v16781_v13  ;;  %v16823_v50 = vld [vmem:[#allocation2 + $0xe2] sm:$0xff] }
 0x39a   :  { %13349 = vmatprep.subr.mxu1 %v10161_v39  ;;  %13472 = vmatpush3.msra.mxu0 %v10180_v22  ;;  %v16817_v22 = vld [vmem:[#allocation2 + $0xda] sm:$0xff] }
 0x39b   :  { %13350 = vmatpush3.msra.mxu1 %v10161_v39  ;;  %13473 = vmatprep.subr.mxu0 %v10179_v52  ;;  %v6543_v39 = vld [vmem:[#allocation2 + $0xc8] sm:$0xff] }
 0x39c   :  { %13254 = vmatmul.mubr.f32.gmra.mxu0 %v6537_v38  ;;  %13132 = vmatmul.mubr.f32.gmra.mxu1 %v16787_v51  ;;  %v6544_v38 = vld [vmem:[#allocation2 + $0xd8] sm:$0xff] }
 0x39d   :  { %13256 = vmatprep.mubr.f32.mxu0 %v6538_v25  ;;  %13134 = vmatprep.mubr.f32.mxu1 %v16793_v24  ;;  %v10175_v25 = vld [vmem:[%s18374_s2 + $0x2b8] sm:$0xff] }
 0x39e   :  { %13351 = vmatprep.subr.mxu1 %v10160_v33  ;;  %13474 = vmatpush3.msra.mxu0 %v10179_v52  ;;  %v10157_v52 = vld [vmem:[%s18374_s2 + $0x228] sm:$0xff] }
 0x39f   :  { %13352 = vmatpush3.msra.mxu1 %v10160_v33  ;;  %13475 = vmatprep.subr.mxu0 %v10178_v29  ;;  %v16829_v33 = vld [vmem:[#allocation2 + $0xf2] sm:$0xff] }
 0x3a0   :  { %13257 = vmatmul.mubr.f32.gmra.mxu0 %v6539_v48  ;;  %13135 = vmatmul.mubr.f32.gmra.mxu1 %v16799_v7  ;;  %v16835_v48 = vld [vmem:[#allocation2 + $0xfa] sm:$0xff] }
 0x3a1   :  { %13259 = vmatprep.mubr.f32.mxu0 %v6540_v20  ;;  %13137 = vmatprep.mubr.f32.mxu1 %v16805_v46  ;;  %v6546_v20 = vld [vmem:[#allocation2 + $0xf0] sm:$0xff] }
 0x3a2   :  { %13353 = vmatprep.subr.mxu1 %v10159_v42  ;;  %13476 = vmatpush3.msra.mxu0 %v10178_v29  ;;  %v6545_v29 = vld [vmem:[#allocation2 + $0xe0] sm:$0xff] }
 0x3a3   :  { %13354 = vmatpush3.msra.mxu1 %v10159_v42  ;;  %13477 = vmatprep.subr.mxu0 %v10177_v15  ;;  %v10156_v42 = vld [vmem:[%s18374_s2 + $0x220] sm:$0xff] }
 0x3a4   :  { %13260 = vmatmul.mubr.f32.gmra.mxu0 %v6541_v8  ;;  %13138 = vmatmul.mubr.f32.gmra.mxu1 %v16811_v60  ;;  %v10174_v8 = vld [vmem:[%s18374_s2 + $0x2b0] sm:$0xff] }
 0x3a5   :  { %13262 = vmatprep.mubr.f32.mxu0 %v6542_v10  ;;  %13140 = vmatprep.mubr.f32.mxu1 %v16817_v22  ;;  %v16847_v10 = vld [vmem:[#allocation2 + $0x112] sm:$0xff] }
 0x3a6   :  { %13355 = vmatprep.subr.mxu1 %v10158_v3  ;;  %13478 = vmatpush3.msra.mxu0 %v10177_v15  ;;  %v16841_v15 = vld [vmem:[#allocation2 + $0x10a] sm:$0xff]  ;;  %18798 = vst [vmem:[#allocation85_spill] sm:$0xff] %v16847_v10 }
 0x3a7   :  { %13356 = vmatpush3.msra.mxu1 %v10158_v3  ;;  %13479 = vmatprep.subr.mxu0 %v10176_v16  ;;  %18797 = vst [vmem:[#allocation84_spill] sm:$0xff] %v16841_v15  ;;  %v6547_v3 = vld [vmem:[#allocation2 + $0xf8] sm:$0xff] }
 0x3a8   :  { %13263 = vmatmul.mubr.f32.gmra.mxu0 %v6543_v39  ;;  %13141 = vmatmul.mubr.f32.gmra.mxu1 %v16823_v50  ;;  %v6548_v39 = vld [vmem:[#allocation2 + $0x108] sm:$0xff] }
 0x3a9   :  { %13265 = vmatprep.mubr.f32.mxu0 %v6544_v38  ;;  %13143 = vmatprep.mubr.f32.mxu1 %v16829_v33  ;;  %v10173_v38 = vld [vmem:[%s18374_s2 + $0x2a8] sm:$0xff] }
 0x3aa   :  { %13357 = vmatprep.subr.mxu1 %v10157_v52  ;;  %13480 = vmatpush3.msra.mxu0 %v10176_v16  ;;  %v10155_v16 = vld [vmem:[%s18374_s2 + $0x218] sm:$0xff] }
 0x3ab   :  { %13358 = vmatpush3.msra.mxu1 %v10157_v52  ;;  %13481 = vmatprep.subr.mxu0 %v10175_v25  ;;  %v16853_v52 = vld [vmem:[#allocation2 + $0x122] sm:$0xff] }
 0x3ac   :  { %13266 = vmatmul.mubr.f32.gmra.mxu0 %v6545_v29  ;;  %13144 = vmatmul.mubr.f32.gmra.mxu1 %v16835_v48  ;;  %18799 = vst [vmem:[#allocation88_spill] sm:$0xff] %v16853_v52  ;;  %v10154_v29 = vld [vmem:[%s18374_s2 + $0x210] sm:$0xff] }
 0x3ad   :  { %13268 = vmatprep.mubr.f32.mxu0 %v6546_v20  ;;  %13146 = vmatprep.mubr.f32.mxu1 %v16841_v15  ;;  %v16865_v20 = vld [vmem:[#allocation2 + $0x13a] sm:$0xff]  ;;  %v6040_v15 = vld [vmem:[#allocation2 + $0x22a] sm:$0xff] }
 0x3ae   :  { %13359 = vmatprep.subr.mxu1 %v10156_v42  ;;  %13482 = vmatpush3.msra.mxu0 %v10175_v25  ;;  %v16859_v25 = vld [vmem:[#allocation2 + $0x12a] sm:$0xff]  ;;  %18801 = vst [vmem:[#allocation115_spill] sm:$0xff] %v16865_v20 }
 0x3af   :  { %13360 = vmatpush3.msra.mxu1 %v10156_v42  ;;  %13483 = vmatprep.subr.mxu0 %v10174_v8  ;;  %18800 = vst [vmem:[#allocation89_spill] sm:$0xff] %v16859_v25  ;;  %v13983_v42 = vld [vmem:[#allocation2 + $0x110] sm:$0xff] }
 0x3b0   :  { %13269 = vmatmul.mubr.f32.gmra.mxu0 %v6547_v3  ;;  %13147 = vmatmul.mubr.f32.gmra.mxu1 %v16847_v10  ;;  %v10172_v3 = vld [vmem:[%s18374_s2 + $0x2a0] sm:$0xff] }
 0x3b1   :  { %13271 = vmatprep.mubr.f32.mxu0 %v6548_v39  ;;  %13149 = vmatprep.mubr.f32.mxu1 %v16853_v52  ;;  %v13984_v39 = vld [vmem:[#allocation2 + $0x120] sm:$0xff]  ;;  %v13988_v52 = vld [vmem:[#allocation2 + $0x150] sm:$0xff] }
 0x3b2   :  { %13361 = vmatprep.subr.mxu1 %v10155_v16  ;;  %13484 = vmatpush3.msra.mxu0 %v10174_v8  ;;  %v6025_v8 = vld [vmem:[#allocation2 + $0x142] sm:$0xff] }
 0x3b3   :  { %13362 = vmatpush3.msra.mxu1 %v10155_v16  ;;  %13485 = vmatprep.subr.mxu0 %v10173_v38  ;;  %v10153_v16 = vld [vmem:[%s18374_s2 + $0x208] sm:$0xff] }
 0x3b4   :  { %13272 = vmatmul.mubr.f32.gmra.mxu0 %v13983_v42  ;;  %13150 = vmatmul.mubr.f32.gmra.mxu1 %v16859_v25  ;;  %v13985_v42 = vld [vmem:[#allocation2 + $0x128] sm:$0xff]  ;;  %v10171_v25 = vld [vmem:[%s18374_s2 + $0x298] sm:$0xff] }
 0x3b5   :  { %13274 = vmatprep.mubr.f32.mxu0 %v13984_v39  ;;  %13152 = vmatprep.mubr.f32.mxu1 %v16865_v20  ;;  %v13986_v39 = vld [vmem:[#allocation2 + $0x138] sm:$0xff]  ;;  %v13987_v20 = vld [vmem:[#allocation2 + $0x140] sm:$0xff] }
 0x3b6   :  { %13363 = vmatprep.subr.mxu1 %v10154_v29  ;;  %13486 = vmatpush3.msra.mxu0 %v10173_v38  ;;  %v6027_v38 = vld [vmem:[#allocation2 + $0x15a] sm:$0xff] }
 0x3b7   :  { %13364 = vmatpush3.msra.mxu1 %v10154_v29  ;;  %13487 = vmatprep.subr.mxu0 %v10172_v3  ;;  %v10152_v29 = vld [vmem:[%s18374_s2 + $0x200] sm:$0xff] }
 0x3b8   :  { %13275 = vmatmul.mubr.f32.gmra.mxu0 %v13985_v42  ;;  %13153 = vmatmul.mubr.f32.gmra.mxu1 %v6025_v8  ;;  %v6028_v8 = vld [vmem:[#allocation2 + $0x16a] sm:$0xff] }
 0x3b9   :  { %13277 = vmatprep.mubr.f32.mxu0 %v13986_v39  ;;  %13155 = vmatprep.mubr.f32.mxu1 %v6026_v58  ;;  %v10170_v42 = vld [vmem:[%s18374_s2 + $0x290] sm:$0xff]  ;;  %v10169_v39 = vld [vmem:[%s18374_s2 + $0x288] sm:$0xff] }
 0x3ba   :  { %13365 = vmatprep.subr.mxu1 %v10153_v16  ;;  %13488 = vmatpush3.msra.mxu0 %v10172_v3  ;;  %v6030_v58 = vld [vmem:[#allocation2 + $0x1b2] sm:$0xff] }
 0x3bb   :  { %13366 = vmatpush3.msra.mxu1 %v10153_v16  ;;  %13489 = vmatprep.subr.mxu0 %v10171_v25  ;;  %v6029_v3 = vld [vmem:[#allocation2 + $0x172] sm:$0xff] }
 0x3bc   :  { %13278 = vmatmul.mubr.f32.gmra.mxu0 %v13987_v20  ;;  %13156 = vmatmul.mubr.f32.gmra.mxu1 %v6027_v38  ;;  %v16886_v16 = vld [vmem:[%s18374_s2 + $0x378] sm:$0xff]  ;;  %v6558_v38 = vld [vmem:[#allocation2 + $0x180] sm:$0xff] }
 0x3bd   :  { %13280 = vmatprep.mubr.f32.mxu0 %v13988_v52  ;;  %13158 = vmatprep.mubr.f32.mxu1 %v6028_v8  ;;  %v13989_v20 = vld [vmem:[#allocation2 + $0x158] sm:$0xff]  ;;  %v10168_v8 = vld [vmem:[%s18374_s2 + $0x280] sm:$0xff] }
 0x3be   :  { %13367 = vmatprep.subr.mxu1 %v10152_v29  ;;  %13490 = vmatpush3.msra.mxu0 %v10171_v25  ;;  %v6031_v52 = vld [vmem:[#allocation2 + $0x1ba] sm:$0xff]  ;;  %v13990_v25 = vld [vmem:[#allocation2 + $0x170] sm:$0xff] }
 0x3bf   :  { %13368 = vmatpush3.msra.mxu1 %v10152_v29  ;;  %13491 = vmatprep.subr.mxu0 %v10170_v42  ;;  %v6032_v29 = vld [vmem:[#allocation2 + $0x1ca] sm:$0xff] }
 0x3c0   :  { %13281 = vmatmul.mubr.f32.gmra.mxu0 %v13989_v20  ;;  %13159 = vmatmul.mubr.f32.gmra.mxu1 %v6029_v3  ;;  %v16896_v3 = vpop.f32.mrf.mxu1  ;;  %v6034_v20 = vld [vmem:[#allocation2 + $0x1e2] sm:$0xff] }
 0x3c1   :  { %13283 = vmatprep.mubr.f32.mxu0 %v16498_v21  ;;  %13161 = vmatprep.mubr.f32.mxu1 %v6030_v58  ;;  %18802 = vst [vmem:[#allocation90_spill] sm:$0xff] %v16896_v3  ;;  %v6559_v21 = vld [vmem:[#allocation2 + $0x188] sm:$0xff]  ;;  %v6033_v58 = vld [vmem:[#allocation2 + $0x1d2] sm:$0xff] }
 0x3c2   :  { %13492 = vmatpush3.msra.mxu0 %v10170_v42  ;;  %13593 = vmatprep.subr.mxu1 %v16886_v16  ;;  %v6037_v3 = vld [vmem:[#allocation2 + $0x202] sm:$0xff] }
 0x3c3   :  { %13493 = vmatprep.subr.mxu0 %v10169_v39 }
 0x3c4   :  { %13284 = vmatmul.mubr.f32.gmra.mxu0 %v13990_v25  ;;  %13162 = vmatmul.mubr.f32.gmra.mxu1 %v6031_v52  ;;  %v6035_v25 = vld [vmem:[#allocation2 + $0x1ea] sm:$0xff] }
 0x3c5   :  { %13286 = vmatprep.mubr.f32.mxu0 %v6558_v38  ;;  %13164 = vmatprep.mubr.f32.mxu1 %v6032_v29  ;;  %v6036_v29 = vld [vmem:[#allocation2 + $0x1fa] sm:$0xff] }
 0x3c6   :  { %13494 = vmatpush3.msra.mxu0 %v10169_v39  ;;  %v16901_v39 = vpop.f32.mrf.mxu0 }
 0x3c7   :  { %13495 = vmatprep.subr.mxu0 %v10168_v8  ;;  %18803 = vst [vmem:[#allocation91_spill] sm:$0xff] %v16901_v39 }
 0x3c8   :  { %13287 = vmatmul.mubr.f32.gmra.mxu0 %v6559_v21  ;;  %v12862_v42 = vpop.f32.mrf.mxu1  ;;  %13165 = vmatmul.mubr.f32.gmra.mxu1 %v6033_v58 }
 0x3c9   :  { %13289 = vmatprep.mubr.f32.mxu0 %v16521_v41  ;;  %13167 = vmatprep.mubr.f32.mxu1 %v6034_v20  ;;  %v6038_v20 = vld [vmem:[#allocation2 + $0x212] sm:$0xff] }
 0x3ca   :  { %v5304_v52 = vpop.f32.mrf.mxu1  ;;  %13496 = vmatpush3.msra.mxu0 %v10168_v8 }
 0x3cc   :  { %13290 = vmatmul.mubr.f32.gmra.mxu0 %v16523_v57  ;;  %v12865_v38 = vpop.f32.mrf.mxu1  ;;  %13168 = vmatmul.mubr.f32.gmra.mxu1 %v6035_v25 }
 0x3cd   :  { %13292 = vmatprep.mubr.f32.mxu0 %v16537_v19  ;;  %13170 = vmatprep.mubr.f32.mxu1 %v6036_v29  ;;  %v6039_v19 = vld [vmem:[#allocation2 + $0x21a] sm:$0xff] }
 0x3ce   :  { %v5314_v21 = vpop.f32.mrf.mxu1 }
 0x3d0   :  { %v12990_v58 = vpop.f32.mrf.mxu0  ;;  %13293 = vmatmul.mubr.f32.gmra.mxu0 %v16539_v36  ;;  %v12868_v41 = vpop.f32.mrf.mxu1  ;;  %13171 = vmatmul.mubr.f32.gmra.mxu1 %v6037_v3 }
 0x3d1   :  { %v16904_v8 = vadd.f32 %v12990_v58, %v12862_v42  ;;  %13295 = vmatprep.mubr.f32.mxu0 %v16553_v43  ;;  %13173 = vmatprep.mubr.f32.mxu1 %v6038_v20  ;;  %v6041_v58 = vld [vmem:[#allocation2 + $0x232] sm:$0xff] }
 0x3d2   :  { %v5689_v57 = vpop.f32.mrf.mxu0  ;;  %v5324_v25 = vpop.f32.mrf.mxu1 }
 0x3d3   :  { %v16907_v10 = vadd.f32 %v5689_v57, %v5304_v52  ;;  %v6042_v57 = vld [vmem:[#allocation2 + $0x242] sm:$0xff] }
 0x3d4   :  { %v12993_v29 = vpop.f32.mrf.mxu0  ;;  %13296 = vmatmul.mubr.f32.gmra.mxu0 %v16555_v44  ;;  %v12871_v39 = vpop.f32.mrf.mxu1  ;;  %13174 = vmatmul.mubr.f32.gmra.mxu1 %v6039_v19 }
 0x3d5   :  { %v16910_v36 = vadd.f32 %v12993_v29, %v12865_v38  ;;  %13298 = vmatprep.mubr.f32.mxu0 %v16569_v27  ;;  %13176 = vmatprep.mubr.f32.mxu1 %v6040_v15  ;;  %v6043_v15 = vld [vmem:[#allocation2 + $0x24a] sm:$0xff] }
 0x3d6   :  { %v5699_v3 = vpop.f32.mrf.mxu0  ;;  %v5334_v42 = vpop.f32.mrf.mxu1 }
 0x3d7   :  { %v16913_v43 = vadd.f32 %v5699_v3, %v5314_v21  ;;  %v6044_v3 = vld [vmem:[#allocation2 + $0x25a] sm:$0xff] }
 0x3d8   :  { %v12996_v20 = vpop.f32.mrf.mxu0  ;;  %13299 = vmatmul.mubr.f32.gmra.mxu0 %v16571_v2  ;;  %v12874_v52 = vpop.f32.mrf.mxu1  ;;  %13177 = vmatmul.mubr.f32.gmra.mxu1 %v6041_v58 }
 0x3d9   :  { %v16916_v44 = vadd.f32 %v12996_v20, %v12868_v41  ;;  %13301 = vmatprep.mubr.f32.mxu0 %v16585_v0  ;;  %13179 = vmatprep.mubr.f32.mxu1 %v6042_v57  ;;  %v6045_v20 = vld [vmem:[#allocation2 + $0x262] sm:$0xff] }
 0x3da   :  { %v5709_v38 = vpop.f32.mrf.mxu0  ;;  %v5344_v19 = vpop.f32.mrf.mxu1 }
 0x3db   :  { %v16919_v27 = vadd.f32 %v5709_v38, %v5324_v25  ;;  %v6046_v38 = vld [vmem:[#allocation2 + $0x272] sm:$0xff] }
 0x3dc   :  { %v12999_v29 = vpop.f32.mrf.mxu0  ;;  %13302 = vmatmul.mubr.f32.gmra.mxu0 %v16587_v63  ;;  %v12877_v21 = vpop.f32.mrf.mxu1  ;;  %13180 = vmatmul.mubr.f32.gmra.mxu1 %v6043_v15 }
 0x3dd   :  { %v16922_v2 = vadd.f32 %v12999_v29, %v12871_v39  ;;  %13304 = vmatprep.mubr.f32.mxu0 %v16606_v55  ;;  %13182 = vmatprep.mubr.f32.mxu1 %v6044_v3  ;;  %v6047_v29 = vld [vmem:[#allocation2 + $0x27a] sm:$0xff] }
 0x3de   :  { %v5719_v41 = vpop.f32.mrf.mxu0  ;;  %v5354_v58 = vpop.f32.mrf.mxu1 }
 0x3df   :  { %v16925_v0 = vadd.f32 %v5719_v41, %v5334_v42  ;;  %v6048_v41 = vld [vmem:[#allocation2 + $0x28a] sm:$0xff] }
 0x3e0   :  { %v13002_v57 = vpop.f32.mrf.mxu0  ;;  %13305 = vmatmul.mubr.f32.gmra.mxu0 %v16608_v6  ;;  %v12880_v25 = vpop.f32.mrf.mxu1  ;;  %13183 = vmatmul.mubr.f32.gmra.mxu1 %v6045_v20 }
 0x3e1   :  { %v16928_v63 = vadd.f32 %v13002_v57, %v12874_v52  ;;  %13307 = vmatprep.mubr.f32.mxu0 %v16622_v59  ;;  %13185 = vmatprep.mubr.f32.mxu1 %v6046_v38  ;;  %v6049_v57 = vld [vmem:[#allocation2 + $0x292] sm:$0xff] }
 0x3e2   :  { %v5729_v39 = vpop.f32.mrf.mxu0  ;;  %v5364_v15 = vpop.f32.mrf.mxu1 }
 0x3e3   :  { %v16931_v55 = vadd.f32 %v5729_v39, %v5344_v19  ;;  %v6050_v39 = vld [vmem:[#allocation2 + $0x2a2] sm:$0xff] }
 0x3e4   :  { %v13005_v3 = vpop.f32.mrf.mxu0  ;;  %13308 = vmatmul.mubr.f32.gmra.mxu0 %v16624_v40  ;;  %v12883_v42 = vpop.f32.mrf.mxu1  ;;  %13186 = vmatmul.mubr.f32.gmra.mxu1 %v6047_v29 }
 0x3e5   :  { %v16934_v6 = vadd.f32 %v13005_v3, %v12877_v21  ;;  %13310 = vmatprep.mubr.f32.mxu0 %v16636_v54  ;;  %13188 = vmatprep.mubr.f32.mxu1 %v6048_v41  ;;  %v6051_v3 = vld [vmem:[#allocation2 + $0x2aa] sm:$0xff] }
 0x3e6   :  { %v5739_v52 = vpop.f32.mrf.mxu0  ;;  %v5374_v20 = vpop.f32.mrf.mxu1 }
 0x3e7   :  { %v16937_v59 = vadd.f32 %v5739_v52, %v5354_v58  ;;  %v6052_v52 = vld [vmem:[#allocation2 + $0x2ba] sm:$0xff] }
 0x3e8   :  { %v13008_v38 = vpop.f32.mrf.mxu0  ;;  %13311 = vmatmul.mubr.f32.gmra.mxu0 %v16638_v37  ;;  %v12886_v19 = vpop.f32.mrf.mxu1  ;;  %13189 = vmatmul.mubr.f32.gmra.mxu1 %v6049_v57  ;;  %v16949_v37 = vld [vmem:[%s18374_s2 + $0x3f8] sm:$0xff] }
 0x3e9   :  { %v16940_v40 = vadd.f32 %v13008_v38, %v12880_v25  ;;  %13313 = vmatprep.mubr.f32.mxu0 %v16656_v1  ;;  %13191 = vmatprep.mubr.f32.mxu1 %v6050_v39 }
 0x3ea   :  { %v5749_v21 = vpop.f32.mrf.mxu0  ;;  %v5384_v29 = vpop.f32.mrf.mxu1  ;;  %13721 = vmatprep.subr.mxu0 %v16949_v37 }
 0x3eb   :  { %v16943_v54 = vadd.f32 %v5749_v21, %v5364_v15  ;;  %v6054_v21 = vld [vmem:[#allocation2 + $0x2d2] sm:$0xff] }
 0x3ec   :  { %v13011_v41 = vpop.f32.mrf.mxu0  ;;  %13314 = vmatmul.mubr.f32.gmra.mxu0 %v16658_v30  ;;  %v12889_v58 = vpop.f32.mrf.mxu1  ;;  %13192 = vmatmul.mubr.f32.gmra.mxu1 %v6051_v3  ;;  %v6053_v30 = vld [vmem:[#allocation2 + $0x2c2] sm:$0xff] }
 0x3ed   :  { %v16951_v25 = vadd.f32 %v13011_v41, %v12883_v42  ;;  %13316 = vmatprep.mubr.f32.mxu0 %v16670_v35  ;;  %13194 = vmatprep.mubr.f32.mxu1 %v6052_v52  ;;  %v6055_v52 = vld [vmem:[#allocation2 + $0x2da] sm:$0xff] }
 0x3ee   :  { %v5759_v1 = vpop.f32.mrf.mxu0  ;;  %v5394_v15 = vpop.f32.mrf.mxu1 }
 0x3ef   :  { %18804 = vst [vmem:[#allocation114_spill] sm:$0xff] %v16951_v25  ;;  %v16955_v57 = vadd.f32 %v5759_v1, %v5374_v20  ;;  %v6056_v1 = vld [vmem:[#allocation2 + $0x2ea] sm:$0xff] }
 0x3f0   :  { %v13014_v38 = vpop.f32.mrf.mxu0  ;;  %13317 = vmatmul.mubr.f32.gmra.mxu0 %v16672_v56  ;;  %v12892_v39 = vpop.f32.mrf.mxu1  ;;  %13195 = vmatmul.mubr.f32.gmra.mxu1 %v6053_v30 }
 0x3f1   :  { %v16958_v3 = vadd.f32 %v13014_v38, %v12886_v19  ;;  %13319 = vmatprep.mubr.f32.mxu0 %v16681_v12  ;;  %13197 = vmatprep.mubr.f32.mxu1 %v6054_v21  ;;  %v6057_v38 = vld [vmem:[#allocation2 + $0x2f2] sm:$0xff] }
 0x3f2   :  { %v5769_v35 = vpop.f32.mrf.mxu0  ;;  %v5404_v42 = vpop.f32.mrf.mxu1 }
 0x3f3   :  { %v16961_v41 = vadd.f32 %v5769_v35, %v5384_v29  ;;  %v6058_v35 = vld [vmem:[#allocation2 + $0x302] sm:$0xff] }
 0x3f4   :  { %v13017_v25 = vpop.f32.mrf.mxu0  ;;  %13320 = vmatmul.mubr.f32.gmra.mxu0 %v16683_v23  ;;  %v12895_v20 = vpop.f32.mrf.mxu1  ;;  %13198 = vmatmul.mubr.f32.gmra.mxu1 %v6055_v52  ;;  %v6059_v52 = vld [vmem:[#allocation2 + $0x30a] sm:$0xff] }
 0x3f5   :  { %v16964_v56 = vadd.f32 %v13017_v25, %v12889_v58  ;;  %13322 = vmatprep.mubr.f32.mxu0 %v16691_v28  ;;  %13200 = vmatprep.mubr.f32.mxu1 %v6056_v1 }
 0x3f6   :  { %v5779_v19 = vpop.f32.mrf.mxu0  ;;  %v5414_v30 = vpop.f32.mrf.mxu1 }
 0x3f7   :  { %v16967_v12 = vadd.f32 %v5779_v19, %v5394_v15  ;;  %v6060_v19 = vld [vmem:[#allocation2 + $0x31a] sm:$0xff] }
 0x3f8   :  { %v13020_v21 = vpop.f32.mrf.mxu0  ;;  %13323 = vmatmul.mubr.f32.gmra.mxu0 %v16693_v31  ;;  %v12898_v29 = vpop.f32.mrf.mxu1  ;;  %13201 = vmatmul.mubr.f32.gmra.mxu1 %v6057_v38 }
 0x3f9   :  { %v16970_v23 = vadd.f32 %v13020_v21, %v12892_v39  ;;  %13325 = vmatprep.mubr.f32.mxu0 %v16699_v4  ;;  %13203 = vmatprep.mubr.f32.mxu1 %v6058_v35  ;;  %v6061_v21 = vld [vmem:[#allocation2 + $0x322] sm:$0xff] }
 0x3fa   :  { %v5789_v58 = vpop.f32.mrf.mxu0  ;;  %v5424_v25 = vpop.f32.mrf.mxu1 }
 0x3fb   :  { %v16973_v28 = vadd.f32 %v5789_v58, %v5404_v42  ;;  %v7058_v58 = vld [vmem:[#allocation2 + $0x19] sm:$0xff] }
 0x3fc   :  { %v13023_v1 = vpop.f32.mrf.mxu0  ;;  %13326 = vmatmul.mubr.f32.gmra.mxu0 %v16701_v47  ;;  %v12901_v15 = vpop.f32.mrf.mxu1  ;;  %13204 = vmatmul.mubr.f32.gmra.mxu1 %v6059_v52 }
 0x3fd   :  { %v16976_v31 = vadd.f32 %v13023_v1, %v12895_v20  ;;  %13328 = vmatprep.mubr.f32.mxu0 %v16708_v11  ;;  %13206 = vmatprep.mubr.f32.mxu1 %v6060_v19  ;;  %v7059_v1 = vld [vmem:[#allocation2 + $0x21] sm:$0xff] }
 0x3fe   :  { %v5799_v39 = vpop.f32.mrf.mxu0  ;;  %v5434_v38 = vpop.f32.mrf.mxu1 }
 0x3ff   :  { %v16979_v4 = vadd.f32 %v5799_v39, %v5414_v30  ;;  %v6590_v30 = vld [vmem:[#allocation2 + $0x330] sm:$0xff] }
 0x400   :  { %v13026_v35 = vpop.f32.mrf.mxu0  ;;  %13329 = vmatmul.mubr.f32.gmra.mxu0 %v16710_v49  ;;  %v12904_v42 = vpop.f32.mrf.mxu1  ;;  %13207 = vmatmul.mubr.f32.gmra.mxu1 %v6061_v21  ;;  %v7060_v49 = vld [vmem:[#allocation2 + $0x31] sm:$0xff] }
 0x401   :  { %v16982_v47 = vadd.f32 %v13026_v35, %v12898_v29  ;;  %13331 = vmatprep.mubr.f32.mxu0 %v16723_v32  ;;  %13369 = vmatprep.mubr.f32.mxu1 %v7058_v58  ;;  %v10198_v29 = vld [vmem:[%s18374_s2 + $0x370] sm:$0xff]  ;;  %v6591_v58 = vld [vmem:[#allocation2 + $0x338] sm:$0xff] }
 0x402   :  { %v5809_v20 = vpop.f32.mrf.mxu0  ;;  %v5444_v52 = vpop.f32.mrf.mxu1 }
 0x403   :  { %v16985_v11 = vadd.f32 %v5809_v20, %v5424_v25 }
 0x404   :  { %v13029_v19 = vpop.f32.mrf.mxu0  ;;  %13332 = vmatmul.mubr.f32.gmra.mxu0 %v16725_v45  ;;  %v12907_v39 = vpop.f32.mrf.mxu1  ;;  %13370 = vmatmul.mubr.f32.vlgmr.msra.gmra.mxu1 %v7059_v1  ;;  %v7061_v45 = vld [vmem:[#allocation2 + $0x39] sm:$0xff] }
 0x405   :  { %18805 = vst [vmem:[#allocation117_spill] sm:$0xff] %v16985_v11  ;;  %v16991_v21 = vadd.f32 %v13029_v19, %v12901_v15  ;;  %13334 = vmatprep.mubr.f32.mxu0 %v6590_v30  ;;  %13372 = vmatprep.mubr.f32.mxu1 %v7060_v49  ;;  %v7062_v11 = vld [vmem:[#allocation2 + $0x49] sm:$0xff]  ;;  %v7063_v49 = vld [vmem:[#allocation2 + $0x51] sm:$0xff] }
 0x406   :  { %v5819_v32 = vpop.f32.mrf.mxu0  ;;  %13594 = vmatpush3.msra.mxu1 %v16886_v16  ;;  %v5454_v25 = vpop.f32.mrf.mxu1  ;;  %v10197_v15 = vld [vmem:[%s18374_s2 + $0x368] sm:$0xff] }
 0x407   :  { %v16994_v35 = vadd.f32 %v5819_v32, %v5434_v38  ;;  %13595 = vmatprep.subr.mxu1 %v10198_v29 }
 0x408   :  { %v13032_v20 = vpop.f32.mrf.mxu0  ;;  %13335 = vmatmul.mubr.f32.gmra.mxu0 %v6591_v58  ;;  %v12910_v1 = vpop.f32.mrf.mxu1  ;;  %13373 = vmatmul.mubr.f32.gmra.mxu1 %v7061_v45  ;;  %v7064_v45 = vld [vmem:[#allocation2 + $0x61] sm:$0xff] }
 0x409   :  { %v16999_v19 = vadd.f32 %v13032_v20, %v12904_v42  ;;  %13497 = vmatprep.mubr.f32.mxu0 %v16717_v34  ;;  %13375 = vmatprep.mubr.f32.mxu1 %v7062_v11  ;;  %v10196_v42 = vld [vmem:[%s18374_s2 + $0x360] sm:$0xff]  ;;  %v10214_v34 = vld [vmem:[%s18374_s2 + $0x3f0] sm:$0xff] }
 0x40a   :  { %v5829_v16 = vpop.f32.mrf.mxu0  ;;  %v5464_v38 = vpop.f32.mrf.mxu1  ;;  %13596 = vmatpush3.msra.mxu1 %v10198_v29  ;;  %v7065_v20 = vld [vmem:[#allocation2 + $0x69] sm:$0xff] }
 0x40b   :  { %v17002_v30 = vadd.f32 %v5829_v16, %v5444_v52  ;;  %13597 = vmatprep.subr.mxu1 %v10197_v15 }
 0x40c   :  { %v13035_v32 = vpop.f32.mrf.mxu0  ;;  %13498 = vmatmul.mubr.f32.vlgmr.msra.gmra.mxu0 %v16728_v18  ;;  %v12913_v58 = vpop.f32.mrf.mxu1  ;;  %13376 = vmatmul.mubr.f32.gmra.mxu1 %v7063_v49 }
 0x40d   :  { %v17011_v11 = vadd.f32 %v13035_v32, %v12907_v39  ;;  %13500 = vmatprep.mubr.f32.mxu0 %v16735_v61  ;;  %13378 = vmatprep.mubr.f32.mxu1 %v7064_v45  ;;  %v7066_v39 = vld [vmem:[#allocation2 + $0x79] sm:$0xff]  ;;  %v7067_v45 = vld [vmem:[#allocation2 + $0x81] sm:$0xff] }
 0x40e   :  { %v5839_v52 = vpop.f32.mrf.mxu0  ;;  %v5474_v29 = vpop.f32.mrf.mxu1  ;;  %13598 = vmatpush3.msra.mxu1 %v10197_v15  ;;  %13722 = vmatpush3.msra.mxu0 %v16949_v37  ;;  %v10195_v61 = vld [vmem:[%s18374_s2 + $0x358] sm:$0xff]  ;;  %v10213_v15 = vld [vmem:[%s18374_s2 + $0x3e8] sm:$0xff] }
 0x40f   :  { %v17015_v18 = vadd.f32 %v5839_v52, %v5454_v25  ;;  %13599 = vmatprep.subr.mxu1 %v10196_v42  ;;  %13723 = vmatprep.subr.mxu0 %v10214_v34 }
 0x410   :  { %v13038_v16 = vpop.f32.mrf.mxu0  ;;  %13501 = vmatmul.mubr.f32.gmra.mxu0 %v16738_v5  ;;  %v12916_v49 = vpop.f32.mrf.mxu1  ;;  %13379 = vmatmul.mubr.f32.gmra.mxu1 %v7065_v20 }
 0x411   :  { %18806 = vst [vmem:[#allocation92_spill] sm:$0xff] %v17015_v18  ;;  %v17024_v37 = vadd.f32 %v13038_v16, %v12910_v1  ;;  %13503 = vmatprep.mubr.f32.mxu0 %v16744_v9  ;;  %13381 = vmatprep.mubr.f32.mxu1 %v7066_v39  ;;  %v7068_v18 = vld [vmem:[#allocation2 + $0x91] sm:$0xff]  ;;  %v10212_v1 = vld [vmem:[%s18374_s2 + $0x3e0] sm:$0xff] }
 0x412   :  { %v5849_v25 = vpop.f32.mrf.mxu0  ;;  %v5484_v32 = vpop.f32.mrf.mxu1  ;;  %13600 = vmatpush3.msra.mxu1 %v10196_v42  ;;  %13724 = vmatpush3.msra.mxu0 %v10214_v34  ;;  %v10194_v9 = vld [vmem:[%s18374_s2 + $0x350] sm:$0xff]  ;;  %v7069_v16 = vld [vmem:[#allocation2 + $0x99] sm:$0xff] }
 0x413   :  { %v17027_v5 = vadd.f32 %v5849_v25, %v5464_v38  ;;  %13601 = vmatprep.subr.mxu1 %v10195_v61  ;;  %13725 = vmatprep.subr.mxu0 %v10213_v15 }
 0x414   :  { %v13041_v52 = vpop.f32.mrf.mxu0  ;;  %13504 = vmatmul.mubr.f32.gmra.mxu0 %v16751_v62  ;;  %v12919_v20 = vpop.f32.mrf.mxu1  ;;  %13382 = vmatmul.mubr.f32.gmra.mxu1 %v7067_v45  ;;  %v7070_v45 = vld [vmem:[#allocation2 + $0xa9] sm:$0xff] }
 0x415   :  { %v17036_v42 = vadd.f32 %v13041_v52, %v12913_v58  ;;  %13506 = vmatprep.mubr.f32.mxu0 %v16757_v53  ;;  %13384 = vmatprep.mubr.f32.mxu1 %v7068_v18  ;;  %v10193_v53 = vld [vmem:[%s18374_s2 + $0x348] sm:$0xff]  ;;  %v10211_v58 = vld [vmem:[%s18374_s2 + $0x3d8] sm:$0xff] }
 0x416   :  { %v5859_v38 = vpop.f32.mrf.mxu0  ;;  %v5494_v34 = vpop.f32.mrf.mxu1  ;;  %13602 = vmatpush3.msra.mxu1 %v10195_v61  ;;  %13726 = vmatpush3.msra.mxu0 %v10213_v15  ;;  %v7071_v15 = vld [vmem:[#allocation2 + $0xb1] sm:$0xff] }
 0x417   :  { %v17039_v62 = vadd.f32 %v5859_v38, %v5474_v29  ;;  %13603 = vmatprep.subr.mxu1 %v10194_v9  ;;  %13727 = vmatprep.subr.mxu0 %v10212_v1 }
 0x418   :  { %v13044_v39 = vpop.f32.mrf.mxu0  ;;  %13507 = vmatmul.mubr.f32.gmra.mxu0 %v16763_v14  ;;  %v12922_v25 = vpop.f32.mrf.mxu1  ;;  %13385 = vmatmul.mubr.f32.gmra.mxu1 %v7069_v16  ;;  %v7072_v16 = vld [vmem:[#allocation2 + $0xc1] sm:$0xff] }
 0x419   :  { %v17048_v18 = vadd.f32 %v13044_v39, %v12916_v49  ;;  %13509 = vmatprep.mubr.f32.mxu0 %v16769_v26  ;;  %13387 = vmatprep.mubr.f32.mxu1 %v7070_v45  ;;  %v10192_v26 = vld [vmem:[%s18374_s2 + $0x340] sm:$0xff]  ;;  %v10210_v49 = vld [vmem:[%s18374_s2 + $0x3d0] sm:$0xff] }
 0x41a   :  { %v5869_v29 = vpop.f32.mrf.mxu0  ;;  %v5504_v61 = vpop.f32.mrf.mxu1  ;;  %13604 = vmatpush3.msra.mxu1 %v10194_v9  ;;  %13728 = vmatpush3.msra.mxu0 %v10212_v1  ;;  %v7073_v39 = vld [vmem:[#allocation2 + $0xc9] sm:$0xff] }
 0x41b   :  { %v17051_v14 = vadd.f32 %v5869_v29, %v5484_v32  ;;  %13605 = vmatprep.subr.mxu1 %v10193_v53  ;;  %13729 = vmatprep.subr.mxu0 %v10211_v58 }
 0x41c   :  { %v13047_v52 = vpop.f32.mrf.mxu0  ;;  %13510 = vmatmul.mubr.f32.gmra.mxu0 %v16775_v17  ;;  %v12925_v38 = vpop.f32.mrf.mxu1  ;;  %13388 = vmatmul.mubr.f32.gmra.mxu1 %v7071_v15  ;;  %v7074_v15 = vld [vmem:[#allocation2 + $0xd9] sm:$0xff] }
 0x41d   :  { %v17060_v9 = vadd.f32 %v13047_v52, %v12919_v20  ;;  %13512 = vmatprep.mubr.f32.mxu0 %v16781_v13  ;;  %13390 = vmatprep.mubr.f32.mxu1 %v7072_v16  ;;  %v10191_v13 = vld [vmem:[%s18374_s2 + $0x338] sm:$0xff]  ;;  %v10209_v20 = vld [vmem:[%s18374_s2 + $0x3c8] sm:$0xff] }
 0x41e   :  { %v5879_v32 = vpop.f32.mrf.mxu0  ;;  %v5514_v1 = vpop.f32.mrf.mxu1  ;;  %13606 = vmatpush3.msra.mxu1 %v10193_v53  ;;  %13730 = vmatpush3.msra.mxu0 %v10211_v58  ;;  %v7075_v52 = vld [vmem:[#allocation2 + $0xe1] sm:$0xff] }
 0x41f   :  { %v17063_v17 = vadd.f32 %v5879_v32, %v5494_v34  ;;  %13607 = vmatprep.subr.mxu1 %v10192_v26  ;;  %13731 = vmatprep.subr.mxu0 %v10210_v49 }
 0x420   :  { %v13050_v45 = vpop.f32.mrf.mxu0  ;;  %13513 = vmatmul.mubr.f32.gmra.mxu0 %v16787_v51  ;;  %v12928_v29 = vpop.f32.mrf.mxu1  ;;  %13391 = vmatmul.mubr.f32.gmra.mxu1 %v7073_v39  ;;  %v7076_v39 = vld [vmem:[#allocation2 + $0xf1] sm:$0xff] }
 0x421   :  { %v17072_v53 = vadd.f32 %v13050_v45, %v12922_v25  ;;  %13515 = vmatprep.mubr.f32.mxu0 %v16793_v24  ;;  %13393 = vmatprep.mubr.f32.mxu1 %v7074_v15  ;;  %v10190_v24 = vld [vmem:[%s18374_s2 + $0x330] sm:$0xff]  ;;  %v10208_v25 = vld [vmem:[%s18374_s2 + $0x3c0] sm:$0xff] }
 0x422   :  { %v5889_v34 = vpop.f32.mrf.mxu0  ;;  %v5524_v58 = vpop.f32.mrf.mxu1  ;;  %13608 = vmatpush3.msra.mxu1 %v10192_v26  ;;  %13732 = vmatpush3.msra.mxu0 %v10210_v49  ;;  %v7077_v45 = vld [vmem:[#allocation2 + $0xf9] sm:$0xff] }
 0x423   :  { %v17075_v51 = vadd.f32 %v5889_v34, %v5504_v61  ;;  %13609 = vmatprep.subr.mxu1 %v10191_v13  ;;  %13733 = vmatprep.subr.mxu0 %v10209_v20 }
 0x424   :  { %v13053_v16 = vpop.f32.mrf.mxu0  ;;  %13516 = vmatmul.mubr.f32.gmra.mxu0 %v16799_v7  ;;  %v12931_v32 = vpop.f32.mrf.mxu1  ;;  %13394 = vmatmul.mubr.f32.gmra.mxu1 %v7075_v52  ;;  %v7078_v52 = vld [vmem:[#allocation2 + $0x109] sm:$0xff] }
 0x425   :  { %v17084_v26 = vadd.f32 %v13053_v16, %v12925_v38  ;;  %13518 = vmatprep.mubr.f32.mxu0 %v16805_v46  ;;  %13396 = vmatprep.mubr.f32.mxu1 %v7076_v39  ;;  %v10189_v46 = vld [vmem:[%s18374_s2 + $0x328] sm:$0xff]  ;;  %v10207_v38 = vld [vmem:[%s18374_s2 + $0x3b8] sm:$0xff] }
 0x426   :  { %v5899_v61 = vpop.f32.mrf.mxu0  ;;  %v5534_v49 = vpop.f32.mrf.mxu1  ;;  %13610 = vmatpush3.msra.mxu1 %v10191_v13  ;;  %13734 = vmatpush3.msra.mxu0 %v10209_v20  ;;  %v7079_v16 = vld [vmem:[#allocation2 + $0x111] sm:$0xff] }
 0x427   :  { %v17087_v7 = vadd.f32 %v5899_v61, %v5514_v1  ;;  %13611 = vmatprep.subr.mxu1 %v10190_v24  ;;  %13735 = vmatprep.subr.mxu0 %v10208_v25 }
 0x428   :  { %v13056_v15 = vpop.f32.mrf.mxu0  ;;  %13519 = vmatmul.mubr.f32.gmra.mxu0 %v16811_v60  ;;  %v12934_v34 = vpop.f32.mrf.mxu1  ;;  %13397 = vmatmul.mubr.f32.gmra.mxu1 %v7077_v45  ;;  %v7080_v45 = vld [vmem:[#allocation2 + $0x121] sm:$0xff] }
 0x429   :  { %v17096_v13 = vadd.f32 %v13056_v15, %v12928_v29  ;;  %13521 = vmatprep.mubr.f32.mxu0 %v16817_v22  ;;  %13399 = vmatprep.mubr.f32.mxu1 %v7078_v52  ;;  %v10188_v22 = vld [vmem:[%s18374_s2 + $0x320] sm:$0xff]  ;;  %v10206_v29 = vld [vmem:[%s18374_s2 + $0x3b0] sm:$0xff] }
 0x42a   :  { %v5909_v1 = vpop.f32.mrf.mxu0  ;;  %v5544_v20 = vpop.f32.mrf.mxu1  ;;  %13612 = vmatpush3.msra.mxu1 %v10190_v24  ;;  %13736 = vmatpush3.msra.mxu0 %v10208_v25  ;;  %v7081_v15 = vld [vmem:[#allocation2 + $0x129] sm:$0xff] }
 0x42b   :  { %18807 = vst [vmem:[#allocation93_spill] sm:$0xff] %v17096_v13  ;;  %v17099_v60 = vadd.f32 %v5909_v1, %v5524_v58  ;;  %13613 = vmatprep.subr.mxu1 %v10189_v46  ;;  %13737 = vmatprep.subr.mxu0 %v10207_v38  ;;  %v7094_v13 = vld [vmem:[#allocation2 + $0x1f9] sm:$0xff] }
 0x42c   :  { %v13059_v39 = vpop.f32.mrf.mxu0  ;;  %13522 = vmatmul.mubr.f32.gmra.mxu0 %v16823_v50  ;;  %v12937_v61 = vpop.f32.mrf.mxu1  ;;  %13400 = vmatmul.mubr.f32.gmra.mxu1 %v7079_v16  ;;  %v7082_v16 = vld [vmem:[#allocation2 + $0x139] sm:$0xff] }
 0x42d   :  { %18808 = vst [vmem:[#allocation116_spill] sm:$0xff] %v17099_v60  ;;  %v17108_v24 = vadd.f32 %v13059_v39, %v12931_v32  ;;  %13524 = vmatprep.mubr.f32.mxu0 %v16829_v33  ;;  %13402 = vmatprep.mubr.f32.mxu1 %v7080_v45  ;;  %v10187_v33 = vld [vmem:[%s18374_s2 + $0x318] sm:$0xff]  ;;  %v10205_v32 = vld [vmem:[%s18374_s2 + $0x3a8] sm:$0xff] }
 0x42e   :  { %v5919_v58 = vpop.f32.mrf.mxu0  ;;  %v5554_v25 = vpop.f32.mrf.mxu1  ;;  %13614 = vmatpush3.msra.mxu1 %v10189_v46  ;;  %13738 = vmatpush3.msra.mxu0 %v10207_v38  ;;  %v7083_v45 = vld [vmem:[#allocation2 + $0x141] sm:$0xff]  ;;  %v7090_v60 = vld [vmem:[#allocation2 + $0x1c9] sm:$0xff] }
 0x42f   :  { %18809 = vst [vmem:[#allocation94_spill] sm:$0xff] %v17108_v24  ;;  %v17111_v50 = vadd.f32 %v5919_v58, %v5534_v49  ;;  %13615 = vmatprep.subr.mxu1 %v10188_v22  ;;  %13739 = vmatprep.subr.mxu0 %v10206_v29  ;;  %v18812_v49 = vld [vmem:[#allocation84_spill] sm:$0xff]  ;;  %v7084_v24 = vld [vmem:[#allocation2 + $0x151] sm:$0xff] }
 0x430   :  { %v13062_v52 = vpop.f32.mrf.mxu0  ;;  %13525 = vmatmul.mubr.f32.gmra.mxu0 %v16835_v48  ;;  %v12940_v1 = vpop.f32.mrf.mxu1  ;;  %13403 = vmatmul.mubr.f32.gmra.mxu1 %v7081_v15  ;;  %v18814_v15 = vld [vmem:[#allocation85_spill] sm:$0xff] }
 0x431   :  { %18810 = vst [vmem:[#allocation95_spill] sm:$0xff] %v17111_v50  ;;  %v17120_v46 = vadd.f32 %v13062_v52, %v12934_v34  ;;  %13527 = vmatprep.mubr.f32.mxu0 %v18812_v49  ;;  %13405 = vmatprep.mubr.f32.mxu1 %v7082_v16  ;;  %v10186_v34 = vld [vmem:[%s18374_s2 + $0x310] sm:$0xff] }
 0x432   :  { %v5929_v38 = vpop.f32.mrf.mxu0  ;;  %v5564_v39 = vpop.f32.mrf.mxu1  ;;  %13616 = vmatpush3.msra.mxu1 %v10188_v22  ;;  %13740 = vmatpush3.msra.mxu0 %v10206_v29  ;;  %v10204_v22 = vld [vmem:[%s18374_s2 + $0x3a0] sm:$0xff] }
 0x433   :  { %18811 = vst [vmem:[#allocation118_spill] sm:$0xff] %v17120_v46  ;;  %v17123_v48 = vadd.f32 %v5929_v38, %v5544_v20  ;;  %13617 = vmatprep.subr.mxu1 %v10187_v33  ;;  %13741 = vmatprep.subr.mxu0 %v10205_v32  ;;  %v18816_v20 = vld [vmem:[#allocation88_spill] sm:$0xff]  ;;  %v7085_v38 = vld [vmem:[#allocation2 + $0x159] sm:$0xff] }
 0x434   :  { %v13065_v58 = vpop.f32.mrf.mxu0  ;;  %13528 = vmatmul.mubr.f32.gmra.mxu0 %v18814_v15  ;;  %v12943_v50 = vpop.f32.mrf.mxu1  ;;  %13406 = vmatmul.mubr.f32.gmra.mxu1 %v7083_v45  ;;  %v18818_v15 = vld [vmem:[#allocation89_spill] sm:$0xff] }
 0x435   :  { %18813 = vst [vmem:[#allocation120_spill] sm:$0xff] %v17123_v48  ;;  %v17132_v29 = vadd.f32 %v13065_v58, %v12937_v61  ;;  %13530 = vmatprep.mubr.f32.mxu0 %v18816_v20  ;;  %13408 = vmatprep.mubr.f32.mxu1 %v7084_v24  ;;  %v7086_v46 = vld [vmem:[#allocation2 + $0x169] sm:$0xff]  ;;  %v10203_v24 = vld [vmem:[%s18374_s2 + $0x398] sm:$0xff] }
 0x436   :  { %v5939_v52 = vpop.f32.mrf.mxu0  ;;  %v5574_v16 = vpop.f32.mrf.mxu1  ;;  %13618 = vmatpush3.msra.mxu1 %v10187_v33  ;;  %13742 = vmatpush3.msra.mxu0 %v10205_v32  ;;  %v10185_v61 = vld [vmem:[%s18374_s2 + $0x308] sm:$0xff] }
 0x437   :  { %18815 = vst [vmem:[#allocation96_spill] sm:$0xff] %v17132_v29  ;;  %v17135_v49 = vadd.f32 %v5939_v52, %v5554_v25  ;;  %13619 = vmatprep.subr.mxu1 %v10186_v34  ;;  %13743 = vmatprep.subr.mxu0 %v10204_v22  ;;  %v18820_v25 = vld [vmem:[#allocation115_spill] sm:$0xff] }
 0x438   :  { %v13068_v45 = vpop.f32.mrf.mxu0  ;;  %13531 = vmatmul.mubr.f32.gmra.mxu0 %v18818_v15  ;;  %v12946_v48 = vpop.f32.mrf.mxu1  ;;  %13409 = vmatmul.mubr.f32.gmra.mxu1 %v7085_v38  ;;  %v7613_v52 = vld [vmem:[#allocation2 + $0x142] sm:$0xff]  ;;  %v7614_v38 = vld [vmem:[#allocation2 + $0x152] sm:$0xff] }
 0x439   :  { %18817 = vst [vmem:[#allocation97_spill] sm:$0xff] %v17135_v49  ;;  %v17144_v33 = vadd.f32 %v13068_v45, %v12940_v1  ;;  %13533 = vmatprep.mubr.f32.mxu0 %v18820_v25  ;;  %13411 = vmatprep.mubr.f32.mxu1 %v7086_v46  ;;  %v7087_v15 = vld [vmem:[#allocation2 + $0x171] sm:$0xff]  ;;  %v7088_v1 = vld [vmem:[#allocation2 + $0x181] sm:$0xff] }
 0x43a   :  { %v5949_v32 = vpop.f32.mrf.mxu0  ;;  %v5584_v58 = vpop.f32.mrf.mxu1  ;;  %13620 = vmatpush3.msra.mxu1 %v10186_v34  ;;  %13744 = vmatpush3.msra.mxu0 %v10204_v22  ;;  %v10184_v46 = vld [vmem:[%s18374_s2 + $0x300] sm:$0xff]  ;;  %v10202_v34 = vld [vmem:[%s18374_s2 + $0x390] sm:$0xff] }
 0x43b   :  { %18819 = vst [vmem:[#allocation119_spill] sm:$0xff] %v17144_v33  ;;  %v17147_v20 = vadd.f32 %v5949_v32, %v5564_v39  ;;  %13621 = vmatprep.subr.mxu1 %v10185_v61  ;;  %13745 = vmatprep.subr.mxu0 %v10203_v24  ;;  %v7615_v32 = vld [vmem:[#allocation2 + $0x15a] sm:$0xff] }
 0x43c   :  { %v13071_v49 = vpop.f32.mrf.mxu0  ;;  %13534 = vmatmul.mubr.f32.gmra.mxu0 %v7613_v52  ;;  %v12949_v29 = vpop.f32.mrf.mxu1  ;;  %13412 = vmatmul.mubr.f32.gmra.mxu1 %v7087_v15  ;;  %v7616_v52 = vld [vmem:[#allocation2 + $0x16a] sm:$0xff] }
 0x43d   :  { %18821 = vst [vmem:[#allocation98_spill] sm:$0xff] %v17147_v20  ;;  %v17155_v39 = vadd.f32 %v13071_v49, %v12943_v50  ;;  %13536 = vmatprep.mubr.f32.mxu0 %v7614_v38  ;;  %13414 = vmatprep.mubr.f32.mxu1 %v7088_v1  ;;  %v7089_v15 = vld [vmem:[#allocation2 + $0x189] sm:$0xff]  ;;  %v17165_v49 = vld [vmem:[%s18374_s2 + $0x478] sm:$0xff] }
 0x43e   :  { %v5959_v22 = vpop.f32.mrf.mxu0  ;;  %v5594_v45 = vpop.f32.mrf.mxu1  ;;  %13622 = vmatpush3.msra.mxu1 %v10185_v61  ;;  %13746 = vmatpush3.msra.mxu0 %v10203_v24  ;;  %v10201_v50 = vld [vmem:[%s18374_s2 + $0x388] sm:$0xff]  ;;  %v7617_v1 = vld [vmem:[#allocation2 + $0x172] sm:$0xff] }
 0x43f   :  { %18822 = vst [vmem:[#allocation99_spill] sm:$0xff] %v17155_v39  ;;  %v17157_v25 = vadd.f32 %v5959_v22, %v5574_v16  ;;  %13623 = vmatprep.subr.mxu1 %v10184_v46  ;;  %13747 = vmatprep.subr.mxu0 %v10202_v34  ;;  %v7091_v22 = vld [vmem:[#allocation2 + $0x1d1] sm:$0xff] }
 0x440   :  { %v13074_v20 = vpop.f32.mrf.mxu0  ;;  %13537 = vmatmul.mubr.f32.gmra.mxu0 %v7615_v32  ;;  %v12952_v33 = vpop.f32.mrf.mxu1  ;;  %13415 = vmatmul.mubr.f32.gmra.mxu1 %v7089_v15  ;;  %v7618_v15 = vld [vmem:[#allocation2 + $0x182] sm:$0xff] }
 0x441   :  { %18823 = vst [vmem:[#allocation121_spill] sm:$0xff] %v17157_v25  ;;  %v17167_v16 = vadd.f32 %v13074_v20, %v12946_v48  ;;  %13539 = vmatprep.mubr.f32.mxu0 %v7616_v52  ;;  %13417 = vmatprep.mubr.f32.mxu1 %v7090_v60  ;;  %v7092_v48 = vld [vmem:[#allocation2 + $0x1e1] sm:$0xff] }
 0x442   :  { %v5969_v61 = vpop.f32.mrf.mxu0  ;;  %v5604_v24 = vpop.f32.mrf.mxu1  ;;  %13624 = vmatpush3.msra.mxu1 %v10184_v46  ;;  %13748 = vmatpush3.msra.mxu0 %v10202_v34  ;;  %v10200_v60 = vld [vmem:[%s18374_s2 + $0x380] sm:$0xff] }
 0x443   :  { %18824 = vst [vmem:[#allocation123_spill] sm:$0xff] %v17167_v16  ;;  %v17169_v38 = vadd.f32 %v5969_v61, %v5584_v58  ;;  %13749 = vmatprep.subr.mxu0 %v10201_v50  ;;  %13849 = vmatprep.subr.mxu1 %v17165_v49  ;;  %v18826_v58 = vld [vmem:[#allocation113_spill] sm:$0xff] }
 0x444   :  { %v13077_v32 = vpop.f32.mrf.mxu0  ;;  %13540 = vmatmul.mubr.f32.gmra.mxu0 %v7617_v1  ;;  %v13115_v25 = vpop.f32.mrf.mxu1  ;;  %13418 = vmatmul.mubr.f32.gmra.mxu1 %v7091_v22  ;;  %v7619_v1 = vld [vmem:[#allocation2 + $0x18a] sm:$0xff] }
 0x445   :  { %18825 = vst [vmem:[#allocation100_spill] sm:$0xff] %v17169_v38  ;;  %v17175_v20 = vadd.f32 %v13077_v32, %v12949_v29  ;;  %13542 = vmatprep.mubr.f32.mxu0 %v7618_v15  ;;  %v6465_v46 = vadd.f32 %v13115_v25, %v18826_v58  ;;  %13420 = vmatprep.mubr.f32.mxu1 %v7092_v48  ;;  %v7093_v38 = vld [vmem:[#allocation2 + $0x1e9] sm:$0xff] }
 0x446   :  { %v5979_v34 = vpop.f32.mrf.mxu0  ;;  %v6145_v52 = vpop.f32.mrf.mxu1  ;;  %13750 = vmatpush3.msra.mxu0 %v10201_v50  ;;  %v7620_v16 = vld [vmem:[#allocation2 + $0x1ca] sm:$0xff]  ;;  %v18829_v50 = vld [vmem:[#allocation91_spill] sm:$0xff] }
 0x447   :  { %v17178_v61 = vadd.f32 %v5979_v34, %v5594_v45  ;;  %13751 = vmatprep.subr.mxu0 %v10200_v60  ;;  %v18828_v45 = vld [vmem:[#allocation90_spill] sm:$0xff] }
 0x448   :  { %v13080_v22 = vpop.f32.mrf.mxu0  ;;  %13543 = vmatmul.mubr.f32.gmra.mxu0 %v7619_v1  ;;  %v13118_v39 = vpop.f32.mrf.mxu1  ;;  %13421 = vmatmul.mubr.f32.gmra.mxu1 %v7093_v38  ;;  %v5680_v48 = vadd.f32 %v18829_v50, %v18828_v45  ;;  %v7621_v34 = vld [vmem:[#allocation2 + $0x1d2] sm:$0xff]  ;;  %v7623_v45 = vld [vmem:[#allocation2 + $0x1ea] sm:$0xff] }
 0x449   :  { %18827 = vst [vmem:[#allocation101_spill] sm:$0xff] %v17178_v61  ;;  %v17180_v29 = vadd.f32 %v13080_v22, %v12952_v33  ;;  %13545 = vmatprep.mubr.f32.mxu0 %v7620_v16  ;;  %v6467_v25 = vadd.f32 %v13118_v39, %v16904_v8  ;;  %13423 = vmatprep.mubr.f32.mxu1 %v7094_v13  ;;  %v7095_v61 = vld [vmem:[#allocation2 + $0x201] sm:$0xff]  ;;  %v7096_v16 = vld [vmem:[#allocation2 + $0x211] sm:$0xff] }
 0x44a   :  { %v5989_v32 = vpop.f32.mrf.mxu0  ;;  %v6155_v15 = vpop.f32.mrf.mxu1  ;;  %13752 = vmatpush3.msra.mxu0 %v10200_v60  ;;  %v7622_v33 = vld [vmem:[#allocation2 + $0x1e2] sm:$0xff]  ;;  %v6464_v13 = vadd.f32 %v6145_v52, %v5680_v48 }
 0x44b   :  { %v17185_v58 = vadd.f32 %v5989_v32, %v5604_v24  ;;  %v6466_v1 = vadd.f32 %v6155_v15, %v16907_v10  ;;  %v7097_v15 = vld [vmem:[#allocation2 + $0x219] sm:$0xff] }
 0x44c   :  { %v13243_v38 = vpop.f32.mrf.mxu0  ;;  %13546 = vmatmul.mubr.f32.gmra.mxu0 %v7621_v34  ;;  %v13121_v22 = vpop.f32.mrf.mxu1  ;;  %13424 = vmatmul.mubr.f32.gmra.mxu1 %v7095_v61  ;;  %v7624_v34 = vld [vmem:[#allocation2 + $0x1fa] sm:$0xff] }
 0x44d   :  { %v17188_v8 = vadd.f32 %v13243_v38, %v6465_v46  ;;  %13548 = vmatprep.mubr.f32.mxu0 %v7622_v33  ;;  %v6469_v39 = vadd.f32 %v13121_v22, %v16910_v36  ;;  %13426 = vmatprep.mubr.f32.mxu1 %v7096_v16  ;;  %v7098_v46 = vld [vmem:[#allocation2 + $0x229] sm:$0xff]  ;;  %v7099_v16 = vld [vmem:[#allocation2 + $0x231] sm:$0xff] }
 0x44e   :  { %v6675_v60 = vpop.f32.mrf.mxu0  ;;  %v6165_v24 = vpop.f32.mrf.mxu1  ;;  %v7625_v22 = vld [vmem:[#allocation2 + $0x202] sm:$0xff] }
 0x44f   :  { %v17191_v32 = vadd.f32 %v6675_v60, %v6464_v13  ;;  %v6468_v10 = vadd.f32 %v6165_v24, %v16913_v43  ;;  %v7626_v60 = vld [vmem:[#allocation2 + $0x212] sm:$0xff] }
 0x450   :  { %v13246_v50 = vpop.f32.mrf.mxu0  ;;  %13549 = vmatmul.mubr.f32.gmra.mxu0 %v7623_v45  ;;  %v13124_v61 = vpop.f32.mrf.mxu1  ;;  %13427 = vmatmul.mubr.f32.gmra.mxu1 %v7097_v15  ;;  %v7100_v45 = vld [vmem:[#allocation2 + $0x241] sm:$0xff] }
 0x451   :  { %v17194_v38 = vadd.f32 %v13246_v50, %v6467_v25  ;;  %13551 = vmatprep.mubr.f32.mxu0 %v7624_v34  ;;  %v6471_v36 = vadd.f32 %v13124_v61, %v16916_v44  ;;  %13429 = vmatprep.mubr.f32.mxu1 %v7098_v46  ;;  %v7627_v34 = vld [vmem:[#allocation2 + $0x21a] sm:$0xff]  ;;  %v7101_v61 = vld [vmem:[#allocation2 + $0x249] sm:$0xff] }
 0x452   :  { %v6685_v52 = vpop.f32.mrf.mxu0  ;;  %v6175_v48 = vpop.f32.mrf.mxu1 }
 0x453   :  { %v17197_v33 = vadd.f32 %v6685_v52, %v6466_v1  ;;  %v6470_v43 = vadd.f32 %v6175_v48, %v16919_v27  ;;  %v7628_v52 = vld [vmem:[#allocation2 + $0x22a] sm:$0xff] }
 0x454   :  { %v13249_v13 = vpop.f32.mrf.mxu0  ;;  %13552 = vmatmul.mubr.f32.gmra.mxu0 %v7625_v22  ;;  %v13127_v24 = vpop.f32.mrf.mxu1  ;;  %13430 = vmatmul.mubr.f32.gmra.mxu1 %v7099_v16  ;;  %v7102_v22 = vld [vmem:[#allocation2 + $0x259] sm:$0xff] }
 0x455   :  { %v17200_v25 = vadd.f32 %v13249_v13, %v6469_v39  ;;  %13554 = vmatprep.mubr.f32.mxu0 %v7626_v60  ;;  %v6473_v44 = vadd.f32 %v13127_v24, %v16922_v2  ;;  %13432 = vmatprep.mubr.f32.mxu1 %v7100_v45  ;;  %v7629_v60 = vld [vmem:[#allocation2 + $0x232] sm:$0xff]  ;;  %v7103_v24 = vld [vmem:[#allocation2 + $0x261] sm:$0xff] }
 0x456   :  { %v6695_v15 = vpop.f32.mrf.mxu0  ;;  %v6185_v50 = vpop.f32.mrf.mxu1 }
 0x457   :  { %v17203_v1 = vadd.f32 %v6695_v15, %v6468_v10  ;;  %v6472_v27 = vadd.f32 %v6185_v50, %v16925_v0  ;;  %v7630_v15 = vld [vmem:[#allocation2 + $0x242] sm:$0xff] }
 0x458   :  { %v13252_v46 = vpop.f32.mrf.mxu0  ;;  %13555 = vmatmul.mubr.f32.gmra.mxu0 %v7627_v34  ;;  %v13130_v48 = vpop.f32.mrf.mxu1  ;;  %13433 = vmatmul.mubr.f32.gmra.mxu1 %v7101_v61  ;;  %v7104_v34 = vld [vmem:[#allocation2 + $0x271] sm:$0xff] }
 0x459   :  { %v17206_v39 = vadd.f32 %v13252_v46, %v6471_v36  ;;  %13557 = vmatprep.mubr.f32.mxu0 %v7628_v52  ;;  %v6475_v2 = vadd.f32 %v13130_v48, %v16928_v63  ;;  %13435 = vmatprep.mubr.f32.mxu1 %v7102_v22  ;;  %v7631_v52 = vld [vmem:[#allocation2 + $0x24a] sm:$0xff]  ;;  %v7105_v48 = vld [vmem:[#allocation2 + $0x279] sm:$0xff] }
 0x45a   :  { %v6705_v16 = vpop.f32.mrf.mxu0  ;;  %v6195_v13 = vpop.f32.mrf.mxu1 }
 0x45b   :  { %v17209_v10 = vadd.f32 %v6705_v16, %v6470_v43  ;;  %v6474_v0 = vadd.f32 %v6195_v13, %v16931_v55  ;;  %v7632_v16 = vld [vmem:[#allocation2 + $0x25a] sm:$0xff] }
 0x45c   :  { %v13255_v45 = vpop.f32.mrf.mxu0  ;;  %13558 = vmatmul.mubr.f32.gmra.mxu0 %v7629_v60  ;;  %v13133_v50 = vpop.f32.mrf.mxu1  ;;  %13436 = vmatmul.mubr.f32.gmra.mxu1 %v7103_v24  ;;  %v7106_v60 = vld [vmem:[#allocation2 + $0x289] sm:$0xff] }
 0x45d   :  { %v17212_v36 = vadd.f32 %v13255_v45, %v6473_v44  ;;  %13560 = vmatprep.mubr.f32.mxu0 %v7630_v15  ;;  %v6477_v63 = vadd.f32 %v13133_v50, %v16934_v6  ;;  %13438 = vmatprep.mubr.f32.mxu1 %v7104_v34  ;;  %v7633_v15 = vld [vmem:[#allocation2 + $0x262] sm:$0xff]  ;;  %v7107_v50 = vld [vmem:[#allocation2 + $0x291] sm:$0xff] }
 0x45e   :  { %v6715_v61 = vpop.f32.mrf.mxu0  ;;  %v6205_v46 = vpop.f32.mrf.mxu1 }
 0x45f   :  { %v17215_v43 = vadd.f32 %v6715_v61, %v6472_v27  ;;  %v6476_v55 = vadd.f32 %v6205_v46, %v16937_v59  ;;  %v7634_v61 = vld [vmem:[#allocation2 + $0x272] sm:$0xff] }
 0x460   :  { %v13258_v22 = vpop.f32.mrf.mxu0  ;;  %13561 = vmatmul.mubr.f32.gmra.mxu0 %v7631_v52  ;;  %v13136_v13 = vpop.f32.mrf.mxu1  ;;  %13439 = vmatmul.mubr.f32.gmra.mxu1 %v7105_v48  ;;  %v7108_v52 = vld [vmem:[#allocation2 + $0x2a1] sm:$0xff]  ;;  %v18830_v48 = vld [vmem:[#allocation114_spill] sm:$0xff] }
 0x461   :  { %v17218_v44 = vadd.f32 %v13258_v22, %v6475_v2  ;;  %13563 = vmatprep.mubr.f32.mxu0 %v7632_v16  ;;  %v6479_v6 = vadd.f32 %v13136_v13, %v16940_v40  ;;  %13441 = vmatprep.mubr.f32.mxu1 %v7106_v60  ;;  %v7635_v13 = vld [vmem:[#allocation2 + $0x27a] sm:$0xff]  ;;  %v7109_v60 = vld [vmem:[#allocation2 + $0x2a9] sm:$0xff] }
 0x462   :  { %v6725_v24 = vpop.f32.mrf.mxu0  ;;  %v6215_v45 = vpop.f32.mrf.mxu1 }
 0x463   :  { %v17221_v27 = vadd.f32 %v6725_v24, %v6474_v0  ;;  %v6478_v59 = vadd.f32 %v6215_v45, %v16943_v54  ;;  %v7636_v45 = vld [vmem:[#allocation2 + $0x28a] sm:$0xff] }
 0x464   :  { %v13261_v34 = vpop.f32.mrf.mxu0  ;;  %13564 = vmatmul.mubr.f32.gmra.mxu0 %v7633_v15  ;;  %v13139_v46 = vpop.f32.mrf.mxu1  ;;  %13442 = vmatmul.mubr.f32.gmra.mxu1 %v7107_v50  ;;  %v7110_v50 = vld [vmem:[#allocation2 + $0x2b9] sm:$0xff] }
 0x465   :  { %v17224_v2 = vadd.f32 %v13261_v34, %v6477_v63  ;;  %13566 = vmatprep.mubr.f32.mxu0 %v7634_v61  ;;  %v6481_v40 = vadd.f32 %v13139_v46, %v18830_v48  ;;  %13444 = vmatprep.mubr.f32.mxu1 %v7108_v52  ;;  %v7637_v52 = vld [vmem:[#allocation2 + $0x292] sm:$0xff]  ;;  %v7111_v48 = vld [vmem:[#allocation2 + $0x2c1] sm:$0xff] }
 0x466   :  { %v6735_v22 = vpop.f32.mrf.mxu0  ;;  %v6225_v16 = vpop.f32.mrf.mxu1 }
 0x467   :  { %v17227_v0 = vadd.f32 %v6735_v22, %v6476_v55  ;;  %v6480_v54 = vadd.f32 %v6225_v16, %v16955_v57  ;;  %v7638_v16 = vld [vmem:[#allocation2 + $0x2a2] sm:$0xff] }
 0x468   :  { %v13264_v24 = vpop.f32.mrf.mxu0  ;;  %13567 = vmatmul.mubr.f32.gmra.mxu0 %v7635_v13  ;;  %v13142_v15 = vpop.f32.mrf.mxu1  ;;  %13445 = vmatmul.mubr.f32.gmra.mxu1 %v7109_v60  ;;  %v7112_v60 = vld [vmem:[#allocation2 + $0x2d1] sm:$0xff] }
 0x469   :  { %v17230_v63 = vadd.f32 %v13264_v24, %v6479_v6  ;;  %13569 = vmatprep.mubr.f32.mxu0 %v7636_v45  ;;  %v6483_v34 = vadd.f32 %v13142_v15, %v16958_v3  ;;  %13447 = vmatprep.mubr.f32.mxu1 %v7110_v50  ;;  %v7639_v15 = vld [vmem:[#allocation2 + $0x2aa] sm:$0xff]  ;;  %v7113_v50 = vld [vmem:[#allocation2 + $0x2d9] sm:$0xff] }
 0x46a   :  { %v6745_v61 = vpop.f32.mrf.mxu0  ;;  %v6235_v46 = vpop.f32.mrf.mxu1 }
 0x46b   :  { %v17233_v55 = vadd.f32 %v6745_v61, %v6478_v59  ;;  %v6482_v57 = vadd.f32 %v6235_v46, %v16961_v41  ;;  %v7640_v46 = vld [vmem:[#allocation2 + $0x2ba] sm:$0xff] }
 0x46c   :  { %v13267_v22 = vpop.f32.mrf.mxu0  ;;  %13570 = vmatmul.mubr.f32.gmra.mxu0 %v7637_v52  ;;  %v13145_v13 = vpop.f32.mrf.mxu1  ;;  %13448 = vmatmul.mubr.f32.gmra.mxu1 %v7111_v48  ;;  %v7114_v48 = vld [vmem:[#allocation2 + $0x2e9] sm:$0xff] }
 0x46d   :  { %v17236_v6 = vadd.f32 %v13267_v22, %v6481_v40  ;;  %13572 = vmatprep.mubr.f32.mxu0 %v7638_v16  ;;  %v6485_v3 = vadd.f32 %v13145_v13, %v16964_v56  ;;  %13450 = vmatprep.mubr.f32.mxu1 %v7112_v60  ;;  %v7641_v13 = vld [vmem:[#allocation2 + $0x2c2] sm:$0xff]  ;;  %v7115_v60 = vld [vmem:[#allocation2 + $0x2f1] sm:$0xff] }
 0x46e   :  { %v6755_v24 = vpop.f32.mrf.mxu0  ;;  %v6245_v45 = vpop.f32.mrf.mxu1 }
 0x46f   :  { %v17239_v59 = vadd.f32 %v6755_v24, %v6480_v54  ;;  %v6484_v41 = vadd.f32 %v6245_v45, %v16967_v12  ;;  %v7642_v45 = vld [vmem:[#allocation2 + $0x2d2] sm:$0xff] }
 0x470   :  { %v13270_v61 = vpop.f32.mrf.mxu0  ;;  %13573 = vmatmul.mubr.f32.gmra.mxu0 %v7639_v15  ;;  %v13148_v52 = vpop.f32.mrf.mxu1  ;;  %13451 = vmatmul.mubr.f32.gmra.mxu1 %v7113_v50  ;;  %v7116_v50 = vld [vmem:[#allocation2 + $0x301] sm:$0xff] }
 0x471   :  { %v17242_v40 = vadd.f32 %v13270_v61, %v6483_v34  ;;  %13575 = vmatprep.mubr.f32.mxu0 %v7640_v46  ;;  %v6487_v56 = vadd.f32 %v13148_v52, %v16970_v23  ;;  %13453 = vmatprep.mubr.f32.mxu1 %v7114_v48  ;;  %v7643_v52 = vld [vmem:[#allocation2 + $0x2da] sm:$0xff]  ;;  %v7117_v48 = vld [vmem:[#allocation2 + $0x309] sm:$0xff] }
 0x472   :  { %v6765_v22 = vpop.f32.mrf.mxu0  ;;  %v6255_v16 = vpop.f32.mrf.mxu1 }
 0x473   :  { %v17245_v54 = vadd.f32 %v6765_v22, %v6482_v57  ;;  %v6486_v12 = vadd.f32 %v6255_v16, %v16973_v28  ;;  %v7644_v16 = vld [vmem:[#allocation2 + $0x2ea] sm:$0xff] }
 0x474   :  { %v13273_v24 = vpop.f32.mrf.mxu0  ;;  %13576 = vmatmul.mubr.f32.gmra.mxu0 %v7641_v13  ;;  %v13151_v15 = vpop.f32.mrf.mxu1  ;;  %13454 = vmatmul.mubr.f32.gmra.mxu1 %v7115_v60  ;;  %v7118_v60 = vld [vmem:[#allocation2 + $0x319] sm:$0xff] }
 0x475   :  { %v17248_v34 = vadd.f32 %v13273_v24, %v6485_v3  ;;  %13578 = vmatprep.mubr.f32.mxu0 %v7642_v45  ;;  %v6489_v23 = vadd.f32 %v13151_v15, %v16976_v31  ;;  %13456 = vmatprep.mubr.f32.mxu1 %v7116_v50  ;;  %v7645_v15 = vld [vmem:[#allocation2 + $0x2f2] sm:$0xff] }
 0x476   :  { %v6775_v61 = vpop.f32.mrf.mxu0  ;;  %v6265_v46 = vpop.f32.mrf.mxu1  ;;  %v18832_v50 = vld [vmem:[#allocation117_spill] sm:$0xff] }
 0x477   :  { %v17251_v57 = vadd.f32 %v6775_v61, %v6484_v41  ;;  %v6488_v28 = vadd.f32 %v6265_v46, %v16979_v4  ;;  %v7119_v61 = vld [vmem:[#allocation2 + $0x321] sm:$0xff] }
 0x478   :  { %v13276_v22 = vpop.f32.mrf.mxu0  ;;  %13579 = vmatmul.mubr.f32.gmra.mxu0 %v7643_v52  ;;  %v13154_v13 = vpop.f32.mrf.mxu1  ;;  %13457 = vmatmul.mubr.f32.gmra.mxu1 %v7117_v48  ;;  %v7646_v52 = vld [vmem:[#allocation2 + $0x302] sm:$0xff]  ;;  %v7120_v48 = vld [vmem:[#allocation2 + $0x331] sm:$0xff] }
 0x479   :  { %18831 = vst [vmem:[#allocation122_spill] sm:$0xff] %v17251_v57  ;;  %v17254_v3 = vadd.f32 %v13276_v22, %v6487_v56  ;;  %13581 = vmatprep.mubr.f32.mxu0 %v7644_v16  ;;  %v6491_v31 = vadd.f32 %v13154_v13, %v16982_v47  ;;  %13459 = vmatprep.mubr.f32.mxu1 %v7118_v60  ;;  %v7647_v13 = vld [vmem:[#allocation2 + $0x30a] sm:$0xff] }
 0x47a   :  { %v6785_v24 = vpop.f32.mrf.mxu0  ;;  %v6275_v45 = vpop.f32.mrf.mxu1 }
 0x47b   :  { %v17257_v41 = vadd.f32 %v6785_v24, %v6486_v12  ;;  %v6490_v4 = vadd.f32 %v6275_v45, %v18832_v50  ;;  %v7121_v24 = vld [vmem:[#allocation2 + $0x339] sm:$0xff] }
 0x47c   :  { %v13279_v46 = vpop.f32.mrf.mxu0  ;;  %13582 = vmatmul.mubr.f32.gmra.mxu0 %v7645_v15  ;;  %v13157_v57 = vpop.f32.mrf.mxu1  ;;  %13460 = vmatmul.mubr.f32.gmra.mxu1 %v7119_v61  ;;  %v7648_v15 = vld [vmem:[#allocation2 + $0x31a] sm:$0xff]  ;;  %v8118_v61 = vld [vmem:[#allocation2 + $0x30] sm:$0xff] }
 0x47d   :  { %v17260_v56 = vadd.f32 %v13279_v46, %v6489_v23  ;;  %13584 = vmatprep.mubr.f32.mxu0 %v7646_v52  ;;  %v6493_v47 = vadd.f32 %v13157_v57, %v16991_v21  ;;  %13462 = vmatprep.mubr.f32.mxu1 %v7120_v48  ;;  %v7649_v52 = vld [vmem:[#allocation2 + $0x322] sm:$0xff]  ;;  %v8119_v48 = vld [vmem:[#allocation2 + $0x38] sm:$0xff] }
 0x47e   :  { %v6795_v22 = vpop.f32.mrf.mxu0  ;;  %v6285_v16 = vpop.f32.mrf.mxu1 }
 0x47f   :  { %v17263_v12 = vadd.f32 %v6795_v22, %v6488_v28  ;;  %v6492_v60 = vadd.f32 %v6285_v16, %v16994_v35  ;;  %v7650_v16 = vld [vmem:[#allocation2 + $0x332] sm:$0xff] }
 0x480   :  { %v13282_v45 = vpop.f32.mrf.mxu0  ;;  %13585 = vmatmul.mubr.f32.gmra.mxu0 %v7647_v13  ;;  %v13160_v50 = vpop.f32.mrf.mxu1  ;;  %13463 = vmatmul.mubr.f32.gmra.mxu1 %v7121_v24  ;;  %v8120_v24 = vld [vmem:[#allocation2 + $0x48] sm:$0xff] }
 0x481   :  { %v17266_v23 = vadd.f32 %v13282_v45, %v6491_v31  ;;  %13587 = vmatprep.mubr.f32.mxu0 %v7648_v15  ;;  %v6495_v21 = vadd.f32 %v13160_v50, %v16999_v19  ;;  %13625 = vmatprep.mubr.f32.mxu1 %v8118_v61  ;;  %v10230_v31 = vld [vmem:[%s18374_s2 + $0x470] sm:$0xff]  ;;  %v7651_v50 = vld [vmem:[#allocation2 + $0x33a] sm:$0xff]  ;;  %v18834_v61 = vld [vmem:[#allocation92_spill] sm:$0xff] }
 0x482   :  { %v6805_v57 = vpop.f32.mrf.mxu0  ;;  %v6295_v46 = vpop.f32.mrf.mxu1 }
 0x483   :  { %v17269_v28 = vadd.f32 %v6805_v57, %v6490_v4  ;;  %v6494_v35 = vadd.f32 %v6295_v46, %v17002_v30  ;;  %v8121_v46 = vld [vmem:[#allocation2 + $0x50] sm:$0xff] }
 0x484   :  { %v13285_v22 = vpop.f32.mrf.mxu0  ;;  %13588 = vmatmul.mubr.f32.gmra.mxu0 %v7649_v52  ;;  %v13163_v13 = vpop.f32.mrf.mxu1  ;;  %13626 = vmatmul.mubr.f32.vlgmr.msra.gmra.mxu1 %v8119_v48  ;;  %v8648_v48 = vld [vmem:[#allocation2 + $0x31] sm:$0xff] }
 0x485   :  { %v17275_v19 = vadd.f32 %v13285_v22, %v6493_v47  ;;  %13590 = vmatprep.mubr.f32.mxu0 %v7650_v16  ;;  %v6497_v4 = vadd.f32 %v13163_v13, %v17011_v11  ;;  %13628 = vmatprep.mubr.f32.mxu1 %v8120_v24  ;;  %v8122_v22 = vld [vmem:[#allocation2 + $0x60] sm:$0xff]  ;;  %v10229_v11 = vld [vmem:[%s18374_s2 + $0x468] sm:$0xff] }
 0x486   :  { %v6815_v45 = vpop.f32.mrf.mxu0  ;;  %13850 = vmatpush3.msra.mxu1 %v17165_v49  ;;  %v6305_v30 = vpop.f32.mrf.mxu1 }
 0x487   :  { %v17279_v15 = vadd.f32 %v6815_v45, %v6492_v60  ;;  %v6496_v57 = vadd.f32 %v6305_v30, %v18834_v61  ;;  %13851 = vmatprep.subr.mxu1 %v10230_v31  ;;  %v8649_v45 = vld [vmem:[#allocation2 + $0x39] sm:$0xff] }
 0x488   :  { %v13288_v52 = vpop.f32.mrf.mxu0  ;;  %13591 = vmatmul.mubr.f32.gmra.mxu0 %v7651_v50  ;;  %v13166_v47 = vpop.f32.mrf.mxu1  ;;  %13629 = vmatmul.mubr.f32.gmra.mxu1 %v8121_v46  ;;  %v8123_v50 = vld [vmem:[#allocation2 + $0x68] sm:$0xff] }
 0x489   :  { %18833 = vst [vmem:[#allocation125_spill] sm:$0xff] %v17279_v15  ;;  %v17285_v16 = vadd.f32 %v13288_v52, %v6495_v21  ;;  %13753 = vmatprep.mubr.f32.mxu0 %v8648_v48  ;;  %v6499_v49 = vadd.f32 %v13166_v47, %v17024_v37  ;;  %13631 = vmatprep.mubr.f32.mxu1 %v8122_v22  ;;  %v8650_v46 = vld [vmem:[#allocation2 + $0x49] sm:$0xff]  ;;  %v8124_v21 = vld [vmem:[#allocation2 + $0x78] sm:$0xff]  ;;  %v10228_v37 = vld [vmem:[%s18374_s2 + $0x460] sm:$0xff] }
 0x48a   :  { %v6825_v60 = vpop.f32.mrf.mxu0  ;;  %v6315_v13 = vpop.f32.mrf.mxu1  ;;  %13852 = vmatpush3.msra.mxu1 %v10230_v31  ;;  %v8651_v47 = vld [vmem:[#allocation2 + $0x51] sm:$0xff] }
 0x48b   :  { %v17288_v24 = vadd.f32 %v6825_v60, %v6494_v35  ;;  %v6498_v30 = vadd.f32 %v6315_v13, %v17027_v5  ;;  %13853 = vmatprep.subr.mxu1 %v10229_v11  ;;  %v8125_v60 = vld [vmem:[#allocation2 + $0x80] sm:$0xff] }
 0x48c   :  { %v13291_v61 = vpop.f32.mrf.mxu0  ;;  %13754 = vmatmul.mubr.f32.vlgmr.msra.gmra.mxu0 %v8649_v45  ;;  %v13169_v15 = vpop.f32.mrf.mxu1  ;;  %13632 = vmatmul.mubr.f32.gmra.mxu1 %v8123_v50  ;;  %v8652_v45 = vld [vmem:[#allocation2 + $0x61] sm:$0xff] }
 0x48d   :  { %v17294_v52 = vadd.f32 %v13291_v61, %v6497_v4  ;;  %13756 = vmatprep.mubr.f32.mxu0 %v8650_v46  ;;  %v6501_v35 = vadd.f32 %v13169_v15, %v17036_v42  ;;  %13634 = vmatprep.mubr.f32.mxu1 %v8124_v21  ;;  %v8126_v4 = vld [vmem:[#allocation2 + $0x90] sm:$0xff]  ;;  %v10227_v42 = vld [vmem:[%s18374_s2 + $0x458] sm:$0xff] }
 0x48e   :  { %v6835_v31 = vpop.f32.mrf.mxu0  ;;  %v6325_v5 = vpop.f32.mrf.mxu1  ;;  %13854 = vmatpush3.msra.mxu1 %v10229_v11  ;;  %v8653_v46 = vld [vmem:[#allocation2 + $0x69] sm:$0xff] }
 0x48f   :  { %v17297_v48 = vadd.f32 %v6835_v31, %v6496_v57  ;;  %v6500_v22 = vadd.f32 %v6325_v5, %v17039_v62  ;;  %13855 = vmatprep.subr.mxu1 %v10228_v37  ;;  %v8127_v31 = vld [vmem:[#allocation2 + $0x98] sm:$0xff] }
 0x490   :  { %v13294_v13 = vpop.f32.mrf.mxu0  ;;  %13757 = vmatmul.mubr.f32.gmra.mxu0 %v8651_v47  ;;  %v13172_v50 = vpop.f32.mrf.mxu1  ;;  %13635 = vmatmul.mubr.f32.gmra.mxu1 %v8125_v60  ;;  %v8654_v47 = vld [vmem:[#allocation2 + $0x79] sm:$0xff] }
 0x491   :  { %v17303_v15 = vadd.f32 %v13294_v13, %v6499_v49  ;;  %13759 = vmatprep.mubr.f32.mxu0 %v8652_v45  ;;  %v6503_v57 = vadd.f32 %v13172_v50, %v17048_v18  ;;  %13637 = vmatprep.mubr.f32.mxu1 %v8126_v4  ;;  %v8128_v49 = vld [vmem:[#allocation2 + $0xa8] sm:$0xff]  ;;  %v10226_v18 = vld [vmem:[%s18374_s2 + $0x450] sm:$0xff] }
 0x492   :  { %v6845_v11 = vpop.f32.mrf.mxu0  ;;  %v6335_v62 = vpop.f32.mrf.mxu1  ;;  %13856 = vmatpush3.msra.mxu1 %v10228_v37  ;;  %v8655_v50 = vld [vmem:[#allocation2 + $0x81] sm:$0xff] }
 0x493   :  { %v17306_v61 = vadd.f32 %v6845_v11, %v6498_v30  ;;  %v6502_v21 = vadd.f32 %v6335_v62, %v17051_v14  ;;  %13857 = vmatprep.subr.mxu1 %v10227_v42  ;;  %v8129_v11 = vld [vmem:[#allocation2 + $0xb0] sm:$0xff] }
 0x494   :  { %v13297_v5 = vpop.f32.mrf.mxu0  ;;  %13760 = vmatmul.mubr.f32.gmra.mxu0 %v8653_v46  ;;  %v13175_v60 = vpop.f32.mrf.mxu1  ;;  %13638 = vmatmul.mubr.f32.gmra.mxu1 %v8127_v31  ;;  %v8656_v46 = vld [vmem:[#allocation2 + $0x91] sm:$0xff] }
 0x495   :  { %v17312_v13 = vadd.f32 %v13297_v5, %v6501_v35  ;;  %13762 = vmatprep.mubr.f32.mxu0 %v8654_v47  ;;  %v6505_v30 = vadd.f32 %v13175_v60, %v17060_v9  ;;  %13640 = vmatprep.mubr.f32.mxu1 %v8128_v49  ;;  %v8130_v35 = vld [vmem:[#allocation2 + $0xc0] sm:$0xff]  ;;  %v10225_v9 = vld [vmem:[%s18374_s2 + $0x448] sm:$0xff] }
 0x496   :  { %v6855_v37 = vpop.f32.mrf.mxu0  ;;  %v6345_v14 = vpop.f32.mrf.mxu1  ;;  %13858 = vmatpush3.msra.mxu1 %v10227_v42  ;;  %v8657_v60 = vld [vmem:[#allocation2 + $0x99] sm:$0xff] }
 0x497   :  { %v17315_v45 = vadd.f32 %v6855_v37, %v6500_v22  ;;  %v6504_v4 = vadd.f32 %v6345_v14, %v17063_v17  ;;  %13859 = vmatprep.subr.mxu1 %v10226_v18  ;;  %v8131_v37 = vld [vmem:[#allocation2 + $0xc8] sm:$0xff] }
 0x498   :  { %v13300_v62 = vpop.f32.mrf.mxu0  ;;  %13763 = vmatmul.mubr.f32.gmra.mxu0 %v8655_v50  ;;  %v13178_v31 = vpop.f32.mrf.mxu1  ;;  %13641 = vmatmul.mubr.f32.gmra.mxu1 %v8129_v11  ;;  %v8658_v50 = vld [vmem:[#allocation2 + $0xa9] sm:$0xff] }
 0x499   :  { %v17321_v5 = vadd.f32 %v13300_v62, %v6503_v57  ;;  %13765 = vmatprep.mubr.f32.mxu0 %v8656_v46  ;;  %v6507_v22 = vadd.f32 %v13178_v31, %v17072_v53  ;;  %13643 = vmatprep.mubr.f32.mxu1 %v8130_v35  ;;  %v8132_v57 = vld [vmem:[#allocation2 + $0xd8] sm:$0xff]  ;;  %v10224_v53 = vld [vmem:[%s18374_s2 + $0x440] sm:$0xff] }
 0x49a   :  { %v6865_v42 = vpop.f32.mrf.mxu0  ;;  %v6355_v17 = vpop.f32.mrf.mxu1  ;;  %13860 = vmatpush3.msra.mxu1 %v10226_v18  ;;  %v8659_v31 = vld [vmem:[#allocation2 + $0xb1] sm:$0xff] }
 0x49b   :  { %v17324_v47 = vadd.f32 %v6865_v42, %v6502_v21  ;;  %v6506_v49 = vadd.f32 %v6355_v17, %v17075_v51  ;;  %13861 = vmatprep.subr.mxu1 %v10225_v9  ;;  %v8133_v42 = vld [vmem:[#allocation2 + $0xe0] sm:$0xff] }
 0x49c   :  { %v13303_v14 = vpop.f32.mrf.mxu0  ;;  %13766 = vmatmul.mubr.f32.gmra.mxu0 %v8657_v60  ;;  %v13181_v11 = vpop.f32.mrf.mxu1  ;;  %13644 = vmatmul.mubr.f32.gmra.mxu1 %v8131_v37  ;;  %v8660_v60 = vld [vmem:[#allocation2 + $0xc1] sm:$0xff] }
 0x49d   :  { %v17330_v62 = vadd.f32 %v13303_v14, %v6505_v30  ;;  %13768 = vmatprep.mubr.f32.mxu0 %v8658_v50  ;;  %v6509_v21 = vadd.f32 %v13181_v11, %v17084_v26  ;;  %13646 = vmatprep.mubr.f32.mxu1 %v8132_v57  ;;  %v8134_v30 = vld [vmem:[#allocation2 + $0xf0] sm:$0xff]  ;;  %v10223_v26 = vld [vmem:[%s18374_s2 + $0x438] sm:$0xff] }
 0x49e   :  { %v6875_v18 = vpop.f32.mrf.mxu0  ;;  %v6365_v51 = vpop.f32.mrf.mxu1  ;;  %13862 = vmatpush3.msra.mxu1 %v10225_v9  ;;  %v8661_v57 = vld [vmem:[#allocation2 + $0xc9] sm:$0xff] }
 0x49f   :  { %18835 = vst [vmem:[#allocation102_spill] sm:$0xff] %v17330_v62  ;;  %v17333_v46 = vadd.f32 %v6875_v18, %v6504_v4  ;;  %v6508_v35 = vadd.f32 %v6365_v51, %v17087_v7  ;;  %13863 = vmatprep.subr.mxu1 %v10224_v53  ;;  %v18838_v4 = vld [vmem:[#allocation93_spill] sm:$0xff]  ;;  %v18840_v18 = vld [vmem:[#allocation116_spill] sm:$0xff] }
 0x4a0   :  { %v13306_v17 = vpop.f32.mrf.mxu0  ;;  %13769 = vmatmul.mubr.f32.gmra.mxu0 %v8659_v31  ;;  %v13184_v37 = vpop.f32.mrf.mxu1  ;;  %13647 = vmatmul.mubr.f32.gmra.mxu1 %v8133_v42  ;;  %v8135_v31 = vld [vmem:[#allocation2 + $0xf8] sm:$0xff] }
 0x4a1   :  { %18836 = vst [vmem:[#allocation103_spill] sm:$0xff] %v17333_v46  ;;  %v17339_v14 = vadd.f32 %v13306_v17, %v6507_v22  ;;  %13771 = vmatprep.mubr.f32.mxu0 %v8660_v60  ;;  %v6511_v9 = vadd.f32 %v13184_v37, %v18838_v4  ;;  %13649 = vmatprep.mubr.f32.mxu1 %v8134_v30  ;;  %v8662_v46 = vld [vmem:[#allocation2 + $0xd9] sm:$0xff]  ;;  %v8136_v22 = vld [vmem:[#allocation2 + $0x108] sm:$0xff]  ;;  %v10222_v17 = vld [vmem:[%s18374_s2 + $0x430] sm:$0xff] }
 0x4a2   :  { %v6885_v50 = vpop.f32.mrf.mxu0  ;;  %v6375_v7 = vpop.f32.mrf.mxu1  ;;  %13864 = vmatpush3.msra.mxu1 %v10224_v53 }
 0x4a3   :  { %18837 = vst [vmem:[#allocation124_spill] sm:$0xff] %v17339_v14  ;;  %v17342_v11 = vadd.f32 %v6885_v50, %v6506_v49  ;;  %v6510_v51 = vadd.f32 %v6375_v7, %v18840_v18  ;;  %13865 = vmatprep.subr.mxu1 %v10223_v26  ;;  %v18842_v49 = vld [vmem:[#allocation94_spill] sm:$0xff]  ;;  %v8663_v50 = vld [vmem:[#allocation2 + $0xe1] sm:$0xff]  ;;  %v8137_v18 = vld [vmem:[#allocation2 + $0x110] sm:$0xff] }
 0x4a4   :  { %v13309_v42 = vpop.f32.mrf.mxu0  ;;  %13772 = vmatmul.mubr.f32.gmra.mxu0 %v8661_v57  ;;  %v13187_v62 = vpop.f32.mrf.mxu1  ;;  %13650 = vmatmul.mubr.f32.gmra.mxu1 %v8135_v31  ;;  %v18844_v7 = vld [vmem:[#allocation95_spill] sm:$0xff] }
 0x4a5   :  { %18839 = vst [vmem:[#allocation156_spill] sm:$0xff] %v17342_v11  ;;  %v17348_v60 = vadd.f32 %v13309_v42, %v6509_v21  ;;  %13774 = vmatprep.mubr.f32.mxu0 %v8662_v46  ;;  %v6513_v53 = vadd.f32 %v13187_v62, %v18842_v49  ;;  %13652 = vmatprep.mubr.f32.mxu1 %v8136_v22  ;;  %v8664_v11 = vld [vmem:[#allocation2 + $0xf1] sm:$0xff]  ;;  %v8138_v21 = vld [vmem:[#allocation2 + $0x120] sm:$0xff]  ;;  %v10221_v62 = vld [vmem:[%s18374_s2 + $0x428] sm:$0xff] }
 0x4a6   :  { %v6895_v37 = vpop.f32.mrf.mxu0  ;;  %v6385_v30 = vpop.f32.mrf.mxu1  ;;  %13866 = vmatpush3.msra.mxu1 %v10223_v26 }
 0x4a7   :  { %18841 = vst [vmem:[#allocation127_spill] sm:$0xff] %v17348_v60  ;;  %v17351_v4 = vadd.f32 %v6895_v37, %v6508_v35  ;;  %v6512_v57 = vadd.f32 %v6385_v30, %v18844_v7  ;;  %13867 = vmatprep.subr.mxu1 %v10222_v17  ;;  %v18846_v35 = vld [vmem:[#allocation118_spill] sm:$0xff]  ;;  %v18848_v30 = vld [vmem:[#allocation120_spill] sm:$0xff] }
 0x4a8   :  { %v13312_v31 = vpop.f32.mrf.mxu0  ;;  %13775 = vmatmul.mubr.f32.gmra.mxu0 %v8663_v50  ;;  %v13190_v14 = vpop.f32.mrf.mxu1  ;;  %13653 = vmatmul.mubr.f32.gmra.mxu1 %v8137_v18  ;;  %v8665_v37 = vld [vmem:[#allocation2 + $0xf9] sm:$0xff]  ;;  %v8139_v7 = vld [vmem:[#allocation2 + $0x128] sm:$0xff] }
 0x4a9   :  { %18843 = vst [vmem:[#allocation104_spill] sm:$0xff] %v17351_v4  ;;  %v17357_v46 = vadd.f32 %v13312_v31, %v6511_v9  ;;  %13777 = vmatprep.mubr.f32.mxu0 %v8664_v11  ;;  %v6515_v26 = vadd.f32 %v13190_v14, %v18846_v35  ;;  %13655 = vmatprep.mubr.f32.mxu1 %v8138_v21  ;;  %v8666_v4 = vld [vmem:[#allocation2 + $0x109] sm:$0xff]  ;;  %v8140_v9 = vld [vmem:[#allocation2 + $0x138] sm:$0xff]  ;;  %v10220_v14 = vld [vmem:[%s18374_s2 + $0x420] sm:$0xff] }
 0x4aa   :  { %v6905_v42 = vpop.f32.mrf.mxu0  ;;  %v6395_v22 = vpop.f32.mrf.mxu1  ;;  %13868 = vmatpush3.msra.mxu1 %v10222_v17 }
 0x4ab   :  { %18845 = vst [vmem:[#allocation105_spill] sm:$0xff] %v17357_v46  ;;  %v17360_v49 = vadd.f32 %v6905_v42, %v6510_v51  ;;  %v6514_v50 = vadd.f32 %v6395_v22, %v18848_v30  ;;  %13869 = vmatprep.subr.mxu1 %v10221_v62  ;;  %v18850_v51 = vld [vmem:[#allocation96_spill] sm:$0xff]  ;;  %v8667_v42 = vld [vmem:[#allocation2 + $0x111] sm:$0xff]  ;;  %v8141_v30 = vld [vmem:[#allocation2 + $0x140] sm:$0xff] }
 0x4ac   :  { %v13315_v18 = vpop.f32.mrf.mxu0  ;;  %13778 = vmatmul.mubr.f32.gmra.mxu0 %v8665_v37  ;;  %v13193_v60 = vpop.f32.mrf.mxu1  ;;  %13656 = vmatmul.mubr.f32.gmra.mxu1 %v8139_v7  ;;  %v18852_v22 = vld [vmem:[#allocation97_spill] sm:$0xff] }
 0x4ad   :  { %18847 = vst [vmem:[#allocation126_spill] sm:$0xff] %v17360_v49  ;;  %v17366_v11 = vadd.f32 %v13315_v18, %v6513_v53  ;;  %13780 = vmatprep.mubr.f32.mxu0 %v8666_v4  ;;  %v6517_v17 = vadd.f32 %v13193_v60, %v18850_v51  ;;  %13658 = vmatprep.mubr.f32.mxu1 %v8140_v9  ;;  %v8668_v49 = vld [vmem:[#allocation2 + $0x121] sm:$0xff]  ;;  %v8142_v53 = vld [vmem:[#allocation2 + $0x150] sm:$0xff]  ;;  %v10219_v60 = vld [vmem:[%s18374_s2 + $0x418] sm:$0xff] }
 0x4ae   :  { %v6915_v31 = vpop.f32.mrf.mxu0  ;;  %v6405_v21 = vpop.f32.mrf.mxu1  ;;  %13870 = vmatpush3.msra.mxu1 %v10221_v62 }
 0x4af   :  { %18849 = vst [vmem:[#allocation157_spill] sm:$0xff] %v17366_v11  ;;  %v17369_v35 = vadd.f32 %v6915_v31, %v6512_v57  ;;  %v6516_v37 = vadd.f32 %v6405_v21, %v18852_v22  ;;  %13871 = vmatprep.subr.mxu1 %v10220_v14  ;;  %v18854_v57 = vld [vmem:[#allocation119_spill] sm:$0xff]  ;;  %v8669_v31 = vld [vmem:[#allocation2 + $0x129] sm:$0xff]  ;;  %v18856_v21 = vld [vmem:[#allocation98_spill] sm:$0xff] }
 0x4b0   :  { %v13318_v7 = vpop.f32.mrf.mxu0  ;;  %13781 = vmatmul.mubr.f32.gmra.mxu0 %v8667_v42  ;;  %v13196_v46 = vpop.f32.mrf.mxu1  ;;  %13659 = vmatmul.mubr.f32.gmra.mxu1 %v8141_v30  ;;  %v8143_v22 = vld [vmem:[#allocation2 + $0x158] sm:$0xff] }
 0x4b1   :  { %18851 = vst [vmem:[#allocation129_spill] sm:$0xff] %v17369_v35  ;;  %v17375_v4 = vadd.f32 %v13318_v7, %v6515_v26  ;;  %13783 = vmatprep.mubr.f32.mxu0 %v8668_v49  ;;  %v6519_v62 = vadd.f32 %v13196_v46, %v18854_v57  ;;  %13661 = vmatprep.mubr.f32.mxu1 %v8142_v53  ;;  %v8670_v35 = vld [vmem:[#allocation2 + $0x139] sm:$0xff]  ;;  %v8144_v26 = vld [vmem:[#allocation2 + $0x168] sm:$0xff]  ;;  %v10218_v46 = vld [vmem:[%s18374_s2 + $0x410] sm:$0xff] }
 0x4b2   :  { %v6925_v18 = vpop.f32.mrf.mxu0  ;;  %v6415_v9 = vpop.f32.mrf.mxu1  ;;  %13872 = vmatpush3.msra.mxu1 %v10220_v14 }
 0x4b3   :  { %18853 = vst [vmem:[#allocation106_spill] sm:$0xff] %v17375_v4  ;;  %v17378_v51 = vadd.f32 %v6925_v18, %v6514_v50  ;;  %v6518_v42 = vadd.f32 %v6415_v9, %v18856_v21  ;;  %13873 = vmatprep.subr.mxu1 %v10219_v60  ;;  %v18858_v50 = vld [vmem:[#allocation99_spill] sm:$0xff]  ;;  %v18860_v9 = vld [vmem:[#allocation121_spill] sm:$0xff] }
 0x4b4   :  { %v13321_v30 = vpop.f32.mrf.mxu0  ;;  %13784 = vmatmul.mubr.f32.gmra.mxu0 %v8669_v31  ;;  %v13199_v11 = vpop.f32.mrf.mxu1  ;;  %13662 = vmatmul.mubr.f32.gmra.mxu1 %v8143_v22  ;;  %v8671_v18 = vld [vmem:[#allocation2 + $0x141] sm:$0xff]  ;;  %v8145_v21 = vld [vmem:[#allocation2 + $0x170] sm:$0xff] }
 0x4b5   :  { %18855 = vst [vmem:[#allocation107_spill] sm:$0xff] %v17378_v51  ;;  %v17384_v49 = vadd.f32 %v13321_v30, %v6517_v17  ;;  %13786 = vmatprep.mubr.f32.mxu0 %v8670_v35  ;;  %v6521_v14 = vadd.f32 %v13199_v11, %v18858_v50  ;;  %13664 = vmatprep.mubr.f32.mxu1 %v8144_v26  ;;  %v8672_v51 = vld [vmem:[#allocation2 + $0x151] sm:$0xff]  ;;  %v8146_v17 = vld [vmem:[#allocation2 + $0x180] sm:$0xff]  ;;  %v10217_v11 = vld [vmem:[%s18374_s2 + $0x408] sm:$0xff] }
 0x4b6   :  { %v6935_v7 = vpop.f32.mrf.mxu0  ;;  %v6425_v53 = vpop.f32.mrf.mxu1  ;;  %13874 = vmatpush3.msra.mxu1 %v10219_v60 }
 0x4b7   :  { %18857 = vst [vmem:[#allocation128_spill] sm:$0xff] %v17384_v49  ;;  %v17387_v57 = vadd.f32 %v6935_v7, %v6516_v37  ;;  %v6520_v31 = vadd.f32 %v6425_v53, %v18860_v9  ;;  %13875 = vmatprep.subr.mxu1 %v10218_v46  ;;  %v18861_v37 = vld [vmem:[#allocation123_spill] sm:$0xff]  ;;  %v18862_v53 = vld [vmem:[#allocation100_spill] sm:$0xff] }
 0x4b8   :  { %v13324_v22 = vpop.f32.mrf.mxu0  ;;  %13787 = vmatmul.mubr.f32.gmra.mxu0 %v8671_v18  ;;  %v13202_v4 = vpop.f32.mrf.mxu1  ;;  %13665 = vmatmul.mubr.f32.gmra.mxu1 %v8145_v21  ;;  %v8673_v7 = vld [vmem:[#allocation2 + $0x159] sm:$0xff]  ;;  %v8147_v9 = vld [vmem:[#allocation2 + $0x188] sm:$0xff] }
 0x4b9   :  { %18859 = vst [vmem:[#allocation131_spill] sm:$0xff] %v17387_v57  ;;  %v17393_v35 = vadd.f32 %v13324_v22, %v6519_v62  ;;  %13789 = vmatprep.mubr.f32.mxu0 %v8672_v51  ;;  %v6523_v60 = vadd.f32 %v13202_v4, %v18861_v37  ;;  %13667 = vmatprep.mubr.f32.mxu1 %v8146_v17  ;;  %v8674_v57 = vld [vmem:[#allocation2 + $0x169] sm:$0xff]  ;;  %v10216_v4 = vld [vmem:[%s18374_s2 + $0x400] sm:$0xff]  ;;  %v8675_v37 = vld [vmem:[#allocation2 + $0x171] sm:$0xff] }
 0x4ba   :  { %v6945_v30 = vpop.f32.mrf.mxu0  ;;  %v6435_v26 = vpop.f32.mrf.mxu1  ;;  %13876 = vmatpush3.msra.mxu1 %v10218_v46 }
 0x4bb   :  { %v17396_v50 = vadd.f32 %v6945_v30, %v6518_v42  ;;  %v6522_v18 = vadd.f32 %v6435_v26, %v18862_v53  ;;  %13877 = vmatprep.subr.mxu1 %v10217_v11  ;;  %v17405_v42 = vld [vmem:[#allocation2] sm:$0xff]  ;;  %v18864_v30 = vld [vmem:[#allocation101_spill] sm:$0xff] }
 0x4bc   :  { %v13327_v21 = vpop.f32.mrf.mxu0  ;;  %13790 = vmatmul.mubr.f32.gmra.mxu0 %v8673_v7  ;;  %v13205_v49 = vpop.f32.mrf.mxu1  ;;  %13668 = vmatmul.mubr.f32.gmra.mxu1 %v8147_v9 }
 0x4bd   :  { %v17402_v62 = vadd.f32 %v13327_v21, %v6521_v14  ;;  %13792 = vmatprep.mubr.f32.mxu0 %v8674_v57  ;;  %v6525_v51 = vadd.f32 %v13205_v49, %v17175_v20  ;;  %13670 = vmatprep.mubr.f32.mxu1 %v17405_v42  ;;  %v8676_v14 = vld [vmem:[#allocation2 + $0x181] sm:$0xff] }
 0x4be   :  { %v6955_v46 = vpop.f32.mrf.mxu0  ;;  %v6445_v22 = vpop.f32.mrf.mxu1  ;;  %13878 = vmatpush3.msra.mxu1 %v10217_v11  ;;  %v8150_v20 = vld [vmem:[#allocation2 + $0x1e0] sm:$0xff] }
 0x4bf   :  { %v17408_v17 = vadd.f32 %v6955_v46, %v6520_v31  ;;  %v6524_v26 = vadd.f32 %v6445_v22, %v18864_v30  ;;  %13879 = vmatprep.subr.mxu1 %v10216_v4  ;;  %v8678_v31 = vld [vmem:[#allocation2 + $0x199] sm:$0xff]  ;;  %v8677_v46 = vld [vmem:[#allocation2 + $0x189] sm:$0xff] }
 0x4c0   :  { %v13330_v7 = vpop.f32.mrf.mxu0  ;;  %13793 = vmatmul.mubr.f32.gmra.mxu0 %v8675_v37  ;;  %v13208_v53 = vpop.f32.mrf.mxu1  ;;  %13671 = vmatmul.mubr.f32.gmra.mxu1 %v17405_v42  ;;  %v8151_v37 = vld [vmem:[#allocation2 + $0x1e8] sm:$0xff] }
 0x4c1   :  { %18863 = vst [vmem:[#allocation108_spill] sm:$0xff] %v17408_v17  ;;  %v17412_v49 = vadd.f32 %v13330_v7, %v6523_v60  ;;  %13795 = vmatprep.mubr.f32.mxu0 %v8676_v14  ;;  %v6527_v57 = vadd.f32 %v13208_v53, %v17180_v29  ;;  %13673 = vmatprep.mubr.f32.mxu1 %v8150_v20  ;;  %v8152_v60 = vld [vmem:[#allocation2 + $0x1f8] sm:$0xff]  ;;  %v8679_v29 = vld [vmem:[#allocation2 + $0x1a1] sm:$0xff] }
 0x4c2   :  { %v6965_v11 = vpop.f32.mrf.mxu0  ;;  %v6455_v9 = vpop.f32.mrf.mxu1  ;;  %13880 = vmatpush3.msra.mxu1 %v10216_v4 }
 0x4c3   :  { %v17415_v21 = vadd.f32 %v6965_v11, %v6522_v18  ;;  %v6526_v22 = vadd.f32 %v6455_v9, %v17185_v58  ;;  %v8153_v58 = vld [vmem:[#allocation2 + $0x200] sm:$0xff] }
 0x4c4   :  { %v13333_v30 = vpop.f32.mrf.mxu0  ;;  %13796 = vmatmul.mubr.f32.gmra.mxu0 %v8677_v46  ;;  %v13371_v17 = vpop.f32.mrf.mxu1  ;;  %13674 = vmatmul.mubr.f32.gmra.mxu1 %v8151_v37  ;;  %v8680_v9 = vld [vmem:[#allocation2 + $0x1e1] sm:$0xff]  ;;  %v8154_v37 = vld [vmem:[#allocation2 + $0x210] sm:$0xff] }
 0x4c5   :  { %v17418_v7 = vadd.f32 %v13333_v30, %v6525_v51  ;;  %13798 = vmatprep.mubr.f32.mxu0 %v8678_v31  ;;  %v7525_v14 = vadd.f32 %v13371_v17, %v17188_v8  ;;  %13676 = vmatprep.mubr.f32.mxu1 %v8152_v60  ;;  %v8155_v60 = vld [vmem:[#allocation2 + $0x218] sm:$0xff] }
 0x4c6   :  { %v6975_v53 = vpop.f32.mrf.mxu0  ;;  %v7205_v4 = vpop.f32.mrf.mxu1 }
 0x4c7   :  { %v17421_v18 = vadd.f32 %v6975_v53, %v6524_v26  ;;  %v7524_v20 = vadd.f32 %v7205_v4, %v17191_v32  ;;  %v8681_v26 = vld [vmem:[#allocation2 + $0x1e9] sm:$0xff] }
 0x4c8   :  { %v13336_v11 = vpop.f32.mrf.mxu0  ;;  %13799 = vmatmul.mubr.f32.gmra.mxu0 %v8679_v29  ;;  %v13374_v46 = vpop.f32.mrf.mxu1  ;;  %13677 = vmatmul.mubr.f32.gmra.mxu1 %v8153_v58  ;;  %v8682_v29 = vld [vmem:[#allocation2 + $0x1f9] sm:$0xff]  ;;  %v8156_v58 = vld [vmem:[#allocation2 + $0x228] sm:$0xff] }
 0x4c9   :  { %v17424_v51 = vadd.f32 %v13336_v11, %v6527_v57  ;;  %13801 = vmatprep.mubr.f32.mxu0 %v8680_v9  ;;  %v7527_v31 = vadd.f32 %v13374_v46, %v17194_v38  ;;  %13679 = vmatprep.mubr.f32.mxu1 %v8154_v37  ;;  %v8683_v46 = vld [vmem:[#allocation2 + $0x201] sm:$0xff]  ;;  %v8157_v37 = vld [vmem:[#allocation2 + $0x230] sm:$0xff] }
 0x4ca   :  { %v6985_v8 = vpop.f32.mrf.mxu0  ;;  %v7215_v17 = vpop.f32.mrf.mxu1 }
 0x4cb   :  { %v17427_v30 = vadd.f32 %v6985_v8, %v6526_v22  ;;  %v7526_v32 = vadd.f32 %v7215_v17, %v17197_v33  ;;  %v8684_v17 = vld [vmem:[#allocation2 + $0x211] sm:$0xff] }
 0x4cc   :  { %v13499_v53 = vpop.f32.mrf.mxu0  ;;  %13802 = vmatmul.mubr.f32.gmra.mxu0 %v8681_v26  ;;  %v13377_v4 = vpop.f32.mrf.mxu1  ;;  %13680 = vmatmul.mubr.f32.gmra.mxu1 %v8155_v60  ;;  %v8158_v60 = vld [vmem:[#allocation2 + $0x240] sm:$0xff] }
 0x4cd   :  { %v17430_v57 = vadd.f32 %v13499_v53, %v7525_v14  ;;  %13804 = vmatprep.mubr.f32.mxu0 %v8682_v29  ;;  %v7529_v38 = vadd.f32 %v13377_v4, %v17200_v25  ;;  %13682 = vmatprep.mubr.f32.mxu1 %v8156_v58  ;;  %v8685_v4 = vld [vmem:[#allocation2 + $0x219] sm:$0xff]  ;;  %v8159_v58 = vld [vmem:[#allocation2 + $0x248] sm:$0xff] }
 0x4ce   :  { %v7735_v11 = vpop.f32.mrf.mxu0  ;;  %v7225_v9 = vpop.f32.mrf.mxu1 }
 0x4cf   :  { %v17433_v22 = vadd.f32 %v7735_v11, %v7524_v20  ;;  %v7528_v33 = vadd.f32 %v7225_v9, %v17203_v1  ;;  %v8686_v9 = vld [vmem:[#allocation2 + $0x229] sm:$0xff] }
 0x4d0   :  { %v13502_v8 = vpop.f32.mrf.mxu0  ;;  %13805 = vmatmul.mubr.f32.gmra.mxu0 %v8683_v46  ;;  %v13380_v26 = vpop.f32.mrf.mxu1  ;;  %13683 = vmatmul.mubr.f32.gmra.mxu1 %v8157_v37  ;;  %v8160_v37 = vld [vmem:[#allocation2 + $0x258] sm:$0xff] }
 0x4d1   :  { %v17436_v14 = vadd.f32 %v13502_v8, %v7527_v31  ;;  %13807 = vmatprep.mubr.f32.mxu0 %v8684_v17  ;;  %v7531_v25 = vadd.f32 %v13380_v26, %v17206_v39  ;;  %13685 = vmatprep.mubr.f32.mxu1 %v8158_v60  ;;  %v8687_v26 = vld [vmem:[#allocation2 + $0x231] sm:$0xff]  ;;  %v8161_v60 = vld [vmem:[#allocation2 + $0x260] sm:$0xff] }
 0x4d2   :  { %v7745_v53 = vpop.f32.mrf.mxu0  ;;  %v7235_v29 = vpop.f32.mrf.mxu1 }
 0x4d3   :  { %v17439_v20 = vadd.f32 %v7745_v53, %v7526_v32  ;;  %v7530_v1 = vadd.f32 %v7235_v29, %v17209_v10  ;;  %v8688_v29 = vld [vmem:[#allocation2 + $0x241] sm:$0xff] }
 0x4d4   :  { %v13505_v11 = vpop.f32.mrf.mxu0  ;;  %13808 = vmatmul.mubr.f32.gmra.mxu0 %v8685_v4  ;;  %v13383_v46 = vpop.f32.mrf.mxu1  ;;  %13686 = vmatmul.mubr.f32.gmra.mxu1 %v8159_v58  ;;  %v8162_v58 = vld [vmem:[#allocation2 + $0x270] sm:$0xff] }
 0x4d5   :  { %v17442_v31 = vadd.f32 %v13505_v11, %v7529_v38  ;;  %13810 = vmatprep.mubr.f32.mxu0 %v8686_v9  ;;  %v7533_v39 = vadd.f32 %v13383_v46, %v17212_v36  ;;  %13688 = vmatprep.mubr.f32.mxu1 %v8160_v37  ;;  %v8689_v46 = vld [vmem:[#allocation2 + $0x249] sm:$0xff]  ;;  %v8163_v37 = vld [vmem:[#allocation2 + $0x278] sm:$0xff] }
 0x4d6   :  { %v7755_v8 = vpop.f32.mrf.mxu0  ;;  %v7245_v17 = vpop.f32.mrf.mxu1 }
 0x4d7   :  { %v17445_v32 = vadd.f32 %v7755_v8, %v7528_v33  ;;  %v7532_v10 = vadd.f32 %v7245_v17, %v17215_v43  ;;  %v8690_v17 = vld [vmem:[#allocation2 + $0x259] sm:$0xff] }
 0x4d8   :  { %v13508_v53 = vpop.f32.mrf.mxu0  ;;  %13811 = vmatmul.mubr.f32.gmra.mxu0 %v8687_v26  ;;  %v13386_v4 = vpop.f32.mrf.mxu1  ;;  %13689 = vmatmul.mubr.f32.gmra.mxu1 %v8161_v60  ;;  %v8164_v60 = vld [vmem:[#allocation2 + $0x288] sm:$0xff] }
 0x4d9   :  { %v17448_v38 = vadd.f32 %v13508_v53, %v7531_v25  ;;  %13813 = vmatprep.mubr.f32.mxu0 %v8688_v29  ;;  %v7535_v36 = vadd.f32 %v13386_v4, %v17218_v44  ;;  %13691 = vmatprep.mubr.f32.mxu1 %v8162_v58  ;;  %v8691_v4 = vld [vmem:[#allocation2 + $0x261] sm:$0xff]  ;;  %v8165_v58 = vld [vmem:[#allocation2 + $0x290] sm:$0xff] }
 0x4da   :  { %v7765_v11 = vpop.f32.mrf.mxu0  ;;  %v7255_v9 = vpop.f32.mrf.mxu1 }
 0x4db   :  { %v17451_v33 = vadd.f32 %v7765_v11, %v7530_v1  ;;  %v7534_v43 = vadd.f32 %v7255_v9, %v17221_v27  ;;  %v8692_v9 = vld [vmem:[#allocation2 + $0x271] sm:$0xff] }
 0x4dc   :  { %v13511_v8 = vpop.f32.mrf.mxu0  ;;  %13814 = vmatmul.mubr.f32.gmra.mxu0 %v8689_v46  ;;  %v13389_v26 = vpop.f32.mrf.mxu1  ;;  %13692 = vmatmul.mubr.f32.gmra.mxu1 %v8163_v37  ;;  %v8166_v37 = vld [vmem:[#allocation2 + $0x2a0] sm:$0xff] }
 0x4dd   :  { %v17454_v25 = vadd.f32 %v13511_v8, %v7533_v39  ;;  %13816 = vmatprep.mubr.f32.mxu0 %v8690_v17  ;;  %v7537_v44 = vadd.f32 %v13389_v26, %v17224_v2  ;;  %13694 = vmatprep.mubr.f32.mxu1 %v8164_v60  ;;  %v8693_v26 = vld [vmem:[#allocation2 + $0x279] sm:$0xff]  ;;  %v8167_v60 = vld [vmem:[#allocation2 + $0x2a8] sm:$0xff] }
 0x4de   :  { %v7775_v53 = vpop.f32.mrf.mxu0  ;;  %v7265_v29 = vpop.f32.mrf.mxu1 }
 0x4df   :  { %v17457_v1 = vadd.f32 %v7775_v53, %v7532_v10  ;;  %v7536_v27 = vadd.f32 %v7265_v29, %v17227_v0  ;;  %v8694_v29 = vld [vmem:[#allocation2 + $0x289] sm:$0xff] }
 0x4e0   :  { %v13514_v11 = vpop.f32.mrf.mxu0  ;;  %13817 = vmatmul.mubr.f32.gmra.mxu0 %v8691_v4  ;;  %v13392_v46 = vpop.f32.mrf.mxu1  ;;  %13695 = vmatmul.mubr.f32.gmra.mxu1 %v8165_v58  ;;  %v8168_v58 = vld [vmem:[#allocation2 + $0x2b8] sm:$0xff] }
 0x4e1   :  { %v17460_v39 = vadd.f32 %v13514_v11, %v7535_v36  ;;  %13819 = vmatprep.mubr.f32.mxu0 %v8692_v9  ;;  %v7539_v2 = vadd.f32 %v13392_v46, %v17230_v63  ;;  %13697 = vmatprep.mubr.f32.mxu1 %v8166_v37  ;;  %v8695_v46 = vld [vmem:[#allocation2 + $0x291] sm:$0xff]  ;;  %v8169_v37 = vld [vmem:[#allocation2 + $0x2c0] sm:$0xff] }
 0x4e2   :  { %v7785_v8 = vpop.f32.mrf.mxu0  ;;  %v7275_v17 = vpop.f32.mrf.mxu1 }
 0x4e3   :  { %v17463_v10 = vadd.f32 %v7785_v8, %v7534_v43  ;;  %v7538_v0 = vadd.f32 %v7275_v17, %v17233_v55  ;;  %v8696_v17 = vld [vmem:[#allocation2 + $0x2a1] sm:$0xff] }
 0x4e4   :  { %v13517_v53 = vpop.f32.mrf.mxu0  ;;  %13820 = vmatmul.mubr.f32.gmra.mxu0 %v8693_v26  ;;  %v13395_v4 = vpop.f32.mrf.mxu1  ;;  %13698 = vmatmul.mubr.f32.gmra.mxu1 %v8167_v60  ;;  %v8170_v60 = vld [vmem:[#allocation2 + $0x2d0] sm:$0xff] }
 0x4e5   :  { %v17466_v36 = vadd.f32 %v13517_v53, %v7537_v44  ;;  %13822 = vmatprep.mubr.f32.mxu0 %v8694_v29  ;;  %v7541_v63 = vadd.f32 %v13395_v4, %v17236_v6  ;;  %13700 = vmatprep.mubr.f32.mxu1 %v8168_v58  ;;  %v8697_v4 = vld [vmem:[#allocation2 + $0x2a9] sm:$0xff]  ;;  %v8171_v58 = vld [vmem:[#allocation2 + $0x2d8] sm:$0xff] }
 0x4e6   :  { %v7795_v11 = vpop.f32.mrf.mxu0  ;;  %v7285_v9 = vpop.f32.mrf.mxu1 }
 0x4e7   :  { %v17469_v43 = vadd.f32 %v7795_v11, %v7536_v27  ;;  %v7540_v55 = vadd.f32 %v7285_v9, %v17239_v59  ;;  %v8698_v9 = vld [vmem:[#allocation2 + $0x2b9] sm:$0xff] }
 0x4e8   :  { %v13520_v8 = vpop.f32.mrf.mxu0  ;;  %13823 = vmatmul.mubr.f32.gmra.mxu0 %v8695_v46  ;;  %v13398_v26 = vpop.f32.mrf.mxu1  ;;  %13701 = vmatmul.mubr.f32.gmra.mxu1 %v8169_v37  ;;  %v8172_v37 = vld [vmem:[#allocation2 + $0x2e8] sm:$0xff] }
 0x4e9   :  { %v17472_v44 = vadd.f32 %v13520_v8, %v7539_v2  ;;  %13825 = vmatprep.mubr.f32.mxu0 %v8696_v17  ;;  %v7543_v6 = vadd.f32 %v13398_v26, %v17242_v40  ;;  %13703 = vmatprep.mubr.f32.mxu1 %v8170_v60  ;;  %v8699_v26 = vld [vmem:[#allocation2 + $0x2c1] sm:$0xff]  ;;  %v18866_v60 = vld [vmem:[#allocation122_spill] sm:$0xff] }
 0x4ea   :  { %v7805_v53 = vpop.f32.mrf.mxu0  ;;  %v7295_v29 = vpop.f32.mrf.mxu1 }
 0x4eb   :  { %v17475_v27 = vadd.f32 %v7805_v53, %v7538_v0  ;;  %v7542_v59 = vadd.f32 %v7295_v29, %v17245_v54  ;;  %v8173_v53 = vld [vmem:[#allocation2 + $0x2f0] sm:$0xff] }
 0x4ec   :  { %v13523_v11 = vpop.f32.mrf.mxu0  ;;  %13826 = vmatmul.mubr.f32.gmra.mxu0 %v8697_v4  ;;  %v13401_v46 = vpop.f32.mrf.mxu1  ;;  %13704 = vmatmul.mubr.f32.gmra.mxu1 %v8171_v58  ;;  %v8700_v4 = vld [vmem:[#allocation2 + $0x2d1] sm:$0xff]  ;;  %v8174_v58 = vld [vmem:[#allocation2 + $0x300] sm:$0xff] }
 0x4ed   :  { %18865 = vst [vmem:[#allocation109_spill] sm:$0xff] %v17475_v27  ;;  %v17478_v2 = vadd.f32 %v13523_v11, %v7541_v63  ;;  %13828 = vmatprep.mubr.f32.mxu0 %v8698_v9  ;;  %v7545_v40 = vadd.f32 %v13401_v46, %v17248_v34  ;;  %13706 = vmatprep.mubr.f32.mxu1 %v8172_v37  ;;  %v8701_v46 = vld [vmem:[#allocation2 + $0x2d9] sm:$0xff] }
 0x4ee   :  { %v7815_v8 = vpop.f32.mrf.mxu0  ;;  %v7305_v17 = vpop.f32.mrf.mxu1 }
 0x4ef   :  { %v17481_v0 = vadd.f32 %v7815_v8, %v7540_v55  ;;  %v7544_v54 = vadd.f32 %v7305_v17, %v18866_v60  ;;  %v8175_v8 = vld [vmem:[#allocation2 + $0x308] sm:$0xff] }
 0x4f0   :  { %v13526_v29 = vpop.f32.mrf.mxu0  ;;  %13829 = vmatmul.mubr.f32.gmra.mxu0 %v8699_v26  ;;  %v13404_v27 = vpop.f32.mrf.mxu1  ;;  %13707 = vmatmul.mubr.f32.gmra.mxu1 %v8173_v53  ;;  %v8702_v26 = vld [vmem:[#allocation2 + $0x2e9] sm:$0xff]  ;;  %v8176_v53 = vld [vmem:[#allocation2 + $0x318] sm:$0xff] }
 0x4f1   :  { %v17484_v63 = vadd.f32 %v13526_v29, %v7543_v6  ;;  %13831 = vmatprep.mubr.f32.mxu0 %v8700_v4  ;;  %v7547_v34 = vadd.f32 %v13404_v27, %v17254_v3  ;;  %13709 = vmatprep.mubr.f32.mxu1 %v8174_v58  ;;  %v8703_v4 = vld [vmem:[#allocation2 + $0x2f1] sm:$0xff]  ;;  %v8177_v58 = vld [vmem:[#allocation2 + $0x320] sm:$0xff] }
 0x4f2   :  { %v7825_v11 = vpop.f32.mrf.mxu0  ;;  %v7315_v9 = vpop.f32.mrf.mxu1 }
 0x4f3   :  { %v17487_v55 = vadd.f32 %v7825_v11, %v7542_v59  ;;  %v7546_v37 = vadd.f32 %v7315_v9, %v17257_v41  ;;  %v8704_v9 = vld [vmem:[#allocation2 + $0x301] sm:$0xff] }
 0x4f4   :  { %v13529_v17 = vpop.f32.mrf.mxu0  ;;  %13832 = vmatmul.mubr.f32.gmra.mxu0 %v8701_v46  ;;  %v13407_v60 = vpop.f32.mrf.mxu1  ;;  %13710 = vmatmul.mubr.f32.gmra.mxu1 %v8175_v8  ;;  %v8178_v8 = vld [vmem:[#allocation2 + $0x330] sm:$0xff] }
 0x4f5   :  { %v17490_v6 = vadd.f32 %v13529_v17, %v7545_v40  ;;  %13834 = vmatprep.mubr.f32.mxu0 %v8702_v26  ;;  %v7549_v3 = vadd.f32 %v13407_v60, %v17260_v56  ;;  %13712 = vmatprep.mubr.f32.mxu1 %v8176_v53  ;;  %v8705_v60 = vld [vmem:[#allocation2 + $0x309] sm:$0xff]  ;;  %v8179_v53 = vld [vmem:[#allocation2 + $0x338] sm:$0xff] }
 0x4f6   :  { %v7835_v27 = vpop.f32.mrf.mxu0  ;;  %v7325_v29 = vpop.f32.mrf.mxu1 }
 0x4f7   :  { %v17493_v59 = vadd.f32 %v7835_v27, %v7544_v54  ;;  %v7548_v41 = vadd.f32 %v7325_v29, %v17263_v12  ;;  %v8706_v29 = vld [vmem:[#allocation2 + $0x319] sm:$0xff] }
 0x4f8   :  { %v13532_v11 = vpop.f32.mrf.mxu0  ;;  %13835 = vmatmul.mubr.f32.gmra.mxu0 %v8703_v4  ;;  %v13410_v46 = vpop.f32.mrf.mxu1  ;;  %13713 = vmatmul.mubr.f32.gmra.mxu1 %v8177_v58 }
 0x4f9   :  { %v17496_v40 = vadd.f32 %v13532_v11, %v7547_v34  ;;  %13837 = vmatprep.mubr.f32.mxu0 %v8704_v9  ;;  %v7551_v56 = vadd.f32 %v13410_v46, %v17266_v23  ;;  %13715 = vmatprep.mubr.f32.mxu1 %v8178_v8  ;;  %v8707_v9 = vld [vmem:[#allocation2 + $0x321] sm:$0xff]  ;;  %v18867_v46 = vld [vmem:[#allocation125_spill] sm:$0xff] }
 0x4fa   :  { %v7845_v17 = vpop.f32.mrf.mxu0  ;;  %v7335_v26 = vpop.f32.mrf.mxu1 }
 0x4fb   :  { %v17499_v54 = vadd.f32 %v7845_v17, %v7546_v37  ;;  %v7550_v12 = vadd.f32 %v7335_v26, %v17269_v28  ;;  %v8708_v17 = vld [vmem:[#allocation2 + $0x331] sm:$0xff] }
 0x4fc   :  { %v13535_v27 = vpop.f32.mrf.mxu0  ;;  %13838 = vmatmul.mubr.f32.gmra.mxu0 %v8705_v60  ;;  %v13413_v4 = vpop.f32.mrf.mxu1  ;;  %13716 = vmatmul.mubr.f32.gmra.mxu1 %v8179_v53 }
 0x4fd   :  { %v17502_v58 = vadd.f32 %v13535_v27, %v7549_v3  ;;  %13840 = vmatprep.mubr.f32.mxu0 %v8706_v29  ;;  %v7553_v34 = vadd.f32 %v13413_v4, %v17275_v19  ;;  %13718 = vmatprep.mubr.f32.mxu1 %v17405_v42  ;;  %v9178_v3 = vld [vmem:[#allocation2 + $0x32] sm:$0xff]  ;;  %v8710_v27 = vld [vmem:[#allocation2 + $0x349] sm:$0xff] }
 0x4fe   :  { %v7855_v23 = vpop.f32.mrf.mxu0  ;;  %v7345_v11 = vpop.f32.mrf.mxu1  ;;  %v8709_v4 = vld [vmem:[#allocation2 + $0x339] sm:$0xff] }
 0x4ff   :  { %v17506_v37 = vadd.f32 %v7855_v23, %v7548_v41  ;;  %v7552_v28 = vadd.f32 %v7345_v11, %v18867_v46  ;;  %v9179_v11 = vld [vmem:[#allocation2 + $0x3a] sm:$0xff] }
 0x500   :  { %v13538_v8 = vpop.f32.mrf.mxu0  ;;  %13841 = vmatmul.mubr.f32.gmra.mxu0 %v8707_v9  ;;  %v13416_v26 = vpop.f32.mrf.mxu1  ;;  %13719 = vmatmul.mubr.f32.gmra.mxu1 %v17405_v42  ;;  %v9180_v42 = vld [vmem:[#allocation2 + $0x4a] sm:$0xff] }
 0x501   :  { %v17510_v60 = vadd.f32 %v13538_v8, %v7551_v56  ;;  %13843 = vmatprep.mubr.f32.mxu0 %v8708_v17  ;;  %v7555_v19 = vadd.f32 %v13416_v26, %v17285_v16  ;;  %13881 = vmatprep.mubr.f32.mxu1 %v9178_v3  ;;  %v8711_v8 = vld [vmem:[#allocation2 + $0x351] sm:$0xff] }
 0x502   :  { %v7865_v53 = vpop.f32.mrf.mxu0  ;;  %v7355_v41 = vpop.f32.mrf.mxu1 }
 0x503   :  { %v17513_v29 = vadd.f32 %v7865_v53, %v7550_v12  ;;  %v7554_v23 = vadd.f32 %v7355_v41, %v17288_v24  ;;  %v9181_v24 = vld [vmem:[#allocation2 + $0x52] sm:$0xff] }
 0x504   :  { %v13541_v9 = vpop.f32.mrf.mxu0  ;;  %13844 = vmatmul.mubr.f32.gmra.mxu0 %v8709_v4  ;;  %v13419_v46 = vpop.f32.mrf.mxu1  ;;  %13882 = vmatmul.mubr.f32.vlgmr.msra.gmra.mxu1 %v9179_v11  ;;  %v9182_v4 = vld [vmem:[#allocation2 + $0x62] sm:$0xff] }
 0x505   :  { %v17516_v56 = vadd.f32 %v13541_v9, %v7553_v34  ;;  %13846 = vmatprep.mubr.f32.mxu0 %v8710_v27  ;;  %v7557_v16 = vadd.f32 %v13419_v46, %v17294_v52  ;;  %13884 = vmatprep.mubr.f32.mxu1 %v9180_v42  ;;  %v9183_v46 = vld [vmem:[#allocation2 + $0x6a] sm:$0xff] }
 0x506   :  { %v7875_v17 = vpop.f32.mrf.mxu0  ;;  %v7365_v26 = vpop.f32.mrf.mxu1 }
 0x507   :  { %v17519_v12 = vadd.f32 %v7875_v17, %v7552_v28  ;;  %v7556_v3 = vadd.f32 %v7365_v26, %v17297_v48  ;;  %v9184_v17 = vld [vmem:[#allocation2 + $0x7a] sm:$0xff] }
 0x508   :  { %v13544_v53 = vpop.f32.mrf.mxu0  ;;  %13847 = vmatmul.mubr.f32.gmra.mxu0 %v8711_v8  ;;  %v13422_v41 = vpop.f32.mrf.mxu1  ;;  %13885 = vmatmul.mubr.f32.gmra.mxu1 %v9181_v24 }
 0x509   :  { %v17522_v11 = vadd.f32 %v13544_v53, %v7555_v19  ;;  %v7559_v34 = vadd.f32 %v13422_v41, %v17303_v15  ;;  %13887 = vmatprep.mubr.f32.mxu1 %v9182_v4 }
 0x50a   :  { %v7885_v27 = vpop.f32.mrf.mxu0  ;;  %v7375_v52 = vpop.f32.mrf.mxu1 }
 0x50b   :  { %v17525_v9 = vadd.f32 %v7885_v27, %v7554_v23  ;;  %v7558_v28 = vadd.f32 %v7375_v52, %v17306_v61  ;;  %v9185_v23 = vld [vmem:[#allocation2 + $0x82] sm:$0xff]  ;;  %v9186_v61 = vld [vmem:[#allocation2 + $0x92] sm:$0xff] }
 0x50c   :  { %v13547_v42 = vpop.f32.mrf.mxu0  ;;  %v13425_v48 = vpop.f32.mrf.mxu1  ;;  %13888 = vmatmul.mubr.f32.gmra.mxu1 %v9183_v46 }
 0x50d   :  { %v17528_v8 = vadd.f32 %v13547_v42, %v7557_v16  ;;  %v7561_v26 = vadd.f32 %v13425_v48, %v17312_v13  ;;  %13890 = vmatprep.mubr.f32.mxu1 %v9184_v17 }
 0x50e   :  { %v7895_v19 = vpop.f32.mrf.mxu0  ;;  %v7385_v24 = vpop.f32.mrf.mxu1 }
 0x50f   :  { %v17531_v15 = vadd.f32 %v7895_v19, %v7556_v3  ;;  %v7560_v53 = vadd.f32 %v7385_v24, %v17315_v45  ;;  %v9187_v3 = vld [vmem:[#allocation2 + $0x9a] sm:$0xff]  ;;  %v9188_v45 = vld [vmem:[#allocation2 + $0xaa] sm:$0xff] }
 0x510   :  { %v13550_v41 = vpop.f32.mrf.mxu0  ;;  %v13428_v4 = vpop.f32.mrf.mxu1  ;;  %13891 = vmatmul.mubr.f32.gmra.mxu1 %v9185_v23  ;;  %v18871_v24 = vld [vmem:[#allocation102_spill] sm:$0xff] }
 0x511   :  { %v17534_v27 = vadd.f32 %v13550_v41, %v7559_v34  ;;  %v7563_v52 = vadd.f32 %v13428_v4, %v17321_v5  ;;  %13893 = vmatprep.mubr.f32.mxu1 %v9186_v61  ;;  %v18873_v4 = vld [vmem:[#allocation103_spill] sm:$0xff] }
 0x512   :  { %v7905_v16 = vpop.f32.mrf.mxu0  ;;  %v7395_v46 = vpop.f32.mrf.mxu1 }
 0x513   :  { %18868 = vst [vmem:[#allocation130_spill] sm:$0xff] %v17534_v27  ;;  %v17537_v13 = vadd.f32 %v7905_v16, %v7558_v28  ;;  %v7562_v42 = vadd.f32 %v7395_v46, %v17324_v47  ;;  %v9189_v28 = vld [vmem:[#allocation2 + $0xb2] sm:$0xff]  ;;  %v9190_v47 = vld [vmem:[#allocation2 + $0xc2] sm:$0xff] }
 0x514   :  { %v13553_v48 = vpop.f32.mrf.mxu0  ;;  %v13431_v17 = vpop.f32.mrf.mxu1  ;;  %13894 = vmatmul.mubr.f32.gmra.mxu1 %v9187_v3  ;;  %v18875_v3 = vld [vmem:[#allocation124_spill] sm:$0xff] }
 0x515   :  { %18869 = vst [vmem:[#allocation133_spill] sm:$0xff] %v17537_v13  ;;  %v17540_v19 = vadd.f32 %v13553_v48, %v7561_v26  ;;  %v7565_v23 = vadd.f32 %v13431_v17, %v18871_v24  ;;  %13896 = vmatprep.mubr.f32.mxu1 %v9188_v45  ;;  %v18877_v45 = vld [vmem:[#allocation156_spill] sm:$0xff] }
 0x516   :  { %v7915_v34 = vpop.f32.mrf.mxu0  ;;  %v7405_v41 = vpop.f32.mrf.mxu1 }
 0x517   :  { %18870 = vst [vmem:[#allocation86_spill] sm:$0xff] %v17540_v19  ;;  %v17543_v5 = vadd.f32 %v7915_v34, %v7560_v53  ;;  %v7564_v61 = vadd.f32 %v7405_v41, %v18873_v4  ;;  %v9191_v53 = vld [vmem:[#allocation2 + $0xca] sm:$0xff]  ;;  %v9192_v41 = vld [vmem:[#allocation2 + $0xda] sm:$0xff] }
 0x518   :  { %v13556_v16 = vpop.f32.mrf.mxu0  ;;  %v13434_v13 = vpop.f32.mrf.mxu1  ;;  %13897 = vmatmul.mubr.f32.gmra.mxu1 %v9189_v28  ;;  %v18879_v28 = vld [vmem:[#allocation127_spill] sm:$0xff] }
 0x519   :  { %18872 = vst [vmem:[#allocation87_spill] sm:$0xff] %v17543_v5  ;;  %v17546_v46 = vadd.f32 %v13556_v16, %v7563_v52  ;;  %v7567_v27 = vadd.f32 %v13434_v13, %v18875_v3  ;;  %13899 = vmatprep.mubr.f32.mxu1 %v9190_v47  ;;  %v18881_v47 = vld [vmem:[#allocation104_spill] sm:$0xff] }
 0x51a   :  { %v7925_v26 = vpop.f32.mrf.mxu0  ;;  %v7415_v48 = vpop.f32.mrf.mxu1 }
 0x51b   :  { %18874 = vst [vmem:[#allocation132_spill] sm:$0xff] %v17546_v46  ;;  %v17549_v17 = vadd.f32 %v7925_v26, %v7562_v42  ;;  %v7566_v24 = vadd.f32 %v7415_v48, %v18877_v45  ;;  %v9193_v42 = vld [vmem:[#allocation2 + $0xe2] sm:$0xff]  ;;  %v9194_v48 = vld [vmem:[#allocation2 + $0xf2] sm:$0xff] }
 0x51c   :  { %v13559_v34 = vpop.f32.mrf.mxu0  ;;  %v13437_v5 = vpop.f32.mrf.mxu1  ;;  %13900 = vmatmul.mubr.f32.gmra.mxu1 %v9191_v53  ;;  %v18883_v53 = vld [vmem:[#allocation105_spill] sm:$0xff] }
 0x51d   :  { %18876 = vst [vmem:[#allocation135_spill] sm:$0xff] %v17549_v17  ;;  %v17552_v4 = vadd.f32 %v13559_v34, %v7565_v23  ;;  %v7569_v19 = vadd.f32 %v13437_v5, %v18879_v28  ;;  %13902 = vmatprep.mubr.f32.mxu1 %v9192_v41  ;;  %v18885_v41 = vld [vmem:[#allocation126_spill] sm:$0xff] }
 0x51e   :  { %v7935_v52 = vpop.f32.mrf.mxu0  ;;  %v7425_v16 = vpop.f32.mrf.mxu1 }
 0x51f   :  { %18878 = vst [vmem:[#allocation61_spill] sm:$0xff] %v17552_v4  ;;  %v17555_v13 = vadd.f32 %v7935_v52, %v7564_v61  ;;  %v7568_v3 = vadd.f32 %v7425_v16, %v18881_v47  ;;  %v9195_v61 = vld [vmem:[#allocation2 + $0xfa] sm:$0xff]  ;;  %v9196_v16 = vld [vmem:[#allocation2 + $0x10a] sm:$0xff] }
 0x520   :  { %v13562_v26 = vpop.f32.mrf.mxu0  ;;  %v13440_v17 = vpop.f32.mrf.mxu1  ;;  %13903 = vmatmul.mubr.f32.gmra.mxu1 %v9193_v42  ;;  %v18887_v42 = vld [vmem:[#allocation157_spill] sm:$0xff] }
 0x521   :  { %18880 = vst [vmem:[#allocation62_spill] sm:$0xff] %v17555_v13  ;;  %v17558_v45 = vadd.f32 %v13562_v26, %v7567_v27  ;;  %v7571_v46 = vadd.f32 %v13440_v17, %v18883_v53  ;;  %13905 = vmatprep.mubr.f32.mxu1 %v9194_v48  ;;  %v18889_v48 = vld [vmem:[#allocation129_spill] sm:$0xff] }
 0x522   :  { %v7945_v23 = vpop.f32.mrf.mxu0  ;;  %v7435_v34 = vpop.f32.mrf.mxu1 }
 0x523   :  { %18882 = vst [vmem:[#allocation134_spill] sm:$0xff] %v17558_v45  ;;  %v17561_v5 = vadd.f32 %v7945_v23, %v7566_v24  ;;  %v7570_v28 = vadd.f32 %v7435_v34, %v18885_v41  ;;  %v9197_v24 = vld [vmem:[#allocation2 + $0x112] sm:$0xff]  ;;  %v9198_v34 = vld [vmem:[#allocation2 + $0x122] sm:$0xff] }
 0x524   :  { %v13565_v52 = vpop.f32.mrf.mxu0  ;;  %v13443_v13 = vpop.f32.mrf.mxu1  ;;  %13906 = vmatmul.mubr.f32.gmra.mxu1 %v9195_v61  ;;  %v18890_v61 = vld [vmem:[#allocation106_spill] sm:$0xff] }
 0x525   :  { %18884 = vst [vmem:[#allocation137_spill] sm:$0xff] %v17561_v5  ;;  %v17564_v47 = vadd.f32 %v13565_v52, %v7569_v19  ;;  %v7573_v4 = vadd.f32 %v13443_v13, %v18887_v42  ;;  %13908 = vmatprep.mubr.f32.mxu1 %v9196_v16  ;;  %v18892_v16 = vld [vmem:[#allocation107_spill] sm:$0xff] }
 0x526   :  { %v7955_v27 = vpop.f32.mrf.mxu0  ;;  %v7445_v26 = vpop.f32.mrf.mxu1 }
 0x527   :  { %18886 = vst [vmem:[#allocation67_spill] sm:$0xff] %v17564_v47  ;;  %v17567_v17 = vadd.f32 %v7955_v27, %v7568_v3  ;;  %v7572_v53 = vadd.f32 %v7445_v26, %v18889_v48  ;;  %v9199_v3 = vld [vmem:[#allocation2 + $0x12a] sm:$0xff]  ;;  %v9200_v26 = vld [vmem:[#allocation2 + $0x13a] sm:$0xff] }
 0x528   :  { %v13568_v23 = vpop.f32.mrf.mxu0  ;;  %v13446_v5 = vpop.f32.mrf.mxu1  ;;  %13909 = vmatmul.mubr.f32.gmra.mxu1 %v9197_v24  ;;  %v18893_v24 = vld [vmem:[#allocation128_spill] sm:$0xff] }
 0x529   :  { %18888 = vst [vmem:[#allocation70_spill] sm:$0xff] %v17567_v17  ;;  %v17570_v41 = vadd.f32 %v13568_v23, %v7571_v46  ;;  %v7575_v45 = vadd.f32 %v13446_v5, %v18890_v61  ;;  %13911 = vmatprep.mubr.f32.mxu1 %v9198_v34  ;;  %v18894_v34 = vld [vmem:[#allocation131_spill] sm:$0xff] }
 0x52a   :  { %v7965_v19 = vpop.f32.mrf.mxu0  ;;  %v7455_v52 = vpop.f32.mrf.mxu1 }
 0x52b   :  { %v17573_v13 = vadd.f32 %v7965_v19, %v7570_v28  ;;  %v7574_v42 = vadd.f32 %v7455_v52, %v18892_v16  ;;  %v9201_v28 = vld [vmem:[#allocation2 + $0x142] sm:$0xff]  ;;  %v9202_v52 = vld [vmem:[#allocation2 + $0x152] sm:$0xff] }
 0x52c   :  { %v13571_v27 = vpop.f32.mrf.mxu0  ;;  %v13449_v17 = vpop.f32.mrf.mxu1  ;;  %13912 = vmatmul.mubr.f32.gmra.mxu1 %v9199_v3 }
 0x52d   :  { %18891 = vst [vmem:[#allocation136_spill] sm:$0xff] %v17573_v13  ;;  %v17576_v48 = vadd.f32 %v13571_v27, %v7573_v4  ;;  %v7577_v47 = vadd.f32 %v13449_v17, %v18893_v24  ;;  %13914 = vmatprep.mubr.f32.mxu1 %v9200_v26 }
 0x52e   :  { %v7975_v46 = vpop.f32.mrf.mxu0  ;;  %v7465_v23 = vpop.f32.mrf.mxu1 }
 0x52f   :  { %v17579_v5 = vadd.f32 %v7975_v46, %v7572_v53  ;;  %v7576_v61 = vadd.f32 %v7465_v23, %v18894_v34  ;;  %v9203_v53 = vld [vmem:[#allocation2 + $0x15a] sm:$0xff]  ;;  %v9204_v23 = vld [vmem:[#allocation2 + $0x16a] sm:$0xff] }
 0x530   :  { %v13574_v19 = vpop.f32.mrf.mxu0  ;;  %v13452_v13 = vpop.f32.mrf.mxu1  ;;  %13915 = vmatmul.mubr.f32.gmra.mxu1 %v9201_v28 }
 0x531   :  { %v17582_v16 = vadd.f32 %v13574_v19, %v7575_v45  ;;  %v7579_v3 = vadd.f32 %v13452_v13, %v17393_v35  ;;  %13917 = vmatprep.mubr.f32.mxu1 %v9202_v52  ;;  %v18896_v13 = vld [vmem:[#allocation108_spill] sm:$0xff] }
 0x532   :  { %v7985_v4 = vpop.f32.mrf.mxu0  ;;  %v7475_v27 = vpop.f32.mrf.mxu1 }
 0x533   :  { %v17585_v17 = vadd.f32 %v7985_v4, %v7574_v42  ;;  %v7578_v26 = vadd.f32 %v7475_v27, %v17396_v50  ;;  %v9205_v42 = vld [vmem:[#allocation2 + $0x172] sm:$0xff]  ;;  %v9206_v50 = vld [vmem:[#allocation2 + $0x182] sm:$0xff] }
 0x534   :  { %v13577_v24 = vpop.f32.mrf.mxu0  ;;  %v13455_v46 = vpop.f32.mrf.mxu1  ;;  %13918 = vmatmul.mubr.f32.gmra.mxu1 %v9203_v53 }
 0x535   :  { %18895 = vst [vmem:[#allocation139_spill] sm:$0xff] %v17585_v17  ;;  %v17588_v34 = vadd.f32 %v13577_v24, %v7577_v47  ;;  %v7581_v28 = vadd.f32 %v13455_v46, %v17402_v62  ;;  %13920 = vmatprep.mubr.f32.mxu1 %v9204_v23  ;;  %v9208_v62 = vld [vmem:[#allocation2 + $0x19a] sm:$0xff]  ;;  %v9207_v23 = vld [vmem:[#allocation2 + $0x18a] sm:$0xff] }
 0x536   :  { %v7995_v45 = vpop.f32.mrf.mxu0  ;;  %v7485_v19 = vpop.f32.mrf.mxu1 }
 0x537   :  { %v17591_v35 = vadd.f32 %v7995_v45, %v7576_v61  ;;  %v7580_v52 = vadd.f32 %v7485_v19, %v18896_v13 }
 0x538   :  { %v13580_v4 = vpop.f32.mrf.mxu0  ;;  %v13458_v17 = vpop.f32.mrf.mxu1  ;;  %13921 = vmatmul.mubr.f32.gmra.mxu1 %v9205_v42 }
 0x539   :  { %v17594_v27 = vadd.f32 %v13580_v4, %v7579_v3  ;;  %v7583_v53 = vadd.f32 %v13458_v17, %v17412_v49  ;;  %13923 = vmatprep.mubr.f32.mxu1 %v9206_v50  ;;  %v9209_v3 = vld [vmem:[#allocation2 + $0x1a2] sm:$0xff] }
 0x53a   :  { %v8005_v47 = vpop.f32.mrf.mxu0  ;;  %v7495_v24 = vpop.f32.mrf.mxu1 }
 0x53b   :  { %v17597_v46 = vadd.f32 %v8005_v47, %v7578_v26  ;;  %v7582_v61 = vadd.f32 %v7495_v24, %v17415_v21  ;;  %v9210_v21 = vld [vmem:[#allocation2 + $0x1e2] sm:$0xff] }
 0x53c   :  { %v13583_v45 = vpop.f32.mrf.mxu0  ;;  %v13461_v19 = vpop.f32.mrf.mxu1  ;;  %13924 = vmatmul.mubr.f32.gmra.mxu1 %v9207_v23 }
 0x53d   :  { %v17600_v13 = vadd.f32 %v13583_v45, %v7581_v28  ;;  %v7585_v42 = vadd.f32 %v13461_v19, %v17418_v7  ;;  %13926 = vmatprep.mubr.f32.mxu1 %v9208_v62  ;;  %v9211_v19 = vld [vmem:[#allocation2 + $0x1ea] sm:$0xff] }
 0x53e   :  { %v8015_v4 = vpop.f32.mrf.mxu0  ;;  %v7505_v49 = vpop.f32.mrf.mxu1 }
 0x53f   :  { %v17603_v17 = vadd.f32 %v8015_v4, %v7580_v52  ;;  %v7584_v50 = vadd.f32 %v7505_v49, %v17421_v18  ;;  %v9212_v18 = vld [vmem:[#allocation2 + $0x1fa] sm:$0xff] }
 0x540   :  { %v13586_v26 = vpop.f32.mrf.mxu0  ;;  %v13464_v47 = vpop.f32.mrf.mxu1  ;;  %13927 = vmatmul.mubr.f32.gmra.mxu1 %v9209_v3 }
 0x541   :  { %v17606_v24 = vadd.f32 %v13586_v26, %v7583_v53  ;;  %v7587_v23 = vadd.f32 %v13464_v47, %v17424_v51  ;;  %13929 = vmatprep.mubr.f32.mxu1 %v9210_v21  ;;  %v9213_v47 = vld [vmem:[#allocation2 + $0x202] sm:$0xff] }
 0x542   :  { %v8025_v28 = vpop.f32.mrf.mxu0  ;;  %v7515_v45 = vpop.f32.mrf.mxu1 }
 0x543   :  { %v17609_v7 = vadd.f32 %v8025_v28, %v7582_v61  ;;  %v7586_v62 = vadd.f32 %v7515_v45, %v17427_v30  ;;  %v9214_v28 = vld [vmem:[#allocation2 + $0x212] sm:$0xff] }
 0x544   :  { %v13589_v52 = vpop.f32.mrf.mxu0  ;;  %v13627_v4 = vpop.f32.mrf.mxu1  ;;  %13930 = vmatmul.mubr.f32.gmra.mxu1 %v9211_v19 }
 0x545   :  { %v17612_v49 = vadd.f32 %v13589_v52, %v7585_v42  ;;  %v17615_v3 = vadd.f32 %v13627_v4, %v17430_v57  ;;  %13932 = vmatprep.mubr.f32.mxu1 %v9212_v18 }
 0x546   :  { %v8035_v53 = vpop.f32.mrf.mxu0  ;;  %v8265_v51 = vpop.f32.mrf.mxu1 }
 0x547   :  { %v17617_v26 = vadd.f32 %v8035_v53, %v7584_v50  ;;  %v17620_v61 = vadd.f32 %v8265_v51, %v17433_v22  ;;  %v9215_v22 = vld [vmem:[#allocation2 + $0x21a] sm:$0xff]  ;;  %v9216_v53 = vld [vmem:[#allocation2 + $0x22a] sm:$0xff] }
 0x548   :  { %v13592_v30 = vpop.f32.mrf.mxu0  ;;  %v13630_v21 = vpop.f32.mrf.mxu1  ;;  %13933 = vmatmul.mubr.f32.gmra.mxu1 %v9213_v47 }
 0x549   :  { %v17622_v45 = vadd.f32 %v13592_v30, %v7587_v23  ;;  %v17625_v42 = vadd.f32 %v13630_v21, %v17436_v14  ;;  %13935 = vmatprep.mubr.f32.mxu1 %v9214_v28  ;;  %v9218_v21 = vld [vmem:[#allocation2 + $0x242] sm:$0xff] }
 0x54a   :  { %v8045_v57 = vpop.f32.mrf.mxu0  ;;  %v8275_v19 = vpop.f32.mrf.mxu1 }
 0x54b   :  { %v17627_v52 = vadd.f32 %v8045_v57, %v7586_v62  ;;  %v17630_v50 = vadd.f32 %v8275_v19, %v17439_v20  ;;  %v9217_v62 = vld [vmem:[#allocation2 + $0x232] sm:$0xff] }
 0x54c   :  { %v17632_v4 = vpop.f32.mrf.mxu0  ;;  %v13633_v18 = vpop.f32.mrf.mxu1  ;;  %13936 = vmatmul.mubr.f32.gmra.mxu1 %v9215_v22  ;;  %v9219_v22 = vld [vmem:[#allocation2 + $0x24a] sm:$0xff] }
 0x54d   :  { %v17635_v23 = vadd.f32 %v13633_v18, %v17442_v31  ;;  %13938 = vmatprep.mubr.f32.mxu1 %v9216_v53  ;;  %v9220_v53 = vld [vmem:[#allocation2 + $0x25a] sm:$0xff] }
 0x54e   :  { %v17637_v14 = vpop.f32.mrf.mxu0  ;;  %v8285_v51 = vpop.f32.mrf.mxu1 }
 0x54f   :  { %v17640_v47 = vadd.f32 %v8285_v51, %v17445_v32 }
 0x550   :  { %v17642_v30 = vpop.f32.mrf.mxu0  ;;  %v13636_v20 = vpop.f32.mrf.mxu1  ;;  %13939 = vmatmul.mubr.f32.gmra.mxu1 %v9217_v62 }
 0x551   :  { %v17645_v28 = vadd.f32 %v13636_v20, %v17448_v38  ;;  %13941 = vmatprep.mubr.f32.mxu1 %v9218_v21  ;;  %v9221_v21 = vld [vmem:[#allocation2 + $0x262] sm:$0xff] }
 0x552   :  { %v17647_v57 = vpop.f32.mrf.mxu0  ;;  %v8295_v31 = vpop.f32.mrf.mxu1 }
 0x553   :  { %18897 = vst [vmem:[#allocation55_spill] sm:$0xff] %v17645_v28  ;;  %v17650_v19 = vadd.f32 %v8295_v31, %v17451_v33  ;;  %v9222_v33 = vld [vmem:[#allocation2 + $0x272] sm:$0xff] }
 0x554   :  { %v17652_v18 = vpop.f32.mrf.mxu0  ;;  %v13639_v32 = vpop.f32.mrf.mxu1  ;;  %13942 = vmatmul.mubr.f32.gmra.mxu1 %v9219_v22 }
 0x555   :  { %18898 = vst [vmem:[#allocation57_spill] sm:$0xff] %v17650_v19  ;;  %v17655_v51 = vadd.f32 %v13639_v32, %v17454_v25  ;;  %13944 = vmatprep.mubr.f32.mxu1 %v9220_v53  ;;  %v9223_v32 = vld [vmem:[#allocation2 + $0x27a] sm:$0xff] }
 0x556   :  { %v17657_v62 = vpop.f32.mrf.mxu0  ;;  %v8305_v38 = vpop.f32.mrf.mxu1 }
 0x557   :  { %18899 = vst [vmem:[#allocation138_spill] sm:$0xff] %v17655_v51  ;;  %v17660_v20 = vadd.f32 %v8305_v38, %v17457_v1  ;;  %v9224_v51 = vld [vmem:[#allocation2 + $0x28a] sm:$0xff] }
 0x558   :  { %v13642_v28 = vpop.f32.mrf.mxu1  ;;  %13945 = vmatmul.mubr.f32.gmra.mxu1 %v9221_v21  ;;  %v17662_v31 = vpop.f32.mrf.mxu0 }
 0x559   :  { %18900 = vst [vmem:[#allocation141_spill] sm:$0xff] %v17660_v20  ;;  %v17665_v19 = vadd.f32 %v13642_v28, %v17460_v39  ;;  %13947 = vmatprep.mubr.f32.mxu1 %v9222_v33  ;;  %v9225_v39 = vld [vmem:[#allocation2 + $0x292] sm:$0xff]  ;;  %v9226_v33 = vld [vmem:[#allocation2 + $0x2a2] sm:$0xff] }
 0x55a   :  { %v8315_v22 = vpop.f32.mrf.mxu1  ;;  %v17670_v1 = vpop.f32.mrf.mxu0 }
 0x55b   :  { %18901 = vst [vmem:[#allocation73_spill] sm:$0xff] %v17665_v19  ;;  %v17668_v25 = vadd.f32 %v8315_v22, %v17463_v10 }
 0x55c   :  { %v13645_v53 = vpop.f32.mrf.mxu1  ;;  %13948 = vmatmul.mubr.f32.gmra.mxu1 %v9223_v32  ;;  %v17678_v10 = vpop.f32.mrf.mxu0 }
 0x55d   :  { %18902 = vst [vmem:[#allocation74_spill] sm:$0xff] %v17668_v25  ;;  %v17673_v38 = vadd.f32 %v13645_v53, %v17466_v36  ;;  %13950 = vmatprep.mubr.f32.mxu1 %v9224_v51  ;;  %v18904_v25 = vld [vmem:[#allocation109_spill] sm:$0xff]  ;;  %v9228_v53 = vld [vmem:[#allocation2 + $0x2ba] sm:$0xff] }
 0x55e   :  { %v8325_v21 = vpop.f32.mrf.mxu1  ;;  %v9227_v36 = vld [vmem:[#allocation2 + $0x2aa] sm:$0xff] }
 0x55f   :  { %v17676_v20 = vadd.f32 %v8325_v21, %v17469_v43  ;;  %v17686_v43 = vpop.f32.mrf.mxu0 }
 0x560   :  { %v13648_v28 = vpop.f32.mrf.mxu1  ;;  %13951 = vmatmul.mubr.f32.gmra.mxu1 %v9225_v39 }
 0x561   :  { %18903 = vst [vmem:[#allocation140_spill] sm:$0xff] %v17676_v20  ;;  %v17681_v22 = vadd.f32 %v13648_v28, %v17472_v44  ;;  %13953 = vmatprep.mubr.f32.mxu1 %v9226_v33  ;;  %v9229_v44 = vld [vmem:[#allocation2 + $0x2c2] sm:$0xff]  ;;  %v9230_v33 = vld [vmem:[#allocation2 + $0x2d2] sm:$0xff] }
 0x562   :  { %v8335_v32 = vpop.f32.mrf.mxu1 }
 0x563   :  { %v17684_v19 = vadd.f32 %v8335_v32, %v18904_v25  ;;  %v17694_v25 = vpop.f32.mrf.mxu0 }
 0x564   :  { %v13651_v51 = vpop.f32.mrf.mxu1  ;;  %13954 = vmatmul.mubr.f32.gmra.mxu1 %v9227_v36 }
 0x565   :  { %18905 = vst [vmem:[#allocation143_spill] sm:$0xff] %v17684_v19  ;;  %v17689_v21 = vadd.f32 %v13651_v51, %v17478_v2  ;;  %13956 = vmatprep.mubr.f32.mxu1 %v9228_v53  ;;  %v9231_v2 = vld [vmem:[#allocation2 + $0x2da] sm:$0xff]  ;;  %v9232_v53 = vld [vmem:[#allocation2 + $0x2ea] sm:$0xff] }
 0x566   :  { %v8345_v39 = vpop.f32.mrf.mxu1 }
 0x567   :  { %v17692_v20 = vadd.f32 %v8345_v39, %v17481_v0  ;;  %v17702_v0 = vpop.f32.mrf.mxu0 }
 0x568   :  { %v13654_v28 = vpop.f32.mrf.mxu1  ;;  %13957 = vmatmul.mubr.f32.gmra.mxu1 %v9229_v44 }
 0x569   :  { %18906 = vst [vmem:[#allocation75_spill] sm:$0xff] %v17692_v20  ;;  %v17697_v32 = vadd.f32 %v13654_v28, %v17484_v63  ;;  %13959 = vmatprep.mubr.f32.mxu1 %v9230_v33  ;;  %v9233_v63 = vld [vmem:[#allocation2 + $0x2f2] sm:$0xff]  ;;  %v9234_v33 = vld [vmem:[#allocation2 + $0x302] sm:$0xff] }
 0x56a   :  { %v8355_v36 = vpop.f32.mrf.mxu1 }
 0x56b   :  { %v17700_v19 = vadd.f32 %v8355_v36, %v17487_v55  ;;  %v17710_v55 = vpop.f32.mrf.mxu0 }
 0x56c   :  { %v13657_v51 = vpop.f32.mrf.mxu1  ;;  %13960 = vmatmul.mubr.f32.gmra.mxu1 %v9231_v2 }
 0x56d   :  { %18907 = vst [vmem:[#allocation76_spill] sm:$0xff] %v17700_v19  ;;  %v17705_v39 = vadd.f32 %v13657_v51, %v17490_v6  ;;  %13962 = vmatprep.mubr.f32.mxu1 %v9232_v53  ;;  %v9235_v6 = vld [vmem:[#allocation2 + $0x30a] sm:$0xff]  ;;  %v9236_v53 = vld [vmem:[#allocation2 + $0x31a] sm:$0xff] }
 0x56e   :  { %v8365_v44 = vpop.f32.mrf.mxu1 }
 0x56f   :  { %v17708_v20 = vadd.f32 %v8365_v44, %v17493_v59  ;;  %v17718_v59 = vpop.f32.mrf.mxu0 }
 0x570   :  { %v13660_v28 = vpop.f32.mrf.mxu1  ;;  %13963 = vmatmul.mubr.f32.gmra.mxu1 %v9233_v63 }
 0x571   :  { %18908 = vst [vmem:[#allocation142_spill] sm:$0xff] %v17708_v20  ;;  %v17713_v36 = vadd.f32 %v13660_v28, %v17496_v40  ;;  %13965 = vmatprep.mubr.f32.mxu1 %v9234_v33  ;;  %v9237_v40 = vld [vmem:[#allocation2 + $0x322] sm:$0xff]  ;;  %v9238_v33 = vld [vmem:[#allocation2 + $0x332] sm:$0xff] }
 0x572   :  { %v8375_v2 = vpop.f32.mrf.mxu1 }
 0x573   :  { %18909 = vst [vmem:[#allocation145_spill] sm:$0xff] %v17713_v36  ;;  %v17716_v19 = vadd.f32 %v8375_v2, %v17499_v54  ;;  %v17726_v54 = vpop.f32.mrf.mxu0  ;;  %v18938_v36 = vld [vmem:[#allocation134_spill] sm:$0xff] }
 0x574   :  { %v13663_v51 = vpop.f32.mrf.mxu1  ;;  %13966 = vmatmul.mubr.f32.gmra.mxu1 %v9235_v6 }
 0x575   :  { %18910 = vst [vmem:[#allocation77_spill] sm:$0xff] %v17716_v19  ;;  %v17721_v44 = vadd.f32 %v13663_v51, %v17502_v58  ;;  %13968 = vmatprep.mubr.f32.mxu1 %v9236_v53  ;;  %v9240_v19 = vld [vmem:[#allocation2 + $0x34a] sm:$0xff]  ;;  %v9239_v51 = vld [vmem:[#allocation2 + $0x33a] sm:$0xff] }
 0x576   :  { %v8385_v63 = vpop.f32.mrf.mxu1 }
 0x577   :  { %18911 = vst [vmem:[#allocation110_spill] sm:$0xff] %v17721_v44  ;;  %v17724_v20 = vadd.f32 %v8385_v63, %v17506_v37  ;;  %v17734_v37 = vpop.f32.mrf.mxu0  ;;  %v18934_v44 = vld [vmem:[#allocation61_spill] sm:$0xff] }
 0x578   :  { %v13666_v28 = vpop.f32.mrf.mxu1  ;;  %13969 = vmatmul.mubr.f32.gmra.mxu1 %v9237_v40  ;;  %v9241_v40 = vld [vmem:[#allocation2 + $0x352] sm:$0xff] }
 0x579   :  { %18912 = vst [vmem:[#allocation144_spill] sm:$0xff] %v17724_v20  ;;  %v17729_v2 = vadd.f32 %v13666_v28, %v17510_v60  ;;  %13971 = vmatprep.mubr.f32.mxu1 %v9238_v33  ;;  %v17742_v33 = vpop.f32.mrf.mxu0 }
 0x57a   :  { %v8395_v6 = vpop.f32.mrf.mxu1 }
 0x57b   :  { %18913 = vst [vmem:[#allocation147_spill] sm:$0xff] %v17729_v2  ;;  %v17732_v58 = vadd.f32 %v8395_v6, %v17513_v29  ;;  %v18929_v2 = vld [vmem:[#allocation132_spill] sm:$0xff] }
 0x57c   :  { %v13669_v53 = vpop.f32.mrf.mxu1  ;;  %13972 = vmatmul.mubr.f32.gmra.mxu1 %v9239_v51 }
 0x57d   :  { %18914 = vst [vmem:[#allocation78_spill] sm:$0xff] %v17732_v58  ;;  %v17737_v63 = vadd.f32 %v13669_v53, %v17516_v56  ;;  %13974 = vmatprep.mubr.f32.mxu1 %v9240_v19  ;;  %v17750_v56 = vpop.f32.mrf.mxu0 }
 0x57e   :  { %v8405_v20 = vpop.f32.mrf.mxu1 }
 0x57f   :  { %18915 = vst [vmem:[#allocation79_spill] sm:$0xff] %v17737_v63  ;;  %v17740_v60 = vadd.f32 %v8405_v20, %v17519_v12  ;;  %v18925_v63 = vld [vmem:[#allocation86_spill] sm:$0xff] }
 0x580   :  { %v13672_v28 = vpop.f32.mrf.mxu1  ;;  %13975 = vmatmul.mubr.f32.gmra.mxu1 %v9241_v40  ;;  %v17758_v40 = vpop.f32.mrf.mxu0 }
 0x581   :  { %18916 = vst [vmem:[#allocation146_spill] sm:$0xff] %v17740_v60  ;;  %v17745_v29 = vadd.f32 %v13672_v28, %v17522_v11  ;;  %v18921_v60 = vld [vmem:[#allocation130_spill] sm:$0xff] }
 0x582   :  { %v8415_v6 = vpop.f32.mrf.mxu1 }
 0x583   :  { %18917 = vst [vmem:[#allocation149_spill] sm:$0xff] %v17745_v29  ;;  %v17748_v51 = vadd.f32 %v8415_v6, %v17525_v9  ;;  %v18923_v29 = vld [vmem:[#allocation133_spill] sm:$0xff] }
 0x584   :  { %v13675_v58 = vpop.f32.mrf.mxu1 }
 0x585   :  { %18918 = vst [vmem:[#allocation80_spill] sm:$0xff] %v17748_v51  ;;  %v17753_v19 = vadd.f32 %v13675_v58, %v17528_v8  ;;  %v17766_v51 = vpop.f32.mrf.mxu0 }
 0x586   :  { %v8425_v53 = vpop.f32.mrf.mxu1 }
 0x587   :  { %18919 = vst [vmem:[#allocation81_spill] sm:$0xff] %v17753_v19  ;;  %v17756_v12 = vadd.f32 %v8425_v53, %v17531_v15  ;;  %v18927_v19 = vld [vmem:[#allocation87_spill] sm:$0xff] }
 0x588   :  { %v13678_v20 = vpop.f32.mrf.mxu1 }
 0x589   :  { %18920 = vst [vmem:[#allocation148_spill] sm:$0xff] %v17756_v12  ;;  %v17761_v11 = vadd.f32 %v13678_v20, %v18921_v60  ;;  %v17774_v12 = vpop.f32.mrf.mxu0 }
 0x58a   :  { %v8435_v28 = vpop.f32.mrf.mxu1 }
 0x58b   :  { %18922 = vst [vmem:[#allocation151_spill] sm:$0xff] %v17761_v11  ;;  %v17764_v9 = vadd.f32 %v8435_v28, %v18923_v29  ;;  %v18931_v11 = vld [vmem:[#allocation135_spill] sm:$0xff] }
 0x58c   :  { %v13681_v6 = vpop.f32.mrf.mxu1 }
 0x58d   :  { %18924 = vst [vmem:[#allocation82_spill] sm:$0xff] %v17764_v9  ;;  %v17769_v8 = vadd.f32 %v13681_v6, %v18925_v63  ;;  %v17782_v9 = vpop.f32.mrf.mxu0 }
 0x58e   :  { %v8445_v58 = vpop.f32.mrf.mxu1  ;;  %18933 = vst [vmem:[#allocation112_spill] sm:$0xff] %v17782_v9  ;;  %v18942_v9 = vld [vmem:[#allocation67_spill] sm:$0xff] }
 0x58f   :  { %18926 = vst [vmem:[#allocation111_spill] sm:$0xff] %v17769_v8  ;;  %v17772_v15 = vadd.f32 %v8445_v58, %v18927_v19  ;;  %v18936_v8 = vld [vmem:[#allocation62_spill] sm:$0xff] }
 0x590   :  { %v13684_v53 = vpop.f32.mrf.mxu1 }
 0x591   :  { %18928 = vst [vmem:[#allocation150_spill] sm:$0xff] %v17772_v15  ;;  %v17777_v60 = vadd.f32 %v13684_v53, %v18929_v2  ;;  %v17790_v15 = vpop.f32.mrf.mxu0 }
 0x592   :  { %v8455_v20 = vpop.f32.mrf.mxu1 }
 0x593   :  { %18930 = vst [vmem:[#allocation153_spill] sm:$0xff] %v17777_v60  ;;  %v17780_v29 = vadd.f32 %v8455_v20, %v18931_v11  ;;  %v18940_v60 = vld [vmem:[#allocation137_spill] sm:$0xff] }
 0x594   :  { %v13687_v28 = vpop.f32.mrf.mxu1 }
 0x595   :  { %18932 = vst [vmem:[#allocation83_spill] sm:$0xff] %v17780_v29  ;;  %v17785_v63 = vadd.f32 %v13687_v28, %v18934_v44  ;;  %v17798_v29 = vpop.f32.mrf.mxu0 }
 0x596   :  { %v8465_v6 = vpop.f32.mrf.mxu1 }
 0x597   :  { %18935 = vst [vmem:[#allocation152_spill] sm:$0xff] %v17785_v63  ;;  %v17788_v19 = vadd.f32 %v8465_v6, %v18936_v8  ;;  %v18943_v63 = vld [vmem:[#allocation70_spill] sm:$0xff] }
 0x598   :  { %v13690_v58 = vpop.f32.mrf.mxu1 }
 0x599   :  { %18937 = vst [vmem:[#allocation155_spill] sm:$0xff] %v17788_v19  ;;  %v17793_v2 = vadd.f32 %v13690_v58, %v18938_v36  ;;  %v17806_v19 = vpop.f32.mrf.mxu0 }
 0x59a   :  { %v8475_v53 = vpop.f32.mrf.mxu1 }
 0x59b   :  { %18939 = vst [vmem:[#allocation154_spill] sm:$0xff] %v17793_v2  ;;  %v17796_v11 = vadd.f32 %v8475_v53, %v18940_v60  ;;  %v18946_v2 = vld [vmem:[#allocation136_spill] sm:$0xff] }
 0x59c   :  { %v13693_v20 = vpop.f32.mrf.mxu1 }
 0x59d   :  { %18941 = vst [vmem:[#allocation84_spill] sm:$0xff] %v17796_v11  ;;  %v17801_v44 = vadd.f32 %v13693_v20, %v18942_v9  ;;  %v17814_v11 = vpop.f32.mrf.mxu0 }
 0x59e   :  { %v8485_v28 = vpop.f32.mrf.mxu1 }
 0x59f   :  { %v17804_v8 = vadd.f32 %v8485_v28, %v18943_v63 }
 0x5a0   :  { %v13696_v6 = vpop.f32.mrf.mxu1 }
 0x5a1   :  { %18944 = vst [vmem:[#allocation85_spill] sm:$0xff] %v17804_v8  ;;  %v17809_v36 = vadd.f32 %v13696_v6, %v17570_v41  ;;  %v17822_v8 = vpop.f32.mrf.mxu0 }
 0x5a2   :  { %v8495_v58 = vpop.f32.mrf.mxu1 }
 0x5a3   :  { %18945 = vst [vmem:[#allocation88_spill] sm:$0xff] %v17809_v36  ;;  %v17812_v60 = vadd.f32 %v8495_v58, %v18946_v2  ;;  %v18949_v36 = vld [vmem:[#allocation139_spill] sm:$0xff] }
 0x5a4   :  { %v13699_v53 = vpop.f32.mrf.mxu1 }
 0x5a5   :  { %18947 = vst [vmem:[#allocation89_spill] sm:$0xff] %v17812_v60  ;;  %v17817_v9 = vadd.f32 %v13699_v53, %v17576_v48  ;;  %v17830_v60 = vpop.f32.mrf.mxu0 }
 0x5a6   :  { %v8505_v20 = vpop.f32.mrf.mxu1 }
 0x5a7   :  { %v17820_v63 = vadd.f32 %v8505_v20, %v17579_v5 }
 0x5a8   :  { %v13702_v28 = vpop.f32.mrf.mxu1 }
 0x5a9   :  { %18948 = vst [vmem:[#allocation115_spill] sm:$0xff] %v17820_v63  ;;  %v17825_v41 = vadd.f32 %v13702_v28, %v17582_v16  ;;  %v17838_v63 = vpop.f32.mrf.mxu0 }
 0x5aa   :  { %v8515_v6 = vpop.f32.mrf.mxu1 }
 0x5ab   :  { %v17828_v2 = vadd.f32 %v8515_v6, %v18949_v36 }
 0x5ac   :  { %v13705_v58 = vpop.f32.mrf.mxu1 }
 0x5ad   :  { %18950 = vst [vmem:[#allocation113_spill] sm:$0xff] %v17828_v2  ;;  %v17833_v48 = vadd.f32 %v13705_v58, %v17588_v34  ;;  %v17846_v2 = vpop.f32.mrf.mxu0 }
 0x5ae   :  { %v8525_v53 = vpop.f32.mrf.mxu1 }
 0x5af   :  { %v17836_v5 = vadd.f32 %v8525_v53, %v17591_v35 }
 0x5b0   :  { %v13708_v20 = vpop.f32.mrf.mxu1 }
 0x5b1   :  { %18951 = vst [vmem:[#allocation90_spill] sm:$0xff] %v17836_v5  ;;  %v17841_v16 = vadd.f32 %v13708_v20, %v17594_v27  ;;  %v17854_v5 = vpop.f32.mrf.mxu0 }
 0x5b2   :  { %v8535_v28 = vpop.f32.mrf.mxu1 }
 0x5b3   :  { %v17844_v36 = vadd.f32 %v8535_v28, %v17597_v46 }
 0x5b4   :  { %v13711_v6 = vpop.f32.mrf.mxu1 }
 0x5b5   :  { %18952 = vst [vmem:[#allocation91_spill] sm:$0xff] %v17844_v36  ;;  %v17849_v34 = vadd.f32 %v13711_v6, %v17600_v13  ;;  %v17862_v36 = vpop.f32.mrf.mxu0 }
 0x5b6   :  { %v8545_v58 = vpop.f32.mrf.mxu1 }
 0x5b7   :  { %v17852_v35 = vadd.f32 %v8545_v58, %v17603_v17 }
 0x5b8   :  { %v13714_v53 = vpop.f32.mrf.mxu1 }
 0x5b9   :  { %18953 = vst [vmem:[#allocation114_spill] sm:$0xff] %v17852_v35  ;;  %v17857_v27 = vadd.f32 %v13714_v53, %v17606_v24  ;;  %v17870_v35 = vpop.f32.mrf.mxu0 }
 0x5ba   :  { %v8555_v20 = vpop.f32.mrf.mxu1 }
 0x5bb   :  { %v17860_v46 = vadd.f32 %v8555_v20, %v17609_v7  ;;  %v9115_v7 = vadd.f32 %v17632_v4, %v17615_v3 }
 0x5bc   :  { %v13717_v28 = vpop.f32.mrf.mxu1 }
 0x5bd   :  { %18954 = vst [vmem:[#allocation117_spill] sm:$0xff] %v17860_v46  ;;  %v17865_v13 = vadd.f32 %v13717_v28, %v17612_v49  ;;  %v17883_v49 = vld [vmem:[%s18376_s4] ss:$0 sm:$0xff]  ;;  %v17887_v28 = vpop.f32.mrf.mxu0 }
 0x5be   :  { %v8565_v6 = vpop.f32.mrf.mxu1 }
 0x5bf   :  { %18955 = vst [vmem:[#allocation92_spill] sm:$0xff] %v17865_v13  ;;  %v17868_v17 = vadd.f32 %v8565_v6, %v17617_v26  ;;  %v9114_v26 = vadd.f32 %v17637_v14, %v17620_v61  ;;  %v9116_v61 = vadd.f32 %v17647_v57, %v17630_v50  ;;  %v18961_v57 = vld [vmem:[#allocation6_spill] sm:$0xff] }
 0x5c0   :  { %v13720_v58 = vpop.f32.mrf.mxu1 }
 0x5c1   :  { %18956 = vst [vmem:[#allocation93_spill] sm:$0xff] %v17868_v17  ;;  %v17873_v24 = vadd.f32 %v13720_v58, %v17622_v45  ;;  %v9117_v58 = vadd.f32 %v17642_v30, %v17625_v42  ;;  %v18960_v42 = vld [vmem:[#allocation3_spill] sm:$0xff] }
 0x5c2   :  { %v8575_v53 = vpop.f32.mrf.mxu1 }
 0x5c3   :  { %18957 = vst [vmem:[#allocation116_spill] sm:$0xff] %v17873_v24  ;;  %v17878_v20 = vadd.f32 %v8575_v53, %v17627_v52  ;;  %v17892_v53 = vpop.f32.mrf.mxu0 }
 0x5c4   :  { %v13883_v46 = vpop.f32.mrf.mxu1 }
 0x5c5   :  { %18958 = vst [vmem:[#allocation94_spill] sm:$0xff] %v17878_v20  ;;  %v9645_v45 = vadd.f32 %v13883_v46, %v9115_v7  ;;  %v18959_v20 = vld [vmem:[#allocation4_spill] sm:$0xff]  ;;  %v9119_v46 = vadd.f32 %v17652_v18, %v17635_v23 }
 0x5c6   :  { %v9325_v6 = vpop.f32.mrf.mxu1 }
 0x5c7   :  { %v9716_v3 = vadd.f32 %v17883_v49, %v9645_v45  ;;  %v9644_v52 = vadd.f32 %v9325_v6, %v9114_v26 }
 0x5c8   :  { %v13886_v4 = vpop.f32.mrf.mxu1 }
 0x5c9   :  { %v9780_v24 = vadd.f32 %v9716_v3, %v18959_v20  ;;  %v9715_v17 = vadd.f32 %v17883_v49, %v9644_v52  ;;  %v9647_v13 = vadd.f32 %v13886_v4, %v9117_v58  ;;  %v9118_v20 = vadd.f32 %v17657_v62, %v17640_v47  ;;  %v17904_v3 = vpop.f32.mrf.mxu0  ;;  %v18963_v4 = vld [vmem:[#allocation5_spill] sm:$0xff] }
 0x5ca   :  { %v9335_v14 = vpop.f32.mrf.mxu1 }
 0x5cb   :  { %v9844_v7 = vmax.f32 %v9780_v24, 0.0  ;;  %v9779_v30 = vadd.f32 %v9715_v17, %v18960_v42  ;;  %v9718_v26 = vadd.f32 %v17883_v49, %v9647_v13  ;;  %v9646_v45 = vadd.f32 %v9335_v14, %v9116_v61  ;;  %v18962_v24 = vld [vmem:[#allocation55_spill] sm:$0xff]  ;;  %v17920_v42 = vpop.f32.mrf.mxu0 }
 0x5cc   :  { %v13889_v6 = vpop.f32.mrf.mxu1  ;;  %v9121_v13 = vadd.f32 %v17662_v31, %v18962_v24  ;;  %v18965_v31 = vld [vmem:[#allocation8_spill] sm:$0xff]  ;;  %v18968_v24 = vld [vmem:[#allocation141_spill] sm:$0xff] }
 0x5cd   :  { %9908 = vst [vmem:[%s18377_s5 + $0x8] sm:$0xff] %v9844_v7  ;;  %v9843_v50 = vmax.f32 %v9779_v30, 0.0  ;;  %v9782_v58 = vadd.f32 %v9718_v26, %v18961_v57  ;;  %v9649_v23 = vadd.f32 %v13889_v6, %v9119_v46  ;;  %v9717_v18 = vadd.f32 %v17883_v49, %v9646_v45  ;;  %v18964_v7 = vld [vmem:[#allocation57_spill] sm:$0xff]  ;;  %v18966_v6 = vld [vmem:[#allocation138_spill] sm:$0xff] }
 0x5ce   :  { %v9345_v17 = vpop.f32.mrf.mxu1  ;;  %v9120_v46 = vadd.f32 %v17670_v1, %v18964_v7  ;;  %v18970_v7 = vld [vmem:[#allocation73_spill] sm:$0xff] }
 0x5cf   :  { %9907 = vst [vmem:[%s18377_s5] sm:$0xff] %v9843_v50  ;;  %v9846_v47 = vmax.f32 %v9782_v58, 0.0  ;;  %v9720_v62 = vadd.f32 %v17883_v49, %v9649_v23  ;;  %v9648_v52 = vadd.f32 %v9345_v17, %v9118_v20  ;;  %v9781_v61 = vadd.f32 %v9717_v18, %v18963_v4  ;;  %v18967_v23 = vld [vmem:[#allocation7_spill] sm:$0xff] }
 0x5d0   :  { %v13892_v14 = vpop.f32.mrf.mxu1  ;;  %v9123_v20 = vadd.f32 %v17678_v10, %v18966_v6  ;;  %v9122_v4 = vadd.f32 %v17686_v43, %v18968_v24  ;;  %v9125_v43 = vadd.f32 %v17694_v25, %v18970_v7  ;;  %v9127_v24 = vadd.f32 %v17710_v55, %v17673_v38  ;;  %v18976_v55 = vld [vmem:[#allocation14_spill] sm:$0xff] }
 0x5d1   :  { %9910 = vst [vmem:[%s18377_s5 + $0x18] sm:$0xff] %v9846_v47  ;;  %v9784_v30 = vadd.f32 %v9720_v62, %v18965_v31  ;;  %v9719_v26 = vadd.f32 %v17883_v49, %v9648_v52  ;;  %v9651_v45 = vadd.f32 %v13892_v14, %v9121_v13  ;;  %v9845_v50 = vmax.f32 %v9781_v61, 0.0  ;;  %v17936_v13 = vpop.f32.mrf.mxu0  ;;  %v18969_v62 = vld [vmem:[#allocation10_spill] sm:$0xff] }
 0x5d2   :  { %v9355_v57 = vpop.f32.mrf.mxu1 }
 0x5d3   :  { %v9848_v58 = vmax.f32 %v9784_v30, 0.0  ;;  %v9783_v18 = vadd.f32 %v9719_v26, %v18967_v23  ;;  %v9722_v1 = vadd.f32 %v17883_v49, %v9651_v45  ;;  %v9650_v17 = vadd.f32 %v9355_v57, %v9120_v46  ;;  %9909 = vst [vmem:[%s18377_s5 + $0x10] sm:$0xff] %v9845_v50  ;;  %v18971_v30 = vld [vmem:[#allocation9_spill] sm:$0xff]  ;;  %v18972_v50 = vld [vmem:[#allocation74_spill] sm:$0xff]  ;;  %v17952_v23 = vpop.f32.mrf.mxu0 }
 0x5d4   :  { %v13895_v47 = vpop.f32.mrf.mxu1  ;;  %v9124_v57 = vadd.f32 %v17702_v0, %v18972_v50 }
 0x5d5   :  { %9912 = vst [vmem:[%s18377_s5 + $0x28] sm:$0xff] %v9848_v58  ;;  %v9847_v10 = vmax.f32 %v9783_v18, 0.0  ;;  %v9786_v52 = vadd.f32 %v9722_v1, %v18969_v62  ;;  %v9721_v61 = vadd.f32 %v17883_v49, %v9650_v17  ;;  %v9653_v14 = vadd.f32 %v13895_v47, %v9123_v20  ;;  %v18973_v20 = vld [vmem:[#allocation12_spill] sm:$0xff]  ;;  %v18974_v47 = vld [vmem:[#allocation11_spill] sm:$0xff] }
 0x5d6   :  { %v9365_v46 = vpop.f32.mrf.mxu1 }
 0x5d7   :  { %9911 = vst [vmem:[%s18377_s5 + $0x20] sm:$0xff] %v9847_v10  ;;  %v9850_v31 = vmax.f32 %v9786_v52, 0.0  ;;  %v9785_v26 = vadd.f32 %v9721_v61, %v18971_v30  ;;  %v9724_v45 = vadd.f32 %v17883_v49, %v9653_v14  ;;  %v9652_v6 = vadd.f32 %v9365_v46, %v9122_v4  ;;  %v18975_v61 = vld [vmem:[#allocation140_spill] sm:$0xff]  ;;  %v17968_v46 = vpop.f32.mrf.mxu0 }
 0x5d8   :  { %v13898_v58 = vpop.f32.mrf.mxu1  ;;  %v9126_v14 = vadd.f32 %v17718_v59, %v18975_v61 }
 0x5d9   :  { %9914 = vst [vmem:[%s18377_s5 + $0x38] sm:$0xff] %v9850_v31  ;;  %v9849_v25 = vmax.f32 %v9785_v26, 0.0  ;;  %v9788_v18 = vadd.f32 %v9724_v45, %v18973_v20  ;;  %v9723_v1 = vadd.f32 %v17883_v49, %v9652_v6  ;;  %v9655_v17 = vadd.f32 %v13898_v58, %v9125_v43  ;;  %v18977_v6 = vld [vmem:[#allocation13_spill] sm:$0xff] }
 0x5da   :  { %v9375_v4 = vpop.f32.mrf.mxu1  ;;  %v9129_v26 = vadd.f32 %v17726_v54, %v17681_v22  ;;  %v18979_v54 = vld [vmem:[#allocation16_spill] sm:$0xff] }
 0x5db   :  { %9913 = vst [vmem:[%s18377_s5 + $0x30] sm:$0xff] %v9849_v25  ;;  %v9852_v0 = vmax.f32 %v9788_v18, 0.0  ;;  %v9787_v10 = vadd.f32 %v9723_v1, %v18974_v47  ;;  %v9726_v62 = vadd.f32 %v17883_v49, %v9655_v17  ;;  %v9654_v52 = vadd.f32 %v9375_v4, %v9124_v57  ;;  %v18978_v25 = vld [vmem:[#allocation143_spill] sm:$0xff]  ;;  %v17984_v1 = vpop.f32.mrf.mxu0 }
 0x5dc   :  { %v13901_v7 = vpop.f32.mrf.mxu1  ;;  %v9128_v20 = vadd.f32 %v17734_v37, %v18978_v25 }
 0x5dd   :  { %9916 = vst [vmem:[%s18377_s5 + $0x48] sm:$0xff] %v9852_v0  ;;  %v9851_v38 = vmax.f32 %v9787_v10, 0.0  ;;  %v9790_v43 = vadd.f32 %v9726_v62, %v18976_v55  ;;  %v9725_v31 = vadd.f32 %v17883_v49, %v9654_v52  ;;  %v9657_v30 = vadd.f32 %v13901_v7, %v9127_v24  ;;  %v18980_v10 = vld [vmem:[#allocation15_spill] sm:$0xff]  ;;  %v18000_v55 = vpop.f32.mrf.mxu0 }
 0x5de   :  { %v9385_v45 = vpop.f32.mrf.mxu1  ;;  %v9131_v0 = vadd.f32 %v17742_v33, %v17689_v21  ;;  %v18982_v33 = vld [vmem:[#allocation18_spill] sm:$0xff] }
 0x5df   :  { %9915 = vst [vmem:[%s18377_s5 + $0x40] sm:$0xff] %v9851_v38  ;;  %v9854_v59 = vmax.f32 %v9790_v43, 0.0  ;;  %v9789_v50 = vadd.f32 %v9725_v31, %v18977_v6  ;;  %v9728_v57 = vadd.f32 %v17883_v49, %v9657_v30  ;;  %v9656_v58 = vadd.f32 %v9385_v45, %v9126_v14  ;;  %v18981_v14 = vld [vmem:[#allocation75_spill] sm:$0xff] }
 0x5e0   :  { %v13904_v18 = vpop.f32.mrf.mxu1  ;;  %v9130_v7 = vadd.f32 %v17750_v56, %v18981_v14 }
 0x5e1   :  { %9918 = vst [vmem:[%s18377_s5 + $0x58] sm:$0xff] %v9854_v59  ;;  %v9853_v22 = vmax.f32 %v9789_v50, 0.0  ;;  %v9792_v17 = vadd.f32 %v9728_v57, %v18979_v54  ;;  %v9727_v24 = vadd.f32 %v17883_v49, %v9656_v58  ;;  %v9659_v4 = vadd.f32 %v13904_v18, %v9129_v26  ;;  %v18983_v59 = vld [vmem:[#allocation17_spill] sm:$0xff]  ;;  %v18984_v58 = vld [vmem:[#allocation76_spill] sm:$0xff]  ;;  %v18016_v18 = vpop.f32.mrf.mxu0 }
 0x5e2   :  { %v9395_v47 = vpop.f32.mrf.mxu1  ;;  %v9133_v26 = vadd.f32 %v17758_v40, %v17697_v32  ;;  %v9132_v25 = vadd.f32 %v17766_v51, %v18984_v58  ;;  %v18985_v40 = vld [vmem:[#allocation20_spill] sm:$0xff] }
 0x5e3   :  { %9917 = vst [vmem:[%s18377_s5 + $0x50] sm:$0xff] %v9853_v22  ;;  %v9856_v37 = vmax.f32 %v9792_v17, 0.0  ;;  %v9791_v62 = vadd.f32 %v9727_v24, %v18980_v10  ;;  %v9730_v52 = vadd.f32 %v17883_v49, %v9659_v4  ;;  %v9658_v61 = vadd.f32 %v9395_v47, %v9128_v20 }
 0x5e4   :  { %v13907_v38 = vpop.f32.mrf.mxu1  ;;  %v9135_v24 = vadd.f32 %v17774_v12, %v17705_v39  ;;  %v18989_v12 = vld [vmem:[#allocation22_spill] sm:$0xff] }
 0x5e5   :  { %9920 = vst [vmem:[%s18377_s5 + $0x68] sm:$0xff] %v9856_v37  ;;  %v9855_v21 = vmax.f32 %v9791_v62, 0.0  ;;  %v9794_v43 = vadd.f32 %v9730_v52, %v18982_v33  ;;  %v9729_v31 = vadd.f32 %v17883_v49, %v9658_v61  ;;  %v9661_v30 = vadd.f32 %v13907_v38, %v9131_v0  ;;  %v18986_v0 = vld [vmem:[#allocation19_spill] sm:$0xff]  ;;  %v18987_v62 = vld [vmem:[#allocation142_spill] sm:$0xff]  ;;  %v18988_v52 = vld [vmem:[#allocation112_spill] sm:$0xff] }
 0x5e6   :  { %v9405_v45 = vpop.f32.mrf.mxu1  ;;  %v9134_v61 = vadd.f32 %v18988_v52, %v18987_v62 }
 0x5e7   :  { %9919 = vst [vmem:[%s18377_s5 + $0x60] sm:$0xff] %v9855_v21  ;;  %v9858_v56 = vmax.f32 %v9794_v43, 0.0  ;;  %v9793_v6 = vadd.f32 %v9729_v31, %v18983_v59  ;;  %v9732_v50 = vadd.f32 %v17883_v49, %v9661_v30  ;;  %v9660_v57 = vadd.f32 %v9405_v45, %v9130_v7  ;;  %v18032_v7 = vpop.f32.mrf.mxu0  ;;  %v18990_v43 = vld [vmem:[#allocation145_spill] sm:$0xff] }
 0x5e8   :  { %v13910_v20 = vpop.f32.mrf.mxu1  ;;  %v9137_v31 = vadd.f32 %v17790_v15, %v18990_v43  ;;  %v18991_v45 = vld [vmem:[#allocation21_spill] sm:$0xff] }
 0x5e9   :  { %9922 = vst [vmem:[%s18377_s5 + $0x78] sm:$0xff] %v9858_v56  ;;  %v9857_v32 = vmax.f32 %v9793_v6, 0.0  ;;  %v9796_v22 = vadd.f32 %v9732_v50, %v18985_v40  ;;  %v9731_v54 = vadd.f32 %v17883_v49, %v9660_v57  ;;  %v9663_v17 = vadd.f32 %v13910_v20, %v9133_v26  ;;  %v18992_v50 = vld [vmem:[#allocation77_spill] sm:$0xff]  ;;  %v18993_v20 = vld [vmem:[#allocation24_spill] sm:$0xff] }
 0x5ea   :  { %v9415_v4 = vpop.f32.mrf.mxu1  ;;  %v9136_v57 = vadd.f32 %v17798_v29, %v18992_v50  ;;  %v18999_v43 = vld [vmem:[#allocation25_spill] sm:$0xff]  ;;  %v19001_v50 = vld [vmem:[#allocation28_spill] sm:$0xff] }
 0x5eb   :  { %9921 = vst [vmem:[%s18377_s5 + $0x70] sm:$0xff] %v9857_v32  ;;  %v9860_v51 = vmax.f32 %v9796_v22, 0.0  ;;  %v9795_v47 = vadd.f32 %v9731_v54, %v18986_v0  ;;  %v9734_v37 = vadd.f32 %v17883_v49, %v9663_v17  ;;  %v9662_v10 = vadd.f32 %v9415_v4, %v9132_v25  ;;  %v18048_v25 = vpop.f32.mrf.mxu0  ;;  %v18994_v54 = vld [vmem:[#allocation110_spill] sm:$0xff]  ;;  %v18995_v4 = vld [vmem:[#allocation23_spill] sm:$0xff] }
 0x5ec   :  { %v13913_v14 = vpop.f32.mrf.mxu1  ;;  %v9139_v17 = vadd.f32 %v17806_v19, %v18994_v54 }
 0x5ed   :  { %9924 = vst [vmem:[%s18377_s5 + $0x88] sm:$0xff] %v9860_v51  ;;  %v9859_v39 = vmax.f32 %v9795_v47, 0.0  ;;  %v9798_v38 = vadd.f32 %v9734_v37, %v18989_v12  ;;  %v9733_v21 = vadd.f32 %v17883_v49, %v9662_v10  ;;  %v9665_v33 = vadd.f32 %v13913_v14, %v9135_v24  ;;  %v18996_v37 = vld [vmem:[#allocation144_spill] sm:$0xff]  ;;  %v18064_v52 = vpop.f32.mrf.mxu0 }
 0x5ee   :  { %v9425_v30 = vpop.f32.mrf.mxu1  ;;  %v9138_v10 = vadd.f32 %v17814_v11, %v18996_v37 }
 0x5ef   :  { %9923 = vst [vmem:[%s18377_s5 + $0x80] sm:$0xff] %v9859_v39  ;;  %v9862_v26 = vmax.f32 %v9798_v38, 0.0  ;;  %v9797_v56 = vadd.f32 %v9733_v21, %v18991_v45  ;;  %v9736_v59 = vadd.f32 %v17883_v49, %v9665_v33  ;;  %v9664_v6 = vadd.f32 %v9425_v30, %v9134_v61  ;;  %v18997_v61 = vld [vmem:[#allocation26_spill] sm:$0xff]  ;;  %v18998_v38 = vld [vmem:[#allocation147_spill] sm:$0xff] }
 0x5f0   :  { %v13916_v58 = vpop.f32.mrf.mxu1  ;;  %v9141_v21 = vadd.f32 %v17822_v8, %v18998_v38  ;;  %v19000_v45 = vld [vmem:[#allocation78_spill] sm:$0xff] }
 0x5f1   :  { %9926 = vst [vmem:[%s18377_s5 + $0x98] sm:$0xff] %v9862_v26  ;;  %v9861_v15 = vmax.f32 %v9797_v56, 0.0  ;;  %v9800_v32 = vadd.f32 %v9736_v59, %v18993_v20  ;;  %v9735_v40 = vadd.f32 %v17883_v49, %v9664_v6  ;;  %v9667_v22 = vadd.f32 %v13916_v58, %v9137_v31  ;;  %v18080_v6 = vpop.f32.mrf.mxu0  ;;  %v19002_v20 = vld [vmem:[#allocation79_spill] sm:$0xff] }
 0x5f2   :  { %v9435_v24 = vpop.f32.mrf.mxu1  ;;  %v9140_v56 = vadd.f32 %v17830_v60, %v19000_v45 }
 0x5f3   :  { %9925 = vst [vmem:[%s18377_s5 + $0x90] sm:$0xff] %v9861_v15  ;;  %v9864_v29 = vmax.f32 %v9800_v32, 0.0  ;;  %v9799_v51 = vadd.f32 %v9735_v40, %v18995_v4  ;;  %v9738_v0 = vadd.f32 %v17883_v49, %v9667_v22  ;;  %v9666_v47 = vadd.f32 %v9435_v24, %v9136_v57  ;;  %v19003_v22 = vld [vmem:[#allocation27_spill] sm:$0xff] }
 0x5f4   :  { %v13919_v62 = vpop.f32.mrf.mxu1  ;;  %v9143_v32 = vadd.f32 %v17838_v63, %v19002_v20 }
 0x5f5   :  { %9928 = vst [vmem:[%s18377_s5 + $0xa8] sm:$0xff] %v9864_v29  ;;  %v9863_v19 = vmax.f32 %v9799_v51, 0.0  ;;  %v9802_v14 = vadd.f32 %v9738_v0, %v18997_v61  ;;  %v9737_v39 = vadd.f32 %v17883_v49, %v9666_v47  ;;  %v9669_v12 = vadd.f32 %v13919_v62, %v9139_v17  ;;  %v19004_v29 = vld [vmem:[#allocation146_spill] sm:$0xff]  ;;  %v18096_v0 = vpop.f32.mrf.mxu0 }
 0x5f6   :  { %v9445_v33 = vpop.f32.mrf.mxu1  ;;  %v9142_v4 = vadd.f32 %v17846_v2, %v19004_v29  ;;  %v19005_v47 = vld [vmem:[#allocation30_spill] sm:$0xff] }
 0x5f7   :  { %9927 = vst [vmem:[%s18377_s5 + $0xa0] sm:$0xff] %v9863_v19  ;;  %v9866_v11 = vmax.f32 %v9802_v14, 0.0  ;;  %v9801_v31 = vadd.f32 %v9737_v39, %v18999_v43  ;;  %v9740_v30 = vadd.f32 %v17883_v49, %v9669_v12  ;;  %v9668_v26 = vadd.f32 %v9445_v33, %v9138_v10  ;;  %v19006_v19 = vld [vmem:[#allocation149_spill] sm:$0xff]  ;;  %v19008_v33 = vld [vmem:[#allocation80_spill] sm:$0xff] }
 0x5f8   :  { %v13922_v59 = vpop.f32.mrf.mxu1  ;;  %v9145_v61 = vadd.f32 %v17854_v5, %v19006_v19  ;;  %v19007_v39 = vld [vmem:[#allocation29_spill] sm:$0xff]  ;;  %v19016_v19 = vld [vmem:[#allocation82_spill] sm:$0xff] }
 0x5f9   :  { %9930 = vst [vmem:[%s18377_s5 + $0xb8] sm:$0xff] %v9866_v11  ;;  %v9865_v8 = vmax.f32 %v9801_v31, 0.0  ;;  %v9804_v57 = vadd.f32 %v9740_v30, %v19001_v50  ;;  %v9739_v58 = vadd.f32 %v17883_v49, %v9668_v26  ;;  %v9671_v15 = vadd.f32 %v13922_v59, %v9141_v21  ;;  %v18112_v31 = vpop.f32.mrf.mxu0  ;;  %v19009_v30 = vld [vmem:[#allocation32_spill] sm:$0xff]  ;;  %v19010_v59 = vld [vmem:[#allocation81_spill] sm:$0xff] }
 0x5fa   :  { %v9455_v40 = vpop.f32.mrf.mxu1  ;;  %v9144_v11 = vadd.f32 %v17862_v36, %v19008_v33  ;;  %v19018_v33 = vld [vmem:[#allocation111_spill] sm:$0xff] }
 0x5fb   :  { %9929 = vst [vmem:[%s18377_s5 + $0xb0] sm:$0xff] %v9865_v8  ;;  %v9868_v60 = vmax.f32 %v9804_v57, 0.0  ;;  %v9803_v54 = vadd.f32 %v9739_v58, %v19003_v22  ;;  %v9742_v17 = vadd.f32 %v17883_v49, %v9671_v15  ;;  %v9670_v24 = vadd.f32 %v9455_v40, %v9140_v56  ;;  %v19011_v57 = vld [vmem:[#allocation31_spill] sm:$0xff]  ;;  %v18128_v22 = vpop.f32.mrf.mxu0 }
 0x5fc   :  { %v13925_v51 = vpop.f32.mrf.mxu1  ;;  %v9147_v8 = vadd.f32 %v17870_v35, %v19010_v59 }
 0x5fd   :  { %9932 = vst [vmem:[%s18377_s5 + $0xc8] sm:$0xff] %v9868_v60  ;;  %v9867_v63 = vmax.f32 %v9803_v54, 0.0  ;;  %v9806_v37 = vadd.f32 %v9742_v17, %v19005_v47  ;;  %v9741_v10 = vadd.f32 %v17883_v49, %v9670_v24  ;;  %v9673_v62 = vadd.f32 %v13925_v51, %v9143_v32  ;;  %v19012_v32 = vld [vmem:[#allocation148_spill] sm:$0xff]  ;;  %v19013_v54 = vld [vmem:[#allocation69_spill] sm:$0xff] }
 0x5fe   :  { %v9465_v14 = vpop.f32.mrf.mxu1  ;;  %v9146_v40 = vadd.f32 %v17887_v28, %v19012_v32  ;;  %v19015_v47 = vld [vmem:[#allocation68_spill] sm:$0xff] }
 0x5ff   :  { %9931 = vst [vmem:[%s18377_s5 + $0xc0] sm:$0xff] %v9867_v63  ;;  %v9870_v2 = vmax.f32 %v9806_v37, 0.0  ;;  %v9805_v12 = vadd.f32 %v9741_v10, %v19007_v39  ;;  %v9744_v38 = vadd.f32 %v17883_v49, %v9673_v62  ;;  %v9672_v21 = vadd.f32 %v9465_v14, %v9142_v4  ;;  %v19014_v4 = vld [vmem:[#allocation151_spill] sm:$0xff]  ;;  %v19017_v39 = vld [vmem:[#allocation34_spill] sm:$0xff] }
 0x600   :  { %v13928_v43 = vpop.f32.mrf.mxu1  ;;  %v9149_v51 = vadd.f32 %v17892_v53, %v19014_v4 }
 0x601   :  { %9934 = vst [vmem:[%s18377_s5 + $0xd8] sm:$0xff] %v9870_v2  ;;  %v9869_v5 = vmax.f32 %v9805_v12, 0.0  ;;  %v9808_v26 = vadd.f32 %v9744_v38, %v19009_v30  ;;  %v9743_v45 = vadd.f32 %v17883_v49, %v9672_v21  ;;  %v9675_v56 = vadd.f32 %v13928_v43, %v9145_v61  ;;  %v18144_v2 = vpop.f32.mrf.mxu0 }
 0x602   :  { %v9475_v50 = vpop.f32.mrf.mxu1  ;;  %v9148_v61 = vadd.f32 %v17904_v3, %v19016_v19 }
 0x603   :  { %9933 = vst [vmem:[%s18377_s5 + $0xd0] sm:$0xff] %v9869_v5  ;;  %v9872_v36 = vmax.f32 %v9808_v26, 0.0  ;;  %v9807_v58 = vadd.f32 %v9743_v45, %v19011_v57  ;;  %v9746_v15 = vadd.f32 %v17883_v49, %v9675_v56  ;;  %v9674_v20 = vadd.f32 %v9475_v50, %v9144_v11  ;;  %v19019_v5 = vld [vmem:[#allocation33_spill] sm:$0xff]  ;;  %v19020_v56 = vld [vmem:[#allocation150_spill] sm:$0xff]  ;;  %v18160_v50 = vpop.f32.mrf.mxu0 }
 0x604   :  { %v13931_v60 = vpop.f32.mrf.mxu1  ;;  %v9151_v11 = vadd.f32 %v17920_v42, %v19018_v33  ;;  %v9150_v59 = vadd.f32 %v17936_v13, %v19020_v56  ;;  %v19031_v56 = vld [vmem:[#allocation39_spill] sm:$0xff] }
 0x605   :  { %9936 = vst [vmem:[%s18377_s5 + $0xe8] sm:$0xff] %v9872_v36  ;;  %v9871_v35 = vmax.f32 %v9807_v58, 0.0  ;;  %v9810_v17 = vadd.f32 %v9746_v15, %v19013_v54  ;;  %v9745_v24 = vadd.f32 %v17883_v49, %v9674_v20  ;;  %v9677_v29 = vadd.f32 %v13931_v60, %v9147_v8  ;;  %v19021_v36 = vld [vmem:[#allocation36_spill] sm:$0xff]  ;;  %v19022_v20 = vld [vmem:[#allocation153_spill] sm:$0xff]  ;;  %v19023_v60 = vld [vmem:[#allocation35_spill] sm:$0xff] }
 0x606   :  { %v9485_v63 = vpop.f32.mrf.mxu1  ;;  %v9153_v32 = vadd.f32 %v17952_v23, %v19022_v20  ;;  %v19033_v20 = vld [vmem:[#allocation42_spill] sm:$0xff] }
 0x607   :  { %9935 = vst [vmem:[%s18377_s5 + $0xe0] sm:$0xff] %v9871_v35  ;;  %v9874_v28 = vmax.f32 %v9810_v17, 0.0  ;;  %v9809_v37 = vadd.f32 %v9745_v24, %v19015_v47  ;;  %v9748_v10 = vadd.f32 %v17883_v49, %v9677_v29  ;;  %v9676_v62 = vadd.f32 %v9485_v63, %v9146_v40  ;;  %v19024_v24 = vld [vmem:[#allocation83_spill] sm:$0xff]  ;;  %v19025_v63 = vld [vmem:[#allocation38_spill] sm:$0xff] }
 0x608   :  { %v13934_v14 = vpop.f32.mrf.mxu1  ;;  %v9152_v29 = vadd.f32 %v17968_v46, %v19024_v24 }
 0x609   :  { %9938 = vst [vmem:[%s18377_s5 + $0xf8] sm:$0xff] %v9874_v28  ;;  %v9873_v53 = vmax.f32 %v9809_v37, 0.0  ;;  %v9812_v12 = vadd.f32 %v9748_v10, %v19017_v39  ;;  %v9747_v38 = vadd.f32 %v17883_v49, %v9676_v62  ;;  %v9679_v21 = vadd.f32 %v13934_v14, %v9149_v51  ;;  %v18176_v51 = vpop.f32.mrf.mxu0  ;;  %v19026_v10 = vld [vmem:[#allocation152_spill] sm:$0xff] }
 0x60a   :  { %v9495_v43 = vpop.f32.mrf.mxu1  ;;  %v9155_v62 = vadd.f32 %v17984_v1, %v19026_v10 }
 0x60b   :  { %9937 = vst [vmem:[%s18377_s5 + $0xf0] sm:$0xff] %v9873_v53  ;;  %v9876_v3 = vmax.f32 %v9812_v12, 0.0  ;;  %v9811_v30 = vadd.f32 %v9747_v38, %v19019_v5  ;;  %v9750_v26 = vadd.f32 %v17883_v49, %v9679_v21  ;;  %v9678_v45 = vadd.f32 %v9495_v43, %v9148_v61  ;;  %v19027_v61 = vld [vmem:[#allocation37_spill] sm:$0xff]  ;;  %v19028_v12 = vld [vmem:[#allocation155_spill] sm:$0xff]  ;;  %v18192_v33 = vpop.f32.mrf.mxu0 }
 0x60c   :  { %v13937_v8 = vpop.f32.mrf.mxu1  ;;  %v9154_v38 = vadd.f32 %v18000_v55, %v19028_v12  ;;  %v19039_v12 = vld [vmem:[#allocation89_spill] sm:$0xff] }
 0x60d   :  { %9940 = vst [vmem:[%s18377_s5 + $0x108] sm:$0xff] %v9876_v3  ;;  %v9875_v42 = vmax.f32 %v9811_v30, 0.0  ;;  %v9814_v57 = vadd.f32 %v9750_v26, %v19021_v36  ;;  %v9749_v58 = vadd.f32 %v17883_v49, %v9678_v45  ;;  %v9681_v15 = vadd.f32 %v13937_v8, %v9151_v11  ;;  %v19029_v11 = vld [vmem:[#allocation40_spill] sm:$0xff]  ;;  %v19030_v30 = vld [vmem:[#allocation154_spill] sm:$0xff] }
 0x60e   :  { %v9505_v40 = vpop.f32.mrf.mxu1  ;;  %v9157_v26 = vadd.f32 %v18016_v18, %v19030_v30  ;;  %v19032_v36 = vld [vmem:[#allocation84_spill] sm:$0xff]  ;;  %v9163_v30 = vadd.f32 %v18112_v31, %v17817_v9 }
 0x60f   :  { %9939 = vst [vmem:[%s18377_s5 + $0x100] sm:$0xff] %v9875_v42  ;;  %v9878_v13 = vmax.f32 %v9814_v57, 0.0  ;;  %v9813_v35 = vadd.f32 %v9749_v58, %v19023_v60  ;;  %v9752_v54 = vadd.f32 %v17883_v49, %v9681_v15  ;;  %v9680_v17 = vadd.f32 %v9505_v40, %v9150_v59  ;;  %v18208_v15 = vpop.f32.mrf.mxu0  ;;  %v19043_v31 = vld [vmem:[#allocation48_spill] sm:$0xff] }
 0x610   :  { %v13940_v4 = vpop.f32.mrf.mxu1  ;;  %v9156_v57 = vadd.f32 %v18032_v7, %v19032_v36  ;;  %v9159_v60 = vadd.f32 %v18048_v25, %v17801_v44  ;;  %v19036_v25 = vld [vmem:[#allocation44_spill] sm:$0xff] }
 0x611   :  { %9942 = vst [vmem:[%s18377_s5 + $0x118] sm:$0xff] %v9878_v13  ;;  %v9877_v23 = vmax.f32 %v9813_v35, 0.0  ;;  %v9816_v28 = vadd.f32 %v9752_v54, %v19025_v63  ;;  %v9751_v47 = vadd.f32 %v17883_v49, %v9680_v17  ;;  %v9683_v37 = vadd.f32 %v13940_v4, %v9153_v32  ;;  %v19034_v54 = vld [vmem:[#allocation41_spill] sm:$0xff] }
 0x612   :  { %v9515_v19 = vpop.f32.mrf.mxu1  ;;  %v19035_v4 = vld [vmem:[#allocation85_spill] sm:$0xff] }
 0x613   :  { %9941 = vst [vmem:[%s18377_s5 + $0x110] sm:$0xff] %v9877_v23  ;;  %v9880_v46 = vmax.f32 %v9816_v28, 0.0  ;;  %v9815_v14 = vadd.f32 %v9751_v47, %v19027_v61  ;;  %v9754_v53 = vadd.f32 %v17883_v49, %v9683_v37  ;;  %v9682_v39 = vadd.f32 %v9515_v19, %v9152_v29  ;;  %v18224_v28 = vpop.f32.mrf.mxu0  ;;  %v19038_v61 = vld [vmem:[#allocation43_spill] sm:$0xff] }
 0x614   :  { %v13943_v21 = vpop.f32.mrf.mxu1  ;;  %v9158_v23 = vadd.f32 %v18064_v52, %v19035_v4 }
 0x615   :  { %9944 = vst [vmem:[%s18377_s5 + $0x128] sm:$0xff] %v9880_v46  ;;  %v9879_v1 = vmax.f32 %v9815_v14, 0.0  ;;  %v9818_v43 = vadd.f32 %v9754_v53, %v19029_v11  ;;  %v9753_v3 = vadd.f32 %v17883_v49, %v9682_v39  ;;  %v9685_v5 = vadd.f32 %v13943_v21, %v9155_v62  ;;  %v19037_v62 = vld [vmem:[#allocation88_spill] sm:$0xff]  ;;  %v19040_v11 = vld [vmem:[#allocation46_spill] sm:$0xff] }
 0x616   :  { %v9525_v45 = vpop.f32.mrf.mxu1  ;;  %v9161_v19 = vadd.f32 %v18080_v6, %v19037_v62 }
 0x617   :  { %9943 = vst [vmem:[%s18377_s5 + $0x120] sm:$0xff] %v9879_v1  ;;  %v9882_v55 = vmax.f32 %v9818_v43, 0.0  ;;  %v9817_v59 = vadd.f32 %v9753_v3, %v19031_v56  ;;  %v9756_v8 = vadd.f32 %v17883_v49, %v9685_v5  ;;  %v9684_v42 = vadd.f32 %v9525_v45, %v9154_v38  ;;  %v18240_v1 = vpop.f32.mrf.mxu0  ;;  %v19041_v45 = vld [vmem:[#allocation45_spill] sm:$0xff] }
 0x618   :  { %v13946_v58 = vpop.f32.mrf.mxu1  ;;  %v9160_v38 = vadd.f32 %v18096_v0, %v19039_v12  ;;  %v9169_v12 = vadd.f32 %v18208_v15, %v17841_v16  ;;  %v19052_v15 = vld [vmem:[#allocation54_spill] sm:$0xff] }
 0x619   :  { %9946 = vst [vmem:[%s18377_s5 + $0x138] sm:$0xff] %v9882_v55  ;;  %v9881_v18 = vmax.f32 %v9817_v59, 0.0  ;;  %v9820_v32 = vadd.f32 %v9756_v8, %v19033_v20  ;;  %v9755_v40 = vadd.f32 %v17883_v49, %v9684_v42  ;;  %v9687_v13 = vadd.f32 %v13946_v58, %v9157_v26  ;;  %v19042_v8 = vld [vmem:[#allocation115_spill] sm:$0xff] }
 0x61a   :  { %v9535_v35 = vpop.f32.mrf.mxu1  ;;  %v9162_v42 = vadd.f32 %v18128_v22, %v19042_v8  ;;  %v19053_v8 = vld [vmem:[#allocation53_spill] sm:$0xff] }
 0x61b   :  { %9945 = vst [vmem:[%s18377_s5 + $0x130] sm:$0xff] %v9881_v18  ;;  %v9884_v7 = vmax.f32 %v9820_v32, 0.0  ;;  %v9819_v17 = vadd.f32 %v9755_v40, %v19034_v54  ;;  %v9758_v24 = vadd.f32 %v17883_v49, %v9687_v13  ;;  %v9686_v29 = vadd.f32 %v9535_v35, %v9156_v57  ;;  %v9075_v57 = vpop.f32.mrf.mxu0  ;;  %v19044_v13 = vld [vmem:[#allocation47_spill] sm:$0xff]  ;;  %v19045_v54 = vld [vmem:[#allocation113_spill] sm:$0xff] }
 0x61c   :  { %v13949_v63 = vpop.f32.mrf.mxu1  ;;  %v9165_v32 = vadd.f32 %v18144_v2, %v17825_v41  ;;  %v19046_v2 = vld [vmem:[#allocation50_spill] sm:$0xff] }
 0x61d   :  { %9948 = vst [vmem:[%s18377_s5 + $0x148] sm:$0xff] %v9884_v7  ;;  %v9883_v44 = vmax.f32 %v9819_v17, 0.0  ;;  %v9822_v47 = vadd.f32 %v9758_v24, %v19036_v25  ;;  %v9757_v37 = vadd.f32 %v17883_v49, %v9686_v29  ;;  %v9689_v10 = vadd.f32 %v13949_v63, %v9159_v60  ;;  %v13842_v29 = vpop.f32.mrf.mxu0 }
 0x61e   :  { %v9545_v46 = vpop.f32.mrf.mxu1  ;;  %v9164_v17 = vadd.f32 %v18160_v50, %v19045_v54 }
 0x61f   :  { %9947 = vst [vmem:[%s18377_s5 + $0x140] sm:$0xff] %v9883_v44  ;;  %v9886_v52 = vmax.f32 %v9822_v47, 0.0  ;;  %v9821_v14 = vadd.f32 %v9757_v37, %v19038_v61  ;;  %v9760_v53 = vadd.f32 %v17883_v49, %v9689_v10  ;;  %v9688_v39 = vadd.f32 %v9545_v46, %v9158_v23  ;;  %v19047_v47 = vld [vmem:[#allocation49_spill] sm:$0xff]  ;;  %v9085_v61 = vpop.f32.mrf.mxu0 }
 0x620   :  { %v13952_v21 = vpop.f32.mrf.mxu1  ;;  %v9167_v44 = vadd.f32 %v18176_v51, %v17833_v48  ;;  %v19049_v51 = vld [vmem:[#allocation52_spill] sm:$0xff] }
 0x621   :  { %9950 = vst [vmem:[%s18377_s5 + $0x158] sm:$0xff] %v9886_v52  ;;  %v9885_v6 = vmax.f32 %v9821_v14, 0.0  ;;  %v9824_v43 = vadd.f32 %v9760_v53, %v19040_v11  ;;  %v9759_v3 = vadd.f32 %v17883_v49, %v9688_v39  ;;  %v9691_v5 = vadd.f32 %v13952_v21, %v9161_v19  ;;  %v19048_v19 = vld [vmem:[#allocation90_spill] sm:$0xff]  ;;  %v19050_v21 = vld [vmem:[#allocation51_spill] sm:$0xff] }
 0x622   :  { %v9555_v26 = vpop.f32.mrf.mxu1  ;;  %v9166_v46 = vadd.f32 %v18192_v33, %v19048_v19 }
 0x623   :  { %9949 = vst [vmem:[%s18377_s5 + $0x150] sm:$0xff] %v9885_v6  ;;  %v9888_v0 = vmax.f32 %v9824_v43, 0.0  ;;  %v9823_v55 = vadd.f32 %v9759_v3, %v19041_v45  ;;  %v9762_v56 = vadd.f32 %v17883_v49, %v9691_v5  ;;  %v9690_v59 = vadd.f32 %v9555_v26, %v9160_v38  ;;  %v19051_v3 = vld [vmem:[#allocation91_spill] sm:$0xff]  ;;  %v13845_v26 = vpop.f32.mrf.mxu0 }
 0x624   :  { %v13955_v36 = vpop.f32.mrf.mxu1  ;;  %v9168_v5 = vadd.f32 %v18224_v28, %v19051_v3 }
 0x625   :  { %9952 = vst [vmem:[%s18377_s5 + $0x168] sm:$0xff] %v9888_v0  ;;  %v9887_v9 = vmax.f32 %v9823_v55, 0.0  ;;  %v9826_v58 = vadd.f32 %v9762_v56, %v19043_v31  ;;  %v9761_v18 = vadd.f32 %v17883_v49, %v9690_v59  ;;  %v9693_v20 = vadd.f32 %v13955_v36, %v9163_v30  ;;  %v19054_v31 = vld [vmem:[#allocation114_spill] sm:$0xff] }
 0x626   :  { %v9565_v40 = vpop.f32.mrf.mxu1  ;;  %v9171_v56 = vadd.f32 %v18240_v1, %v17849_v34  ;;  %v19055_v1 = vld [vmem:[#allocation58_spill] sm:$0xff] }
 0x627   :  { %9951 = vst [vmem:[%s18377_s5 + $0x160] sm:$0xff] %v9887_v9  ;;  %v9890_v22 = vmax.f32 %v9826_v58, 0.0  ;;  %v9825_v60 = vadd.f32 %v9761_v18, %v19044_v13  ;;  %v9764_v35 = vadd.f32 %v17883_v49, %v9693_v20  ;;  %v9692_v7 = vadd.f32 %v9565_v40, %v9162_v42  ;;  %v9095_v20 = vpop.f32.mrf.mxu0 }
 0x628   :  { %v13958_v24 = vpop.f32.mrf.mxu1  ;;  %v9170_v58 = vadd.f32 %v9075_v57, %v19054_v31  ;;  %v9173_v13 = vadd.f32 %v13842_v29, %v17857_v27  ;;  %v19058_v29 = vld [vmem:[#allocation60_spill] sm:$0xff] }
 0x629   :  { %9954 = vst [vmem:[%s18377_s5 + $0x178] sm:$0xff] %v9890_v22  ;;  %v9889_v41 = vmax.f32 %v9825_v60, 0.0  ;;  %v9828_v4 = vadd.f32 %v9764_v35, %v19046_v2  ;;  %v9763_v23 = vadd.f32 %v17883_v49, %v9692_v7  ;;  %v9695_v63 = vadd.f32 %v13958_v24, %v9165_v32  ;;  %v19056_v35 = vld [vmem:[#allocation56_spill] sm:$0xff]  ;;  %v19057_v24 = vld [vmem:[#allocation117_spill] sm:$0xff] }
 0x62a   :  { %v9575_v25 = vpop.f32.mrf.mxu1 }
 0x62b   :  { %9953 = vst [vmem:[%s18377_s5 + $0x170] sm:$0xff] %v9889_v41  ;;  %v9892_v50 = vmax.f32 %v9828_v4, 0.0  ;;  %v9827_v37 = vadd.f32 %v9763_v23, %v19047_v47  ;;  %v9766_v10 = vadd.f32 %v17883_v49, %v9695_v63  ;;  %v9694_v62 = vadd.f32 %v9575_v25, %v9164_v17  ;;  %v13848_v4 = vpop.f32.mrf.mxu0  ;;  %v19059_v25 = vld [vmem:[#allocation92_spill] sm:$0xff] }
 0x62c   :  { %v13961_v52 = vpop.f32.mrf.mxu1  ;;  %v9172_v41 = vadd.f32 %v9085_v61, %v19057_v24 }
 0x62d   :  { %9956 = vst [vmem:[%s18377_s5 + $0x188] sm:$0xff] %v9892_v50  ;;  %v9891_v48 = vmax.f32 %v9827_v37, 0.0  ;;  %v9830_v14 = vadd.f32 %v9766_v10, %v19049_v51  ;;  %v9765_v53 = vadd.f32 %v17883_v49, %v9694_v62  ;;  %v9697_v39 = vadd.f32 %v13961_v52, %v9167_v44  ;;  %v19060_v10 = vld [vmem:[#allocation59_spill] sm:$0xff]  ;;  %v19061_v52 = vld [vmem:[#allocation93_spill] sm:$0xff]  ;;  %v9105_v51 = vpop.f32.mrf.mxu0 }
 0x62e   :  { %v9585_v38 = vpop.f32.mrf.mxu1  ;;  %v9175_v50 = vadd.f32 %v13845_v26, %v19059_v25  ;;  %v9174_v61 = vadd.f32 %v9095_v20, %v19061_v52  ;;  %v19065_v26 = vld [vmem:[#allocation94_spill] sm:$0xff] }
 0x62f   :  { %9955 = vst [vmem:[%s18377_s5 + $0x180] sm:$0xff] %v9891_v48  ;;  %v9894_v33 = vmax.f32 %v9830_v14, 0.0  ;;  %v9829_v6 = vadd.f32 %v9765_v53, %v19050_v21  ;;  %v9768_v11 = vadd.f32 %v17883_v49, %v9697_v39  ;;  %v9696_v43 = vadd.f32 %v9585_v38, %v9166_v46  ;;  %v19062_v53 = vld [vmem:[#allocation64_spill] sm:$0xff] }
 0x630   :  { %v13964_v30 = vpop.f32.mrf.mxu1 }
 0x631   :  { %9958 = vst [vmem:[%s18377_s5 + $0x198] sm:$0xff] %v9894_v33  ;;  %v9893_v16 = vmax.f32 %v9829_v6, 0.0  ;;  %v9832_v0 = vadd.f32 %v9768_v11, %v19052_v15  ;;  %v9767_v45 = vadd.f32 %v17883_v49, %v9696_v43  ;;  %v9699_v55 = vadd.f32 %v13964_v30, %v9169_v12  ;;  %v19063_v33 = vld [vmem:[#allocation116_spill] sm:$0xff]  ;;  %v19064_v43 = vld [vmem:[#allocation63_spill] sm:$0xff] }
 0x632   :  { %v9595_v59 = vpop.f32.mrf.mxu1  ;;  %v9177_v21 = vadd.f32 %v13848_v4, %v19063_v33 }
 0x633   :  { %9957 = vst [vmem:[%s18377_s5 + $0x190] sm:$0xff] %v9893_v16  ;;  %v9896_v28 = vmax.f32 %v9832_v0, 0.0  ;;  %v9831_v42 = vadd.f32 %v9767_v45, %v19053_v8  ;;  %v9770_v36 = vadd.f32 %v17883_v49, %v9699_v55  ;;  %v9698_v9 = vadd.f32 %v9595_v59, %v9168_v5  ;;  %v19066_v45 = vld [vmem:[#allocation66_spill] sm:$0xff] }
 0x634   :  { %v13967_v18 = vpop.f32.mrf.mxu1  ;;  %v9176_v16 = vadd.f32 %v9105_v51, %v19065_v26 }
 0x635   :  { %9960 = vst [vmem:[%s18377_s5 + $0x1a8] sm:$0xff] %v9896_v28  ;;  %v9895_v34 = vmax.f32 %v9831_v42, 0.0  ;;  %v9834_v32 = vadd.f32 %v9770_v36, %v19055_v1  ;;  %v9769_v40 = vadd.f32 %v17883_v49, %v9698_v9  ;;  %v9701_v22 = vadd.f32 %v13967_v18, %v9171_v56  ;;  %v19067_v42 = vld [vmem:[#allocation65_spill] sm:$0xff]  ;;  %v19068_v18 = vld [vmem:[#allocation72_spill] sm:$0xff] }
 0x636   :  { %v9605_v60 = vpop.f32.mrf.mxu1 }
 0x637   :  { %9959 = vst [vmem:[%s18377_s5 + $0x1a0] sm:$0xff] %v9895_v34  ;;  %v9898_v57 = vmax.f32 %v9834_v32, 0.0  ;;  %v9833_v7 = vadd.f32 %v9769_v40, %v19056_v35  ;;  %v9772_v54 = vadd.f32 %v17883_v49, %v9701_v22  ;;  %v9700_v17 = vadd.f32 %v9605_v60, %v9170_v58  ;;  %v19069_v32 = vld [vmem:[#allocation71_spill] sm:$0xff] }
 0x638   :  { %v13970_v2 = vpop.f32.mrf.mxu1 }
 0x639   :  { %9962 = vst [vmem:[%s18377_s5 + $0x1b8] sm:$0xff] %v9898_v57  ;;  %v9897_v27 = vmax.f32 %v9833_v7, 0.0  ;;  %v9836_v23 = vadd.f32 %v9772_v54, %v19058_v29  ;;  %v9771_v63 = vadd.f32 %v17883_v49, %v9700_v17  ;;  %v9703_v44 = vadd.f32 %v13970_v2, %v9173_v13 }
 0x63a   :  { %v9615_v47 = vpop.f32.mrf.mxu1 }
 0x63b   :  { %9961 = vst [vmem:[%s18377_s5 + $0x1b0] sm:$0xff] %v9897_v27  ;;  %v9900_v37 = vmax.f32 %v9836_v23, 0.0  ;;  %v9835_v62 = vadd.f32 %v9771_v63, %v19060_v10  ;;  %v9774_v19 = vadd.f32 %v17883_v49, %v9703_v44  ;;  %v9702_v46 = vadd.f32 %v9615_v47, %v9172_v41 }
 0x63c   :  { %v13973_v48 = vpop.f32.mrf.mxu1 }
 0x63d   :  { %9964 = vst [vmem:[%s18377_s5 + $0x1c8] sm:$0xff] %v9900_v37  ;;  %v9899_v14 = vmax.f32 %v9835_v62, 0.0  ;;  %v9838_v39 = vadd.f32 %v9774_v19, %v19062_v53  ;;  %v9773_v12 = vadd.f32 %v17883_v49, %v9702_v46  ;;  %v9705_v38 = vadd.f32 %v13973_v48, %v9175_v50 }
 0x63e   :  { %v9625_v6 = vpop.f32.mrf.mxu1 }
 0x63f   :  { %9963 = vst [vmem:[%s18377_s5 + $0x1c0] sm:$0xff] %v9899_v14  ;;  %v9902_v11 = vmax.f32 %v9838_v39, 0.0  ;;  %v9837_v3 = vadd.f32 %v9773_v12, %v19064_v43  ;;  %v9776_v5 = vadd.f32 %v17883_v49, %v9705_v38  ;;  %v9704_v30 = vadd.f32 %v9625_v6, %v9174_v61 }
 0x640   :  { %v13976_v15 = vpop.f32.mrf.mxu1 }
 0x641   :  { %9966 = vst [vmem:[%s18377_s5 + $0x1d8] sm:$0xff] %v9902_v11  ;;  %v9901_v0 = vmax.f32 %v9837_v3, 0.0  ;;  %v9840_v55 = vadd.f32 %v9776_v5, %v19066_v45  ;;  %v9775_v56 = vadd.f32 %v17883_v49, %v9704_v30  ;;  %v9707_v59 = vadd.f32 %v13976_v15, %v9177_v21 }
 0x642   :  { %v9635_v28 = vpop.f32.mrf.mxu1 }
 0x643   :  { %9965 = vst [vmem:[%s18377_s5 + $0x1d0] sm:$0xff] %v9901_v0  ;;  %v9904_v8 = vmax.f32 %v9840_v55, 0.0  ;;  %v9839_v36 = vadd.f32 %v9775_v56, %v19067_v42  ;;  %v9778_v9 = vadd.f32 %v17883_v49, %v9707_v59  ;;  %v9706_v31 = vadd.f32 %v9635_v28, %v9176_v16 }
 0x645   :  { %9968 = vst [vmem:[%s18377_s5 + $0x1e8] sm:$0xff] %v9904_v8  ;;  %v9903_v58 = vmax.f32 %v9839_v36, 0.0  ;;  %v9842_v20 = vadd.f32 %v9778_v9, %v19068_v18  ;;  %v9777_v34 = vadd.f32 %v17883_v49, %v9706_v31 }
 0x647   :  { %9967 = vst [vmem:[%s18377_s5 + $0x1e0] sm:$0xff] %v9903_v58  ;;  %v9906_v1 = vmax.f32 %v9842_v20, 0.0  ;;  %v9841_v40 = vadd.f32 %v9777_v34, %v19069_v32 }
 0x649   :  { %9970 = vst [vmem:[%s18377_s5 + $0x1f8] sm:$0xff] %v9906_v1  ;;  %v9905_v22 = vmax.f32 %v9841_v40, 0.0 }
 0x64b   :  { %9969 = vst [vmem:[%s18377_s5 + $0x1f0] sm:$0xff] %v9905_v22 }

</bundles_post_ra>
